<compile_context>
chip_gen: v5e
topology: v5e:2x2
jax: 0.10.0
libtpu: 0.0.40
codegen_flags: <defaults>
</compile_context>

<pallas_src>
import jax
import jax.numpy as jnp
from jax import lax
from jax.experimental import pallas as pl
from jax.experimental.pallas import tpu as pltpu

# ---------------- model / problem dims (small, consistent with the module) ----------------
NODE_IN   = 16    # node_in_dim
HID       = 32    # node_hidden_dim
EDGE_IN   = 8     # edge_in_dim
NUM_CLASS = 4     # num_class
SEQ_T     = 8     # edge temporal sequence length
N_SRC     = 16    # nodes in layer i (sources)
N_DST     = 8     # nodes in layer i+1 (destinations)
DEG       = 4     # fixed in-degree per destination node
E_TOT     = N_DST * DEG

H2   = 2 * HID            # fused hidden width (edge | att) = 64
GATE = 4 * H2             # 256 interleaved gate columns
KDIM = 2 * H2 + EDGE_IN   # 136 fused-LHS width: [h | c | x]
NOUT = GATE + H2          # 320 fused-RHS output width: [gates | c_s]


# ==================== fused kernel: 2x TLSTM2 + message/attn + sparsemax + NodeUpdate + fc ====================
def fused_kernel(x_ref, dt_ref, len_ref, hsrc_ref, selfh_ref,
                 wbig_ref, bbig_ref,
                 attn_ref, weo_ref, beo_ref, wnode_ref, bnode_ref,
                 wfc_ref, bfc_ref, out_ref):
    # ---------- hoisted pre-work (off the serial recurrence chain) ----------
    decay_all = 1.0 / jnp.log(dt_ref[...] + jnp.e)      # (T*E, 1) time-major, exact (off-chain)
    e_len = len_ref[...]                                 # (E, 1) int32
    w_big = wbig_ref[...]                                # (KDIM, NOUT) bf16, loop-invariant
    b_big = bbig_ref[...]                                # (1, NOUT) f32  [gate bias | decomp bias]

    # ---------- fused time-aware LSTM recurrence (edge LSTM + attention LSTM together) ----------
    h = jnp.zeros((E_TOT, H2), jnp.float32)              # [h_edge | h_att]
    c = jnp.zeros((E_TOT, H2), jnp.float32)              # [c_edge | c_att]
    for t in range(SEQ_T):
        # one MXU push per step: [h | c | x_t] @ w_big -> [gates (256) | c_s_pre (64)]
        hc = jnp.concatenate([h, c], axis=1).astype(jnp.bfloat16)                 # (E, 128) bf16
        lhs = jnp.concatenate([hc, x_ref[t * E_TOT:(t + 1) * E_TOT, :]], axis=1)  # (E, 136) bf16
        res = jnp.dot(lhs, w_big, preferred_element_type=jnp.float32) + b_big     # (E, 320) f32

        # time-aware memory decomposition (both LSTMs at once, same delta_t)
        c_s = jnp.tanh(res[:, GATE:])                                             # (E, 64)
        decay_t = decay_all[t * E_TOT:(t + 1) * E_TOT, :]                         # (E, 1) row slab
        c_adj = c - c_s + c_s * decay_t

        gates = res[:, :GATE]
        sig = jax.nn.sigmoid(gates[:, :3 * H2])          # one 192-lane EUP call for i, f, o
        i_g = sig[:, 0 * H2:1 * H2]
        f_g = sig[:, 1 * H2:2 * H2]
        o_g = sig[:, 2 * H2:3 * H2]
        g_g = jnp.tanh(gates[:, 3 * H2:])

        c_new = f_g * c_adj + i_g * g_g
        h_new = o_g * jnp.tanh(c_new)

        v = e_len > t                                     # (E, 1) validity, no iota / lane extract
        c = jnp.where(v, c_new, c)
        h = jnp.where(v, h_new, h)

    e_out = h[:, 0:HID]                                   # (E, HID)
    a_out = h[:, HID:H2]                                  # (E, HID)

    # ---------- node block: message + attention + sparsemax + NodeUpdate + fc (off-chain, f32) ----------
    self_h = selfh_ref[...]                               # (N_DST, NODE_IN)
    h_src = hsrc_ref[...]                                 # (E, NODE_IN)
    weo = weo_ref[...]
    beo = beo_ref[...]
    wnode = wnode_ref[...]
    bnode = bnode_ref[...]

    weo_top = weo[0:NODE_IN, :]
    weo_bot = weo[NODE_IN:, :]

    # self_h_tmp = edge_out_layer(cat(self_h, zeros(HID)))  (no relu)
    self_h_tmp = jnp.dot(self_h, weo_top, preferred_element_type=jnp.float32) + beo

    # batched messages for ALL edges: relu(edge_out_layer(cat(h_src, e_out)))
    msg = jnp.maximum(
        jnp.dot(h_src, weo_top, preferred_element_type=jnp.float32)
        + jnp.dot(e_out, weo_bot, preferred_element_type=jnp.float32) + beo, 0.0)   # (E, HID)

    # batched attention logits: leaky_relu(attn_layer(a_out))
    attw = attn_ref[...]                                  # (1, HID)
    logit = jnp.sum(a_out * attw, axis=1, keepdims=True)  # (E, 1)
    logit = jnp.where(logit >= 0.0, logit, 0.01 * logit)

    # assemble (N_DST, DEG) attention matrix from per-slot (aligned) row slices
    col = lax.broadcasted_iota(jnp.int32, (N_DST, DEG), 1)
    a = jnp.zeros((N_DST, DEG), jnp.float32)
    for j in range(DEG):
        a = a + logit[j * N_DST:(j + 1) * N_DST, :] * (col == j).astype(jnp.float32)

    # ---- sparsemax over the DEG neighbors (sort-free, O(DEG^2)) ----
    z = a - jnp.max(a, axis=1, keepdims=True)
    rank = jnp.ones((N_DST, DEG), jnp.float32)
    for j in range(DEG):
        zj = z[:, j:j + 1]
        gt = (zj > z) | ((zj == z) & (j < col))
        rank = rank + gt.astype(jnp.float32)
    csum = jnp.zeros((N_DST, DEG), jnp.float32)
    for j in range(DEG):
        zj = z[:, j:j + 1]
        rj = rank[:, j:j + 1]
        csum = csum + zj * (rj <= rank).astype(jnp.float32)
    is_gt = (1.0 + rank * z > csum).astype(jnp.float32)
    k = jnp.max(is_gt * rank, axis=1, keepdims=True)
    taus = (jnp.sum(is_gt * z, axis=1, keepdims=True) - 1.0) / k
    alpha = jnp.maximum(z - taus, 0.0)                    # (N_DST, DEG)

    # weighted sum of messages (per-slot aligned slices of the batched msg)
    h_agg = jnp.zeros((N_DST, HID), jnp.float32)
    for j in range(DEG):
        h_agg = h_agg + alpha[:, j:j + 1] * msg[j * N_DST:(j + 1) * N_DST, :]

    # NodeUpdate: relu(Linear(cat(self_h, h_agg - self_h_tmp)))
    hn = h_agg - self_h_tmp
    act = (jnp.dot(self_h, wnode[0:NODE_IN, :], preferred_element_type=jnp.float32)
           + jnp.dot(hn, wnode[NODE_IN:, :], preferred_element_type=jnp.float32) + bnode)
    act = jnp.maximum(act, 0.0)

    # final classifier
    out_ref[...] = jnp.dot(act, wfc_ref[...], preferred_element_type=jnp.float32) + bfc_ref[...]


# ==================== parameter fusion for the two LSTMs (done once, plain JAX) ====================
def _fuse_lstm_params(pe, pa):
    """Interleave edge/att gate weights and pack wh/wd/wx into one (KDIM, NOUT) per-step RHS."""
    def cat_gates(we, wa):
        parts = []
        for g in range(4):                              # gate order i, f, o, g
            parts.append(we[..., g * HID:(g + 1) * HID])
            parts.append(wa[..., g * HID:(g + 1) * HID])
        return jnp.concatenate(parts, axis=-1)

    wx_cat = cat_gates(pe["wx"], pa["wx"])              # (EDGE_IN, 256)
    b_cat = cat_gates(pe["b"], pa["b"])                 # (1, 256)
    zg = jnp.zeros_like(pe["wh"])
    wh_blk = jnp.concatenate([cat_gates(pe["wh"], zg),  # rows = h_edge -> edge gate cols only
                              cat_gates(zg, pa["wh"])], axis=0)   # rows = h_att -> att gate cols
    zd = jnp.zeros_like(pe["wd"])
    wd_blk = jnp.concatenate(
        [jnp.concatenate([pe["wd"], zd], axis=1),
         jnp.concatenate([zd, pa["wd"]], axis=1)], axis=0)        # (2H, 2H) block-diag
    bd_cat = jnp.concatenate([pe["bd"], pa["bd"]], axis=1)        # (1, 2H)

    # fused per-step RHS: rows = [h (2H) | c (2H) | x (EDGE_IN)],
    # cols = [interleaved gates (8H) first (v5e: 2 hot MXU column passes) | c_s (2H) last]
    w_big = jnp.concatenate([
        jnp.concatenate([wh_blk, jnp.zeros((H2, H2), jnp.float32)], axis=1),
        jnp.concatenate([jnp.zeros((H2, GATE), jnp.float32), wd_blk], axis=1),
        jnp.concatenate([wx_cat, jnp.zeros((EDGE_IN, H2), jnp.float32)], axis=1),
    ], axis=0)                                                    # (136, 320)
    b_big = jnp.concatenate([b_cat, bd_cat], axis=1)              # (1, 320)
    return w_big, b_big


# ==================== full forward: one pallas_call (gathers / param fusion are plain-JAX glue) ====================
def gtea_tlstm3_forward(node_features, edge_features, delta_t, edge_len, src_ids, layer_nid, params):
    h = node_features                                   # layer-0 activation (dropout = identity)
    e_len2d = edge_len[:, None].astype(jnp.int32)
    h_src = h[src_ids]                                  # [E, NODE_IN]  (graph gather = glue)
    self_h = h[layer_nid]                               # [N_DST, NODE_IN]

    # time-major flattening so each timestep is a contiguous, sublane-aligned row slab
    x_tm = edge_features.transpose(1, 0, 2).reshape(SEQ_T * E_TOT, EDGE_IN).astype(jnp.bfloat16)
    dt_tm = delta_t.transpose(1, 0).reshape(SEQ_T * E_TOT, 1)

    w_big, b_big = _fuse_lstm_params(params["edge_lstm"], params["att_lstm"])
    w_big = w_big.astype(jnp.bfloat16)                  # native single-pass MXU operand dtype
    attn_row = params["attn_w"].T                       # (1, HID)

    return pl.pallas_call(
        fused_kernel,
        out_shape=jax.ShapeDtypeStruct((N_DST, NUM_CLASS), jnp.float32),
        grid_spec=pltpu.PrefetchScalarGridSpec(
            num_scalar_prefetch=0,
            grid=(1,),
            in_specs=[
                pl.BlockSpec((SEQ_T * E_TOT, EDGE_IN), lambda i: (0, 0)),   # x (time-major, bf16)
                pl.BlockSpec((SEQ_T * E_TOT, 1), lambda i: (0, 0)),         # delta_t (time-major)
                pl.BlockSpec((E_TOT, 1), lambda i: (0, 0)),                 # edge_len
                pl.BlockSpec((E_TOT, NODE_IN), lambda i: (0, 0)),           # h_src
                pl.BlockSpec((N_DST, NODE_IN), lambda i: (0, 0)),           # self_h
                pl.BlockSpec((KDIM, NOUT), lambda i: (0, 0)),               # fused recurrent RHS
                pl.BlockSpec((1, NOUT), lambda i: (0, 0)),                  # fused biases
                pl.BlockSpec((1, HID), lambda i: (0, 0)),                   # attn weight row
                pl.BlockSpec((NODE_IN + HID, HID), lambda i: (0, 0)),       # w_eo
                pl.BlockSpec((1, HID), lambda i: (0, 0)),                   # b_eo
                pl.BlockSpec((NODE_IN + HID, HID), lambda i: (0, 0)),       # w_node
                pl.BlockSpec((1, HID), lambda i: (0, 0)),                   # b_node
                pl.BlockSpec((HID, NUM_CLASS), lambda i: (0, 0)),           # w_fc
                pl.BlockSpec((1, NUM_CLASS), lambda i: (0, 0)),             # b_fc
            ],
            out_specs=pl.BlockSpec((N_DST, NUM_CLASS), lambda i: (0, 0)),
        ),
        compiler_params=pltpu.CompilerParams(dimension_semantics=("arbitrary",)),
    )(x_tm, dt_tm, e_len2d, h_src, self_h,
      w_big, b_big,
      attn_row, params["w_eo"], params["b_eo"],
      params["w_node"], params["b_node"], params["w_fc"], params["b_fc"])


# ============================ pure-JAX reference (for checking) ============================
def _sparsemax_ref(z):
    z = z - jnp.max(z, axis=-1, keepdims=True)
    zs = jnp.flip(jnp.sort(z, axis=-1), axis=-1)
    n = z.shape[-1]
    rng = jnp.arange(1, n + 1, dtype=z.dtype)
    bound = 1 + rng * zs
    cum = jnp.cumsum(zs, axis=-1)
    is_gt = (bound > cum).astype(z.dtype)
    k = jnp.max(is_gt * rng, axis=-1, keepdims=True)
    taus = (jnp.sum(is_gt * zs, axis=-1, keepdims=True) - 1.0) / k
    return jnp.maximum(z - taus, 0.0)


def _tlstm_ref(x, dt, e_len, p):
    E = x.shape[0]
    h = jnp.zeros((E, HID)); c = jnp.zeros((E, HID))
    for t in range(SEQ_T):
        x_t = x[:, t, :]; dt_t = dt[:, t:t + 1]
        c_s = jnp.tanh(c @ p["wd"] + p["bd"])
        c_adj = c - c_s + c_s * (1.0 / jnp.log(jnp.e + dt_t))
        g = x_t @ p["wx"] + h @ p["wh"] + p["b"]
        i_g = jax.nn.sigmoid(g[:, :HID]); f_g = jax.nn.sigmoid(g[:, HID:2 * HID])
        o_g = jax.nn.sigmoid(g[:, 2 * HID:3 * HID]); g_g = jnp.tanh(g[:, 3 * HID:])
        c_new = f_g * c_adj + i_g * g_g
        h_new = o_g * jnp.tanh(c_new)
        valid = (t < e_len)[:, None]
        c = jnp.where(valid, c_new, c); h = jnp.where(valid, h_new, h)
    return h


def _forward_ref(node_features, edge_features, delta_t, edge_len, src_ids, layer_nid, params):
    # edge index convention: e = j * N_DST + n  (neighbor-slot major)
    with jax.default_matmul_precision("float32"):
        h = node_features
        e_out = _tlstm_ref(edge_features, delta_t, edge_len, params["edge_lstm"])
        a_out = _tlstm_ref(edge_features, delta_t, edge_len, params["att_lstm"])
        self_h = h[layer_nid]
        self_h_tmp = jnp.concatenate([self_h, jnp.zeros((N_DST, HID))], 1) @ params["w_eo"] + params["b_eo"]
        h_src = h[src_ids]
        msg = jnp.maximum(jnp.concatenate([h_src, e_out], 1) @ params["w_eo"] + params["b_eo"], 0.0)
        a = jax.nn.leaky_relu(a_out @ params["attn_w"], 0.01).reshape(DEG, N_DST).T   # (N_DST, DEG)
        m = msg.reshape(DEG, N_DST, HID)
        alpha = _sparsemax_ref(a)                                                     # (N_DST, DEG)
        h_red = jnp.sum(alpha.T[:, :, None] * m, axis=0)                              # (N_DST, HID)
        hn = h_red - self_h_tmp
        act = jnp.maximum(jnp.concatenate([self_h, hn], 1) @ params["w_node"] + params["b_node"], 0.0)
        return act @ params["w_fc"] + params["b_fc"]


# ============================ deterministic setup ============================
def _uniform(key, shape, fan_in):
    s = 1.0 / jnp.sqrt(jnp.float32(fan_in))
    return jax.random.uniform(key, shape, jnp.float32, -s, s)


def make_params(key):
    ks = jax.random.split(key, 24)

    def lstm_params(k0, k1, k2, k3, k4):
        return {
            "wx": _uniform(k0, (EDGE_IN, 4 * HID), EDGE_IN),
            "wh": _uniform(k1, (HID, 4 * HID), HID),
            "b":  _uniform(k2, (1, 4 * HID), HID),
            "wd": _uniform(k3, (HID, HID), HID),
            "bd": _uniform(k4, (1, HID), HID),
        }

    return {
        "edge_lstm": lstm_params(*ks[0:5]),
        "att_lstm":  lstm_params(*ks[5:10]),
        "attn_w":  _uniform(ks[10], (HID, 1), HID),
        "w_eo":    _uniform(ks[11], (NODE_IN + HID, HID), NODE_IN + HID),
        "b_eo":    _uniform(ks[12], (1, HID), NODE_IN + HID),
        "w_node":  _uniform(ks[13], (NODE_IN + HID, HID), NODE_IN + HID),
        "b_node":  _uniform(ks[14], (1, HID), NODE_IN + HID),
        "w_fc":    _uniform(ks[15], (HID, NUM_CLASS), HID),
        "b_fc":    _uniform(ks[16], (1, NUM_CLASS), HID),
    }


if __name__ == "__main__":
    key = jax.random.PRNGKey(0)
    k_par, k_nf, k_ef, k_dt, k_len, k_src = jax.random.split(key, 6)

    params = make_params(k_par)

    node_features = jax.random.normal(k_nf, (N_SRC, NODE_IN), jnp.float32)
    edge_features = jax.random.normal(k_ef, (E_TOT, SEQ_T, EDGE_IN), jnp.float32)
    delta_t = jax.random.uniform(k_dt, (E_TOT, SEQ_T), jnp.float32, 0.0, 5.0)
    edge_len = jax.random.randint(k_len, (E_TOT,), 1, SEQ_T + 1).astype(jnp.int32)
    src_ids = jax.random.randint(k_src, (E_TOT,), 0, N_SRC).astype(jnp.int32)
    layer_nid = jnp.arange(N_DST, dtype=jnp.int32)   # dst nodes mapped into the source layer

    fwd = jax.jit(gtea_tlstm3_forward)
    out = fwd(node_features, edge_features, delta_t, edge_len, src_ids, layer_nid, params)
    out = jax.block_until_ready(out)

    ref = _forward_ref(node_features, edge_features, delta_t, edge_len,
                       src_ids, layer_nid, params)
    err = float(jnp.max(jnp.abs(out - ref)))
    assert out.shape == (N_DST, NUM_CLASS)
    # kernel uses bf16 MXU operands for the recurrence (native single-pass); ref is f32-precision
    assert jnp.all(jnp.isfinite(out)) and err < 1e-2, f"mismatch vs reference: {err}"

    print("KERNEL_OK")
</pallas_src>

<mosaic_0001>
module attributes {stable_mosaic.version = 11 : i64} {
  func.func @fused_kernel(%arg0: i32, %arg1: memref<256x8xbf16, #tpu.memory_space<vmem>>, %arg2: memref<256x1xf32, #tpu.memory_space<vmem>>, %arg3: memref<32x1xi32, #tpu.memory_space<vmem>>, %arg4: memref<32x16xf32, #tpu.memory_space<vmem>>, %arg5: memref<8x16xf32, #tpu.memory_space<vmem>>, %arg6: memref<136x320xbf16, #tpu.memory_space<vmem>>, %arg7: memref<1x320xf32, #tpu.memory_space<vmem>>, %arg8: memref<1x32xf32, #tpu.memory_space<vmem>>, %arg9: memref<48x32xf32, #tpu.memory_space<vmem>>, %arg10: memref<1x32xf32, #tpu.memory_space<vmem>>, %arg11: memref<48x32xf32, #tpu.memory_space<vmem>>, %arg12: memref<1x32xf32, #tpu.memory_space<vmem>>, %arg13: memref<32x4xf32, #tpu.memory_space<vmem>>, %arg14: memref<1x4xf32, #tpu.memory_space<vmem>>, %arg15: memref<8x4xf32, #tpu.memory_space<vmem>>) attributes {dimension_semantics = [#tpu.dimension_semantics<arbitrary>], iteration_bounds = array<i64: 1>, scalar_prefetch = 0 : i64, scratch_operands = 0 : i64, tpu.core_type = #tpu.core_type<tc>, window_params = [{pipeline_mode = #tpu.pipeline_mode<synchronous>, transform_indices = @transform_0, window_bounds = array<i64: 256, 8>}, {pipeline_mode = #tpu.pipeline_mode<synchronous>, transform_indices = @transform_1, window_bounds = array<i64: 256, 1>}, {pipeline_mode = #tpu.pipeline_mode<synchronous>, transform_indices = @transform_2, window_bounds = array<i64: 32, 1>}, {pipeline_mode = #tpu.pipeline_mode<synchronous>, transform_indices = @transform_3, window_bounds = array<i64: 32, 16>}, {pipeline_mode = #tpu.pipeline_mode<synchronous>, transform_indices = @transform_4, window_bounds = array<i64: 8, 16>}, {pipeline_mode = #tpu.pipeline_mode<synchronous>, transform_indices = @transform_5, window_bounds = array<i64: 136, 320>}, {pipeline_mode = #tpu.pipeline_mode<synchronous>, transform_indices = @transform_6, window_bounds = array<i64: 1, 320>}, {pipeline_mode = #tpu.pipeline_mode<synchronous>, transform_indices = @transform_7, window_bounds = array<i64: 1, 32>}, {pipeline_mode = #tpu.pipeline_mode<synchronous>, transform_indices = @transform_8, window_bounds = array<i64: 48, 32>}, {pipeline_mode = #tpu.pipeline_mode<synchronous>, transform_indices = @transform_9, window_bounds = array<i64: 1, 32>}, {pipeline_mode = #tpu.pipeline_mode<synchronous>, transform_indices = @transform_10, window_bounds = array<i64: 48, 32>}, {pipeline_mode = #tpu.pipeline_mode<synchronous>, transform_indices = @transform_11, window_bounds = array<i64: 1, 32>}, {pipeline_mode = #tpu.pipeline_mode<synchronous>, transform_indices = @transform_12, window_bounds = array<i64: 32, 4>}, {pipeline_mode = #tpu.pipeline_mode<synchronous>, transform_indices = @transform_13, window_bounds = array<i64: 1, 4>}, {pipeline_mode = #tpu.pipeline_mode<synchronous>, transform_indices = @transform_14, window_bounds = array<i64: 8, 4>}]} {
    %c0 = arith.constant 0 : index
    %c0_0 = arith.constant 0 : index
    %0 = vector.load %arg2[%c0, %c0_0] : memref<256x1xf32, #tpu.memory_space<vmem>>, vector<256x1xf32>
    %cst = arith.constant 2.71828175 : f32
    %1 = vector.broadcast %cst : f32 to vector<256x1xf32>
    %2 = arith.addf %0, %1 : vector<256x1xf32>
    %3 = math.log %2 : vector<256x1xf32>
    %cst_1 = arith.constant 1.000000e+00 : f32
    %4 = vector.broadcast %cst_1 : f32 to vector<256x1xf32>
    %5 = arith.divf %4, %3 : vector<256x1xf32>
    %c0_2 = arith.constant 0 : index
    %c0_3 = arith.constant 0 : index
    %6 = vector.load %arg3[%c0_2, %c0_3] : memref<32x1xi32, #tpu.memory_space<vmem>>, vector<32x1xi32>
    %c0_4 = arith.constant 0 : index
    %c0_5 = arith.constant 0 : index
    %7 = vector.load %arg6[%c0_4, %c0_5] : memref<136x320xbf16, #tpu.memory_space<vmem>>, vector<136x320xbf16>
    %c0_6 = arith.constant 0 : index
    %c0_7 = arith.constant 0 : index
    %8 = vector.load %arg7[%c0_6, %c0_7] : memref<1x320xf32, #tpu.memory_space<vmem>>, vector<1x320xf32>
    %cst_8 = arith.constant 0.000000e+00 : f32
    %9 = vector.broadcast %cst_8 : f32 to vector<32x64xf32>
    %cst_9 = arith.constant 0.000000e+00 : f32
    %10 = vector.broadcast %cst_9 : f32 to vector<32x64xf32>
    %11 = tpu.concatenate %9, %10 in 1 : vector<32x64xf32>, vector<32x64xf32> -> vector<32x128xf32>
    %12 = arith.truncf %11 : vector<32x128xf32> to vector<32x128xbf16>
    %c0_10 = arith.constant 0 : index
    %c0_11 = arith.constant 0 : index
    %13 = vector.load %arg1[%c0_10, %c0_11] : memref<256x8xbf16, #tpu.memory_space<vmem>>, vector<32x8xbf16>
    %14 = tpu.concatenate %12, %13 in 1 : vector<32x128xbf16>, vector<32x8xbf16> -> vector<32x136xbf16>
    %cst_12 = arith.constant dense<0.000000e+00> : vector<32x320xf32>
    %15 = tpu.matmul %14, %7, %cst_12 {dimension_numbers = #tpu.dot_dimension_numbers<[1], [0], [0], [1], [0, 0, 1, 1], [], []>} : vector<32x136xbf16>, vector<136x320xbf16>, vector<32x320xf32> -> vector<32x320xf32>
    %16 = vector.broadcast %8 : vector<1x320xf32> to vector<32x320xf32>
    %17 = arith.addf %15, %16 : vector<32x320xf32>
    %18 = vector.extract_strided_slice %17 {offsets = [0, 256], sizes = [32, 64], strides = [1, 1]} : vector<32x320xf32> to vector<32x64xf32>
    %19 = math.tanh %18 : vector<32x64xf32>
    %20 = vector.extract_strided_slice %5 {offsets = [0, 0], sizes = [32, 1], strides = [1, 1]} : vector<256x1xf32> to vector<32x1xf32>
    %21 = arith.subf %10, %19 : vector<32x64xf32>
    %22 = vector.broadcast %20 : vector<32x1xf32> to vector<32x64xf32>
    %23 = arith.mulf %19, %22 : vector<32x64xf32>
    %24 = arith.addf %21, %23 : vector<32x64xf32>
    %25 = vector.extract_strided_slice %17 {offsets = [0, 0], sizes = [32, 256], strides = [1, 1]} : vector<32x320xf32> to vector<32x256xf32>
    %26 = vector.extract_strided_slice %25 {offsets = [0, 0], sizes = [32, 192], strides = [1, 1]} : vector<32x256xf32> to vector<32x192xf32>
    %27 = arith.negf %26 : vector<32x192xf32>
    %28 = math.exp %27 : vector<32x192xf32>
    %cst_13 = arith.constant 1.000000e+00 : f32
    %29 = vector.broadcast %cst_13 : f32 to vector<32x192xf32>
    %30 = arith.addf %29, %28 : vector<32x192xf32>
    %31 = arith.divf %29, %30 : vector<32x192xf32>
    %32 = vector.extract_strided_slice %31 {offsets = [0, 0], sizes = [32, 64], strides = [1, 1]} : vector<32x192xf32> to vector<32x64xf32>
    %33 = vector.extract_strided_slice %31 {offsets = [0, 64], sizes = [32, 64], strides = [1, 1]} : vector<32x192xf32> to vector<32x64xf32>
    %34 = vector.extract_strided_slice %31 {offsets = [0, 128], sizes = [32, 64], strides = [1, 1]} : vector<32x192xf32> to vector<32x64xf32>
    %35 = vector.extract_strided_slice %25 {offsets = [0, 192], sizes = [32, 64], strides = [1, 1]} : vector<32x256xf32> to vector<32x64xf32>
    %36 = math.tanh %35 : vector<32x64xf32>
    %37 = arith.mulf %33, %24 : vector<32x64xf32>
    %38 = arith.mulf %32, %36 : vector<32x64xf32>
    %39 = arith.addf %37, %38 : vector<32x64xf32>
    %40 = math.tanh %39 : vector<32x64xf32>
    %41 = arith.mulf %34, %40 : vector<32x64xf32>
    %c0_i32 = arith.constant 0 : i32
    %42 = vector.broadcast %c0_i32 : i32 to vector<32x1xi32>
    %43 = arith.cmpi sgt, %6, %42 : vector<32x1xi32>
    %44 = vector.shape_cast %43 : vector<32x1xi1> to vector<32x1xi1>
    %45 = vector.broadcast %44 : vector<32x1xi1> to vector<32x64xi1>
    %46 = arith.select %45, %39, %10 : vector<32x64xi1>, vector<32x64xf32>
    %47 = vector.shape_cast %43 : vector<32x1xi1> to vector<32x1xi1>
    %48 = vector.broadcast %47 : vector<32x1xi1> to vector<32x64xi1>
    %49 = arith.select %48, %41, %9 : vector<32x64xi1>, vector<32x64xf32>
    %50 = tpu.concatenate %49, %46 in 1 : vector<32x64xf32>, vector<32x64xf32> -> vector<32x128xf32>
    %51 = arith.truncf %50 : vector<32x128xf32> to vector<32x128xbf16>
    %c32 = arith.constant 32 : index
    %c0_14 = arith.constant 0 : index
    %52 = vector.load %arg1[%c32, %c0_14] : memref<256x8xbf16, #tpu.memory_space<vmem>>, vector<32x8xbf16>
    %53 = tpu.concatenate %51, %52 in 1 : vector<32x128xbf16>, vector<32x8xbf16> -> vector<32x136xbf16>
    %cst_15 = arith.constant dense<0.000000e+00> : vector<32x320xf32>
    %54 = tpu.matmul %53, %7, %cst_15 {dimension_numbers = #tpu.dot_dimension_numbers<[1], [0], [0], [1], [0, 0, 1, 1], [], []>} : vector<32x136xbf16>, vector<136x320xbf16>, vector<32x320xf32> -> vector<32x320xf32>
    %55 = vector.broadcast %8 : vector<1x320xf32> to vector<32x320xf32>
    %56 = arith.addf %54, %55 : vector<32x320xf32>
    %57 = vector.extract_strided_slice %56 {offsets = [0, 256], sizes = [32, 64], strides = [1, 1]} : vector<32x320xf32> to vector<32x64xf32>
    %58 = math.tanh %57 : vector<32x64xf32>
    %59 = vector.extract_strided_slice %5 {offsets = [32, 0], sizes = [32, 1], strides = [1, 1]} : vector<256x1xf32> to vector<32x1xf32>
    %60 = arith.subf %46, %58 : vector<32x64xf32>
    %61 = vector.broadcast %59 : vector<32x1xf32> to vector<32x64xf32>
    %62 = arith.mulf %58, %61 : vector<32x64xf32>
    %63 = arith.addf %60, %62 : vector<32x64xf32>
    %64 = vector.extract_strided_slice %56 {offsets = [0, 0], sizes = [32, 256], strides = [1, 1]} : vector<32x320xf32> to vector<32x256xf32>
    %65 = vector.extract_strided_slice %64 {offsets = [0, 0], sizes = [32, 192], strides = [1, 1]} : vector<32x256xf32> to vector<32x192xf32>
    %66 = arith.negf %65 : vector<32x192xf32>
    %67 = math.exp %66 : vector<32x192xf32>
    %cst_16 = arith.constant 1.000000e+00 : f32
    %68 = vector.broadcast %cst_16 : f32 to vector<32x192xf32>
    %69 = arith.addf %68, %67 : vector<32x192xf32>
    %70 = arith.divf %68, %69 : vector<32x192xf32>
    %71 = vector.extract_strided_slice %70 {offsets = [0, 0], sizes = [32, 64], strides = [1, 1]} : vector<32x192xf32> to vector<32x64xf32>
    %72 = vector.extract_strided_slice %70 {offsets = [0, 64], sizes = [32, 64], strides = [1, 1]} : vector<32x192xf32> to vector<32x64xf32>
    %73 = vector.extract_strided_slice %70 {offsets = [0, 128], sizes = [32, 64], strides = [1, 1]} : vector<32x192xf32> to vector<32x64xf32>
    %74 = vector.extract_strided_slice %64 {offsets = [0, 192], sizes = [32, 64], strides = [1, 1]} : vector<32x256xf32> to vector<32x64xf32>
    %75 = math.tanh %74 : vector<32x64xf32>
    %76 = arith.mulf %72, %63 : vector<32x64xf32>
    %77 = arith.mulf %71, %75 : vector<32x64xf32>
    %78 = arith.addf %76, %77 : vector<32x64xf32>
    %79 = math.tanh %78 : vector<32x64xf32>
    %80 = arith.mulf %73, %79 : vector<32x64xf32>
    %c1_i32 = arith.constant 1 : i32
    %81 = vector.broadcast %c1_i32 : i32 to vector<32x1xi32>
    %82 = arith.cmpi sgt, %6, %81 : vector<32x1xi32>
    %83 = vector.shape_cast %82 : vector<32x1xi1> to vector<32x1xi1>
    %84 = vector.broadcast %83 : vector<32x1xi1> to vector<32x64xi1>
    %85 = arith.select %84, %78, %46 : vector<32x64xi1>, vector<32x64xf32>
    %86 = vector.shape_cast %82 : vector<32x1xi1> to vector<32x1xi1>
    %87 = vector.broadcast %86 : vector<32x1xi1> to vector<32x64xi1>
    %88 = arith.select %87, %80, %49 : vector<32x64xi1>, vector<32x64xf32>
    %89 = tpu.concatenate %88, %85 in 1 : vector<32x64xf32>, vector<32x64xf32> -> vector<32x128xf32>
    %90 = arith.truncf %89 : vector<32x128xf32> to vector<32x128xbf16>
    %c64 = arith.constant 64 : index
    %c0_17 = arith.constant 0 : index
    %91 = vector.load %arg1[%c64, %c0_17] : memref<256x8xbf16, #tpu.memory_space<vmem>>, vector<32x8xbf16>
    %92 = tpu.concatenate %90, %91 in 1 : vector<32x128xbf16>, vector<32x8xbf16> -> vector<32x136xbf16>
    %cst_18 = arith.constant dense<0.000000e+00> : vector<32x320xf32>
    %93 = tpu.matmul %92, %7, %cst_18 {dimension_numbers = #tpu.dot_dimension_numbers<[1], [0], [0], [1], [0, 0, 1, 1], [], []>} : vector<32x136xbf16>, vector<136x320xbf16>, vector<32x320xf32> -> vector<32x320xf32>
    %94 = vector.broadcast %8 : vector<1x320xf32> to vector<32x320xf32>
    %95 = arith.addf %93, %94 : vector<32x320xf32>
    %96 = vector.extract_strided_slice %95 {offsets = [0, 256], sizes = [32, 64], strides = [1, 1]} : vector<32x320xf32> to vector<32x64xf32>
    %97 = math.tanh %96 : vector<32x64xf32>
    %98 = vector.extract_strided_slice %5 {offsets = [64, 0], sizes = [32, 1], strides = [1, 1]} : vector<256x1xf32> to vector<32x1xf32>
    %99 = arith.subf %85, %97 : vector<32x64xf32>
    %100 = vector.broadcast %98 : vector<32x1xf32> to vector<32x64xf32>
    %101 = arith.mulf %97, %100 : vector<32x64xf32>
    %102 = arith.addf %99, %101 : vector<32x64xf32>
    %103 = vector.extract_strided_slice %95 {offsets = [0, 0], sizes = [32, 256], strides = [1, 1]} : vector<32x320xf32> to vector<32x256xf32>
    %104 = vector.extract_strided_slice %103 {offsets = [0, 0], sizes = [32, 192], strides = [1, 1]} : vector<32x256xf32> to vector<32x192xf32>
    %105 = arith.negf %104 : vector<32x192xf32>
    %106 = math.exp %105 : vector<32x192xf32>
    %cst_19 = arith.constant 1.000000e+00 : f32
    %107 = vector.broadcast %cst_19 : f32 to vector<32x192xf32>
    %108 = arith.addf %107, %106 : vector<32x192xf32>
    %109 = arith.divf %107, %108 : vector<32x192xf32>
    %110 = vector.extract_strided_slice %109 {offsets = [0, 0], sizes = [32, 64], strides = [1, 1]} : vector<32x192xf32> to vector<32x64xf32>
    %111 = vector.extract_strided_slice %109 {offsets = [0, 64], sizes = [32, 64], strides = [1, 1]} : vector<32x192xf32> to vector<32x64xf32>
    %112 = vector.extract_strided_slice %109 {offsets = [0, 128], sizes = [32, 64], strides = [1, 1]} : vector<32x192xf32> to vector<32x64xf32>
    %113 = vector.extract_strided_slice %103 {offsets = [0, 192], sizes = [32, 64], strides = [1, 1]} : vector<32x256xf32> to vector<32x64xf32>
    %114 = math.tanh %113 : vector<32x64xf32>
    %115 = arith.mulf %111, %102 : vector<32x64xf32>
    %116 = arith.mulf %110, %114 : vector<32x64xf32>
    %117 = arith.addf %115, %116 : vector<32x64xf32>
    %118 = math.tanh %117 : vector<32x64xf32>
    %119 = arith.mulf %112, %118 : vector<32x64xf32>
    %c2_i32 = arith.constant 2 : i32
    %120 = vector.broadcast %c2_i32 : i32 to vector<32x1xi32>
    %121 = arith.cmpi sgt, %6, %120 : vector<32x1xi32>
    %122 = vector.shape_cast %121 : vector<32x1xi1> to vector<32x1xi1>
    %123 = vector.broadcast %122 : vector<32x1xi1> to vector<32x64xi1>
    %124 = arith.select %123, %117, %85 : vector<32x64xi1>, vector<32x64xf32>
    %125 = vector.shape_cast %121 : vector<32x1xi1> to vector<32x1xi1>
    %126 = vector.broadcast %125 : vector<32x1xi1> to vector<32x64xi1>
    %127 = arith.select %126, %119, %88 : vector<32x64xi1>, vector<32x64xf32>
    %128 = tpu.concatenate %127, %124 in 1 : vector<32x64xf32>, vector<32x64xf32> -> vector<32x128xf32>
    %129 = arith.truncf %128 : vector<32x128xf32> to vector<32x128xbf16>
    %c96 = arith.constant 96 : index
    %c0_20 = arith.constant 0 : index
    %130 = vector.load %arg1[%c96, %c0_20] : memref<256x8xbf16, #tpu.memory_space<vmem>>, vector<32x8xbf16>
    %131 = tpu.concatenate %129, %130 in 1 : vector<32x128xbf16>, vector<32x8xbf16> -> vector<32x136xbf16>
    %cst_21 = arith.constant dense<0.000000e+00> : vector<32x320xf32>
    %132 = tpu.matmul %131, %7, %cst_21 {dimension_numbers = #tpu.dot_dimension_numbers<[1], [0], [0], [1], [0, 0, 1, 1], [], []>} : vector<32x136xbf16>, vector<136x320xbf16>, vector<32x320xf32> -> vector<32x320xf32>
    %133 = vector.broadcast %8 : vector<1x320xf32> to vector<32x320xf32>
    %134 = arith.addf %132, %133 : vector<32x320xf32>
    %135 = vector.extract_strided_slice %134 {offsets = [0, 256], sizes = [32, 64], strides = [1, 1]} : vector<32x320xf32> to vector<32x64xf32>
    %136 = math.tanh %135 : vector<32x64xf32>
    %137 = vector.extract_strided_slice %5 {offsets = [96, 0], sizes = [32, 1], strides = [1, 1]} : vector<256x1xf32> to vector<32x1xf32>
    %138 = arith.subf %124, %136 : vector<32x64xf32>
    %139 = vector.broadcast %137 : vector<32x1xf32> to vector<32x64xf32>
    %140 = arith.mulf %136, %139 : vector<32x64xf32>
    %141 = arith.addf %138, %140 : vector<32x64xf32>
    %142 = vector.extract_strided_slice %134 {offsets = [0, 0], sizes = [32, 256], strides = [1, 1]} : vector<32x320xf32> to vector<32x256xf32>
    %143 = vector.extract_strided_slice %142 {offsets = [0, 0], sizes = [32, 192], strides = [1, 1]} : vector<32x256xf32> to vector<32x192xf32>
    %144 = arith.negf %143 : vector<32x192xf32>
    %145 = math.exp %144 : vector<32x192xf32>
    %cst_22 = arith.constant 1.000000e+00 : f32
    %146 = vector.broadcast %cst_22 : f32 to vector<32x192xf32>
    %147 = arith.addf %146, %145 : vector<32x192xf32>
    %148 = arith.divf %146, %147 : vector<32x192xf32>
    %149 = vector.extract_strided_slice %148 {offsets = [0, 0], sizes = [32, 64], strides = [1, 1]} : vector<32x192xf32> to vector<32x64xf32>
    %150 = vector.extract_strided_slice %148 {offsets = [0, 64], sizes = [32, 64], strides = [1, 1]} : vector<32x192xf32> to vector<32x64xf32>
    %151 = vector.extract_strided_slice %148 {offsets = [0, 128], sizes = [32, 64], strides = [1, 1]} : vector<32x192xf32> to vector<32x64xf32>
    %152 = vector.extract_strided_slice %142 {offsets = [0, 192], sizes = [32, 64], strides = [1, 1]} : vector<32x256xf32> to vector<32x64xf32>
    %153 = math.tanh %152 : vector<32x64xf32>
    %154 = arith.mulf %150, %141 : vector<32x64xf32>
    %155 = arith.mulf %149, %153 : vector<32x64xf32>
    %156 = arith.addf %154, %155 : vector<32x64xf32>
    %157 = math.tanh %156 : vector<32x64xf32>
    %158 = arith.mulf %151, %157 : vector<32x64xf32>
    %c3_i32 = arith.constant 3 : i32
    %159 = vector.broadcast %c3_i32 : i32 to vector<32x1xi32>
    %160 = arith.cmpi sgt, %6, %159 : vector<32x1xi32>
    %161 = vector.shape_cast %160 : vector<32x1xi1> to vector<32x1xi1>
    %162 = vector.broadcast %161 : vector<32x1xi1> to vector<32x64xi1>
    %163 = arith.select %162, %156, %124 : vector<32x64xi1>, vector<32x64xf32>
    %164 = vector.shape_cast %160 : vector<32x1xi1> to vector<32x1xi1>
    %165 = vector.broadcast %164 : vector<32x1xi1> to vector<32x64xi1>
    %166 = arith.select %165, %158, %127 : vector<32x64xi1>, vector<32x64xf32>
    %167 = tpu.concatenate %166, %163 in 1 : vector<32x64xf32>, vector<32x64xf32> -> vector<32x128xf32>
    %168 = arith.truncf %167 : vector<32x128xf32> to vector<32x128xbf16>
    %c128 = arith.constant 128 : index
    %c0_23 = arith.constant 0 : index
    %169 = vector.load %arg1[%c128, %c0_23] : memref<256x8xbf16, #tpu.memory_space<vmem>>, vector<32x8xbf16>
    %170 = tpu.concatenate %168, %169 in 1 : vector<32x128xbf16>, vector<32x8xbf16> -> vector<32x136xbf16>
    %cst_24 = arith.constant dense<0.000000e+00> : vector<32x320xf32>
    %171 = tpu.matmul %170, %7, %cst_24 {dimension_numbers = #tpu.dot_dimension_numbers<[1], [0], [0], [1], [0, 0, 1, 1], [], []>} : vector<32x136xbf16>, vector<136x320xbf16>, vector<32x320xf32> -> vector<32x320xf32>
    %172 = vector.broadcast %8 : vector<1x320xf32> to vector<32x320xf32>
    %173 = arith.addf %171, %172 : vector<32x320xf32>
    %174 = vector.extract_strided_slice %173 {offsets = [0, 256], sizes = [32, 64], strides = [1, 1]} : vector<32x320xf32> to vector<32x64xf32>
    %175 = math.tanh %174 : vector<32x64xf32>
    %176 = vector.extract_strided_slice %5 {offsets = [128, 0], sizes = [32, 1], strides = [1, 1]} : vector<256x1xf32> to vector<32x1xf32>
    %177 = arith.subf %163, %175 : vector<32x64xf32>
    %178 = vector.broadcast %176 : vector<32x1xf32> to vector<32x64xf32>
    %179 = arith.mulf %175, %178 : vector<32x64xf32>
    %180 = arith.addf %177, %179 : vector<32x64xf32>
    %181 = vector.extract_strided_slice %173 {offsets = [0, 0], sizes = [32, 256], strides = [1, 1]} : vector<32x320xf32> to vector<32x256xf32>
    %182 = vector.extract_strided_slice %181 {offsets = [0, 0], sizes = [32, 192], strides = [1, 1]} : vector<32x256xf32> to vector<32x192xf32>
    %183 = arith.negf %182 : vector<32x192xf32>
    %184 = math.exp %183 : vector<32x192xf32>
    %cst_25 = arith.constant 1.000000e+00 : f32
    %185 = vector.broadcast %cst_25 : f32 to vector<32x192xf32>
    %186 = arith.addf %185, %184 : vector<32x192xf32>
    %187 = arith.divf %185, %186 : vector<32x192xf32>
    %188 = vector.extract_strided_slice %187 {offsets = [0, 0], sizes = [32, 64], strides = [1, 1]} : vector<32x192xf32> to vector<32x64xf32>
    %189 = vector.extract_strided_slice %187 {offsets = [0, 64], sizes = [32, 64], strides = [1, 1]} : vector<32x192xf32> to vector<32x64xf32>
    %190 = vector.extract_strided_slice %187 {offsets = [0, 128], sizes = [32, 64], strides = [1, 1]} : vector<32x192xf32> to vector<32x64xf32>
    %191 = vector.extract_strided_slice %181 {offsets = [0, 192], sizes = [32, 64], strides = [1, 1]} : vector<32x256xf32> to vector<32x64xf32>
    %192 = math.tanh %191 : vector<32x64xf32>
    %193 = arith.mulf %189, %180 : vector<32x64xf32>
    %194 = arith.mulf %188, %192 : vector<32x64xf32>
    %195 = arith.addf %193, %194 : vector<32x64xf32>
    %196 = math.tanh %195 : vector<32x64xf32>
    %197 = arith.mulf %190, %196 : vector<32x64xf32>
    %c4_i32 = arith.constant 4 : i32
    %198 = vector.broadcast %c4_i32 : i32 to vector<32x1xi32>
    %199 = arith.cmpi sgt, %6, %198 : vector<32x1xi32>
    %200 = vector.shape_cast %199 : vector<32x1xi1> to vector<32x1xi1>
    %201 = vector.broadcast %200 : vector<32x1xi1> to vector<32x64xi1>
    %202 = arith.select %201, %195, %163 : vector<32x64xi1>, vector<32x64xf32>
    %203 = vector.shape_cast %199 : vector<32x1xi1> to vector<32x1xi1>
    %204 = vector.broadcast %203 : vector<32x1xi1> to vector<32x64xi1>
    %205 = arith.select %204, %197, %166 : vector<32x64xi1>, vector<32x64xf32>
    %206 = tpu.concatenate %205, %202 in 1 : vector<32x64xf32>, vector<32x64xf32> -> vector<32x128xf32>
    %207 = arith.truncf %206 : vector<32x128xf32> to vector<32x128xbf16>
    %c160 = arith.constant 160 : index
    %c0_26 = arith.constant 0 : index
    %208 = vector.load %arg1[%c160, %c0_26] : memref<256x8xbf16, #tpu.memory_space<vmem>>, vector<32x8xbf16>
    %209 = tpu.concatenate %207, %208 in 1 : vector<32x128xbf16>, vector<32x8xbf16> -> vector<32x136xbf16>
    %cst_27 = arith.constant dense<0.000000e+00> : vector<32x320xf32>
    %210 = tpu.matmul %209, %7, %cst_27 {dimension_numbers = #tpu.dot_dimension_numbers<[1], [0], [0], [1], [0, 0, 1, 1], [], []>} : vector<32x136xbf16>, vector<136x320xbf16>, vector<32x320xf32> -> vector<32x320xf32>
    %211 = vector.broadcast %8 : vector<1x320xf32> to vector<32x320xf32>
    %212 = arith.addf %210, %211 : vector<32x320xf32>
    %213 = vector.extract_strided_slice %212 {offsets = [0, 256], sizes = [32, 64], strides = [1, 1]} : vector<32x320xf32> to vector<32x64xf32>
    %214 = math.tanh %213 : vector<32x64xf32>
    %215 = vector.extract_strided_slice %5 {offsets = [160, 0], sizes = [32, 1], strides = [1, 1]} : vector<256x1xf32> to vector<32x1xf32>
    %216 = arith.subf %202, %214 : vector<32x64xf32>
    %217 = vector.broadcast %215 : vector<32x1xf32> to vector<32x64xf32>
    %218 = arith.mulf %214, %217 : vector<32x64xf32>
    %219 = arith.addf %216, %218 : vector<32x64xf32>
    %220 = vector.extract_strided_slice %212 {offsets = [0, 0], sizes = [32, 256], strides = [1, 1]} : vector<32x320xf32> to vector<32x256xf32>
    %221 = vector.extract_strided_slice %220 {offsets = [0, 0], sizes = [32, 192], strides = [1, 1]} : vector<32x256xf32> to vector<32x192xf32>
    %222 = arith.negf %221 : vector<32x192xf32>
    %223 = math.exp %222 : vector<32x192xf32>
    %cst_28 = arith.constant 1.000000e+00 : f32
    %224 = vector.broadcast %cst_28 : f32 to vector<32x192xf32>
    %225 = arith.addf %224, %223 : vector<32x192xf32>
    %226 = arith.divf %224, %225 : vector<32x192xf32>
    %227 = vector.extract_strided_slice %226 {offsets = [0, 0], sizes = [32, 64], strides = [1, 1]} : vector<32x192xf32> to vector<32x64xf32>
    %228 = vector.extract_strided_slice %226 {offsets = [0, 64], sizes = [32, 64], strides = [1, 1]} : vector<32x192xf32> to vector<32x64xf32>
    %229 = vector.extract_strided_slice %226 {offsets = [0, 128], sizes = [32, 64], strides = [1, 1]} : vector<32x192xf32> to vector<32x64xf32>
    %230 = vector.extract_strided_slice %220 {offsets = [0, 192], sizes = [32, 64], strides = [1, 1]} : vector<32x256xf32> to vector<32x64xf32>
    %231 = math.tanh %230 : vector<32x64xf32>
    %232 = arith.mulf %228, %219 : vector<32x64xf32>
    %233 = arith.mulf %227, %231 : vector<32x64xf32>
    %234 = arith.addf %232, %233 : vector<32x64xf32>
    %235 = math.tanh %234 : vector<32x64xf32>
    %236 = arith.mulf %229, %235 : vector<32x64xf32>
    %c5_i32 = arith.constant 5 : i32
    %237 = vector.broadcast %c5_i32 : i32 to vector<32x1xi32>
    %238 = arith.cmpi sgt, %6, %237 : vector<32x1xi32>
    %239 = vector.shape_cast %238 : vector<32x1xi1> to vector<32x1xi1>
    %240 = vector.broadcast %239 : vector<32x1xi1> to vector<32x64xi1>
    %241 = arith.select %240, %234, %202 : vector<32x64xi1>, vector<32x64xf32>
    %242 = vector.shape_cast %238 : vector<32x1xi1> to vector<32x1xi1>
    %243 = vector.broadcast %242 : vector<32x1xi1> to vector<32x64xi1>
    %244 = arith.select %243, %236, %205 : vector<32x64xi1>, vector<32x64xf32>
    %245 = tpu.concatenate %244, %241 in 1 : vector<32x64xf32>, vector<32x64xf32> -> vector<32x128xf32>
    %246 = arith.truncf %245 : vector<32x128xf32> to vector<32x128xbf16>
    %c192 = arith.constant 192 : index
    %c0_29 = arith.constant 0 : index
    %247 = vector.load %arg1[%c192, %c0_29] : memref<256x8xbf16, #tpu.memory_space<vmem>>, vector<32x8xbf16>
    %248 = tpu.concatenate %246, %247 in 1 : vector<32x128xbf16>, vector<32x8xbf16> -> vector<32x136xbf16>
    %cst_30 = arith.constant dense<0.000000e+00> : vector<32x320xf32>
    %249 = tpu.matmul %248, %7, %cst_30 {dimension_numbers = #tpu.dot_dimension_numbers<[1], [0], [0], [1], [0, 0, 1, 1], [], []>} : vector<32x136xbf16>, vector<136x320xbf16>, vector<32x320xf32> -> vector<32x320xf32>
    %250 = vector.broadcast %8 : vector<1x320xf32> to vector<32x320xf32>
    %251 = arith.addf %249, %250 : vector<32x320xf32>
    %252 = vector.extract_strided_slice %251 {offsets = [0, 256], sizes = [32, 64], strides = [1, 1]} : vector<32x320xf32> to vector<32x64xf32>
    %253 = math.tanh %252 : vector<32x64xf32>
    %254 = vector.extract_strided_slice %5 {offsets = [192, 0], sizes = [32, 1], strides = [1, 1]} : vector<256x1xf32> to vector<32x1xf32>
    %255 = arith.subf %241, %253 : vector<32x64xf32>
    %256 = vector.broadcast %254 : vector<32x1xf32> to vector<32x64xf32>
    %257 = arith.mulf %253, %256 : vector<32x64xf32>
    %258 = arith.addf %255, %257 : vector<32x64xf32>
    %259 = vector.extract_strided_slice %251 {offsets = [0, 0], sizes = [32, 256], strides = [1, 1]} : vector<32x320xf32> to vector<32x256xf32>
    %260 = vector.extract_strided_slice %259 {offsets = [0, 0], sizes = [32, 192], strides = [1, 1]} : vector<32x256xf32> to vector<32x192xf32>
    %261 = arith.negf %260 : vector<32x192xf32>
    %262 = math.exp %261 : vector<32x192xf32>
    %cst_31 = arith.constant 1.000000e+00 : f32
    %263 = vector.broadcast %cst_31 : f32 to vector<32x192xf32>
    %264 = arith.addf %263, %262 : vector<32x192xf32>
    %265 = arith.divf %263, %264 : vector<32x192xf32>
    %266 = vector.extract_strided_slice %265 {offsets = [0, 0], sizes = [32, 64], strides = [1, 1]} : vector<32x192xf32> to vector<32x64xf32>
    %267 = vector.extract_strided_slice %265 {offsets = [0, 64], sizes = [32, 64], strides = [1, 1]} : vector<32x192xf32> to vector<32x64xf32>
    %268 = vector.extract_strided_slice %265 {offsets = [0, 128], sizes = [32, 64], strides = [1, 1]} : vector<32x192xf32> to vector<32x64xf32>
    %269 = vector.extract_strided_slice %259 {offsets = [0, 192], sizes = [32, 64], strides = [1, 1]} : vector<32x256xf32> to vector<32x64xf32>
    %270 = math.tanh %269 : vector<32x64xf32>
    %271 = arith.mulf %267, %258 : vector<32x64xf32>
    %272 = arith.mulf %266, %270 : vector<32x64xf32>
    %273 = arith.addf %271, %272 : vector<32x64xf32>
    %274 = math.tanh %273 : vector<32x64xf32>
    %275 = arith.mulf %268, %274 : vector<32x64xf32>
    %c6_i32 = arith.constant 6 : i32
    %276 = vector.broadcast %c6_i32 : i32 to vector<32x1xi32>
    %277 = arith.cmpi sgt, %6, %276 : vector<32x1xi32>
    %278 = vector.shape_cast %277 : vector<32x1xi1> to vector<32x1xi1>
    %279 = vector.broadcast %278 : vector<32x1xi1> to vector<32x64xi1>
    %280 = arith.select %279, %273, %241 : vector<32x64xi1>, vector<32x64xf32>
    %281 = vector.shape_cast %277 : vector<32x1xi1> to vector<32x1xi1>
    %282 = vector.broadcast %281 : vector<32x1xi1> to vector<32x64xi1>
    %283 = arith.select %282, %275, %244 : vector<32x64xi1>, vector<32x64xf32>
    %284 = tpu.concatenate %283, %280 in 1 : vector<32x64xf32>, vector<32x64xf32> -> vector<32x128xf32>
    %285 = arith.truncf %284 : vector<32x128xf32> to vector<32x128xbf16>
    %c224 = arith.constant 224 : index
    %c0_32 = arith.constant 0 : index
    %286 = vector.load %arg1[%c224, %c0_32] : memref<256x8xbf16, #tpu.memory_space<vmem>>, vector<32x8xbf16>
    %287 = tpu.concatenate %285, %286 in 1 : vector<32x128xbf16>, vector<32x8xbf16> -> vector<32x136xbf16>
    %cst_33 = arith.constant dense<0.000000e+00> : vector<32x320xf32>
    %288 = tpu.matmul %287, %7, %cst_33 {dimension_numbers = #tpu.dot_dimension_numbers<[1], [0], [0], [1], [0, 0, 1, 1], [], []>} : vector<32x136xbf16>, vector<136x320xbf16>, vector<32x320xf32> -> vector<32x320xf32>
    %289 = vector.broadcast %8 : vector<1x320xf32> to vector<32x320xf32>
    %290 = arith.addf %288, %289 : vector<32x320xf32>
    %291 = vector.extract_strided_slice %290 {offsets = [0, 256], sizes = [32, 64], strides = [1, 1]} : vector<32x320xf32> to vector<32x64xf32>
    %292 = math.tanh %291 : vector<32x64xf32>
    %293 = vector.extract_strided_slice %5 {offsets = [224, 0], sizes = [32, 1], strides = [1, 1]} : vector<256x1xf32> to vector<32x1xf32>
    %294 = arith.subf %280, %292 : vector<32x64xf32>
    %295 = vector.broadcast %293 : vector<32x1xf32> to vector<32x64xf32>
    %296 = arith.mulf %292, %295 : vector<32x64xf32>
    %297 = arith.addf %294, %296 : vector<32x64xf32>
    %298 = vector.extract_strided_slice %290 {offsets = [0, 0], sizes = [32, 256], strides = [1, 1]} : vector<32x320xf32> to vector<32x256xf32>
    %299 = vector.extract_strided_slice %298 {offsets = [0, 0], sizes = [32, 192], strides = [1, 1]} : vector<32x256xf32> to vector<32x192xf32>
    %300 = arith.negf %299 : vector<32x192xf32>
    %301 = math.exp %300 : vector<32x192xf32>
    %cst_34 = arith.constant 1.000000e+00 : f32
    %302 = vector.broadcast %cst_34 : f32 to vector<32x192xf32>
    %303 = arith.addf %302, %301 : vector<32x192xf32>
    %304 = arith.divf %302, %303 : vector<32x192xf32>
    %305 = vector.extract_strided_slice %304 {offsets = [0, 0], sizes = [32, 64], strides = [1, 1]} : vector<32x192xf32> to vector<32x64xf32>
    %306 = vector.extract_strided_slice %304 {offsets = [0, 64], sizes = [32, 64], strides = [1, 1]} : vector<32x192xf32> to vector<32x64xf32>
    %307 = vector.extract_strided_slice %304 {offsets = [0, 128], sizes = [32, 64], strides = [1, 1]} : vector<32x192xf32> to vector<32x64xf32>
    %308 = vector.extract_strided_slice %298 {offsets = [0, 192], sizes = [32, 64], strides = [1, 1]} : vector<32x256xf32> to vector<32x64xf32>
    %309 = math.tanh %308 : vector<32x64xf32>
    %310 = arith.mulf %306, %297 : vector<32x64xf32>
    %311 = arith.mulf %305, %309 : vector<32x64xf32>
    %312 = arith.addf %310, %311 : vector<32x64xf32>
    %313 = math.tanh %312 : vector<32x64xf32>
    %314 = arith.mulf %307, %313 : vector<32x64xf32>
    %c7_i32 = arith.constant 7 : i32
    %315 = vector.broadcast %c7_i32 : i32 to vector<32x1xi32>
    %316 = arith.cmpi sgt, %6, %315 : vector<32x1xi32>
    %317 = vector.shape_cast %316 : vector<32x1xi1> to vector<32x1xi1>
    %318 = vector.broadcast %317 : vector<32x1xi1> to vector<32x64xi1>
    %319 = arith.select %318, %314, %283 : vector<32x64xi1>, vector<32x64xf32>
    %320 = vector.extract_strided_slice %319 {offsets = [0, 0], sizes = [32, 32], strides = [1, 1]} : vector<32x64xf32> to vector<32x32xf32>
    %321 = vector.extract_strided_slice %319 {offsets = [0, 32], sizes = [32, 32], strides = [1, 1]} : vector<32x64xf32> to vector<32x32xf32>
    %c0_35 = arith.constant 0 : index
    %c0_36 = arith.constant 0 : index
    %322 = vector.load %arg5[%c0_35, %c0_36] : memref<8x16xf32, #tpu.memory_space<vmem>>, vector<8x16xf32>
    %c0_37 = arith.constant 0 : index
    %c0_38 = arith.constant 0 : index
    %323 = vector.load %arg4[%c0_37, %c0_38] : memref<32x16xf32, #tpu.memory_space<vmem>>, vector<32x16xf32>
    %c0_39 = arith.constant 0 : index
    %c0_40 = arith.constant 0 : index
    %324 = vector.load %arg9[%c0_39, %c0_40] : memref<48x32xf32, #tpu.memory_space<vmem>>, vector<48x32xf32>
    %c0_41 = arith.constant 0 : index
    %c0_42 = arith.constant 0 : index
    %325 = vector.load %arg10[%c0_41, %c0_42] : memref<1x32xf32, #tpu.memory_space<vmem>>, vector<1x32xf32>
    %c0_43 = arith.constant 0 : index
    %c0_44 = arith.constant 0 : index
    %326 = vector.load %arg11[%c0_43, %c0_44] : memref<48x32xf32, #tpu.memory_space<vmem>>, vector<48x32xf32>
    %c0_45 = arith.constant 0 : index
    %c0_46 = arith.constant 0 : index
    %327 = vector.load %arg12[%c0_45, %c0_46] : memref<1x32xf32, #tpu.memory_space<vmem>>, vector<1x32xf32>
    %328 = vector.extract_strided_slice %324 {offsets = [0, 0], sizes = [16, 32], strides = [1, 1]} : vector<48x32xf32> to vector<16x32xf32>
    %329 = vector.extract_strided_slice %324 {offsets = [16, 0], sizes = [32, 32], strides = [1, 1]} : vector<48x32xf32> to vector<32x32xf32>
    %cst_47 = arith.constant dense<0.000000e+00> : vector<8x32xf32>
    %330 = tpu.matmul %322, %328, %cst_47 {dimension_numbers = #tpu.dot_dimension_numbers<[1], [0], [0], [1], [0, 0, 1, 1], [], []>} : vector<8x16xf32>, vector<16x32xf32>, vector<8x32xf32> -> vector<8x32xf32>
    %331 = vector.broadcast %325 : vector<1x32xf32> to vector<8x32xf32>
    %332 = arith.addf %330, %331 : vector<8x32xf32>
    %cst_48 = arith.constant dense<0.000000e+00> : vector<32x32xf32>
    %333 = tpu.matmul %323, %328, %cst_48 {dimension_numbers = #tpu.dot_dimension_numbers<[1], [0], [0], [1], [0, 0, 1, 1], [], []>} : vector<32x16xf32>, vector<16x32xf32>, vector<32x32xf32> -> vector<32x32xf32>
    %cst_49 = arith.constant dense<0.000000e+00> : vector<32x32xf32>
    %334 = tpu.matmul %320, %329, %cst_49 {dimension_numbers = #tpu.dot_dimension_numbers<[1], [0], [0], [1], [0, 0, 1, 1], [], []>} : vector<32x32xf32>, vector<32x32xf32>, vector<32x32xf32> -> vector<32x32xf32>
    %335 = arith.addf %333, %334 : vector<32x32xf32>
    %336 = vector.broadcast %325 : vector<1x32xf32> to vector<32x32xf32>
    %337 = arith.addf %335, %336 : vector<32x32xf32>
    %cst_50 = arith.constant 0.000000e+00 : f32
    %338 = vector.broadcast %cst_50 : f32 to vector<32x32xf32>
    %339 = arith.maximumf %337, %338 : vector<32x32xf32>
    %c0_51 = arith.constant 0 : index
    %c0_52 = arith.constant 0 : index
    %340 = vector.load %arg8[%c0_51, %c0_52] : memref<1x32xf32, #tpu.memory_space<vmem>>, vector<1x32xf32>
    %341 = vector.broadcast %340 : vector<1x32xf32> to vector<32x32xf32>
    %342 = arith.mulf %321, %341 : vector<32x32xf32>
    %cst_53 = arith.constant dense<0.000000e+00> : vector<32xf32>
    %343 = vector.multi_reduction <add>, %342, %cst_53 [1] : vector<32x32xf32> to vector<32xf32>
    %344 = vector.shape_cast %343 : vector<32xf32> to vector<32x1xf32>
    %cst_54 = arith.constant 0.000000e+00 : f32
    %345 = vector.broadcast %cst_54 : f32 to vector<32x1xf32>
    %346 = arith.cmpf oge, %344, %345 : vector<32x1xf32>
    %cst_55 = arith.constant 0.00999999977 : f32
    %347 = vector.broadcast %cst_55 : f32 to vector<32x1xf32>
    %348 = arith.mulf %347, %344 : vector<32x1xf32>
    %349 = arith.select %346, %344, %348 : vector<32x1xi1>, vector<32x1xf32>
    %350 = tpu.iota {dimensions = array<i32: 1>} : vector<8x4xi32>
    %cst_56 = arith.constant 0.000000e+00 : f32
    %351 = vector.broadcast %cst_56 : f32 to vector<8x4xf32>
    %352 = vector.extract_strided_slice %349 {offsets = [0, 0], sizes = [8, 1], strides = [1, 1]} : vector<32x1xf32> to vector<8x1xf32>
    %c0_i32_57 = arith.constant 0 : i32
    %353 = vector.broadcast %c0_i32_57 : i32 to vector<8x4xi32>
    %354 = arith.cmpi eq, %350, %353 : vector<8x4xi32>
    %355 = arith.extui %354 : vector<8x4xi1> to vector<8x4xi32>
    %356 = arith.sitofp %355 : vector<8x4xi32> to vector<8x4xf32>
    %357 = vector.broadcast %352 : vector<8x1xf32> to vector<8x4xf32>
    %358 = arith.mulf %357, %356 : vector<8x4xf32>
    %359 = arith.addf %351, %358 : vector<8x4xf32>
    %360 = vector.extract_strided_slice %349 {offsets = [8, 0], sizes = [8, 1], strides = [1, 1]} : vector<32x1xf32> to vector<8x1xf32>
    %c1_i32_58 = arith.constant 1 : i32
    %361 = vector.broadcast %c1_i32_58 : i32 to vector<8x4xi32>
    %362 = arith.cmpi eq, %350, %361 : vector<8x4xi32>
    %363 = arith.extui %362 : vector<8x4xi1> to vector<8x4xi32>
    %364 = arith.sitofp %363 : vector<8x4xi32> to vector<8x4xf32>
    %365 = vector.broadcast %360 : vector<8x1xf32> to vector<8x4xf32>
    %366 = arith.mulf %365, %364 : vector<8x4xf32>
    %367 = arith.addf %359, %366 : vector<8x4xf32>
    %368 = vector.extract_strided_slice %349 {offsets = [16, 0], sizes = [8, 1], strides = [1, 1]} : vector<32x1xf32> to vector<8x1xf32>
    %c2_i32_59 = arith.constant 2 : i32
    %369 = vector.broadcast %c2_i32_59 : i32 to vector<8x4xi32>
    %370 = arith.cmpi eq, %350, %369 : vector<8x4xi32>
    %371 = arith.extui %370 : vector<8x4xi1> to vector<8x4xi32>
    %372 = arith.sitofp %371 : vector<8x4xi32> to vector<8x4xf32>
    %373 = vector.broadcast %368 : vector<8x1xf32> to vector<8x4xf32>
    %374 = arith.mulf %373, %372 : vector<8x4xf32>
    %375 = arith.addf %367, %374 : vector<8x4xf32>
    %376 = vector.extract_strided_slice %349 {offsets = [24, 0], sizes = [8, 1], strides = [1, 1]} : vector<32x1xf32> to vector<8x1xf32>
    %c3_i32_60 = arith.constant 3 : i32
    %377 = vector.broadcast %c3_i32_60 : i32 to vector<8x4xi32>
    %378 = arith.cmpi eq, %350, %377 : vector<8x4xi32>
    %379 = arith.extui %378 : vector<8x4xi1> to vector<8x4xi32>
    %380 = arith.sitofp %379 : vector<8x4xi32> to vector<8x4xf32>
    %381 = vector.broadcast %376 : vector<8x1xf32> to vector<8x4xf32>
    %382 = arith.mulf %381, %380 : vector<8x4xf32>
    %383 = arith.addf %375, %382 : vector<8x4xf32>
    %cst_61 = arith.constant dense<0xFF800000> : vector<8xf32>
    %384 = vector.multi_reduction <maximumf>, %383, %cst_61 [1] : vector<8x4xf32> to vector<8xf32>
    %385 = vector.shape_cast %384 : vector<8xf32> to vector<8x1xf32>
    %386 = vector.broadcast %385 : vector<8x1xf32> to vector<8x4xf32>
    %387 = arith.subf %383, %386 : vector<8x4xf32>
    %cst_62 = arith.constant 1.000000e+00 : f32
    %388 = vector.broadcast %cst_62 : f32 to vector<8x4xf32>
    %389 = vector.extract_strided_slice %387 {offsets = [0, 0], sizes = [8, 1], strides = [1, 1]} : vector<8x4xf32> to vector<8x1xf32>
    %390 = vector.broadcast %389 : vector<8x1xf32> to vector<8x4xf32>
    %391 = arith.cmpf ogt, %390, %387 : vector<8x4xf32>
    %392 = vector.broadcast %389 : vector<8x1xf32> to vector<8x4xf32>
    %393 = arith.cmpf oeq, %392, %387 : vector<8x4xf32>
    %c0_i32_63 = arith.constant 0 : i32
    %394 = vector.broadcast %c0_i32_63 : i32 to vector<8x4xi32>
    %395 = arith.cmpi sgt, %350, %394 : vector<8x4xi32>
    %396 = arith.andi %393, %395 : vector<8x4xi1>
    %397 = arith.ori %391, %396 : vector<8x4xi1>
    %398 = arith.extui %397 : vector<8x4xi1> to vector<8x4xi32>
    %399 = arith.sitofp %398 : vector<8x4xi32> to vector<8x4xf32>
    %400 = arith.addf %388, %399 : vector<8x4xf32>
    %401 = vector.extract_strided_slice %387 {offsets = [0, 1], sizes = [8, 1], strides = [1, 1]} : vector<8x4xf32> to vector<8x1xf32>
    %402 = vector.broadcast %401 : vector<8x1xf32> to vector<8x4xf32>
    %403 = arith.cmpf ogt, %402, %387 : vector<8x4xf32>
    %404 = vector.broadcast %401 : vector<8x1xf32> to vector<8x4xf32>
    %405 = arith.cmpf oeq, %404, %387 : vector<8x4xf32>
    %c1_i32_64 = arith.constant 1 : i32
    %406 = vector.broadcast %c1_i32_64 : i32 to vector<8x4xi32>
    %407 = arith.cmpi sgt, %350, %406 : vector<8x4xi32>
    %408 = arith.andi %405, %407 : vector<8x4xi1>
    %409 = arith.ori %403, %408 : vector<8x4xi1>
    %410 = arith.extui %409 : vector<8x4xi1> to vector<8x4xi32>
    %411 = arith.sitofp %410 : vector<8x4xi32> to vector<8x4xf32>
    %412 = arith.addf %400, %411 : vector<8x4xf32>
    %413 = vector.extract_strided_slice %387 {offsets = [0, 2], sizes = [8, 1], strides = [1, 1]} : vector<8x4xf32> to vector<8x1xf32>
    %414 = vector.broadcast %413 : vector<8x1xf32> to vector<8x4xf32>
    %415 = arith.cmpf ogt, %414, %387 : vector<8x4xf32>
    %416 = vector.broadcast %413 : vector<8x1xf32> to vector<8x4xf32>
    %417 = arith.cmpf oeq, %416, %387 : vector<8x4xf32>
    %c2_i32_65 = arith.constant 2 : i32
    %418 = vector.broadcast %c2_i32_65 : i32 to vector<8x4xi32>
    %419 = arith.cmpi sgt, %350, %418 : vector<8x4xi32>
    %420 = arith.andi %417, %419 : vector<8x4xi1>
    %421 = arith.ori %415, %420 : vector<8x4xi1>
    %422 = arith.extui %421 : vector<8x4xi1> to vector<8x4xi32>
    %423 = arith.sitofp %422 : vector<8x4xi32> to vector<8x4xf32>
    %424 = arith.addf %412, %423 : vector<8x4xf32>
    %425 = vector.extract_strided_slice %387 {offsets = [0, 3], sizes = [8, 1], strides = [1, 1]} : vector<8x4xf32> to vector<8x1xf32>
    %426 = vector.broadcast %425 : vector<8x1xf32> to vector<8x4xf32>
    %427 = arith.cmpf ogt, %426, %387 : vector<8x4xf32>
    %428 = vector.broadcast %425 : vector<8x1xf32> to vector<8x4xf32>
    %429 = arith.cmpf oeq, %428, %387 : vector<8x4xf32>
    %c3_i32_66 = arith.constant 3 : i32
    %430 = vector.broadcast %c3_i32_66 : i32 to vector<8x4xi32>
    %431 = arith.cmpi sgt, %350, %430 : vector<8x4xi32>
    %432 = arith.andi %429, %431 : vector<8x4xi1>
    %433 = arith.ori %427, %432 : vector<8x4xi1>
    %434 = arith.extui %433 : vector<8x4xi1> to vector<8x4xi32>
    %435 = arith.sitofp %434 : vector<8x4xi32> to vector<8x4xf32>
    %436 = arith.addf %424, %435 : vector<8x4xf32>
    %cst_67 = arith.constant 0.000000e+00 : f32
    %437 = vector.broadcast %cst_67 : f32 to vector<8x4xf32>
    %438 = vector.extract_strided_slice %387 {offsets = [0, 0], sizes = [8, 1], strides = [1, 1]} : vector<8x4xf32> to vector<8x1xf32>
    %439 = vector.extract_strided_slice %436 {offsets = [0, 0], sizes = [8, 1], strides = [1, 1]} : vector<8x4xf32> to vector<8x1xf32>
    %440 = vector.broadcast %439 : vector<8x1xf32> to vector<8x4xf32>
    %441 = arith.cmpf ole, %440, %436 : vector<8x4xf32>
    %442 = arith.extui %441 : vector<8x4xi1> to vector<8x4xi32>
    %443 = arith.sitofp %442 : vector<8x4xi32> to vector<8x4xf32>
    %444 = vector.broadcast %438 : vector<8x1xf32> to vector<8x4xf32>
    %445 = arith.mulf %444, %443 : vector<8x4xf32>
    %446 = arith.addf %437, %445 : vector<8x4xf32>
    %447 = vector.extract_strided_slice %387 {offsets = [0, 1], sizes = [8, 1], strides = [1, 1]} : vector<8x4xf32> to vector<8x1xf32>
    %448 = vector.extract_strided_slice %436 {offsets = [0, 1], sizes = [8, 1], strides = [1, 1]} : vector<8x4xf32> to vector<8x1xf32>
    %449 = vector.broadcast %448 : vector<8x1xf32> to vector<8x4xf32>
    %450 = arith.cmpf ole, %449, %436 : vector<8x4xf32>
    %451 = arith.extui %450 : vector<8x4xi1> to vector<8x4xi32>
    %452 = arith.sitofp %451 : vector<8x4xi32> to vector<8x4xf32>
    %453 = vector.broadcast %447 : vector<8x1xf32> to vector<8x4xf32>
    %454 = arith.mulf %453, %452 : vector<8x4xf32>
    %455 = arith.addf %446, %454 : vector<8x4xf32>
    %456 = vector.extract_strided_slice %387 {offsets = [0, 2], sizes = [8, 1], strides = [1, 1]} : vector<8x4xf32> to vector<8x1xf32>
    %457 = vector.extract_strided_slice %436 {offsets = [0, 2], sizes = [8, 1], strides = [1, 1]} : vector<8x4xf32> to vector<8x1xf32>
    %458 = vector.broadcast %457 : vector<8x1xf32> to vector<8x4xf32>
    %459 = arith.cmpf ole, %458, %436 : vector<8x4xf32>
    %460 = arith.extui %459 : vector<8x4xi1> to vector<8x4xi32>
    %461 = arith.sitofp %460 : vector<8x4xi32> to vector<8x4xf32>
    %462 = vector.broadcast %456 : vector<8x1xf32> to vector<8x4xf32>
    %463 = arith.mulf %462, %461 : vector<8x4xf32>
    %464 = arith.addf %455, %463 : vector<8x4xf32>
    %465 = vector.extract_strided_slice %387 {offsets = [0, 3], sizes = [8, 1], strides = [1, 1]} : vector<8x4xf32> to vector<8x1xf32>
    %466 = vector.extract_strided_slice %436 {offsets = [0, 3], sizes = [8, 1], strides = [1, 1]} : vector<8x4xf32> to vector<8x1xf32>
    %467 = vector.broadcast %466 : vector<8x1xf32> to vector<8x4xf32>
    %468 = arith.cmpf ole, %467, %436 : vector<8x4xf32>
    %469 = arith.extui %468 : vector<8x4xi1> to vector<8x4xi32>
    %470 = arith.sitofp %469 : vector<8x4xi32> to vector<8x4xf32>
    %471 = vector.broadcast %465 : vector<8x1xf32> to vector<8x4xf32>
    %472 = arith.mulf %471, %470 : vector<8x4xf32>
    %473 = arith.addf %464, %472 : vector<8x4xf32>
    %474 = arith.mulf %436, %387 : vector<8x4xf32>
    %cst_68 = arith.constant 1.000000e+00 : f32
    %475 = vector.broadcast %cst_68 : f32 to vector<8x4xf32>
    %476 = arith.addf %475, %474 : vector<8x4xf32>
    %477 = arith.cmpf ogt, %476, %473 : vector<8x4xf32>
    %478 = arith.extui %477 : vector<8x4xi1> to vector<8x4xi32>
    %479 = arith.sitofp %478 : vector<8x4xi32> to vector<8x4xf32>
    %480 = arith.mulf %479, %436 : vector<8x4xf32>
    %cst_69 = arith.constant dense<0xFF800000> : vector<8xf32>
    %481 = vector.multi_reduction <maximumf>, %480, %cst_69 [1] : vector<8x4xf32> to vector<8xf32>
    %482 = vector.shape_cast %481 : vector<8xf32> to vector<8x1xf32>
    %483 = arith.mulf %479, %387 : vector<8x4xf32>
    %cst_70 = arith.constant dense<0.000000e+00> : vector<8xf32>
    %484 = vector.multi_reduction <add>, %483, %cst_70 [1] : vector<8x4xf32> to vector<8xf32>
    %485 = vector.shape_cast %484 : vector<8xf32> to vector<8x1xf32>
    %cst_71 = arith.constant 1.000000e+00 : f32
    %486 = vector.broadcast %cst_71 : f32 to vector<8x1xf32>
    %487 = arith.subf %485, %486 : vector<8x1xf32>
    %488 = arith.divf %487, %482 : vector<8x1xf32>
    %489 = vector.broadcast %488 : vector<8x1xf32> to vector<8x4xf32>
    %490 = arith.subf %387, %489 : vector<8x4xf32>
    %cst_72 = arith.constant 0.000000e+00 : f32
    %491 = vector.broadcast %cst_72 : f32 to vector<8x4xf32>
    %492 = arith.maximumf %490, %491 : vector<8x4xf32>
    %cst_73 = arith.constant 0.000000e+00 : f32
    %493 = vector.broadcast %cst_73 : f32 to vector<8x32xf32>
    %494 = vector.extract_strided_slice %492 {offsets = [0, 0], sizes = [8, 1], strides = [1, 1]} : vector<8x4xf32> to vector<8x1xf32>
    %495 = vector.extract_strided_slice %339 {offsets = [0, 0], sizes = [8, 32], strides = [1, 1]} : vector<32x32xf32> to vector<8x32xf32>
    %496 = vector.broadcast %494 : vector<8x1xf32> to vector<8x32xf32>
    %497 = arith.mulf %496, %495 : vector<8x32xf32>
    %498 = arith.addf %493, %497 : vector<8x32xf32>
    %499 = vector.extract_strided_slice %492 {offsets = [0, 1], sizes = [8, 1], strides = [1, 1]} : vector<8x4xf32> to vector<8x1xf32>
    %500 = vector.extract_strided_slice %339 {offsets = [8, 0], sizes = [8, 32], strides = [1, 1]} : vector<32x32xf32> to vector<8x32xf32>
    %501 = vector.broadcast %499 : vector<8x1xf32> to vector<8x32xf32>
    %502 = arith.mulf %501, %500 : vector<8x32xf32>
    %503 = arith.addf %498, %502 : vector<8x32xf32>
    %504 = vector.extract_strided_slice %492 {offsets = [0, 2], sizes = [8, 1], strides = [1, 1]} : vector<8x4xf32> to vector<8x1xf32>
    %505 = vector.extract_strided_slice %339 {offsets = [16, 0], sizes = [8, 32], strides = [1, 1]} : vector<32x32xf32> to vector<8x32xf32>
    %506 = vector.broadcast %504 : vector<8x1xf32> to vector<8x32xf32>
    %507 = arith.mulf %506, %505 : vector<8x32xf32>
    %508 = arith.addf %503, %507 : vector<8x32xf32>
    %509 = vector.extract_strided_slice %492 {offsets = [0, 3], sizes = [8, 1], strides = [1, 1]} : vector<8x4xf32> to vector<8x1xf32>
    %510 = vector.extract_strided_slice %339 {offsets = [24, 0], sizes = [8, 32], strides = [1, 1]} : vector<32x32xf32> to vector<8x32xf32>
    %511 = vector.broadcast %509 : vector<8x1xf32> to vector<8x32xf32>
    %512 = arith.mulf %511, %510 : vector<8x32xf32>
    %513 = arith.addf %508, %512 : vector<8x32xf32>
    %514 = arith.subf %513, %332 : vector<8x32xf32>
    %515 = vector.extract_strided_slice %326 {offsets = [0, 0], sizes = [16, 32], strides = [1, 1]} : vector<48x32xf32> to vector<16x32xf32>
    %cst_74 = arith.constant dense<0.000000e+00> : vector<8x32xf32>
    %516 = tpu.matmul %322, %515, %cst_74 {dimension_numbers = #tpu.dot_dimension_numbers<[1], [0], [0], [1], [0, 0, 1, 1], [], []>} : vector<8x16xf32>, vector<16x32xf32>, vector<8x32xf32> -> vector<8x32xf32>
    %517 = vector.extract_strided_slice %326 {offsets = [16, 0], sizes = [32, 32], strides = [1, 1]} : vector<48x32xf32> to vector<32x32xf32>
    %cst_75 = arith.constant dense<0.000000e+00> : vector<8x32xf32>
    %518 = tpu.matmul %514, %517, %cst_75 {dimension_numbers = #tpu.dot_dimension_numbers<[1], [0], [0], [1], [0, 0, 1, 1], [], []>} : vector<8x32xf32>, vector<32x32xf32>, vector<8x32xf32> -> vector<8x32xf32>
    %519 = arith.addf %516, %518 : vector<8x32xf32>
    %520 = vector.broadcast %327 : vector<1x32xf32> to vector<8x32xf32>
    %521 = arith.addf %519, %520 : vector<8x32xf32>
    %cst_76 = arith.constant 0.000000e+00 : f32
    %522 = vector.broadcast %cst_76 : f32 to vector<8x32xf32>
    %523 = arith.maximumf %521, %522 : vector<8x32xf32>
    %c0_77 = arith.constant 0 : index
    %c0_78 = arith.constant 0 : index
    %524 = vector.load %arg13[%c0_77, %c0_78] : memref<32x4xf32, #tpu.memory_space<vmem>>, vector<32x4xf32>
    %cst_79 = arith.constant dense<0.000000e+00> : vector<8x4xf32>
    %525 = tpu.matmul %523, %524, %cst_79 {dimension_numbers = #tpu.dot_dimension_numbers<[1], [0], [0], [1], [0, 0, 1, 1], [], []>} : vector<8x32xf32>, vector<32x4xf32>, vector<8x4xf32> -> vector<8x4xf32>
    %c0_80 = arith.constant 0 : index
    %c0_81 = arith.constant 0 : index
    %526 = vector.load %arg14[%c0_80, %c0_81] : memref<1x4xf32, #tpu.memory_space<vmem>>, vector<1x4xf32>
    %527 = vector.broadcast %526 : vector<1x4xf32> to vector<8x4xf32>
    %528 = arith.addf %525, %527 : vector<8x4xf32>
    %c0_82 = arith.constant 0 : index
    %c0_83 = arith.constant 0 : index
    %529 = vector.load %arg15[%c0_82, %c0_83] : memref<8x4xf32, #tpu.memory_space<vmem>>, vector<8x4xf32>
    tpu.vector_store %arg15[%c0_82, %c0_83], %528 {strides = array<i32>} : memref<8x4xf32, #tpu.memory_space<vmem>>, vector<8x4xf32>,
    return
  }
  func.func @transform_0(%arg0: i32) -> (i32, i32) {
    %c0_i32 = arith.constant 0 : i32
    %c0_i32_0 = arith.constant 0 : i32
    %c0_i32_1 = arith.constant 0 : i32
    return %c0_i32, %c0_i32_0 : i32, i32
  }
  func.func @transform_1(%arg0: i32) -> (i32, i32) {
    %c0_i32 = arith.constant 0 : i32
    %c0_i32_0 = arith.constant 0 : i32
    %c0_i32_1 = arith.constant 0 : i32
    return %c0_i32, %c0_i32_0 : i32, i32
  }
  func.func @transform_2(%arg0: i32) -> (i32, i32) {
    %c0_i32 = arith.constant 0 : i32
    %c0_i32_0 = arith.constant 0 : i32
    %c0_i32_1 = arith.constant 0 : i32
    return %c0_i32, %c0_i32_0 : i32, i32
  }
  func.func @transform_3(%arg0: i32) -> (i32, i32) {
    %c0_i32 = arith.constant 0 : i32
    %c0_i32_0 = arith.constant 0 : i32
    %c0_i32_1 = arith.constant 0 : i32
    return %c0_i32, %c0_i32_0 : i32, i32
  }
  func.func @transform_4(%arg0: i32) -> (i32, i32) {
    %c0_i32 = arith.constant 0 : i32
    %c0_i32_0 = arith.constant 0 : i32
    %c0_i32_1 = arith.constant 0 : i32
    return %c0_i32, %c0_i32_0 : i32, i32
  }
  func.func @transform_5(%arg0: i32) -> (i32, i32) {
    %c0_i32 = arith.constant 0 : i32
    %c0_i32_0 = arith.constant 0 : i32
    %c0_i32_1 = arith.constant 0 : i32
    return %c0_i32, %c0_i32_0 : i32, i32
  }
  func.func @transform_6(%arg0: i32) -> (i32, i32) {
    %c0_i32 = arith.constant 0 : i32
    %c0_i32_0 = arith.constant 0 : i32
    %c0_i32_1 = arith.constant 0 : i32
    return %c0_i32, %c0_i32_0 : i32, i32
  }
  func.func @transform_7(%arg0: i32) -> (i32, i32) {
    %c0_i32 = arith.constant 0 : i32
    %c0_i32_0 = arith.constant 0 : i32
    %c0_i32_1 = arith.constant 0 : i32
    return %c0_i32, %c0_i32_0 : i32, i32
  }
  func.func @transform_8(%arg0: i32) -> (i32, i32) {
    %c0_i32 = arith.constant 0 : i32
    %c0_i32_0 = arith.constant 0 : i32
    %c0_i32_1 = arith.constant 0 : i32
    return %c0_i32, %c0_i32_0 : i32, i32
  }
  func.func @transform_9(%arg0: i32) -> (i32, i32) {
    %c0_i32 = arith.constant 0 : i32
    %c0_i32_0 = arith.constant 0 : i32
    %c0_i32_1 = arith.constant 0 : i32
    return %c0_i32, %c0_i32_0 : i32, i32
  }
  func.func @transform_10(%arg0: i32) -> (i32, i32) {
    %c0_i32 = arith.constant 0 : i32
    %c0_i32_0 = arith.constant 0 : i32
    %c0_i32_1 = arith.constant 0 : i32
    return %c0_i32, %c0_i32_0 : i32, i32
  }
  func.func @transform_11(%arg0: i32) -> (i32, i32) {
    %c0_i32 = arith.constant 0 : i32
    %c0_i32_0 = arith.constant 0 : i32
    %c0_i32_1 = arith.constant 0 : i32
    return %c0_i32, %c0_i32_0 : i32, i32
  }
  func.func @transform_12(%arg0: i32) -> (i32, i32) {
    %c0_i32 = arith.constant 0 : i32
    %c0_i32_0 = arith.constant 0 : i32
    %c0_i32_1 = arith.constant 0 : i32
    return %c0_i32, %c0_i32_0 : i32, i32
  }
  func.func @transform_13(%arg0: i32) -> (i32, i32) {
    %c0_i32 = arith.constant 0 : i32
    %c0_i32_0 = arith.constant 0 : i32
    %c0_i32_1 = arith.constant 0 : i32
    return %c0_i32, %c0_i32_0 : i32, i32
  }
  func.func @transform_14(%arg0: i32) -> (i32, i32) {
    %c0_i32 = arith.constant 0 : i32
    %c0_i32_0 = arith.constant 0 : i32
    %c0_i32_1 = arith.constant 0 : i32
    return %c0_i32, %c0_i32_0 : i32, i32
  }
}

</mosaic_0001>

<bundles_post_ra>
// kernel: gtea_tlstm3_forward.1
= control target key start
LH: loop header
LB: loop body
LE: loop exit
PB: predicated region body
PF: predicated region fallthrough
CT: control target
= control target key end

     0   :  { %vm864_vm0 = vcmask 1043456   ;;  %vm857_vm1 = vcmask 64512   ;;  %s6040_s28 = smov 32   ;;  %s8247_s5 = inlined_call_operand.vmem [shape: bf16[136,320], index: 5, kind: input, shape index: {}]   ;;  %s8248_s0 = inlined_call_operand.vmem [shape: bf16[256,8], index: 0, kind: input, shape index: {}]   ;;  %s8249_s1 = inlined_call_operand.vmem [shape: f32[256,1], index: 1, kind: input, shape index: {}]   ;;  %s8250_s6 = inlined_call_operand.vmem [shape: f32[1,320], index: 6, kind: input, shape index: {}]   ;;  %s8251_s2 = inlined_call_operand.vmem [shape: s32[32,1], index: 2, kind: input, shape index: {}]   ;;  %s8252_s7 = inlined_call_operand.vmem [shape: f32[1,32], index: 7, kind: input, shape index: {}]   ;;  %s8253_s8 = inlined_call_operand.vmem [shape: f32[48,32], index: 8, kind: input, shape index: {}]   ;;  %s8254_s4 = inlined_call_operand.vmem [shape: f32[8,16], index: 4, kind: input, shape index: {}]   ;;  %s8255_s3 = inlined_call_operand.vmem [shape: f32[32,16], index: 3, kind: input, shape index: {}]   ;;  %s8256_s9 = inlined_call_operand.vmem [shape: f32[1,32], index: 9, kind: input, shape index: {}]   ;;  %s8257_s10 = inlined_call_operand.vmem [shape: f32[48,32], index: 10, kind: input, shape index: {}]   ;;  %s8258_s12 = inlined_call_operand.vmem [shape: f32[32,4], index: 12, kind: input, shape index: {}]   ;;  %s8259_s11 = inlined_call_operand.vmem [shape: f32[1,32], index: 11, kind: input, shape index: {}]   ;;  %s8260_s13 = inlined_call_operand.vmem [shape: f32[1,4], index: 13, kind: input, shape index: {}]   ;;  %s8261_s14 = inlined_call_operand.vmem [shape: f32[8,4], index: 14, kind: output, shape index: {}]  }
   0x1   :  { %v5399_v0 = vld [vmem:[%s8247_s5 + $0xac] sm:$0xf]  ;;  %v5176_v1 = vld [vmem:[%s8247_s5 + $0xb4] sm:$0xf0]  ;;  %v692_v2 = vld [vmem:[%s8247_s5 + $0xc0] sm:$0xff] }
   0x2   :  { %v6130_v3 = vor.u32 %v5399_v0, %v5176_v1  ;;  %v804_v4 = vunpack.c.h.b16 %v692_v2  ;;  %v5396_v5 = vld [vmem:[%s8247_s5 + $0x94] sm:$0xf]  ;;  %v5164_v6 = vld [vmem:[%s8247_s5 + $0x9c] sm:$0xf0]  ;;  %v803_v7 = vunpack.c.l.b16 %v692_v2  ;;  %v5182_v8 = vld [vmem:[%s8247_s5 + $0xb0] sm:$0xf] }
   0x3   :  { %v6142_v10 = vor.u32 %v5396_v5, %v5164_v6  ;;  %v5393_v12 = vld [vmem:[%s8247_s5 + $0x7c] sm:$0xf]  ;;  %v5152_v14 = vld [vmem:[%s8247_s5 + $0x84] sm:$0xf0]  ;;  %v5170_v16 = vld [vmem:[%s8247_s5 + $0x98] sm:$0xf] }
   0x4   :  { %912 = vmatpush.bf16.msra.mxu2 %v6130_v3  ;;  %v831_v9 = vpack.c.b16 %v804_v4, %v804_v4  ;;  %v830_v11 = vpack.c.b16 %v803_v7, %v803_v7  ;;  %v5401_v13 = vld [vmem:[%s8247_s5 + $0xb8] sm:$0xf0]  ;;  %v5398_v17 = vld [vmem:[%s8247_s5 + $0xa0] sm:$0xf0]  ;;  %v6175_v21 = vor.u32 %v5393_v12, %v5152_v14  ;;  %v5140_v24 = vld [vmem:[%s8247_s5 + $0x6c] sm:$0xf0] }
   0x5   :  { %v6153_v15 = vor.u32 %v5401_v13, %v5182_v8  ;;  %v6167_v19 = vld [vmem:[%s8248_s0] sm:$0xff]  ;;  %v6181_v23 = vor.u32 %v5398_v17, %v5170_v16  ;;  %v5395_v26 = vld [vmem:[%s8247_s5 + $0x88] sm:$0xf0]  ;;  %v5128_v29 = vld [vmem:[%s8247_s5 + $0x54] sm:$0xf0]  ;;  %v6037_v0 = vmov 0.0|0.0  }
   0x6   :  { %v6162_v18 = vsel %vm864_vm0, %v831_v9, 0  ;;  %v6170_v20 = vsel %vm864_vm0, %v830_v11, 0  ;;  %v5390_v22 = vld [vmem:[%s8247_s5 + $0x64] sm:$0xf]  ;;  %v5158_v25 = vld [vmem:[%s8247_s5 + $0x80] sm:$0xf]  ;;  %v701_v1 = vunpack.c.l.b16 %v6037_v0 }
   0x7   :  { %938 = vmatpush.bf16.msra.mxu3 %v6162_v18  ;;  %900 = vmatpush.bf16.msra.mxu1 %v6170_v20  ;;  %v6197_v27 = vor.u32 %v5390_v22, %v5140_v24  ;;  %v5387_v28 = vld [vmem:[%s8247_s5 + $0x4c] sm:$0xf]  ;;  %v6206_v30 = vor.u32 %v5395_v26, %v5158_v25  ;;  %v693_v31 = vld [vmem:[%s8247_s5 + $0xc8] sm:$0xf]  ;;  %v5392_v33 = vld [vmem:[%s8247_s5 + $0x70] sm:$0xf0] }
   0x8   :  { %913 = vmatpush.bf16.msra.mxu2 %v6142_v10  ;;  %v5146_v32 = vld [vmem:[%s8247_s5 + $0x68] sm:$0xf]  ;;  %v805_v34 = vunpack.c.l.b16 %v693_v31  ;;  %v48_v35 = vld [vmem:[%s8249_s1] sm:$0xff]  ;;  %v6221_v38 = vor.u32 %v5387_v28, %v5128_v29  ;;  %v5384_v39 = vld [vmem:[%s8247_s5 + $0x34] sm:$0xf]  ;;  %v8263_v2 = vmov 0   ;;  %v6332_v17 = vpack.c.b16 %v701_v1, %v701_v1 }
   0x9   :  { %v80_v36 = vadd.f32 2.7182817, %v48_v35  ;;  %v5116_v40 = vld [vmem:[%s8247_s5 + $0x3c] sm:$0xf0]  ;;  %v6230_v41 = vor.u32 %v5392_v33, %v5146_v32  ;;  %v5134_v42 = vld [vmem:[%s8247_s5 + $0x50] sm:$0xf]  ;;  %5427 = vset.pattern.permute.xlu0 %v8263_v2  ;;  %5428 = vset.pattern.permute.xlu2 %v8263_v2 }
   0xa   :  { %5186 = vmatmul.msk.bf16.vlgmr.msra.gmra.mxu3 %vm857_vm1, %v6167_v19  ;;  %5184 = vmatmul.msk.bf16.vlgmr.msra.gmra.mxu1 %vm857_vm1, %v6167_v19  ;;  %v832_v37 = vpack.c.b16 %v805_v34, %v805_v34  ;;  %v5389_v43 = vld [vmem:[%s8247_s5 + $0x58] sm:$0xf0]  ;;  %v6244_v45 = vor.u32 %v5384_v39, %v5116_v40  ;;  %v5104_v48 = vld [vmem:[%s8247_s5 + $0x24] sm:$0xf0]  ;;  %v5122_v49 = vld [vmem:[%s8247_s5 + $0x38] sm:$0xf] }
   0xb   :  { %950 = vmatpush.bf16.msrb.mxu1 %v6153_v15  ;;  %5446 = vlog2.f32 %v80_v36  ;;  %v5381_v46 = vld [vmem:[%s8247_s5 + $0x1c] sm:$0xf]  ;;  %v6250_v47 = vor.u32 %v5389_v43, %v5134_v42  ;;  %v5386_v50 = vld [vmem:[%s8247_s5 + $0x40] sm:$0xf0]  ;;  %v6264_v52 = vld [vmem:[%s8248_s0 + $0x8] sm:$0xff]  ;;  %5429 = vset.pattern.permute.xlu1 %v8263_v2 }
   0xc   :  { %914 = vmatpush.bf16.msra.mxu2 %v6175_v21  ;;  %v6239_v44 = vsel %vm864_vm0, %v832_v37, 0  ;;  %v49_v53 = vld [vmem:[%s8249_s1 + $0x8] sm:$0xff]  ;;  %v6272_v56 = vor.u32 %v5381_v46, %v5104_v48  ;;  %v5378_v57 = vld [vmem:[%s8247_s5 + $0x4] sm:$0xf]  ;;  %v6278_v58 = vor.u32 %v5386_v50, %v5122_v49  ;;  %v5092_v59 = vld [vmem:[%s8247_s5 + $0xc] sm:$0xf0] }
   0xd   :  { %976 = vmatpush.bf16.msrb.mxu3 %v6239_v44  ;;  %v81_v55 = vadd.f32 2.7182817, %v49_v53  ;;  %v5110_v60 = vld [vmem:[%s8247_s5 + $0x20] sm:$0xf]  ;;  %v5383_v61 = vld [vmem:[%s8247_s5 + $0x28] sm:$0xf0]  ;;  %v6311_v7 = vor.u32 %v5378_v57, %v5092_v59 }
   0xe   :  { %v5174_v62 = vld [vmem:[%s8247_s5 + $0xa8] sm:$0xf]  ;;  %v5400_v63 = vld [vmem:[%s8247_s5 + $0xb0] sm:$0xf0]  ;;  %v5162_v5 = vld [vmem:[%s8247_s5 + $0x90] sm:$0xf]  ;;  %v6314_v8 = vor.u32 %v5383_v61, %v5110_v60 }
   0xf   :  { %951 = vmatpush.bf16.msrb.mxu1 %v6181_v23  ;;  %v6301_v4 = vor.u32 %v5400_v63, %v5174_v62  ;;  %v5397_v6 = vld [vmem:[%s8247_s5 + $0x98] sm:$0xf0]  ;;  %v5098_v9 = vld [vmem:[%s8247_s5 + $0x8] sm:$0xf]  ;;  %v5380_v11 = vld [vmem:[%s8247_s5 + $0x10] sm:$0xf0] }
  0x10   :  { %915 = vmatpush.bf16.msra.mxu2 %v6197_v27  ;;  %v6323_v12 = vor.u32 %v5397_v6, %v5162_v5  ;;  %v5150_v13 = vld [vmem:[%s8247_s5 + $0x78] sm:$0xf]  ;;  %v5394_v14 = vld [vmem:[%s8247_s5 + $0x80] sm:$0xf0]  ;;  %v6336_v24 = vor.u32 %v5380_v11, %v5098_v9  ;;  %v5138_v33 = vld [vmem:[%s8247_s5 + $0x60] sm:$0xf] }
  0x11   :  { %1401 = vmatpush.bf16.msra.mxu3 %v6162_v18  ;;  %v5447_v51 = vpop.eup %5446  ;;  %874 = vmatpush.bf16.msra.mxu0 %v6301_v4  ;;  %v6342_v29 = vor.u32 %v5394_v14, %v5150_v13  ;;  %v5391_v34 = vld [vmem:[%s8247_s5 + $0x68] sm:$0xf0]  ;;  %v5126_v40 = vld [vmem:[%s8247_s5 + $0x48] sm:$0xf]  ;;  %v5388_v42 = vld [vmem:[%s8247_s5 + $0x50] sm:$0xf0] }
  0x12   :  { %v6269_v54 = vmul.f32 0.6931472, %v5447_v51  ;;  %v6356_v37 = vor.u32 %v5391_v34, %v5138_v33  ;;  %v6366_v49 = vor.u32 %v5388_v42, %v5126_v40  ;;  %v5114_v51 = vld [vmem:[%s8247_s5 + $0x30] sm:$0xf]  ;;  %v5385_v53 = vld [vmem:[%s8247_s5 + $0x38] sm:$0xf0] }
  0x13   :  { %952 = vmatpush.bf16.msrb.mxu1 %v6206_v30  ;;  %v6383_v59 = vor.u32 %v5385_v53, %v5114_v51  ;;  %v5102_v62 = vld [vmem:[%s8247_s5 + $0x18] sm:$0xf]  ;;  %v5382_v63 = vld [vmem:[%s8247_s5 + $0x20] sm:$0xf0]  ;;  %v5090_v9 = vld [vmem:[%s8247_s5] sm:$0xf] }
  0x14   :  { %916 = vmatpush.bf16.msra.mxu2 %v6221_v38  ;;  %5448 = vrcp.f32 %v6269_v54  ;;  %v185_v26 = vand.u32 2147483647, %v6269_v54  ;;  %v187_v28 = vand.u32 2147483648, %v6269_v54  ;;  %vm181_vm2 = vweird.f32 %v6269_v54  ;;  %8301 = vst [vmem:[#allocation2_spill] sm:$0xff] %v6356_v37  ;;  %v5379_v11 = vld [vmem:[%s8247_s5 + $0x8] sm:$0xf0] }
  0x15   :  { %5450 = vlog2.f32 %v81_v55  ;;  %875 = vmatpush.bf16.msra.mxu0 %v6323_v12  ;;  %8302 = vst [vmem:[#allocation3_spill] sm:$0xff] %v6366_v49  ;;  %v6393_v5 = vor.u32 %v5382_v63, %v5102_v62 }
  0x16   :  { %v188_v36 = vor.u32 1.1754944e-38, %v187_v28  ;;  %vm186_vm5 = vcmp.eq.f32.partialorder %v185_v26, 8.507059e+37  ;;  %8303 = vst [vmem:[#allocation4_spill] sm:$0xff] %v6383_v59 }
  0x17   :  { %953 = vmatpush.bf16.msrb.mxu1 %v6230_v41  ;;  %8304 = vst [vmem:[#allocation5_spill] sm:$0xff] %v6393_v5 }
  0x18   :  { %917 = vmatpush.bf16.msra.mxu2 %v6244_v45 }
  0x19   :  { %876 = vmatpush.bf16.msra.mxu0 %v6342_v29 }
  0x1a   :  { %5187 = vmatmul.msk.bf16.gmra.mxu3 %vm857_vm1, %v6264_v52  ;;  %5185 = vmatmul.msk.bf16.gmra.mxu1 %vm857_vm1, %v6264_v52  ;;  %v5449_v16 = vpop.eup %5448 }
  0x1b   :  { %954 = vmatpush.bf16.msrb.mxu1 %v6250_v47  ;;  %v5451_v22 = vpop.eup %5450  ;;  %v177_v25 = vmul.f32 %v5449_v16, %v6269_v54  ;;  %vm182_vm3 = vweird.f32 %v5449_v16 }
  0x1c   :  { %918 = vmatpush.bf16.msra.mxu2 %v6272_v56  ;;  %v115_v31 = vmul.f32 0.6931472, %v5451_v22  ;;  %vm183_vm4 = vmor %vm181_vm2, %vm182_vm3 }
  0x1d   :  { %v178_v32 = vsub.f32 1.0, %v177_v25  ;;  %877 = vmatpush.bf16.msra.mxu0 %v6356_v37 }
  0x1e   :  { %5452 = vrcp.f32 %v115_v31  ;;  %v202_v54 = vand.u32 2147483648, %v115_v31  ;;  %vm196_vm6 = vweird.f32 %v115_v31  ;;  %v200_v57 = vand.u32 2147483647, %v115_v31 }
  0x1f   :  { %955 = vmatpush.bf16.msrb.mxu1 %v6278_v58  ;;  %v179_v35 = vmul.f32 %v5449_v16, %v178_v32 }
  0x20   :  { %919 = vmatpush.bf16.msra.mxu2 %v6311_v7  ;;  %v203_v0 = vor.u32 1.1754944e-38, %v202_v54  ;;  %vm201_vm9 = vcmp.eq.f32.partialorder %v200_v57, 8.507059e+37 }
  0x21   :  { %v180_v39 = vadd.f32 %v5449_v16, %v179_v35  ;;  %878 = vmatpush.bf16.msra.mxu0 %v6366_v49 }
  0x23   :  { %956 = vmatpush.bf16.msrb.mxu1 %v6314_v8  ;;  %920 = vmatmul.bf16.vlgmr.msra.gmra.mxu2 %v6332_v17  ;;  %v184_v43 = vsel %vm183_vm4, %v5449_v16, %v180_v39  ;;  %v6404_v16 = vor.u32 %v5379_v11, %v5090_v9  ;;  %v694_v9 = vld [vmem:[%s8250_s6] sm:$0x7]  ;;  %s6039_s6 = smov 64  }
  0x24   :  { %1363 = vmatpush.bf16.msrb.mxu2 %v6170_v20  ;;  %v5453_v46 = vpop.eup %5452  ;;  %v189_v48 = vsel %vm186_vm5, %v188_v36, %v184_v43  ;;  %v6454_v11 = vperm.slane %v694_v9, 1 }
  0x25   :  { %v192_v50 = vmul.f32 %v5453_v46, %v115_v31  ;;  %998 = vperm.xlu0 %5427, %v189_v48   ;;  %vm197_vm7 = vweird.f32 %v5453_v46  ;;  %879 = vmatpush.bf16.msra.mxu0 %v6383_v59  ;;  %8305 = vst [vmem:[#allocation6_spill] sm:$0xff] %v6404_v16 }
  0x26   :  { %vm198_vm8 = vmor %vm196_vm6, %vm197_vm7  ;;  %8306 = vst [vmem:[#allocation7_spill] sm:$0xff] %v6454_v11 }
  0x27   :  { %957 = vmatpush.bf16.msrb.mxu1 %v6336_v24  ;;  %v193_v55 = vsub.f32 1.0, %v192_v50 }
  0x28   :  { %1439 = vmatpush.bf16.msra.mxu2 %v6239_v44 }
  0x29   :  { %v194_v61 = vmul.f32 %v5453_v46, %v193_v55  ;;  %880 = vmatpush.bf16.msra.mxu0 %v6393_v5 }
  0x2a   :  { %5188 = vmatmul.msk.bf16.vlgmr.msrb.gmra.mxu3 %vm857_vm1, %v6167_v19  ;;  %958 = vmatmul.bf16.vlgmr.msrb.gmra.mxu1 %v6332_v17  ;;  %v50_v19 = vld [vmem:[%s8249_s1 + $0x10] sm:$0xff] }
  0x2b   :  { %1375 = vmatpush.bf16.msra.mxu1 %v6130_v3  ;;  %1841 = vmatpush.bf16.msrb.mxu3 %v6170_v20  ;;  %v82_v60 = vadd.f32 2.7182817, %v50_v19  ;;  %v195_v1 = vadd.f32 %v5453_v46, %v194_v61 }
  0x2d   :  { %5454 = vlog2.f32 %v82_v60  ;;  %v199_v6 = vsel %vm198_vm8, %v5453_v46, %v195_v1  ;;  %881 = vmatpush.bf16.msra.mxu0 %v6404_v16 }
  0x2e   :  { %v204_v13 = vsel %vm201_vm9, %v203_v0, %v199_v6 }
  0x2f   :  { %1376 = vmatpush.bf16.msra.mxu1 %v6142_v10  ;;  %1003 = vperm.xlu0 %5427, %v204_v13  }
  0x30   :  { %882 = vmatmul.bf16.vlgmr.msra.gmra.mxu0 %v6332_v17 }
  0x31   :  { %1337 = vmatpush.bf16.msrb.mxu0 %v6301_v4 }
  0x33   :  { %1377 = vmatpush.bf16.msra.mxu1 %v6175_v21  ;;  %925 = vmatmul.bf16.gmra.mxu2 %v6332_v17  ;;  %v5455_v14 = vpop.eup %5454 }
  0x34   :  { %v117_v22 = vmul.f32 0.6931472, %v5455_v14 }
  0x35   :  { %1338 = vmatpush.bf16.msrb.mxu0 %v6323_v12 }
  0x36   :  { %5456 = vrcp.f32 %v117_v22  ;;  %v217_v28 = vand.u32 2147483648, %v117_v22  ;;  %vm211_vm10 = vweird.f32 %v117_v22  ;;  %v215_v32 = vand.u32 2147483647, %v117_v22 }
  0x37   :  { %1378 = vmatpush.bf16.msra.mxu1 %v6197_v27 }
  0x38   :  { %v218_v33 = vor.u32 1.1754944e-38, %v217_v28  ;;  %vm216_vm13 = vcmp.eq.f32.partialorder %v215_v32, 8.507059e+37 }
  0x39   :  { %1339 = vmatpush.bf16.msrb.mxu0 %v6342_v29 }
  0x3a   :  { %5189 = vmatmul.msk.bf16.gmra.mxu3 %vm857_vm1, %v6264_v52  ;;  %963 = vmatmul.bf16.gmra.mxu1 %v6332_v17 }
  0x3b   :  { %1379 = vmatpush.bf16.msra.mxu1 %v6221_v38 }
  0x3c   :  { %v5457_v25 = vpop.eup %5456 }
  0x3d   :  { %v207_v26 = vmul.f32 %v5457_v25, %v117_v22  ;;  %vm212_vm11 = vweird.f32 %v5457_v25  ;;  %1340 = vmatpush.bf16.msrb.mxu0 %v6356_v37  ;;  %v6456_v22 = vperm.slane %v694_v9, 2 }
  0x3e   :  { %vm213_vm12 = vmor %vm211_vm10, %vm212_vm11 }
  0x3f   :  { %1380 = vmatpush.bf16.msra.mxu1 %v6244_v45  ;;  %v208_v31 = vsub.f32 1.0, %v207_v26  ;;  %8307 = vst [vmem:[#allocation8_spill] sm:$0xff] %v6456_v22 }
  0x40   :  { %887 = vmatmul.bf16.gmra.mxu0 %v6332_v17  ;;  %v51_v17 = vld [vmem:[%s8249_s1 + $0x18] sm:$0xff] }
  0x41   :  { %v209_v52 = vmul.f32 %v5457_v25, %v208_v31  ;;  %1341 = vmatpush.bf16.msrb.mxu0 %v6366_v49  ;;  %v83_v39 = vadd.f32 2.7182817, %v51_v17 }
  0x43   :  { %1381 = vmatpush.bf16.msra.mxu1 %v6272_v56  ;;  %v210_v34 = vadd.f32 %v5457_v25, %v209_v52  ;;  %5458 = vlog2.f32 %v83_v39 }
  0x45   :  { %v214_v35 = vsel %vm213_vm12, %v5457_v25, %v210_v34  ;;  %1342 = vmatpush.bf16.msrb.mxu0 %v6383_v59 }
  0x46   :  { %v219_v36 = vsel %vm216_vm13, %v218_v33, %v214_v35 }
  0x47   :  { %1382 = vmatpush.bf16.msra.mxu1 %v6311_v7  ;;  %1008 = vperm.xlu2 %5428, %v219_v36  }
  0x49   :  { %1343 = vmatpush.bf16.msrb.mxu0 %v6393_v5  ;;  %v5459_v40 = vpop.eup %5458 }
  0x4a   :  { %v119_v42 = vmul.f32 0.6931472, %v5459_v40 }
  0x4b   :  { %1815 = vmatpush.bf16.msrb.mxu1 %v6301_v4 }
  0x4c   :  { %5460 = vrcp.f32 %v119_v42  ;;  %v232_v54 = vand.u32 2147483648, %v119_v42  ;;  %vm226_vm14 = vweird.f32 %v119_v42  ;;  %v230_v19 = vand.u32 2147483647, %v119_v42 }
  0x4d   :  { %1344 = vmatpush.bf16.msrb.mxu0 %v6404_v16 }
  0x4e   :  { %v233_v60 = vor.u32 1.1754944e-38, %v232_v54  ;;  %vm231_vm2 = vcmp.eq.f32.partialorder %v230_v19, 8.507059e+37 }
  0x4f   :  { %1816 = vmatpush.bf16.msrb.mxu1 %v6323_v12 }
  0x51   :  { %1413 = vmatpush.bf16.msra.mxu0 %v6153_v15 }
  0x52   :  { %v5461_v46 = vpop.eup %5460 }
  0x53   :  { %1817 = vmatpush.bf16.msrb.mxu1 %v6342_v29  ;;  %v222_v48 = vmul.f32 %v5461_v46, %v119_v42  ;;  %vm227_vm15 = vweird.f32 %v5461_v46 }
  0x54   :  { %vm228_vm0 = vmor %vm226_vm14, %vm227_vm15 }
  0x55   :  { %1414 = vmatpush.bf16.msra.mxu0 %v6181_v23  ;;  %v223_v50 = vsub.f32 1.0, %v222_v48 }
  0x57   :  { %1818 = vmatpush.bf16.msrb.mxu1 %v6356_v37  ;;  %v224_v53 = vmul.f32 %v5461_v46, %v223_v50 }
  0x59   :  { %1415 = vmatpush.bf16.msra.mxu0 %v6206_v30  ;;  %v225_v57 = vadd.f32 %v5461_v46, %v224_v53 }
  0x5b   :  { %1819 = vmatpush.bf16.msrb.mxu1 %v6366_v49  ;;  %v229_v61 = vsel %vm228_vm0, %v5461_v46, %v225_v57 }
  0x5c   :  { %v234_v62 = vsel %vm231_vm2, %v233_v60, %v229_v61 }
  0x5d   :  { %1416 = vmatpush.bf16.msra.mxu0 %v6230_v41  ;;  %1013 = vperm.xlu2 %5428, %v234_v62  }
  0x5f   :  { %1820 = vmatpush.bf16.msrb.mxu1 %v6383_v59 }
  0x61   :  { %1417 = vmatpush.bf16.msra.mxu0 %v6250_v47 }
  0x63   :  { %1821 = vmatpush.bf16.msrb.mxu1 %v6393_v5 }
  0x65   :  { %1418 = vmatpush.bf16.msra.mxu0 %v6278_v58 }
  0x67   :  { %1822 = vmatpush.bf16.msrb.mxu1 %v6404_v16 }
  0x69   :  { %1419 = vmatpush.bf16.msra.mxu0 %v6314_v8 }
  0x6d   :  { %1420 = vmatpush.bf16.msra.mxu0 %v6336_v24 }
  0x87   :  { %v6443_v43 = vpop.f32.mrf.mxu1 }
  0x8d   :  { %v940_v51 = vpop.f32.mrf.mxu3 }
  0x8f   :  { %v6445_v55 = vpop.f32.mrf.mxu1 }
  0x95   :  { %v942_v63 = vpop.f32.mrf.mxu3 }
  0x97   :  { %v6447_v0 = vpop.f32.mrf.mxu1  ;;  %v999_v40 = vpop.permute.xlu0 %998 }
  0x9d   :  { %v945_v1 = vpop.f32.mrf.mxu3 }
  0x9f   :  { %v6449_v6 = vpop.f32.mrf.mxu1 }
  0xa5   :  { %v947_v13 = vpop.f32.mrf.mxu3 }
  0xa6   :  { %v921_v14 = vpop.f32.mrf.mxu2 }
  0xa7   :  { %v922_v25 = vadd.f32 %v921_v14, %v6454_v11  ;;  %v959_v26 = vpop.f32.mrf.mxu1 }
  0xa8   :  { %v960_v31 = vadd.f32 %v959_v26, %v6456_v22 }
  0xa9   :  { %v6459_v28 = vadd.f32 %v940_v51, %v922_v25 }
  0xab   :  { %5462 = vtanh.f32 %v6459_v28 }
  0xad   :  { %v978_v32 = vpop.f32.mrf.mxu3 }
  0xae   :  { %v979_v52 = vadd.f32 %v978_v32, %v960_v31  ;;  %v923_v33 = vpop.f32.mrf.mxu2  ;;  %v1004_v32 = vpop.permute.xlu0 %1003 }
  0xaf   :  { %v924_v34 = vadd.f32 %v923_v33, %v6454_v11  ;;  %v961_v35 = vpop.f32.mrf.mxu1 }
  0xb0   :  { %5464 = vtanh.f32 %v979_v52  ;;  %v962_v39 = vadd.f32 %v961_v35, %v6456_v22 }
  0xb1   :  { %v5463_v36 = vpop.eup %5462  ;;  %v6464_v17 = vadd.f32 %v942_v63, %v924_v34 }
  0xb2   :  { %1204 = vrot.lane.b32.xlu1 %v5463_v36, %s6039_s6 }
  0xb3   :  { %5466 = vtanh.f32 %v6464_v17 }
  0xb5   :  { %v980_v42 = vpop.f32.mrf.mxu3 }
  0xb6   :  { %v5465_v46 = vpop.eup %5464  ;;  %v926_v48 = vpop.f32.mrf.mxu2  ;;  %v981_v50 = vadd.f32 %v980_v42, %v962_v39 }
  0xb7   :  { %v927_v51 = vadd.f32 %v926_v48, %v6454_v11  ;;  %v992_v53 = vsub.f32 0.0, %v5465_v46  ;;  %v1016_v54 = vmul.f32 %v5465_v46, %v999_v40  ;;  %v964_v57 = vpop.f32.mrf.mxu1  ;;  %v1009_v39 = vpop.permute.xlu2 %1008 }
  0xb8   :  { %5468 = vtanh.f32 %v981_v50  ;;  %v965_v62 = vadd.f32 %v964_v57, %v6456_v22  ;;  %v6484_v50 = vperm.slane %v694_v9, 0 }
  0xb9   :  { %v5467_v19 = vpop.eup %5466  ;;  %v6470_v60 = vadd.f32 %v945_v1, %v927_v51  ;;  %v1020_v61 = vadd.f32 %v1016_v54, %v992_v53 }
  0xba   :  { %1206 = vrot.lane.b32.xlu1 %v5467_v19, %s6039_s6  ;;  %8308 = vst [vmem:[#allocation9_spill] sm:$0xff] %v6484_v50 }
  0xbb   :  { %5470 = vtanh.f32 %v6470_v60  ;;  %1184 = vrot.lane.b32.xlu2 %v1020_v61, %s6039_s6 }
  0xbd   :  { %v983_v63 = vpop.f32.mrf.mxu3 }
  0xbe   :  { %v928_v14 = vpop.f32.mrf.mxu2  ;;  %v984_v25 = vadd.f32 %v983_v63, %v965_v62  ;;  %v5469_v26 = vpop.eup %5468 }
  0xbf   :  { %v929_v31 = vadd.f32 %v928_v14, %v6454_v11  ;;  %v993_v33 = vsub.f32 0.0, %v5469_v26  ;;  %v1017_v34 = vmul.f32 %v5469_v26, %v1004_v32 }
  0xc0   :  { %5472 = vtanh.f32 %v984_v25 }
  0xc1   :  { %v5471_v52 = vpop.eup %5470  ;;  %v6477_v1 = vadd.f32 %v947_v13, %v929_v31  ;;  %v1021_v35 = vadd.f32 %v1017_v34, %v993_v33  ;;  %v883_v13 = vpop.f32.mrf.mxu0 }
  0xc2   :  { %1208 = vrot.lane.b32.xlu0 %v5471_v52, %s6039_s6  ;;  %v884_v51 = vadd.f32 %v883_v13, %v6484_v50 }
  0xc3   :  { %5474 = vtanh.f32 %v6477_v1 }
  0xc4   :  { %v903_v54 = vadd.f32 %v6443_v43, %v884_v51 }
  0xc5   :  { %v985_v13 = vpop.f32.mrf.mxu3 }
  0xc6   :  { %v5473_v36 = vpop.eup %5472  ;;  %v5190_v57 = vmul.f32 -1.442695, %v903_v54 }
  0xc7   :  { %v994_v42 = vsub.f32 0.0, %v5473_v36  ;;  %v1018_v46 = vmul.f32 %v5473_v36, %v1009_v39 }
  0xc8   :  { %5476 = vpow2.f32 %v5190_v57 }
  0xc9   :  { %v5475_v40 = vpop.eup %5474  ;;  %v1022_v48 = vadd.f32 %v1018_v46, %v994_v42  ;;  %v885_v53 = vpop.f32.mrf.mxu0 }
  0xca   :  { %1210 = vrot.lane.b32.xlu1 %v5475_v40, %s6039_s6  ;;  %1186 = vrot.lane.b32.xlu0 %v1021_v35, %s6039_s6  ;;  %v886_v19 = vadd.f32 %v885_v53, %v6484_v50  ;;  %v966_v40 = vpop.f32.mrf.mxu1 }
  0xcc   :  { %v905_v62 = vadd.f32 %v6445_v55, %v886_v19 }
  0xce   :  { %v5192_v63 = vmul.f32 -1.442695, %v905_v62  ;;  %v5477_v25 = vpop.eup %5476 }
  0xcf   :  { %v1048_v26 = vadd.f32 1.0, %v5477_v25 }
  0xd0   :  { %5478 = vpow2.f32 %v5192_v63 }
  0xd1   :  { %v888_v61 = vpop.f32.mrf.mxu0  ;;  %5480 = vrcp.f32 %v1048_v26  ;;  %vm1061_vm3 = vweird.f32 %v1048_v26  ;;  %v1067_v19 = vand.u32 2147483648, %v1048_v26  ;;  %v1065_v62 = vand.u32 2147483647, %v1048_v26 }
  0xd2   :  { %1188 = vrot.lane.b32.xlu0 %v1022_v48, %s6039_s6  ;;  %v889_v14 = vadd.f32 %v888_v61, %v6484_v50  ;;  %v967_v48 = vadd.f32 %v966_v40, %v6456_v22 }
  0xd3   :  { %v1068_v25 = vor.u32 1.1754944e-38, %v1067_v19  ;;  %vm1066_vm6 = vcmp.eq.f32.partialorder %v1065_v62, 8.507059e+37 }
  0xd4   :  { %v908_v9 = vadd.f32 %v6447_v0, %v889_v14  ;;  %v986_v54 = vadd.f32 %v985_v13, %v967_v48  ;;  %v1014_v48 = vpop.permute.xlu2 %1013 }
  0xd6   :  { %v5194_v32 = vmul.f32 -1.442695, %v908_v9  ;;  %v5479_v43 = vpop.eup %5478 }
  0xd7   :  { %v1050_v34 = vadd.f32 1.0, %v5479_v43  ;;  %v5481_v35 = vpop.eup %5480 }
  0xd8   :  { %5482 = vpow2.f32 %v5194_v32  ;;  %v1057_v39 = vmul.f32 %v5481_v35, %v1048_v26  ;;  %vm1062_vm4 = vweird.f32 %v5481_v35 }
  0xd9   :  { %v890_v31 = vpop.f32.mrf.mxu0  ;;  %5484 = vrcp.f32 %v1050_v34  ;;  %vm1063_vm5 = vmor %vm1061_vm3, %vm1062_vm4  ;;  %vm1091_vm7 = vweird.f32 %v1050_v34 }
  0xda   :  { %v891_v52 = vadd.f32 %v890_v31, %v6484_v50  ;;  %v1058_v0 = vsub.f32 1.0, %v1057_v39  ;;  %v1095_v39 = vand.u32 2147483647, %v1050_v34 }
  0xdc   :  { %v910_v33 = vadd.f32 %v6449_v6, %v891_v52  ;;  %v1059_v53 = vmul.f32 %v5481_v35, %v1058_v0  ;;  %vm1096_vm10 = vcmp.eq.f32.partialorder %v1095_v39, 8.507059e+37 }
  0xde   :  { %v5196_v55 = vmul.f32 -1.442695, %v910_v33  ;;  %v5483_v36 = vpop.eup %5482  ;;  %v1060_v61 = vadd.f32 %v5481_v35, %v1059_v53 }
  0xdf   :  { %v6494_v42 = vadd.f32 1.0, %v5483_v36  ;;  %v5485_v46 = vpop.eup %5484 }
  0xe0   :  { %5486 = vpow2.f32 %v5196_v55  ;;  %v1087_v6 = vmul.f32 %v5485_v46, %v1050_v34  ;;  %v1064_v9 = vsel %vm1063_vm5, %v5481_v35, %v1060_v61  ;;  %vm1092_vm8 = vweird.f32 %v5485_v46 }
  0xe1   :  { %5488 = vrcp.f32 %v6494_v42  ;;  %v6502_v43 = vsel %vm1066_vm6, %v1068_v25, %v1064_v9  ;;  %v1097_v55 = vand.u32 2147483648, %v1050_v34  ;;  %vm1093_vm9 = vmor %vm1091_vm7, %vm1092_vm8  ;;  %vm1121_vm11 = vweird.f32 %v6494_v42 }
  0xe2   :  { %v1088_v63 = vsub.f32 1.0, %v1087_v6  ;;  %5490 = vtanh.f32 %v986_v54  ;;  %v1127_v62 = vand.u32 2147483648, %v6494_v42  ;;  %v1125_v9 = vand.u32 2147483647, %v6494_v42 }
  0xe4   :  { %v1089_v31 = vmul.f32 %v5485_v46, %v1088_v63  ;;  %vm1126_vm14 = vcmp.eq.f32.partialorder %v1125_v9, 8.507059e+37 }
  0xe6   :  { %v5487_v51 = vpop.eup %5486  ;;  %v1090_v36 = vadd.f32 %v5485_v46, %v1089_v31 }
  0xe7   :  { %v6498_v57 = vadd.f32 1.0, %v5487_v51  ;;  %v5489_v14 = vpop.eup %5488  ;;  %v1098_v51 = vor.u32 1.1754944e-38, %v1097_v55 }
  0xe8   :  { %v1117_v32 = vmul.f32 %v5489_v14, %v6494_v42  ;;  %v5491_v52 = vpop.eup %5490  ;;  %v1094_v53 = vsel %vm1093_vm9, %v5485_v46, %v1090_v36  ;;  %vm1122_vm12 = vweird.f32 %v5489_v14  ;;  %v1128_v46 = vor.u32 1.1754944e-38, %v1127_v62 }
  0xe9   :  { %5492 = vrcp.f32 %v6498_v57  ;;  %v995_v35 = vsub.f32 0.0, %v5491_v52  ;;  %v1019_v13 = vmul.f32 %v5491_v52, %v1014_v48  ;;  %v1099_v34 = vsel %vm1096_vm10, %v1098_v51, %v1094_v53  ;;  %vm1123_vm13 = vmor %vm1121_vm11, %vm1122_vm12  ;;  %v6522_v51 = vld [vmem:[%s8251_s2] sm:$0xff] }
  0xea   :  { %v1118_v40 = vsub.f32 1.0, %v1117_v32  ;;  %vm1151_vm15 = vweird.f32 %v6498_v57  ;;  %v1155_v42 = vand.u32 2147483647, %v6498_v57  ;;  %vm1264_vm4 = vcmp.gt.s32.totalorder %v6522_v51, 0 }
  0xeb   :  { %v1023_v19 = vadd.f32 %v1019_v13, %v995_v35 }
  0xec   :  { %v1119_v6 = vmul.f32 %v5489_v14, %v1118_v40  ;;  %vm1156_vm3 = vcmp.eq.f32.partialorder %v1155_v42, 8.507059e+37 }
  0xee   :  { %v1120_v25 = vadd.f32 %v5489_v14, %v1119_v6  ;;  %v53_v6 = vld [vmem:[%s8249_s1 + $0x28] sm:$0xff] }
  0xef   :  { %v5493_v0 = vpop.eup %5492  ;;  %v85_v62 = vadd.f32 2.7182817, %v53_v6 }
  0xf0   :  { %v1147_v54 = vmul.f32 %v5493_v0, %v6498_v57  ;;  %v1124_v32 = vsel %vm1123_vm13, %v5489_v14, %v1120_v25  ;;  %vm1152_vm0 = vweird.f32 %v5493_v0  ;;  %v52_v25 = vld [vmem:[%s8249_s1 + $0x20] sm:$0xff] }
  0xf1   :  { %v1129_v55 = vsel %vm1126_vm14, %v1128_v46, %v1124_v32  ;;  %vm1153_vm2 = vmor %vm1151_vm15, %vm1152_vm0 }
  0xf2   :  { %v1148_v31 = vsub.f32 1.0, %v1147_v54 }
  0xf4   :  { %v1149_v52 = vmul.f32 %v5493_v0, %v1148_v31  ;;  %v54_v31 = vld [vmem:[%s8249_s1 + $0x30] sm:$0xff] }
  0xf6   :  { %v1150_v39 = vadd.f32 %v5493_v0, %v1149_v52  ;;  %v84_v52 = vadd.f32 2.7182817, %v52_v25 }
  0xf8   :  { %v1154_v48 = vsel %vm1153_vm2, %v5493_v0, %v1150_v39 }
 0x115   :  { %v1185_v53 = vpop.permute.xlu2 %1184 }
 0x124   :  { %v1205_v33 = vpop.permute.xlu1 %1204 }
 0x125   :  { %v1216_v26 = vmul.f32 %v1205_v33, %v6502_v43 }
 0x127   :  { %1224 = vrot.lane.b32.xlu1 %v1216_v26, %s6039_s6  ;;  %v1157_v26 = vand.u32 2147483648, %v6498_v57  ;;  %v1268_v57 = vsel %vm1264_vm4, 1, %v8263_v2 }
 0x129   :  { %v1158_v40 = vor.u32 1.1754944e-38, %v1157_v26 }
 0x12b   :  { %v6516_v35 = vsel %vm1156_vm3, %v1158_v40, %v1154_v48  ;;  %v659_v48 = vld [vmem:[%s8251_s2 + $0x18] sm:$0xff] }
 0x12c   :  { %v1207_v61 = vpop.permute.xlu1 %1206  ;;  %vm1267_vm5 = vcmp.gt.s32.totalorder %v659_v48, 0 }
 0x12d   :  { %v1217_v63 = vmul.f32 %v1207_v61, %v1099_v34 }
 0x12f   :  { %1226 = vrot.lane.b32.xlu2 %v1217_v63, %s6039_s6  ;;  %1190 = vrot.lane.b32.xlu1 %v1023_v19, %s6039_s6 }
 0x134   :  { %v1209_v33 = vpop.permute.xlu0 %1208 }
 0x135   :  { %v1218_v36 = vmul.f32 %v1209_v33, %v1129_v55  ;;  %v86_v33 = vadd.f32 2.7182817, %v54_v31  ;;  %v6563_v31 = vld [vmem:[%s8251_s2 + $0x10] sm:$0xff] }
 0x136   :  { %8309 = vst [vmem:[#allocation10_spill] sm:$0xff] %v6563_v31  ;;  %vm1266_vm7 = vcmp.gt.s32.totalorder %v6563_v31, 0 }
 0x137   :  { %1228 = vrot.lane.b32.xlu2 %v1218_v36, %s6039_s6 }
 0x13c   :  { %v1211_v14 = vpop.permute.xlu1 %1210  ;;  %v1187_v0 = vpop.permute.xlu0 %1186 }
 0x13d   :  { %v1219_v13 = vmul.f32 %v1211_v14, %v6516_v35  ;;  %v1197_v54 = vmul.f32 %v1187_v0, %v1099_v34  ;;  %v1271_v0 = vsel %vm1267_vm5, 1, %v8263_v2 }
 0x13f   :  { %1230 = vrot.lane.b32.xlu0 %v1219_v13, %s6039_s6 }
 0x144   :  { %v1189_v63 = vpop.permute.xlu0 %1188 }
 0x145   :  { %v1198_v9 = vmul.f32 %v1189_v63, %v1129_v55  ;;  %v1196_v55 = vmul.f32 %v1185_v53, %v6502_v43 }
 0x147   :  { %1273 = vperm.xlu0 %5427, %v1268_v57  }
 0x189   :  { %v1227_v19 = vpop.permute.xlu2 %1226 }
 0x18a   :  { %v6530_v61 = vadd.f32 %v1227_v19, %v1197_v54  ;;  %v6555_v54 = vld [vmem:[%s8251_s2 + $0x8] sm:$0xff] }
 0x18b   :  { %vm1265_vm6 = vcmp.gt.s32.totalorder %v6555_v54, 0 }
 0x18c   :  { %5494 = vtanh.f32 %v6530_v61 }
 0x18d   :  { %5496 = vlog2.f32 %v85_v62  ;;  %v1269_v62 = vsel %vm1265_vm6, 1, %v8263_v2 }
 0x191   :  { %v1229_v46 = vpop.permute.xlu2 %1228 }
 0x192   :  { %v5495_v32 = vpop.eup %5494  ;;  %v6539_v34 = vadd.f32 %v1229_v46, %v1198_v9 }
 0x193   :  { %1250 = vrot.lane.b32.xlu2 %v5495_v32, %s6039_s6  ;;  %v5497_v26 = vpop.eup %5496 }
 0x194   :  { %5498 = vtanh.f32 %v6539_v34  ;;  %v123_v36 = vmul.f32 0.6931472, %v5497_v26 }
 0x195   :  { %5500 = vlog2.f32 %v84_v52 }
 0x196   :  { %5502 = vlog2.f32 %v86_v33  ;;  %vm256_vm8 = vweird.f32 %v123_v36 }
 0x197   :  { %5504 = vrcp.f32 %v123_v36 }
 0x199   :  { %v1225_v39 = vpop.permute.xlu1 %1224 }
 0x19a   :  { %v5499_v42 = vpop.eup %5498  ;;  %v6544_v40 = vadd.f32 %v1225_v39, %v1196_v55  ;;  %v1270_v55 = vsel %vm1266_vm7, 1, %v8263_v2  ;;  %v262_v39 = vand.u32 2147483648, %v123_v36 }
 0x19b   :  { %1252 = vrot.lane.b32.xlu2 %v5499_v42, %s6039_s6  ;;  %v5501_v14 = vpop.eup %5500 }
 0x19c   :  { %5506 = vtanh.f32 %v6544_v40  ;;  %v5503_v13 = vpop.eup %5502  ;;  %v121_v57 = vmul.f32 0.6931472, %v5501_v14  ;;  %v260_v14 = vand.u32 2147483647, %v123_v36 }
 0x19d   :  { %v125_v43 = vmul.f32 0.6931472, %v5503_v13  ;;  %v5505_v53 = vpop.eup %5504 }
 0x19e   :  { %5508 = vrcp.f32 %v121_v57  ;;  %v252_v19 = vmul.f32 %v5505_v53, %v123_v36  ;;  %vm257_vm9 = vweird.f32 %v5505_v53  ;;  %vm261_vm11 = vcmp.eq.f32.partialorder %v260_v14, 8.507059e+37 }
 0x19f   :  { %5510 = vrcp.f32 %v125_v43  ;;  %vm258_vm10 = vmor %vm256_vm8, %vm257_vm9  ;;  %vm241_vm12 = vweird.f32 %v121_v57  ;;  %vm271_vm14 = vweird.f32 %v125_v43  ;;  %v277_v36 = vand.u32 2147483648, %v125_v43 }
 0x1a0   :  { %v253_v25 = vsub.f32 1.0, %v252_v19  ;;  %v263_v19 = vor.u32 1.1754944e-38, %v262_v39 }
 0x1a1   :  { %v1191_v46 = vpop.permute.xlu1 %1190  ;;  %v278_v39 = vor.u32 1.1754944e-38, %v277_v36 }
 0x1a2   :  { %v5507_v6 = vpop.eup %5506  ;;  %v254_v32 = vmul.f32 %v5505_v53, %v253_v25  ;;  %v1199_v26 = vmul.f32 %v1191_v46, %v6516_v35  ;;  %v247_v46 = vand.u32 2147483648, %v121_v57 }
 0x1a3   :  { %1282 = vperm.xlu2 %5428, %v1271_v0   ;;  %1248 = vrot.lane.b32.xlu1 %v5507_v6, %s6039_s6 }
 0x1a4   :  { %v5509_v63 = vpop.eup %5508  ;;  %v255_v48 = vadd.f32 %v5505_v53, %v254_v32 }
 0x1a5   :  { %v5511_v9 = vpop.eup %5510  ;;  %v237_v52 = vmul.f32 %v5509_v63, %v121_v57  ;;  %vm242_vm13 = vweird.f32 %v5509_v63 }
 0x1a6   :  { %v267_v33 = vmul.f32 %v5511_v9, %v125_v43  ;;  %vm272_vm15 = vweird.f32 %v5511_v9  ;;  %vm243_vm0 = vmor %vm241_vm12, %vm242_vm13  ;;  %vm1296_vm13 = vcmask 523264  }
 0x1a7   :  { %v238_v13 = vsub.f32 1.0, %v237_v52  ;;  %v245_v52 = vand.u32 2147483647, %v121_v57  ;;  %vm273_vm2 = vmor %vm271_vm14, %vm272_vm15  ;;  %v5193_v57 = vmul.f32 -1.442695, %v6464_v17 }
 0x1a8   :  { %v268_v0 = vsub.f32 1.0, %v267_v33  ;;  %v5197_v17 = vmul.f32 -1.442695, %v6477_v1  ;;  %v6595_v1 = vld [vmem:[%s8248_s0 + $0x18] sm:$0xff] }
 0x1a9   :  { %v239_v25 = vmul.f32 %v5509_v63, %v238_v13  ;;  %vm246_vm3 = vcmp.eq.f32.partialorder %v245_v52, 8.507059e+37 }
 0x1aa   :  { %v269_v31 = vmul.f32 %v5511_v9, %v268_v0  ;;  %v5191_v0 = vmul.f32 -1.442695, %v6459_v28 }
 0x1ab   :  { %1276 = vperm.xlu1 %5429, %v1269_v62   ;;  %v259_v62 = vsel %vm258_vm10, %v5505_v53, %v255_v48  ;;  %v240_v32 = vadd.f32 %v5509_v63, %v239_v25  ;;  %v248_v53 = vor.u32 1.1754944e-38, %v247_v46 }
 0x1ac   :  { %v264_v35 = vsel %vm261_vm11, %v263_v19, %v259_v62  ;;  %v270_v33 = vadd.f32 %v5511_v9, %v269_v31  ;;  %v5195_v62 = vmul.f32 -1.442695, %v6470_v60 }
 0x1ae   :  { %v274_v48 = vsel %vm273_vm2, %v5511_v9, %v270_v33 }
 0x1b1   :  { %v1231_v42 = vpop.permute.xlu0 %1230 }
 0x1b2   :  { %v6568_v6 = vadd.f32 %v1231_v42, %v1199_v26  ;;  %v275_v26 = vand.u32 2147483647, %v125_v43  ;;  %v244_v42 = vsel %vm243_vm0, %v5509_v63, %v240_v32  ;;  %v6578_v63 = vld [vmem:[%s8248_s0 + $0x10] sm:$0xff] }
 0x1b3   :  { %1279 = vperm.xlu1 %5429, %v1270_v55   ;;  %v249_v14 = vsel %vm246_vm3, %v248_v53, %v244_v42  ;;  %5208 = vmatmul.msk.bf16.vlgmr.msra.gmra.mxu3 %vm857_vm1, %v6578_v63 }
 0x1b4   :  { %5512 = vtanh.f32 %v6568_v6  ;;  %vm276_vm4 = vcmp.eq.f32.partialorder %v275_v26, 8.507059e+37  ;;  %5206 = vmatmul.msk.bf16.vlgmr.msrb.gmra.mxu2 %vm857_vm1, %v6578_v63  ;;  %1917 = vmatpush.bf16.msra.mxu3 %v6239_v44 }
 0x1b5   :  { %v279_v13 = vsel %vm276_vm4, %v278_v39, %v274_v48  ;;  %5514 = vpow2.f32 %v5191_v0  ;;  %1879 = vmatpush.bf16.msrb.mxu2 %v6162_v18 }
 0x1b6   :  { %5516 = vpow2.f32 %v5193_v57 }
 0x1ba   :  { %v5513_v55 = vpop.eup %5512 }
 0x1bb   :  { %1254 = vrot.lane.b32.xlu0 %v5513_v55, %s6039_s6  ;;  %1482 = vperm.xlu1 %5429, %v264_v35   ;;  %v5515_v43 = vpop.eup %5514 }
 0x1bc   :  { %v1049_v31 = vadd.f32 1.0, %v5515_v43  ;;  %v5517_v19 = vpop.eup %5516  ;;  %v1274_v43 = vpop.permute.xlu0 %1273 }
 0x1bd   :  { %v1051_v9 = vadd.f32 1.0, %v5517_v19  ;;  %vm1284_vm11 = vcmp.eq.s32.totalorder %v1274_v43, 1 }
 0x1be   :  { %5518 = vrcp.f32 %v1049_v31  ;;  %v1082_v39 = vand.u32 2147483648, %v1049_v31  ;;  %vm1076_vm6 = vweird.f32 %v1049_v31  ;;  %v1080_v42 = vand.u32 2147483647, %v1049_v31 }
 0x1bf   :  { %5520 = vpow2.f32 %v5195_v62  ;;  %vm1106_vm10 = vweird.f32 %v1051_v9 }
 0x1c0   :  { %5522 = vrcp.f32 %v1051_v9  ;;  %v1083_v0 = vor.u32 1.1754944e-38, %v1082_v39  ;;  %vm1081_vm8 = vcmp.eq.f32.partialorder %v1080_v42, 8.507059e+37  ;;  %v6613_v39 = vsel %vm1284_vm11, %v6544_v40, 0.0 }
 0x1c1   :  { %5524 = vpow2.f32 %v5197_v17  ;;  %v1112_v17 = vand.u32 2147483648, %v1051_v9 }
 0x1c3   :  { %1477 = vperm.xlu0 %5427, %v249_v14   ;;  %1487 = vperm.xlu1 %5429, %v279_v13  }
 0x1c4   :  { %v5519_v28 = vpop.eup %5518  ;;  %5209 = vmatmul.msk.bf16.gmra.mxu3 %vm857_vm1, %v6595_v1  ;;  %5207 = vmatmul.msk.bf16.gmra.mxu2 %vm857_vm1, %v6595_v1 }
 0x1c5   :  { %v1072_v60 = vmul.f32 %v5519_v28, %v1049_v31  ;;  %v5521_v25 = vpop.eup %5520  ;;  %vm1077_vm5 = vweird.f32 %v5519_v28 }
 0x1c6   :  { %v5523_v35 = vpop.eup %5522  ;;  %v6587_v36 = vadd.f32 1.0, %v5521_v25  ;;  %vm1078_vm7 = vmor %vm1076_vm6, %vm1077_vm5 }
 0x1c7   :  { %v1073_v46 = vsub.f32 1.0, %v1072_v60  ;;  %v1102_v32 = vmul.f32 %v5523_v35, %v1051_v9  ;;  %v5525_v52 = vpop.eup %5524  ;;  %vm1107_vm9 = vweird.f32 %v5523_v35 }
 0x1c8   :  { %5526 = vrcp.f32 %v6587_v36  ;;  %v6590_v26 = vadd.f32 1.0, %v5525_v52  ;;  %vm1108_vm12 = vmor %vm1106_vm10, %vm1107_vm9  ;;  %vm1136_vm2 = vweird.f32 %v6587_v36 }
 0x1c9   :  { %v1074_v33 = vmul.f32 %v5519_v28, %v1073_v46  ;;  %v1103_v55 = vsub.f32 1.0, %v1102_v32  ;;  %v1110_v32 = vand.u32 2147483647, %v1051_v9 }
 0x1ca   :  { %5528 = vrcp.f32 %v6590_v26 }
 0x1cb   :  { %v1075_v53 = vadd.f32 %v5519_v28, %v1074_v33  ;;  %v1104_v14 = vmul.f32 %v5523_v35, %v1103_v55  ;;  %v1113_v55 = vor.u32 1.1754944e-38, %v1112_v17  ;;  %vm1111_vm14 = vcmp.eq.f32.partialorder %v1110_v32, 8.507059e+37 }
 0x1cc   :  { %v1142_v17 = vand.u32 2147483648, %v6587_v36 }
 0x1cd   :  { %v1079_v13 = vsel %vm1078_vm7, %v5519_v28, %v1075_v53  ;;  %v1105_v31 = vadd.f32 %v5523_v35, %v1104_v14  ;;  %vm1166_vm7 = vweird.f32 %v6590_v26 }
 0x1ce   :  { %v6597_v48 = vpop.eup %5526  ;;  %v1084_v19 = vsel %vm1081_vm8, %v1083_v0, %v1079_v13 }
 0x1cf   :  { %v1132_v57 = vmul.f32 %v6597_v48, %v6587_v36  ;;  %v1109_v52 = vsel %vm1108_vm12, %v5523_v35, %v1105_v31  ;;  %vm1137_vm0 = vweird.f32 %v6597_v48 }
 0x1d0   :  { %v6606_v46 = vpop.eup %5528  ;;  %v1114_v42 = vsel %vm1111_vm14, %v1113_v55, %v1109_v52  ;;  %vm1138_vm3 = vmor %vm1136_vm2, %vm1137_vm0  ;;  %v1143_v55 = vor.u32 1.1754944e-38, %v1142_v17 }
 0x1d1   :  { %v1133_v28 = vsub.f32 1.0, %v1132_v57  ;;  %v1162_v53 = vmul.f32 %v6606_v46, %v6590_v26  ;;  %vm1167_vm5 = vweird.f32 %v6606_v46 }
 0x1d2   :  { %vm1168_vm8 = vmor %vm1166_vm7, %vm1167_vm5 }
 0x1d3   :  { %v1134_v14 = vmul.f32 %v6597_v48, %v1133_v28  ;;  %v1163_v0 = vsub.f32 1.0, %v1162_v53 }
 0x1d4   :  { %5210 = vmatmul.msk.bf16.vlgmr.msra.gmra.mxu2 %vm857_vm1, %v6578_v63 }
 0x1d5   :  { %v1135_v40 = vadd.f32 %v6597_v48, %v1134_v14  ;;  %2319 = vmatpush.bf16.msra.mxu2 %v6170_v20 }
 0x1d7   :  { %v1139_v52 = vsel %vm1138_vm3, %v6597_v48, %v1135_v40 }
 0x1e4   :  { %5211 = vmatmul.msk.bf16.gmra.mxu2 %vm857_vm1, %v6595_v1  ;;  %v55_v1 = vld [vmem:[%s8249_s1 + $0x38] sm:$0xff] }
 0x1ed   :  { %v1251_v60 = vpop.permute.xlu2 %1250 }
 0x1ee   :  { %v1261_v13 = vmul.f32 %v1251_v60, %v1114_v42 }
 0x215   :  { %v1249_v62 = vpop.permute.xlu1 %1248 }
 0x216   :  { %v1260_v25 = vmul.f32 %v1249_v62, %v1084_v19  ;;  %v1253_v19 = vpop.permute.xlu2 %1252 }
 0x218   :  { %v6608_v33 = vsel %vm1284_vm11, %v1260_v25, 0.0  ;;  %v1164_v25 = vmul.f32 %v6606_v46, %v1163_v0 }
 0x219   :  { %v1297_v9 = vsel %vm1296_vm13, %v6608_v33, %v6613_v39 }
 0x21a   :  { %v1301_v57 = vpack.c.bf16 %v1297_v9, %v1297_v9  ;;  %v1165_v14 = vadd.f32 %v6606_v46, %v1164_v25 }
 0x21c   :  { %v1313_v28 = vunpack.c.l.b16 %v1301_v57  ;;  %v1169_v57 = vsel %vm1168_vm8, %v6606_v46, %v1165_v14 }
 0x21d   :  { %v1277_v35 = vpop.permute.xlu1 %1276 }
 0x21e   :  { %vm1285_vm15 = vcmp.eq.s32.totalorder %v1277_v35, 1  ;;  %v1283_v48 = vpop.permute.xlu2 %1282 }
 0x21f   :  { %v6620_v43 = vsel %vm1285_vm15, %v6530_v61, 0.0  ;;  %v6622_v31 = vsel %vm1285_vm15, %v1261_v13, 0.0  ;;  %v1140_v61 = vand.u32 2147483647, %v6587_v36  ;;  %v1172_v36 = vand.u32 2147483648, %v6590_v26 }
 0x220   :  { %v1298_v62 = vsel %vm1296_vm13, %v6622_v31, %v6620_v43  ;;  %v1170_v13 = vand.u32 2147483647, %v6590_v26  ;;  %vm1287_vm10 = vcmp.eq.s32.totalorder %v1283_v48, 1 }
 0x221   :  { %v1302_v60 = vpack.c.bf16 %v1298_v62, %v1298_v62  ;;  %vm1141_vm4 = vcmp.eq.f32.partialorder %v1140_v61, 8.507059e+37  ;;  %v1173_v40 = vor.u32 1.1754944e-38, %v1172_v36 }
 0x222   :  { %v1144_v63 = vsel %vm1141_vm4, %v1143_v55, %v1139_v52  ;;  %vm1171_vm9 = vcmp.eq.f32.partialorder %v1170_v13, 8.507059e+37  ;;  %v87_v52 = vadd.f32 2.7182817, %v55_v1 }
 0x223   :  { %v1314_v32 = vunpack.c.l.b16 %v1302_v60  ;;  %v1262_v9 = vmul.f32 %v1253_v19, %v1144_v63  ;;  %v1174_v19 = vsel %vm1171_vm9, %v1173_v40, %v1169_v57 }
 0x224   :  { %5530 = vlog2.f32 %v87_v52 }
 0x225   :  { %v1280_v53 = vpop.permute.xlu1 %1279  ;;  %v1317_v42 = vpack.c.b16 %v1314_v32, %v1313_v28 }
 0x226   :  { %vm1286_vm6 = vcmp.eq.s32.totalorder %v1280_v53, 1 }
 0x227   :  { %1345 = vmatmul.bf16.vlgmr.msrb.gmra.mxu0 %v1317_v42  ;;  %1383 = vmatmul.bf16.vlgmr.msra.gmra.mxu1 %v1317_v42  ;;  %v6645_v35 = vsel %vm1286_vm6, %v6539_v34, 0.0  ;;  %v6647_v0 = vsel %vm1286_vm6, %v1262_v9, 0.0  ;;  %v6656_v34 = vsel %vm1287_vm10, %v6568_v6, 0.0 }
 0x228   :  { %1853 = vmatpush.bf16.msrb.mxu0 %v6130_v3  ;;  %1891 = vmatpush.bf16.msra.mxu1 %v6153_v15  ;;  %v1299_v26 = vsel %vm1296_vm13, %v6647_v0, %v6645_v35 }
 0x229   :  { %v1303_v60 = vpack.c.bf16 %v1299_v26, %v1299_v26 }
 0x22a   :  { %v5531_v55 = vpop.eup %5530 }
 0x22b   :  { %v1315_v32 = vunpack.c.l.b16 %v1303_v60  ;;  %v127_v53 = vmul.f32 0.6931472, %v5531_v55 }
 0x22c   :  { %1854 = vmatpush.bf16.msrb.mxu0 %v6142_v10  ;;  %1892 = vmatpush.bf16.msra.mxu1 %v6181_v23 }
 0x22d   :  { %v1255_v62 = vpop.permute.xlu0 %1254  ;;  %5532 = vrcp.f32 %v127_v53  ;;  %vm286_vm11 = vweird.f32 %v127_v53  ;;  %v290_v52 = vand.u32 2147483647, %v127_v53 }
 0x22e   :  { %v1263_v17 = vmul.f32 %v1255_v62, %v1174_v19 }
 0x22f   :  { %vm291_vm15 = vcmp.eq.f32.partialorder %v290_v52, 8.507059e+37 }
 0x230   :  { %v6658_v61 = vsel %vm1287_vm10, %v1263_v17, 0.0  ;;  %1855 = vmatpush.bf16.msrb.mxu0 %v6175_v21  ;;  %1893 = vmatpush.bf16.msra.mxu1 %v6206_v30 }
 0x231   :  { %v1300_v46 = vsel %vm1296_vm13, %v6658_v61, %v6656_v34 }
 0x232   :  { %v1304_v25 = vpack.c.bf16 %v1300_v46, %v1300_v46 }
 0x233   :  { %v5533_v14 = vpop.eup %5532 }
 0x234   :  { %v1316_v28 = vunpack.c.l.b16 %v1304_v25  ;;  %1856 = vmatpush.bf16.msrb.mxu0 %v6197_v27  ;;  %1894 = vmatpush.bf16.msra.mxu1 %v6230_v41  ;;  %v282_v36 = vmul.f32 %v5533_v14, %v127_v53  ;;  %vm287_vm12 = vweird.f32 %v5533_v14 }
 0x235   :  { %vm288_vm14 = vmor %vm286_vm11, %vm287_vm12 }
 0x236   :  { %v1318_v6 = vpack.c.b16 %v1316_v28, %v1315_v32  ;;  %v1403_v63 = vpop.f32.mrf.mxu3  ;;  %v283_v26 = vsub.f32 1.0, %v282_v36 }
 0x238   :  { %1350 = vmatmul.bf16.gmra.mxu0 %v1318_v6  ;;  %1388 = vmatmul.bf16.gmra.mxu1 %v1318_v6  ;;  %v284_v17 = vmul.f32 %v5533_v14, %v283_v26 }
 0x239   :  { %1857 = vmatpush.bf16.msrb.mxu0 %v6221_v38  ;;  %1895 = vmatpush.bf16.msra.mxu1 %v6250_v47 }
 0x23a   :  { %v285_v1 = vadd.f32 %v5533_v14, %v284_v17 }
 0x23c   :  { %v289_v36 = vsel %vm288_vm14, %v5533_v14, %v285_v1 }
 0x23d   :  { %1858 = vmatpush.bf16.msrb.mxu0 %v6244_v45  ;;  %1896 = vmatpush.bf16.msra.mxu1 %v6278_v58 }
 0x23e   :  { %v1405_v60 = vpop.f32.mrf.mxu3 }
 0x241   :  { %1859 = vmatpush.bf16.msrb.mxu0 %v6272_v56  ;;  %1897 = vmatpush.bf16.msra.mxu1 %v6314_v8 }
 0x245   :  { %1860 = vmatpush.bf16.msrb.mxu0 %v6311_v7  ;;  %1898 = vmatpush.bf16.msra.mxu1 %v6336_v24 }
 0x248   :  { %1421 = vmatmul.bf16.vlgmr.msra.gmra.mxu0 %v1317_v42  ;;  %v1365_v42 = vpop.f32.mrf.mxu2 }
 0x249   :  { %2293 = vmatpush.bf16.msra.mxu0 %v6301_v4 }
 0x24d   :  { %2294 = vmatpush.bf16.msra.mxu0 %v6323_v12 }
 0x250   :  { %v6688_v9 = vpop.f32.mrf.mxu2 }
 0x251   :  { %2295 = vmatpush.bf16.msra.mxu0 %v6342_v29 }
 0x255   :  { %2296 = vmatpush.bf16.msra.mxu0 %v6356_v37 }
 0x258   :  { %1426 = vmatmul.bf16.gmra.mxu0 %v1318_v6  ;;  %v1370_v28 = vpop.f32.mrf.mxu2  ;;  %v292_v6 = vand.u32 2147483648, %v127_v53 }
 0x259   :  { %2297 = vmatpush.bf16.msra.mxu0 %v6366_v49 }
 0x25d   :  { %2298 = vmatpush.bf16.msra.mxu0 %v6383_v59 }
 0x261   :  { %2299 = vmatpush.bf16.msra.mxu0 %v6393_v5 }
 0x265   :  { %2300 = vmatpush.bf16.msra.mxu0 %v6404_v16 }
 0x2a4   :  { %v1346_v13 = vpop.f32.mrf.mxu0  ;;  %v1384_v48 = vpop.f32.mrf.mxu1 }
 0x2a5   :  { %v1347_v57 = vadd.f32 %v1346_v13, %v6484_v50  ;;  %v1385_v40 = vadd.f32 %v1384_v48, %v6454_v11  ;;  %v1408_v13 = vpop.f32.mrf.mxu3 }
 0x2a7   :  { %v6692_v19 = vadd.f32 %v1403_v63, %v1385_v40  ;;  %v6694_v62 = vadd.f32 %v1365_v42, %v1347_v57  ;;  %v293_v42 = vor.u32 1.1754944e-38, %v292_v6 }
 0x2a9   :  { %5534 = vtanh.f32 %v6692_v19  ;;  %v294_v40 = vsel %vm291_vm15, %v293_v42, %v289_v36 }
 0x2ac   :  { %v6697_v46 = vpop.f32.mrf.mxu0  ;;  %v1386_v25 = vpop.f32.mrf.mxu1 }
 0x2ad   :  { %v1387_v32 = vadd.f32 %v1386_v25, %v6454_v11  ;;  %v6706_v25 = vpop.f32.mrf.mxu2  ;;  %v1410_v52 = vpop.f32.mrf.mxu3 }
 0x2af   :  { %v5535_v55 = vpop.eup %5534  ;;  %v6700_v63 = vadd.f32 %v1405_v60, %v1387_v32 }
 0x2b0   :  { %1683 = vrot.lane.b32.xlu2 %v5535_v55, %s6039_s6 }
 0x2b1   :  { %5536 = vtanh.f32 %v6700_v63 }
 0x2b5   :  { %v1351_v48 = vpop.f32.mrf.mxu0  ;;  %v1389_v57 = vpop.f32.mrf.mxu1 }
 0x2b6   :  { %v1352_v26 = vadd.f32 %v1351_v48, %v6484_v50  ;;  %v1390_v17 = vadd.f32 %v1389_v57, %v6454_v11  ;;  %v1441_v36 = vpop.f32.mrf.mxu2 }
 0x2b7   :  { %v5537_v53 = vpop.eup %5536 }
 0x2b8   :  { %v6708_v60 = vadd.f32 %v1408_v13, %v1390_v17  ;;  %v1371_v32 = vadd.f32 %v1370_v28, %v1352_v26  ;;  %1685 = vrot.lane.b32.xlu0 %v5537_v53, %s6039_s6  ;;  %1492 = vperm.xlu2 %5428, %v294_v40  }
 0x2ba   :  { %5538 = vtanh.f32 %v6708_v60 }
 0x2bd   :  { %v1353_v14 = vpop.f32.mrf.mxu0  ;;  %v1391_v6 = vpop.f32.mrf.mxu1 }
 0x2be   :  { %v1392_v1 = vadd.f32 %v1391_v6, %v6454_v11  ;;  %v1443_v40 = vpop.f32.mrf.mxu2  ;;  %v1478_v6 = vpop.permute.xlu0 %1477  ;;  %v5216_v11 = vmul.f32 -1.442695, %v1371_v32  ;;  %v1354_v16 = vadd.f32 %v1353_v14, %v6484_v50 }
 0x2c0   :  { %v5539_v55 = vpop.eup %5538  ;;  %v6713_v42 = vadd.f32 %v1410_v52, %v1392_v1 }
 0x2c1   :  { %1687 = vrot.lane.b32.xlu0 %v5539_v55, %s6039_s6 }
 0x2c2   :  { %5540 = vtanh.f32 %v6713_v42 }
 0x2c5   :  { %v1422_v13 = vpop.f32.mrf.mxu0 }
 0x2c6   :  { %v1423_v28 = vadd.f32 %v1422_v13, %v6456_v22  ;;  %v1446_v13 = vpop.f32.mrf.mxu2 }
 0x2c8   :  { %v5541_v48 = vpop.eup %5540  ;;  %v1442_v57 = vadd.f32 %v1441_v36, %v1423_v28 }
 0x2c9   :  { %1689 = vrot.lane.b32.xlu1 %v5541_v48, %s6039_s6  ;;  %v1483_v48 = vpop.permute.xlu1 %1482 }
 0x2ca   :  { %5542 = vtanh.f32 %v1442_v57 }
 0x2cd   :  { %v1424_v26 = vpop.f32.mrf.mxu0 }
 0x2ce   :  { %v1425_v17 = vadd.f32 %v1424_v26, %v6456_v22 }
 0x2d0   :  { %v5543_v53 = vpop.eup %5542  ;;  %v1444_v1 = vadd.f32 %v1443_v40, %v1425_v17  ;;  %v5212_v40 = vmul.f32 -1.442695, %v6694_v62 }
 0x2d1   :  { %1459 = vrot.lane.b32.xlu2 %v5543_v53, %s6039_s6  ;;  %v1495_v52 = vmul.f32 %v5543_v53, %v1478_v6 }
 0x2d2   :  { %5544 = vtanh.f32 %v1444_v1  ;;  %v1349_v1 = vadd.f32 %v6697_v46, %v6484_v50 }
 0x2d3   :  { %1503 = vrot.lane.b32.xlu1 %v1495_v52, %s6039_s6 }
 0x2d5   :  { %v1427_v55 = vpop.f32.mrf.mxu0 }
 0x2d6   :  { %v1428_v36 = vadd.f32 %v1427_v55, %v6456_v22  ;;  %v1368_v55 = vadd.f32 %v6688_v9, %v1349_v1 }
 0x2d8   :  { %v5545_v28 = vpop.eup %5544  ;;  %v1447_v57 = vadd.f32 %v1446_v13, %v1428_v36  ;;  %v5214_v13 = vmul.f32 -1.442695, %v1368_v55  ;;  %v1373_v55 = vadd.f32 %v6706_v25, %v1354_v16 }
 0x2d9   :  { %1461 = vrot.lane.b32.xlu0 %v5545_v28, %s6039_s6  ;;  %v1496_v2 = vmul.f32 %v5545_v28, %v1483_v48 }
 0x2da   :  { %5546 = vtanh.f32 %v1447_v57  ;;  %v5218_v32 = vmul.f32 -1.442695, %v1373_v55 }
 0x2db   :  { %1505 = vrot.lane.b32.xlu2 %v1496_v2, %s6039_s6  ;;  %5548 = vpow2.f32 %v5212_v40  ;;  %v1448_v40 = vpop.f32.mrf.mxu2 }
 0x2dd   :  { %v1429_v62 = vpop.f32.mrf.mxu0 }
 0x2de   :  { %v1430_v48 = vadd.f32 %v1429_v62, %v6456_v22 }
 0x2e0   :  { %v6726_v26 = vpop.eup %5546  ;;  %v1449_v9 = vadd.f32 %v1448_v40, %v1430_v48 }
 0x2e1   :  { %v5549_v17 = vpop.eup %5548 }
 0x2e2   :  { %v1543_v53 = vadd.f32 1.0, %v5549_v17 }
 0x2e3   :  { %1463 = vrot.lane.b32.xlu2 %v6726_v26, %s6039_s6 }
 0x2e4   :  { %5550 = vrcp.f32 %v1543_v53  ;;  %v1562_v57 = vand.u32 2147483648, %v1543_v53  ;;  %vm1556_vm2 = vweird.f32 %v1543_v53  ;;  %v1560_v17 = vand.u32 2147483647, %v1543_v53 }
 0x2e5   :  { %5552 = vpow2.f32 %v5214_v13 }
 0x2e6   :  { %v1563_v1 = vor.u32 1.1754944e-38, %v1562_v57  ;;  %vm1561_vm4 = vcmp.eq.f32.partialorder %v1560_v17, 8.507059e+37  ;;  %5554 = vpow2.f32 %v5216_v11 }
 0x2e7   :  { %5556 = vtanh.f32 %v1449_v9 }
 0x2ea   :  { %v5551_v6 = vpop.eup %5550 }
 0x2eb   :  { %v1552_v52 = vmul.f32 %v5551_v6, %v1543_v53  ;;  %vm1557_vm0 = vweird.f32 %v5551_v6  ;;  %v5553_v46 = vpop.eup %5552 }
 0x2ec   :  { %vm1558_vm3 = vmor %vm1556_vm2, %vm1557_vm0  ;;  %v5555_v14 = vpop.eup %5554 }
 0x2ed   :  { %v1553_v2 = vsub.f32 1.0, %v1552_v52  ;;  %v1545_v52 = vadd.f32 1.0, %v5553_v46  ;;  %v5557_v53 = vpop.eup %5556  ;;  %v1547_v62 = vadd.f32 1.0, %v5555_v14 }
 0x2ef   :  { %v1554_v36 = vmul.f32 %v5551_v6, %v1553_v2  ;;  %5558 = vrcp.f32 %v1545_v52  ;;  %v1592_v9 = vand.u32 2147483648, %v1545_v52  ;;  %vm1586_vm6 = vweird.f32 %v1545_v52 }
 0x2f0   :  { %5560 = vpow2.f32 %v5218_v32  ;;  %vm1616_vm10 = vweird.f32 %v1547_v62 }
 0x2f1   :  { %v1555_v28 = vadd.f32 %v5551_v6, %v1554_v36  ;;  %5562 = vrcp.f32 %v1547_v62  ;;  %v1593_v32 = vor.u32 1.1754944e-38, %v1592_v9  ;;  %v1488_v9 = vpop.permute.xlu1 %1487 }
 0x2f3   :  { %v1559_v5 = vsel %vm1558_vm3, %v5551_v6, %v1555_v28  ;;  %vm1743_vm3 = vcmp.gt.s32.totalorder %v6522_v51, 1 }
 0x2f4   :  { %v6736_v13 = vsel %vm1561_vm4, %v1563_v1, %v1559_v5  ;;  %vm1744_vm4 = vcmp.gt.s32.totalorder %v6555_v54, 1 }
 0x2f5   :  { %v5559_v48 = vpop.eup %5558 }
 0x2f6   :  { %v1582_v5 = vmul.f32 %v5559_v48, %v1545_v52  ;;  %v5561_v16 = vpop.eup %5560  ;;  %vm1587_vm5 = vweird.f32 %v5559_v48 }
 0x2f7   :  { %v1549_v11 = vadd.f32 1.0, %v5561_v16  ;;  %v5563_v57 = vpop.eup %5562  ;;  %vm1588_vm7 = vmor %vm1586_vm6, %vm1587_vm5 }
 0x2f8   :  { %v1583_v25 = vsub.f32 1.0, %v1582_v5  ;;  %v1612_v17 = vmul.f32 %v5563_v57, %v1547_v62  ;;  %vm1617_vm9 = vweird.f32 %v5563_v57 }
 0x2f9   :  { %5564 = vrcp.f32 %v1549_v11  ;;  %vm1618_vm11 = vmor %vm1616_vm10, %vm1617_vm9  ;;  %vm1646_vm15 = vweird.f32 %v1549_v11 }
 0x2fa   :  { %v1584_v40 = vmul.f32 %v5559_v48, %v1583_v25  ;;  %v1613_v1 = vsub.f32 1.0, %v1612_v17  ;;  %v1620_v17 = vand.u32 2147483647, %v1547_v62 }
 0x2fc   :  { %v1585_v46 = vadd.f32 %v5559_v48, %v1584_v40  ;;  %v1614_v14 = vmul.f32 %v5563_v57, %v1613_v1  ;;  %v1622_v40 = vand.u32 2147483648, %v1547_v62  ;;  %vm1621_vm12 = vcmp.eq.f32.partialorder %v1620_v17, 8.507059e+37 }
 0x2fd   :  { %v1650_v62 = vand.u32 2147483647, %v1549_v11 }
 0x2fe   :  { %v1615_v16 = vadd.f32 %v5563_v57, %v1614_v14 }
 0x2ff   :  { %v5565_v55 = vpop.eup %5564  ;;  %vm1651_vm2 = vcmp.eq.f32.partialorder %v1650_v62, 8.507059e+37 }
 0x300   :  { %vm1647_vm14 = vweird.f32 %v5565_v55 }
 0x301   :  { %vm1648_vm0 = vmor %vm1646_vm15, %vm1647_vm14 }
 0x30a   :  { %v1684_v2 = vpop.permute.xlu2 %1683 }
 0x30b   :  { %v1695_v36 = vmul.f32 %v1684_v2, %v6736_v13  ;;  %v1590_v2 = vand.u32 2147483647, %v1545_v52  ;;  %v1619_v52 = vsel %vm1618_vm11, %v5563_v57, %v1615_v16 }
 0x30d   :  { %1703 = vrot.lane.b32.xlu0 %v1695_v36, %s6039_s6  ;;  %v1589_v36 = vsel %vm1588_vm7, %v5559_v48, %v1585_v46  ;;  %vm1591_vm8 = vcmp.eq.f32.partialorder %v1590_v2, 8.507059e+37  ;;  %v1623_v46 = vor.u32 1.1754944e-38, %v1622_v40 }
 0x30f   :  { %v6746_v2 = vsel %vm1621_vm12, %v1623_v46, %v1619_v52  ;;  %v58_v52 = vld [vmem:[%s8249_s1 + $0x50] sm:$0xff] }
 0x312   :  { %v1493_v6 = vpop.permute.xlu2 %1492 }
 0x313   :  { %v1498_v28 = vmul.f32 %v5557_v53, %v1493_v6 }
 0x315   :  { %1465 = vrot.lane.b32.xlu0 %v5557_v53, %s6039_s6  ;;  %1509 = vrot.lane.b32.xlu2 %v1498_v28, %s6039_s6  ;;  %v1642_v53 = vmul.f32 %v5565_v55, %v1549_v11  ;;  %v6742_v28 = vsel %vm1591_vm8, %v1593_v32, %v1589_v36  ;;  %v1497_v36 = vmul.f32 %v6726_v26, %v1488_v9 }
 0x317   :  { %v1643_v25 = vsub.f32 1.0, %v1642_v53  ;;  %v1652_v53 = vand.u32 2147483648, %v1549_v11  ;;  %v57_v11 = vld [vmem:[%s8249_s1 + $0x48] sm:$0xff] }
 0x318   :  { %v89_v17 = vadd.f32 2.7182817, %v57_v11 }
 0x319   :  { %v1644_v48 = vmul.f32 %v5565_v55, %v1643_v25  ;;  %v8310_v25 = vmov 0  }
 0x31a   :  { %v1747_v40 = vsel %vm1743_vm3, 1, %v8310_v25  ;;  %5566 = vlog2.f32 %v89_v17  ;;  %v1748_v11 = vsel %vm1744_vm4, 1, %v8310_v25 }
 0x31b   :  { %v1645_v14 = vadd.f32 %v5565_v55, %v1644_v48 }
 0x31d   :  { %v1649_v57 = vsel %vm1648_vm0, %v5565_v55, %v1645_v14 }
 0x320   :  { %v5567_v51 = vpop.eup %5566 }
 0x32a   :  { %v1686_v6 = vpop.permute.xlu0 %1685 }
 0x32b   :  { %v1696_v5 = vmul.f32 %v1686_v6, %v6742_v28  ;;  %v1653_v6 = vor.u32 1.1754944e-38, %v1652_v53  ;;  %v1460_v55 = vpop.permute.xlu2 %1459 }
 0x32c   :  { %v1471_v9 = vsub.f32 %v6613_v39, %v1460_v55 }
 0x32d   :  { %1705 = vrot.lane.b32.xlu1 %v1696_v5, %s6039_s6  ;;  %v6752_v5 = vsel %vm1651_vm2, %v1653_v6, %v1649_v57 }
 0x333   :  { %v1688_v1 = vpop.permute.xlu0 %1687 }
 0x334   :  { %v1697_v32 = vmul.f32 %v1688_v1, %v6746_v2  ;;  %v90_v1 = vadd.f32 2.7182817, %v58_v52 }
 0x335   :  { %1507 = vrot.lane.b32.xlu1 %v1497_v36, %s6039_s6 }
 0x336   :  { %1707 = vrot.lane.b32.xlu0 %v1697_v32, %s6039_s6  ;;  %v131_v32 = vmul.f32 0.6931472, %v5567_v51  ;;  %5568 = vlog2.f32 %v90_v1 }
 0x338   :  { %5570 = vrcp.f32 %v131_v32  ;;  %vm316_vm6 = vweird.f32 %v131_v32 }
 0x33b   :  { %v1690_v16 = vpop.permute.xlu1 %1689 }
 0x33c   :  { %v1698_v26 = vmul.f32 %v1690_v16, %v6752_v5  ;;  %v5569_v57 = vpop.eup %5568 }
 0x33d   :  { %v133_v6 = vmul.f32 0.6931472, %v5569_v57 }
 0x33e   :  { %1709 = vrot.lane.b32.xlu1 %v1698_v26, %s6039_s6  ;;  %v5571_v16 = vpop.eup %5570 }
 0x33f   :  { %vm317_vm7 = vweird.f32 %v5571_v16  ;;  %vm331_vm10 = vweird.f32 %v133_v6  ;;  %v337_v50 = vand.u32 2147483648, %v133_v6 }
 0x340   :  { %vm318_vm8 = vmor %vm316_vm6, %vm317_vm7 }
 0x345   :  { %v1504_v48 = vpop.permute.xlu1 %1503 }
 0x346   :  { %1752 = vperm.xlu1 %5429, %v1747_v40   ;;  %v1515_v36 = vadd.f32 %v1504_v48, %v1471_v9  ;;  %v312_v40 = vmul.f32 %v5571_v16, %v131_v32  ;;  %v8311_v48 = vld [vmem:[#allocation10_spill] sm:$0xff] }
 0x347   :  { %vm1745_vm5 = vcmp.gt.s32.totalorder %v8311_v48, 1 }
 0x348   :  { %v1675_v14 = vmul.f32 %v6736_v13, %v1515_v36  ;;  %v313_v17 = vsub.f32 1.0, %v312_v40  ;;  %v56_v13 = vld [vmem:[%s8249_s1 + $0x40] sm:$0xff]  ;;  %v1749_v54 = vsel %vm1745_vm5, 1, %v8310_v25  ;;  %v322_v36 = vand.u32 2147483648, %v131_v32 }
 0x349   :  { %v88_v52 = vadd.f32 2.7182817, %v56_v13 }
 0x34a   :  { %v314_v9 = vmul.f32 %v5571_v16, %v313_v17 }
 0x34b   :  { %v1462_v46 = vpop.permute.xlu0 %1461 }
 0x34c   :  { %v1472_v51 = vsub.f32 %v6620_v43, %v1462_v46 }
 0x37f   :  { %v1704_v53 = vpop.permute.xlu0 %1703 }
 0x380   :  { %v6766_v62 = vadd.f32 %v1704_v53, %v1675_v14  ;;  %v315_v14 = vadd.f32 %v5571_v16, %v314_v9  ;;  %v320_v53 = vand.u32 2147483647, %v131_v32  ;;  %v335_v9 = vand.u32 2147483647, %v133_v6 }
 0x382   :  { %5572 = vtanh.f32 %v6766_v62  ;;  %v319_v13 = vsel %vm318_vm8, %v5571_v16, %v315_v14  ;;  %vm321_vm9 = vcmp.eq.f32.partialorder %v320_v53, 8.507059e+37  ;;  %v338_v16 = vor.u32 1.1754944e-38, %v337_v50 }
 0x383   :  { %5574 = vrcp.f32 %v133_v6  ;;  %vm336_vm14 = vcmp.eq.f32.partialorder %v335_v9, 8.507059e+37 }
 0x384   :  { %5576 = vlog2.f32 %v88_v52 }
 0x388   :  { %v5573_v26 = vpop.eup %5572 }
 0x389   :  { %1727 = vrot.lane.b32.xlu2 %v5573_v26, %s6039_s6  ;;  %v5575_v55 = vpop.eup %5574  ;;  %v1506_v26 = vpop.permute.xlu2 %1505 }
 0x38a   :  { %v327_v1 = vmul.f32 %v5575_v55, %v133_v6  ;;  %v1516_v40 = vadd.f32 %v1506_v26, %v1472_v51  ;;  %v5577_v48 = vpop.eup %5576  ;;  %vm332_vm11 = vweird.f32 %v5575_v55 }
 0x38b   :  { %v129_v32 = vmul.f32 0.6931472, %v5577_v48  ;;  %vm333_vm12 = vmor %vm331_vm10, %vm332_vm11 }
 0x38c   :  { %v328_v57 = vsub.f32 1.0, %v327_v1  ;;  %v1676_v46 = vmul.f32 %v6742_v28, %v1516_v40 }
 0x38d   :  { %vm301_vm15 = vweird.f32 %v129_v32 }
 0x38e   :  { %v329_v17 = vmul.f32 %v5575_v55, %v328_v57 }
 0x390   :  { %v330_v52 = vadd.f32 %v5575_v55, %v329_v17 }
 0x391   :  { %1755 = vperm.xlu2 %5428, %v1748_v11   ;;  %v323_v11 = vor.u32 1.1754944e-38, %v322_v36  ;;  %v1464_v51 = vpop.permute.xlu2 %1463 }
 0x392   :  { %v334_v36 = vsel %vm333_vm12, %v5575_v55, %v330_v52  ;;  %v1473_v28 = vsub.f32 %v6645_v35, %v1464_v51 }
 0x393   :  { %v324_v22 = vsel %vm321_vm9, %v323_v11, %v319_v13  ;;  %v339_v14 = vsel %vm336_vm14, %v338_v16, %v334_v36 }
 0x399   :  { %1758 = vperm.xlu2 %5428, %v1749_v54   ;;  %v1466_v54 = vpop.permute.xlu0 %1465 }
 0x39a   :  { %v1474_v53 = vsub.f32 %v6656_v34, %v1466_v54  ;;  %v305_v54 = vand.u32 2147483647, %v129_v32 }
 0x39c   :  { %vm306_vm4 = vcmp.eq.f32.partialorder %v305_v54, 8.507059e+37 }
 0x39f   :  { %v1706_v59 = vpop.permute.xlu1 %1705 }
 0x3a0   :  { %v6779_v1 = vadd.f32 %v1706_v59, %v1676_v46 }
 0x3a1   :  { %1960 = vperm.xlu2 %5428, %v324_v22   ;;  %v1510_v22 = vpop.permute.xlu2 %1509 }
 0x3a2   :  { %5578 = vtanh.f32 %v6779_v1  ;;  %v1518_v50 = vadd.f32 %v1510_v22, %v1474_v53 }
 0x3a3   :  { %5580 = vrcp.f32 %v129_v32 }
 0x3a4   :  { %v1678_v17 = vmul.f32 %v6752_v5, %v1518_v50  ;;  %v307_v5 = vand.u32 2147483648, %v129_v32  ;;  %v5217_v50 = vmul.f32 -1.442695, %v6708_v60 }
 0x3a7   :  { %v1508_v57 = vpop.permute.xlu1 %1507 }
 0x3a8   :  { %v5579_v6 = vpop.eup %5578  ;;  %v1517_v26 = vadd.f32 %v1508_v57, %v1473_v28  ;;  %v1708_v11 = vpop.permute.xlu0 %1707 }
 0x3a9   :  { %v5581_v59 = vpop.eup %5580  ;;  %1965 = vperm.xlu2 %5428, %v339_v14   ;;  %1729 = vrot.lane.b32.xlu0 %v5579_v6, %s6039_s6  ;;  %v308_v14 = vor.u32 1.1754944e-38, %v307_v5  ;;  %v5213_v6 = vmul.f32 -1.442695, %v6692_v19  ;;  %v5219_v19 = vmul.f32 -1.442695, %v6713_v42 }
 0x3aa   :  { %v1677_v40 = vmul.f32 %v6746_v2, %v1517_v26  ;;  %v297_v13 = vmul.f32 %v5581_v59, %v129_v32  ;;  %vm302_vm0 = vweird.f32 %v5581_v59  ;;  %v6797_v2 = vld [vmem:[%s8251_s2 + $0x18] sm:$0xff]  ;;  %v5215_v26 = vmul.f32 -1.442695, %v6700_v63 }
 0x3ab   :  { %vm1746_vm2 = vcmp.gt.s32.totalorder %v6797_v2, 1  ;;  %vm303_vm3 = vmor %vm301_vm15, %vm302_vm0 }
 0x3ac   :  { %v6786_v55 = vadd.f32 %v1708_v11, %v1677_v40  ;;  %v298_v46 = vsub.f32 1.0, %v297_v13  ;;  %v1750_v28 = vsel %vm1746_vm2, 1, %v8310_v25 }
 0x3ae   :  { %5582 = vtanh.f32 %v6786_v55  ;;  %v299_v51 = vmul.f32 %v5581_v59, %v298_v46 }
 0x3b0   :  { %v1710_v48 = vpop.permute.xlu1 %1709  ;;  %v300_v16 = vadd.f32 %v5581_v59, %v299_v51 }
 0x3b1   :  { %v6790_v52 = vadd.f32 %v1710_v48, %v1678_v17  ;;  %v6808_v17 = vld [vmem:[%s8248_s0 + $0x20] sm:$0xff] }
 0x3b2   :  { %v304_v53 = vsel %vm303_vm3, %v5581_v59, %v300_v16  ;;  %5230 = vmatmul.msk.bf16.vlgmr.msrb.gmra.mxu2 %vm857_vm1, %v6808_v17  ;;  %5228 = vmatmul.msk.bf16.vlgmr.msrb.gmra.mxu3 %vm857_vm1, %v6808_v17 }
 0x3b3   :  { %5584 = vtanh.f32 %v6790_v52  ;;  %v309_v57 = vsel %vm306_vm4, %v308_v14, %v304_v53  ;;  %2357 = vmatpush.bf16.msrb.mxu3 %v6162_v18  ;;  %2395 = vmatpush.bf16.msrb.mxu2 %v6239_v44  ;;  %v6825_v53 = vld [vmem:[%s8248_s0 + $0x28] sm:$0xff] }
 0x3b4   :  { %v5583_v9 = vpop.eup %5582  ;;  %5586 = vpow2.f32 %v5213_v6 }
 0x3b5   :  { %1731 = vrot.lane.b32.xlu0 %v5583_v9, %s6039_s6  ;;  %5588 = vpow2.f32 %v5215_v26 }
 0x3b9   :  { %v5585_v36 = vpop.eup %5584 }
 0x3ba   :  { %1733 = vrot.lane.b32.xlu1 %v5585_v36, %s6039_s6  ;;  %v5587_v22 = vpop.eup %5586 }
 0x3bb   :  { %v1544_v32 = vadd.f32 1.0, %v5587_v22  ;;  %v5589_v40 = vpop.eup %5588 }
 0x3bc   :  { %v1546_v11 = vadd.f32 1.0, %v5589_v40  ;;  %v1753_v40 = vpop.permute.xlu1 %1752 }
 0x3bd   :  { %1761 = vperm.xlu0 %5427, %v1750_v28   ;;  %5590 = vrcp.f32 %v1544_v32  ;;  %v1577_v54 = vand.u32 2147483648, %v1544_v32  ;;  %vm1571_vm6 = vweird.f32 %v1544_v32  ;;  %v1575_v28 = vand.u32 2147483647, %v1544_v32 }
 0x3be   :  { %5592 = vpow2.f32 %v5217_v50  ;;  %vm1601_vm10 = vweird.f32 %v1546_v11  ;;  %vm1763_vm11 = vcmp.eq.s32.totalorder %v1753_v40, 1 }
 0x3bf   :  { %5594 = vrcp.f32 %v1546_v11  ;;  %v1578_v22 = vor.u32 1.1754944e-38, %v1577_v54  ;;  %vm1576_vm8 = vcmp.eq.f32.partialorder %v1575_v28, 8.507059e+37  ;;  %v6838_v54 = vsel %vm1763_vm11, %v6766_v62, %v6613_v39 }
 0x3c0   :  { %5596 = vpow2.f32 %v5219_v19 }
 0x3c2   :  { %1955 = vperm.xlu1 %5429, %v309_v57   ;;  %5231 = vmatmul.msk.bf16.gmra.mxu2 %vm857_vm1, %v6825_v53 }
 0x3c3   :  { %v5591_v13 = vpop.eup %5590  ;;  %5229 = vmatmul.msk.bf16.gmra.mxu3 %vm857_vm1, %v6825_v53 }
 0x3c4   :  { %v1567_v59 = vmul.f32 %v5591_v13, %v1544_v32  ;;  %v5593_v63 = vpop.eup %5592  ;;  %vm1572_vm5 = vweird.f32 %v5591_v13 }
 0x3c5   :  { %v5595_v48 = vpop.eup %5594  ;;  %v6817_v46 = vadd.f32 1.0, %v5593_v63  ;;  %vm1573_vm7 = vmor %vm1571_vm6, %vm1572_vm5  ;;  %v1605_v63 = vand.u32 2147483647, %v1546_v11 }
 0x3c6   :  { %v1568_v60 = vsub.f32 1.0, %v1567_v59  ;;  %v1597_v51 = vmul.f32 %v5595_v48, %v1546_v11  ;;  %v5597_v5 = vpop.eup %5596  ;;  %vm1602_vm9 = vweird.f32 %v5595_v48 }
 0x3c7   :  { %5598 = vrcp.f32 %v6817_v46  ;;  %v6820_v36 = vadd.f32 1.0, %v5597_v5  ;;  %vm1603_vm12 = vmor %vm1601_vm10, %vm1602_vm9  ;;  %vm1606_vm14 = vcmp.eq.f32.partialorder %v1605_v63, 8.507059e+37  ;;  %vm1631_vm2 = vweird.f32 %v6817_v46 }
 0x3c8   :  { %v1569_v9 = vmul.f32 %v5591_v13, %v1568_v60  ;;  %v1598_v16 = vsub.f32 1.0, %v1597_v51 }
 0x3c9   :  { %5600 = vrcp.f32 %v6820_v36  ;;  %vm1661_vm6 = vweird.f32 %v6820_v36 }
 0x3ca   :  { %v1570_v42 = vadd.f32 %v5591_v13, %v1569_v9  ;;  %v1599_v6 = vmul.f32 %v5595_v48, %v1598_v16 }
 0x3cc   :  { %v1574_v57 = vsel %vm1573_vm7, %v5591_v13, %v1570_v42  ;;  %v1600_v59 = vadd.f32 %v5595_v48, %v1599_v6  ;;  %v1607_v13 = vand.u32 2147483648, %v1546_v11 }
 0x3cd   :  { %v5599_v26 = vpop.eup %5598  ;;  %v1579_v32 = vsel %vm1576_vm8, %v1578_v22, %v1574_v57 }
 0x3ce   :  { %v1627_v19 = vmul.f32 %v5599_v26, %v6817_v46  ;;  %v1604_v5 = vsel %vm1603_vm12, %v5595_v48, %v1600_v59  ;;  %v1608_v16 = vor.u32 1.1754944e-38, %v1607_v13  ;;  %vm1632_vm0 = vweird.f32 %v5599_v26 }
 0x3cf   :  { %v5601_v60 = vpop.eup %5600  ;;  %v1637_v59 = vand.u32 2147483648, %v6817_v46  ;;  %vm1633_vm3 = vmor %vm1631_vm2, %vm1632_vm0 }
 0x3d0   :  { %v1628_v42 = vsub.f32 1.0, %v1627_v19  ;;  %v1609_v11 = vsel %vm1606_vm14, %v1608_v16, %v1604_v5  ;;  %v1657_v57 = vmul.f32 %v5601_v60, %v6820_v36  ;;  %vm1662_vm5 = vweird.f32 %v5601_v60 }
 0x3d1   :  { %vm1663_vm8 = vmor %vm1661_vm6, %vm1662_vm5 }
 0x3d2   :  { %v1629_v6 = vmul.f32 %v5599_v26, %v1628_v42 }
 0x3d3   :  { %5232 = vmatmul.msk.bf16.vlgmr.msra.gmra.mxu3 %vm857_vm1, %v6808_v17 }
 0x3d4   :  { %2797 = vmatpush.bf16.msra.mxu3 %v6170_v20 }
 0x3e3   :  { %v1728_v14 = vpop.permute.xlu2 %1727  ;;  %5233 = vmatmul.msk.bf16.gmra.mxu3 %vm857_vm1, %v6825_v53  ;;  %v8314_v53 = vld [vmem:[#allocation6_spill] sm:$0xff] }
 0x3e4   :  { %v1739_v50 = vmul.f32 %v1728_v14, %v1579_v32  ;;  %v1658_v32 = vsub.f32 1.0, %v1657_v57 }
 0x3e6   :  { %v6834_v9 = vsel %vm1763_vm11, %v1739_v50, %v6608_v33  ;;  %v1630_v50 = vadd.f32 %v5599_v26, %v1629_v6 }
 0x3e7   :  { %v1775_v28 = vsel %vm1296_vm13, %v6834_v9, %v6838_v54 }
 0x3e8   :  { %v1779_v22 = vpack.c.bf16 %v1775_v28, %v1775_v28  ;;  %v1634_v63 = vsel %vm1633_vm3, %v5599_v26, %v1630_v50  ;;  %v1665_v26 = vand.u32 2147483647, %v6820_v36 }
 0x3ea   :  { %v1791_v19 = vunpack.c.l.b16 %v1779_v22  ;;  %vm1666_vm9 = vcmp.eq.f32.partialorder %v1665_v26, 8.507059e+37 }
 0x3eb   :  { %v1756_v51 = vpop.permute.xlu2 %1755 }
 0x3ec   :  { %vm1764_vm15 = vcmp.eq.s32.totalorder %v1756_v51, 1  ;;  %v1638_v51 = vor.u32 1.1754944e-38, %v1637_v59 }
 0x3ed   :  { %v6846_v48 = vsel %vm1764_vm15, %v6779_v1, %v6620_v43  ;;  %v1635_v43 = vand.u32 2147483647, %v6817_v46  ;;  %v1667_v46 = vand.u32 2147483648, %v6820_v36 }
 0x3ef   :  { %vm1636_vm4 = vcmp.eq.f32.partialorder %v1635_v43, 8.507059e+37  ;;  %v1668_v57 = vor.u32 1.1754944e-38, %v1667_v46  ;;  %v8316_v46 = vld [vmem:[#allocation7_spill] sm:$0xff] }
 0x3f0   :  { %v1639_v42 = vsel %vm1636_vm4, %v1638_v51, %v1634_v63 }
 0x3f3   :  { %v1759_v5 = vpop.permute.xlu2 %1758 }
 0x3f4   :  { %vm1765_vm7 = vcmp.eq.s32.totalorder %v1759_v5, 1 }
 0x3f5   :  { %v6872_v6 = vsel %vm1765_vm7, %v6786_v55, %v6645_v35 }
 0x41b   :  { %v1730_v14 = vpop.permute.xlu0 %1729 }
 0x41c   :  { %v1740_v33 = vmul.f32 %v1730_v14, %v1609_v11 }
 0x41e   :  { %v6849_v39 = vsel %vm1764_vm15, %v1740_v33, %v6622_v31  ;;  %v1659_v31 = vmul.f32 %v5601_v60, %v1658_v32 }
 0x41f   :  { %v1776_v62 = vsel %vm1296_vm13, %v6849_v39, %v6846_v48 }
 0x420   :  { %v1780_v40 = vpack.c.bf16 %v1776_v62, %v1776_v62  ;;  %v1660_v28 = vadd.f32 %v5601_v60, %v1659_v31 }
 0x422   :  { %v1792_v13 = vunpack.c.l.b16 %v1780_v40  ;;  %v1664_v14 = vsel %vm1663_vm8, %v5601_v60, %v1660_v28  ;;  %v8315_v28 = vld [vmem:[#allocation9_spill] sm:$0xff] }
 0x423   :  { %v1669_v22 = vsel %vm1666_vm9, %v1668_v57, %v1664_v14 }
 0x424   :  { %v1795_v1 = vpack.c.b16 %v1792_v13, %v1791_v19  ;;  %v59_v19 = vld [vmem:[%s8249_s1 + $0x58] sm:$0xff] }
 0x425   :  { %v91_v13 = vadd.f32 2.7182817, %v59_v19 }
 0x426   :  { %1823 = vmatmul.bf16.vlgmr.msrb.gmra.mxu1 %v1795_v1  ;;  %1861 = vmatmul.bf16.vlgmr.msrb.gmra.mxu0 %v1795_v1 }
 0x427   :  { %v1732_v16 = vpop.permute.xlu0 %1731  ;;  %2331 = vmatpush.bf16.msrb.mxu1 %v6130_v3  ;;  %2369 = vmatpush.bf16.msrb.mxu0 %v6153_v15  ;;  %5602 = vlog2.f32 %v91_v13 }
 0x428   :  { %v1741_v17 = vmul.f32 %v1732_v16, %v1639_v42 }
 0x42a   :  { %v6866_v11 = vsel %vm1765_vm7, %v1741_v17, %v6647_v0 }
 0x42b   :  { %2332 = vmatpush.bf16.msrb.mxu1 %v6142_v10  ;;  %2370 = vmatpush.bf16.msrb.mxu0 %v6181_v23  ;;  %v1777_v36 = vsel %vm1296_vm13, %v6866_v11, %v6872_v6 }
 0x42c   :  { %v1734_v33 = vpop.permute.xlu1 %1733  ;;  %v1781_v55 = vpack.c.bf16 %v1777_v36, %v1777_v36 }
 0x42d   :  { %v1742_v62 = vmul.f32 %v1734_v33, %v1669_v22  ;;  %v5603_v43 = vpop.eup %5602 }
 0x42e   :  { %v1793_v50 = vunpack.c.l.b16 %v1781_v55  ;;  %v135_v31 = vmul.f32 0.6931472, %v5603_v43 }
 0x42f   :  { %v1762_v0 = vpop.permute.xlu0 %1761  ;;  %2333 = vmatpush.bf16.msrb.mxu1 %v6175_v21  ;;  %2371 = vmatpush.bf16.msrb.mxu0 %v6206_v30 }
 0x430   :  { %vm1766_vm10 = vcmp.eq.s32.totalorder %v1762_v0, 1  ;;  %5604 = vrcp.f32 %v135_v31  ;;  %vm346_vm11 = vweird.f32 %v135_v31 }
 0x431   :  { %v6881_v60 = vsel %vm1766_vm10, %v6790_v52, %v6656_v34  ;;  %v6884_v35 = vsel %vm1766_vm10, %v1742_v62, %v6658_v61  ;;  %v8312_v61 = vld [vmem:[#allocation4_spill] sm:$0xff]  ;;  %v8313_v52 = vld [vmem:[#allocation5_spill] sm:$0xff] }
 0x432   :  { %v1778_v32 = vsel %vm1296_vm13, %v6884_v35, %v6881_v60 }
 0x433   :  { %v1782_v40 = vpack.c.bf16 %v1778_v32, %v1778_v32  ;;  %2334 = vmatpush.bf16.msrb.mxu1 %v6197_v27  ;;  %2372 = vmatpush.bf16.msrb.mxu0 %v6230_v41  ;;  %v352_v32 = vand.u32 2147483648, %v135_v31 }
 0x435   :  { %v1794_v59 = vunpack.c.l.b16 %v1782_v40  ;;  %v1881_v51 = vpop.f32.mrf.mxu2  ;;  %v353_v43 = vor.u32 1.1754944e-38, %v352_v32 }
 0x436   :  { %v5605_v63 = vpop.eup %5604 }
 0x437   :  { %v1796_v34 = vpack.c.b16 %v1794_v59, %v1793_v50  ;;  %2335 = vmatpush.bf16.msrb.mxu1 %v6221_v38  ;;  %2373 = vmatpush.bf16.msrb.mxu0 %v6250_v47  ;;  %v342_v5 = vmul.f32 %v5605_v63, %v135_v31  ;;  %vm347_vm12 = vweird.f32 %v5605_v63  ;;  %v350_v50 = vand.u32 2147483647, %v135_v31 }
 0x438   :  { %vm348_vm14 = vmor %vm346_vm11, %vm347_vm12 }
 0x439   :  { %1828 = vmatmul.bf16.gmra.mxu1 %v1796_v34  ;;  %1866 = vmatmul.bf16.gmra.mxu0 %v1796_v34  ;;  %v343_v14 = vsub.f32 1.0, %v342_v5  ;;  %vm351_vm15 = vcmp.eq.f32.partialorder %v350_v50, 8.507059e+37 }
 0x43b   :  { %2336 = vmatpush.bf16.msrb.mxu1 %v6244_v45  ;;  %2374 = vmatpush.bf16.msrb.mxu0 %v6278_v58  ;;  %v344_v36 = vmul.f32 %v5605_v63, %v343_v14 }
 0x43d   :  { %v1883_v62 = vpop.f32.mrf.mxu2  ;;  %v345_v40 = vadd.f32 %v5605_v63, %v344_v36 }
 0x43f   :  { %2337 = vmatpush.bf16.msrb.mxu1 %v6272_v56  ;;  %2375 = vmatpush.bf16.msrb.mxu0 %v6314_v8 }
 0x443   :  { %2338 = vmatpush.bf16.msrb.mxu1 %v6311_v7  ;;  %2376 = vmatpush.bf16.msrb.mxu0 %v6336_v24 }
 0x445   :  { %v1886_v5 = vpop.f32.mrf.mxu2 }
 0x449   :  { %1899 = vmatmul.bf16.vlgmr.msra.gmra.mxu1 %v1795_v1  ;;  %v1843_v1 = vpop.f32.mrf.mxu3 }
 0x44a   :  { %2771 = vmatpush.bf16.msra.mxu1 %v6301_v4 }
 0x44d   :  { %v1888_v32 = vpop.f32.mrf.mxu2 }
 0x44e   :  { %2772 = vmatpush.bf16.msra.mxu1 %v6323_v12 }
 0x451   :  { %v6918_v22 = vpop.f32.mrf.mxu3 }
 0x452   :  { %2773 = vmatpush.bf16.msra.mxu1 %v6342_v29 }
 0x456   :  { %2774 = vmatpush.bf16.msra.mxu1 %v6356_v37 }
 0x459   :  { %1904 = vmatmul.bf16.gmra.mxu1 %v1796_v34  ;;  %v1848_v13 = vpop.f32.mrf.mxu3 }
 0x45a   :  { %2775 = vmatpush.bf16.msra.mxu1 %v6366_v49 }
 0x45e   :  { %2776 = vmatpush.bf16.msra.mxu1 %v8312_v61 }
 0x461   :  { %v1850_v14 = vpop.f32.mrf.mxu3 }
 0x462   :  { %2777 = vmatpush.bf16.msra.mxu1 %v8313_v52 }
 0x466   :  { %2778 = vmatpush.bf16.msra.mxu1 %v8314_v53 }
 0x4a3   :  { %v1824_v42 = vpop.f32.mrf.mxu1  ;;  %v1862_v16 = vpop.f32.mrf.mxu0 }
 0x4a4   :  { %v1825_v17 = vadd.f32 %v1824_v42, %v8315_v28  ;;  %v1863_v26 = vadd.f32 %v1862_v16, %v8316_v46 }
 0x4a6   :  { %v6914_v57 = vadd.f32 %v1881_v51, %v1863_v26  ;;  %v6916_v33 = vadd.f32 %v1843_v1, %v1825_v17  ;;  %v349_v1 = vsel %vm348_vm14, %v5605_v63, %v345_v40 }
 0x4a7   :  { %v354_v51 = vsel %vm351_vm15, %v353_v43, %v349_v1  ;;  %v8317_v1 = vld [vmem:[#allocation8_spill] sm:$0xff] }
 0x4a8   :  { %5606 = vtanh.f32 %v6914_v57 }
 0x4ab   :  { %v1864_v0 = vpop.f32.mrf.mxu0  ;;  %v1826_v34 = vpop.f32.mrf.mxu1 }
 0x4ac   :  { %v1865_v55 = vadd.f32 %v1864_v0, %v8316_v46 }
 0x4ae   :  { %v5607_v59 = vpop.eup %5606  ;;  %v6922_v19 = vadd.f32 %v1883_v62, %v1865_v55 }
 0x4af   :  { %2161 = vrot.lane.b32.xlu0 %v5607_v59, %s6039_s6  ;;  %v1919_v59 = vpop.f32.mrf.mxu3 }
 0x4b0   :  { %5608 = vtanh.f32 %v6922_v19 }
 0x4b6   :  { %v5609_v42 = vpop.eup %5608  ;;  %v1829_v16 = vpop.f32.mrf.mxu1 }
 0x4b7   :  { %v1867_v17 = vpop.f32.mrf.mxu0  ;;  %v1830_v31 = vadd.f32 %v1829_v16, %v8315_v28  ;;  %2163 = vrot.lane.b32.xlu1 %v5609_v42, %s6039_s6  ;;  %1970 = vperm.xlu0 %5427, %v354_v51   ;;  %v1921_v42 = vpop.f32.mrf.mxu3 }
 0x4b8   :  { %v1868_v26 = vadd.f32 %v1867_v17, %v8316_v46 }
 0x4b9   :  { %v1849_v62 = vadd.f32 %v1848_v13, %v1830_v31 }
 0x4ba   :  { %v6929_v36 = vadd.f32 %v1886_v5, %v1868_v26  ;;  %v1956_v26 = vpop.permute.xlu1 %1955 }
 0x4bc   :  { %5610 = vtanh.f32 %v6929_v36 }
 0x4be   :  { %v1831_v63 = vpop.f32.mrf.mxu1 }
 0x4bf   :  { %v1869_v0 = vpop.f32.mrf.mxu0 }
 0x4c0   :  { %v1870_v55 = vadd.f32 %v1869_v0, %v8316_v46 }
 0x4c2   :  { %v6933_v40 = vadd.f32 %v1888_v32, %v1870_v55  ;;  %v5611_v50 = vpop.eup %5610 }
 0x4c3   :  { %2165 = vrot.lane.b32.xlu1 %v5611_v50, %s6039_s6  ;;  %v1924_v50 = vpop.f32.mrf.mxu3 }
 0x4c4   :  { %5612 = vtanh.f32 %v6933_v40 }
 0x4c6   :  { %v1900_v43 = vpop.f32.mrf.mxu1 }
 0x4c7   :  { %v1901_v51 = vadd.f32 %v1900_v43, %v8317_v1 }
 0x4c9   :  { %v1920_v13 = vadd.f32 %v1919_v59, %v1901_v51  ;;  %v1961_v51 = vpop.permute.xlu2 %1960 }
 0x4ca   :  { %v5613_v5 = vpop.eup %5612 }
 0x4cb   :  { %2167 = vrot.lane.b32.xlu2 %v5613_v5, %s6039_s6  ;;  %5614 = vtanh.f32 %v1920_v13 }
 0x4ce   :  { %v1902_v16 = vpop.f32.mrf.mxu1 }
 0x4cf   :  { %v1903_v17 = vadd.f32 %v1902_v16, %v8317_v1  ;;  %v5234_v16 = vmul.f32 -1.442695, %v6916_v33 }
 0x4d1   :  { %v5615_v31 = vpop.eup %5614  ;;  %v1922_v0 = vadd.f32 %v1921_v42, %v1903_v17  ;;  %v1827_v17 = vadd.f32 %v1826_v34, %v8315_v28 }
 0x4d2   :  { %1937 = vrot.lane.b32.xlu0 %v5615_v31, %s6039_s6  ;;  %v1973_v55 = vmul.f32 %v5615_v31, %v1956_v26 }
 0x4d3   :  { %5616 = vtanh.f32 %v1922_v0  ;;  %v1846_v31 = vadd.f32 %v6918_v22, %v1827_v17 }
 0x4d4   :  { %1981 = vrot.lane.b32.xlu2 %v1973_v55, %s6039_s6 }
 0x4d5   :  { %v5236_v26 = vmul.f32 -1.442695, %v1846_v31 }
 0x4d6   :  { %v1905_v32 = vpop.f32.mrf.mxu1 }
 0x4d7   :  { %v1906_v59 = vadd.f32 %v1905_v32, %v8317_v1  ;;  %v1832_v32 = vadd.f32 %v1831_v63, %v8315_v28 }
 0x4d9   :  { %v5617_v43 = vpop.eup %5616  ;;  %v1925_v5 = vadd.f32 %v1924_v50, %v1906_v59  ;;  %v5238_v59 = vmul.f32 -1.442695, %v1849_v62 }
 0x4da   :  { %1939 = vrot.lane.b32.xlu1 %v5617_v43, %s6039_s6  ;;  %v1974_v13 = vmul.f32 %v5617_v43, %v1961_v51  ;;  %v1851_v51 = vadd.f32 %v1850_v14, %v1832_v32 }
 0x4db   :  { %5618 = vtanh.f32 %v1925_v5 }
 0x4dc   :  { %1983 = vrot.lane.b32.xlu0 %v1974_v13, %s6039_s6  ;;  %5620 = vpow2.f32 %v5234_v16  ;;  %v5240_v33 = vmul.f32 -1.442695, %v1851_v51 }
 0x4dd   :  { %5622 = vpow2.f32 %v5236_v26 }
 0x4de   :  { %v1907_v46 = vpop.f32.mrf.mxu1 }
 0x4df   :  { %v1908_v32 = vadd.f32 %v1907_v46, %v8317_v1 }
 0x4e1   :  { %v6945_v42 = vpop.eup %5618 }
 0x4e2   :  { %v5621_v0 = vpop.eup %5620 }
 0x4e3   :  { %v2021_v55 = vadd.f32 1.0, %v5621_v0  ;;  %v5623_v50 = vpop.eup %5622 }
 0x4e4   :  { %1941 = vrot.lane.b32.xlu0 %v6945_v42, %s6039_s6  ;;  %v2023_v43 = vadd.f32 1.0, %v5623_v50 }
 0x4e5   :  { %5624 = vrcp.f32 %v2021_v55  ;;  %v2040_v50 = vand.u32 2147483648, %v2021_v55  ;;  %vm2034_vm2 = vweird.f32 %v2021_v55  ;;  %v2038_v51 = vand.u32 2147483647, %v2021_v55 }
 0x4e6   :  { %5626 = vpow2.f32 %v5238_v59  ;;  %v1926_v59 = vpop.f32.mrf.mxu3  ;;  %vm2064_vm6 = vweird.f32 %v2023_v43 }
 0x4e7   :  { %5628 = vrcp.f32 %v2023_v43  ;;  %v2041_v28 = vor.u32 1.1754944e-38, %v2040_v50  ;;  %vm2039_vm4 = vcmp.eq.f32.partialorder %v2038_v51, 8.507059e+37 }
 0x4e8   :  { %5630 = vpow2.f32 %v5240_v33 }
 0x4eb   :  { %v5625_v5 = vpop.eup %5624 }
 0x4ec   :  { %v2030_v13 = vmul.f32 %v5625_v5, %v2021_v55  ;;  %v5627_v34 = vpop.eup %5626  ;;  %vm2035_vm0 = vweird.f32 %v5625_v5  ;;  %v2070_v55 = vand.u32 2147483648, %v2023_v43 }
 0x4ed   :  { %v5629_v22 = vpop.eup %5628  ;;  %v6953_v17 = vadd.f32 1.0, %v5627_v34  ;;  %vm2036_vm3 = vmor %vm2034_vm2, %vm2035_vm0 }
 0x4ee   :  { %v2031_v16 = vsub.f32 1.0, %v2030_v13  ;;  %v2060_v26 = vmul.f32 %v5629_v22, %v2023_v43  ;;  %v5631_v0 = vpop.eup %5630  ;;  %vm2065_vm5 = vweird.f32 %v5629_v22 }
 0x4ef   :  { %5632 = vrcp.f32 %v6953_v17  ;;  %v6956_v62 = vadd.f32 1.0, %v5631_v0  ;;  %vm2066_vm7 = vmor %vm2064_vm6, %vm2065_vm5  ;;  %vm2094_vm10 = vweird.f32 %v6953_v17 }
 0x4f0   :  { %v2032_v31 = vmul.f32 %v5625_v5, %v2031_v16  ;;  %v2061_v63 = vsub.f32 1.0, %v2060_v26  ;;  %v1927_v16 = vadd.f32 %v1926_v59, %v1908_v32 }
 0x4f1   :  { %5634 = vrcp.f32 %v6956_v62  ;;  %vm2124_vm15 = vweird.f32 %v6956_v62 }
 0x4f2   :  { %v2033_v14 = vadd.f32 %v5625_v5, %v2032_v31  ;;  %v2062_v13 = vmul.f32 %v5629_v22, %v2061_v63  ;;  %5636 = vtanh.f32 %v1927_v16 }
 0x4f4   :  { %v2037_v33 = vsel %vm2036_vm3, %v5625_v5, %v2033_v14  ;;  %v2063_v26 = vadd.f32 %v5629_v22, %v2062_v13  ;;  %v2068_v5 = vand.u32 2147483647, %v2023_v43 }
 0x4f5   :  { %v5633_v34 = vpop.eup %5632  ;;  %v6960_v53 = vsel %vm2039_vm4, %v2041_v28, %v2037_v33  ;;  %v2071_v28 = vor.u32 1.1754944e-38, %v2070_v55 }
 0x4f6   :  { %v2090_v46 = vmul.f32 %v5633_v34, %v6953_v17  ;;  %v2067_v14 = vsel %vm2066_vm7, %v5629_v22, %v2063_v26  ;;  %vm2069_vm8 = vcmp.eq.f32.partialorder %v2068_v5, 8.507059e+37  ;;  %vm2095_vm9 = vweird.f32 %v5633_v34  ;;  %v1966_v26 = vpop.permute.xlu2 %1965 }
 0x4f7   :  { %v5635_v1 = vpop.eup %5634  ;;  %v2072_v51 = vsel %vm2069_vm8, %v2071_v28, %v2067_v14  ;;  %vm2096_vm11 = vmor %vm2094_vm10, %vm2095_vm9  ;;  %v1975_v14 = vmul.f32 %v6945_v42, %v1966_v26 }
 0x4f8   :  { %v2091_v63 = vsub.f32 1.0, %v2090_v46  ;;  %v2120_v32 = vmul.f32 %v5635_v1, %v6956_v62  ;;  %v5637_v50 = vpop.eup %5636  ;;  %v2098_v46 = vand.u32 2147483647, %v6953_v17  ;;  %vm2125_vm12 = vweird.f32 %v5635_v1 }
 0x4f9   :  { %vm2126_vm0 = vmor %vm2124_vm15, %vm2125_vm12 }
 0x4fa   :  { %v2092_v16 = vmul.f32 %v5633_v34, %v2091_v63  ;;  %v2121_v52 = vsub.f32 1.0, %v2120_v32  ;;  %v2130_v32 = vand.u32 2147483648, %v6956_v62  ;;  %vm2099_vm14 = vcmp.eq.f32.partialorder %v2098_v46, 8.507059e+37  ;;  %v60_v46 = vld [vmem:[%s8249_s1 + $0x60] sm:$0xff] }
 0x4fc   :  { %v2093_v43 = vadd.f32 %v5633_v34, %v2092_v16  ;;  %v2122_v22 = vmul.f32 %v5635_v1, %v2121_v52  ;;  %v2128_v52 = vand.u32 2147483647, %v6956_v62  ;;  %v6985_v62 = vld [vmem:[%s8251_s2] sm:$0xff] }
 0x4fd   :  { %8318 = vst [vmem:[#allocation10_spill] sm:$0xff] %v6985_v62  ;;  %vm2221_vm3 = vcmp.gt.s32.totalorder %v6985_v62, 2 }
 0x4fe   :  { %v2097_v55 = vsel %vm2096_vm11, %v5633_v34, %v2093_v43  ;;  %v2123_v5 = vadd.f32 %v5635_v1, %v2122_v22  ;;  %vm2129_vm2 = vcmp.eq.f32.partialorder %v2128_v52, 8.507059e+37 }
 0x500   :  { %v2127_v34 = vsel %vm2126_vm0, %v5635_v1, %v2123_v5  ;;  %v92_v5 = vadd.f32 2.7182817, %v60_v46 }
 0x502   :  { %5638 = vlog2.f32 %v92_v5 }
 0x521   :  { %v2162_v0 = vpop.permute.xlu0 %2161 }
 0x522   :  { %v2173_v31 = vmul.f32 %v2162_v0, %v6960_v53 }
 0x524   :  { %2181 = vrot.lane.b32.xlu1 %v2173_v31, %s6039_s6  ;;  %v2100_v31 = vand.u32 2147483648, %v6953_v17 }
 0x526   :  { %v2101_v63 = vor.u32 1.1754944e-38, %v2100_v31 }
 0x528   :  { %v6977_v28 = vsel %vm2099_vm14, %v2101_v63, %v2097_v55  ;;  %v61_v55 = vld [vmem:[%s8249_s1 + $0x68] sm:$0xff] }
 0x529   :  { %v1971_v59 = vpop.permute.xlu0 %1970  ;;  %v2164_v33 = vpop.permute.xlu1 %2163 }
 0x52a   :  { %v1976_v13 = vmul.f32 %v5637_v50, %v1971_v59  ;;  %v2174_v0 = vmul.f32 %v2164_v33, %v2072_v51  ;;  %v2168_v59 = vpop.permute.xlu2 %2167  ;;  %v2131_v33 = vor.u32 1.1754944e-38, %v2130_v32  ;;  %v93_v32 = vadd.f32 2.7182817, %v61_v55 }
 0x52c   :  { %1943 = vrot.lane.b32.xlu1 %v5637_v50, %s6039_s6  ;;  %1987 = vrot.lane.b32.xlu0 %v1976_v13, %s6039_s6  ;;  %v2132_v42 = vsel %vm2129_vm2, %v2131_v33, %v2127_v34  ;;  %v5639_v34 = vpop.eup %5638  ;;  %vm2224_vm2 = vcmp.gt.s32.totalorder %v6797_v2, 2 }
 0x52d   :  { %2183 = vrot.lane.b32.xlu2 %v2174_v0, %s6039_s6  ;;  %v2176_v13 = vmul.f32 %v2168_v59, %v2132_v42  ;;  %v2225_v0 = vsel %vm2221_vm3, 1, %v8310_v25 }
 0x532   :  { %v1982_v22 = vpop.permute.xlu2 %1981 }
 0x535   :  { %1985 = vrot.lane.b32.xlu2 %v1975_v14, %s6039_s6  ;;  %v2166_v50 = vpop.permute.xlu1 %2165 }
 0x536   :  { %v2175_v17 = vmul.f32 %v2166_v50, %v6977_v28 }
 0x538   :  { %2185 = vrot.lane.b32.xlu1 %v2175_v17, %s6039_s6  ;;  %v62_v17 = vld [vmem:[%s8249_s1 + $0x70] sm:$0xff] }
 0x539   :  { %v94_v33 = vadd.f32 2.7182817, %v62_v17 }
 0x53d   :  { %2187 = vrot.lane.b32.xlu2 %v2176_v13, %s6039_s6 }
 0x544   :  { %v1938_v1 = vpop.permute.xlu0 %1937 }
 0x545   :  { %2230 = vperm.xlu2 %5428, %v2225_v0   ;;  %v1949_v50 = vsub.f32 %v6838_v54, %v1938_v1 }
 0x547   :  { %v1993_v0 = vadd.f32 %v1982_v22, %v1949_v50 }
 0x54c   :  { %v1940_v16 = vpop.permute.xlu1 %1939 }
 0x54d   :  { %v1950_v43 = vsub.f32 %v6846_v48, %v1940_v16 }
 0x54e   :  { %v1984_v31 = vpop.permute.xlu0 %1983 }
 0x54f   :  { %v1994_v26 = vadd.f32 %v1984_v31, %v1950_v43  ;;  %v2153_v43 = vmul.f32 %v6960_v53, %v1993_v0 }
 0x551   :  { %v2154_v14 = vmul.f32 %v2072_v51, %v1994_v26  ;;  %v7004_v51 = vmul.f32 0.6931472, %v5639_v34 }
 0x553   :  { %vm361_vm6 = vweird.f32 %v7004_v51 }
 0x556   :  { %v1942_v26 = vpop.permute.xlu0 %1941 }
 0x587   :  { %v2184_v63 = vpop.permute.xlu2 %2183 }
 0x588   :  { %v6996_v52 = vadd.f32 %v2184_v63, %v2154_v14 }
 0x58a   :  { %5640 = vtanh.f32 %v6996_v52 }
 0x58b   :  { %5642 = vlog2.f32 %v93_v32 }
 0x58c   :  { %5644 = vlog2.f32 %v94_v33 }
 0x58d   :  { %5646 = vrcp.f32 %v7004_v51 }
 0x58f   :  { %v1986_v46 = vpop.permute.xlu2 %1985 }
 0x590   :  { %v5641_v59 = vpop.eup %5640 }
 0x591   :  { %v5643_v13 = vpop.eup %5642  ;;  %2207 = vrot.lane.b32.xlu1 %v5641_v59, %s6039_s6  ;;  %v7025_v59 = vld [vmem:[%s8251_s2 + $0x8] sm:$0xff] }
 0x592   :  { %v7006_v16 = vmul.f32 0.6931472, %v5643_v13  ;;  %v5645_v22 = vpop.eup %5644  ;;  %8319 = vst [vmem:[#allocation11_spill] sm:$0xff] %v7025_v59  ;;  %vm2222_vm4 = vcmp.gt.s32.totalorder %v7025_v59, 2  ;;  %v1951_v13 = vsub.f32 %v6872_v6, %v1942_v26  ;;  %v7039_v26 = vld [vmem:[%s8251_s2 + $0x10] sm:$0xff] }
 0x593   :  { %v5647_v55 = vpop.eup %5646  ;;  %v7014_v5 = vmul.f32 0.6931472, %v5645_v22  ;;  %8320 = vst [vmem:[#allocation12_spill] sm:$0xff] %v7039_v26  ;;  %vm2223_vm5 = vcmp.gt.s32.totalorder %v7039_v26, 2 }
 0x594   :  { %5648 = vrcp.f32 %v7006_v16  ;;  %v357_v17 = vmul.f32 %v5647_v55, %v7004_v51  ;;  %v1995_v22 = vadd.f32 %v1986_v46, %v1951_v13  ;;  %vm362_vm7 = vweird.f32 %v5647_v55 }
 0x595   :  { %v365_v13 = vand.u32 2147483647, %v7004_v51  ;;  %vm376_vm8 = vweird.f32 %v7006_v16  ;;  %vm7053_vm10 = vmor %vm361_vm6, %vm362_vm7  ;;  %vm391_vm15 = vweird.f32 %v7014_v5 }
 0x596   :  { %v2182_v31 = vpop.permute.xlu1 %2181  ;;  %v2155_v59 = vmul.f32 %v6977_v28, %v1995_v22 }
 0x597   :  { %v7009_v1 = vadd.f32 %v2182_v31, %v2153_v43  ;;  %v2188_v43 = vpop.permute.xlu2 %2187  ;;  %v358_v31 = vsub.f32 1.0, %v357_v17  ;;  %vm366_vm12 = vcmp.eq.f32.partialorder %v365_v13, 8.507059e+37 }
 0x599   :  { %5650 = vtanh.f32 %v7009_v1  ;;  %v359_v62 = vmul.f32 %v5647_v55, %v358_v31  ;;  %v5241_v31 = vmul.f32 -1.442695, %v6933_v40 }
 0x59a   :  { %v7016_v14 = vpop.eup %5648  ;;  %5652 = vrcp.f32 %v7014_v5 }
 0x59b   :  { %v372_v33 = vmul.f32 %v7016_v14, %v7006_v16  ;;  %v360_v28 = vadd.f32 %v5647_v55, %v359_v62  ;;  %vm377_vm9 = vweird.f32 %v7016_v14 }
 0x59c   :  { %vm378_vm11 = vmor %vm376_vm8, %vm377_vm9 }
 0x59e   :  { %v1944_v63 = vpop.permute.xlu1 %1943  ;;  %v1988_v50 = vpop.permute.xlu0 %1987 }
 0x59f   :  { %v5651_v32 = vpop.eup %5650  ;;  %v1952_v53 = vsub.f32 %v6881_v60, %v1944_v63 }
 0x5a0   :  { %2205 = vrot.lane.b32.xlu0 %v5651_v32, %s6039_s6  ;;  %v2226_v32 = vsel %vm2222_vm4, 1, %v8310_v25 }
 0x5a1   :  { %v1996_v34 = vadd.f32 %v1988_v50, %v1952_v53  ;;  %v373_v53 = vsub.f32 1.0, %v372_v33  ;;  %v5653_v50 = vpop.eup %5652  ;;  %v367_v33 = vand.u32 2147483648, %v7004_v51  ;;  %v380_v51 = vand.u32 2147483647, %v7006_v16 }
 0x5a2   :  { %v387_v17 = vmul.f32 %v5653_v50, %v7014_v5  ;;  %vm392_vm0 = vweird.f32 %v5653_v50 }
 0x5a3   :  { %v2156_v0 = vmul.f32 %v2132_v42, %v1996_v34  ;;  %v374_v46 = vmul.f32 %v7016_v14, %v373_v53  ;;  %v364_v53 = vsel %vm7053_vm10, %v5647_v55, %v360_v28  ;;  %vm381_vm14 = vcmp.eq.f32.partialorder %v380_v51, 8.507059e+37  ;;  %vm393_vm3 = vmor %vm391_vm15, %vm392_vm0 }
 0x5a4   :  { %v388_v22 = vsub.f32 1.0, %v387_v17  ;;  %v395_v17 = vand.u32 2147483647, %v7014_v5 }
 0x5a5   :  { %v7031_v63 = vadd.f32 %v2188_v43, %v2156_v0  ;;  %v2227_v43 = vsel %vm2223_vm5, 1, %v8310_v25  ;;  %v375_v62 = vadd.f32 %v7016_v14, %v374_v46  ;;  %v397_v46 = vand.u32 2147483648, %v7014_v5 }
 0x5a6   :  { %v389_v61 = vmul.f32 %v5653_v50, %v388_v22  ;;  %vm396_vm4 = vcmp.eq.f32.partialorder %v395_v17, 8.507059e+37  ;;  %v7093_v17 = vld [vmem:[%s8248_s0 + $0x38] sm:$0xff] }
 0x5a7   :  { %5654 = vtanh.f32 %v7031_v63  ;;  %v379_v26 = vsel %vm378_vm11, %v7016_v14, %v375_v62  ;;  %v2228_v14 = vsel %vm2224_vm2, 1, %v8310_v25 }
 0x5a8   :  { %2233 = vperm.xlu0 %5427, %v2226_v32   ;;  %v368_v32 = vor.u32 1.1754944e-38, %v367_v33  ;;  %v390_v55 = vadd.f32 %v5653_v50, %v389_v61  ;;  %v398_v33 = vor.u32 1.1754944e-38, %v397_v46 }
 0x5aa   :  { %v2186_v42 = vpop.permute.xlu1 %2185  ;;  %v369_v37 = vsel %vm366_vm12, %v368_v32, %v364_v53  ;;  %v394_v28 = vsel %vm393_vm3, %v5653_v50, %v390_v55 }
 0x5ab   :  { %v7045_v34 = vadd.f32 %v2186_v42, %v2155_v59  ;;  %v382_v59 = vand.u32 2147483648, %v7006_v16 }
 0x5ad   :  { %v5655_v0 = vpop.eup %5654  ;;  %5656 = vtanh.f32 %v7045_v34  ;;  %v383_v42 = vor.u32 1.1754944e-38, %v382_v59 }
 0x5ae   :  { %2211 = vrot.lane.b32.xlu2 %v5655_v0, %s6039_s6  ;;  %v5239_v0 = vmul.f32 -1.442695, %v6929_v36 }
 0x5af   :  { %v384_v16 = vsel %vm381_vm14, %v383_v42, %v379_v26  ;;  %v5235_v26 = vmul.f32 -1.442695, %v6914_v57  ;;  %v7077_v57 = vld [vmem:[%s8248_s0 + $0x30] sm:$0xff] }
 0x5b0   :  { %2236 = vperm.xlu0 %5427, %v2227_v43   ;;  %5252 = vmatmul.msk.bf16.vlgmr.msrb.gmra.mxu3 %vm857_vm1, %v7077_v57 }
 0x5b1   :  { %5658 = vpow2.f32 %v5235_v26  ;;  %5250 = vmatmul.msk.bf16.vlgmr.msra.gmra.mxu2 %vm857_vm1, %v7077_v57  ;;  %2873 = vmatpush.bf16.msrb.mxu3 %v6239_v44 }
 0x5b2   :  { %2835 = vmatpush.bf16.msra.mxu2 %v6162_v18 }
 0x5b3   :  { %v5657_v49 = vpop.eup %5656 }
 0x5b4   :  { %2209 = vrot.lane.b32.xlu1 %v5657_v49, %s6039_s6  ;;  %v399_v49 = vsel %vm396_vm4, %v398_v33, %v394_v28 }
 0x5b6   :  { %2433 = vperm.xlu2 %5428, %v369_v37   ;;  %v5237_v37 = vmul.f32 -1.442695, %v6922_v19 }
 0x5b7   :  { %v5659_v13 = vpop.eup %5658 }
 0x5b8   :  { %2438 = vperm.xlu0 %5427, %v384_v16   ;;  %5660 = vpow2.f32 %v5237_v37  ;;  %v2022_v2 = vadd.f32 1.0, %v5659_v13 }
 0x5ba   :  { %5662 = vrcp.f32 %v2022_v2  ;;  %v2055_v42 = vand.u32 2147483648, %v2022_v2  ;;  %vm2049_vm6 = vweird.f32 %v2022_v2  ;;  %v2053_v46 = vand.u32 2147483647, %v2022_v2 }
 0x5bc   :  { %2239 = vperm.xlu1 %5429, %v2228_v14   ;;  %v2056_v28 = vor.u32 1.1754944e-38, %v2055_v42  ;;  %vm2054_vm8 = vcmp.eq.f32.partialorder %v2053_v46, 8.507059e+37 }
 0x5be   :  { %v5661_v61 = vpop.eup %5660 }
 0x5bf   :  { %v2024_v5 = vadd.f32 1.0, %v5661_v61 }
 0x5c0   :  { %2443 = vperm.xlu0 %5427, %v399_v49   ;;  %v5663_v43 = vpop.eup %5662  ;;  %v2231_v49 = vpop.permute.xlu2 %2230  ;;  %5253 = vmatmul.msk.bf16.gmra.mxu3 %vm857_vm1, %v7093_v17 }
 0x5c1   :  { %5664 = vrcp.f32 %v2024_v5  ;;  %v2045_v50 = vmul.f32 %v5663_v43, %v2022_v2  ;;  %vm2050_vm5 = vweird.f32 %v5663_v43  ;;  %5251 = vmatmul.msk.bf16.gmra.mxu2 %vm857_vm1, %v7093_v17  ;;  %v2085_v2 = vand.u32 2147483648, %v2024_v5 }
 0x5c2   :  { %5666 = vpow2.f32 %v5239_v0  ;;  %vm2051_vm7 = vmor %vm2049_vm6, %vm2050_vm5  ;;  %vm2079_vm10 = vweird.f32 %v2024_v5  ;;  %vm2241_vm11 = vcmp.eq.s32.totalorder %v2231_v49, 1 }
 0x5c3   :  { %v2046_v36 = vsub.f32 1.0, %v2045_v50  ;;  %5668 = vpow2.f32 %v5241_v31 }
 0x5c5   :  { %v2047_v51 = vmul.f32 %v5663_v43, %v2046_v36  ;;  %v2086_v36 = vor.u32 1.1754944e-38, %v2085_v2 }
 0x5c7   :  { %v5665_v19 = vpop.eup %5664  ;;  %v2048_v53 = vadd.f32 %v5663_v43, %v2047_v51 }
 0x5c8   :  { %v5667_v59 = vpop.eup %5666  ;;  %v2075_v62 = vmul.f32 %v5665_v19, %v2024_v5  ;;  %vm2080_vm9 = vweird.f32 %v5665_v19 }
 0x5c9   :  { %v7085_v40 = vadd.f32 1.0, %v5667_v59  ;;  %v5669_v22 = vpop.eup %5668  ;;  %v2052_v14 = vsel %vm2051_vm7, %v5663_v43, %v2048_v53  ;;  %v2083_v43 = vand.u32 2147483647, %v2024_v5  ;;  %vm2081_vm12 = vmor %vm2079_vm10, %vm2080_vm9 }
 0x5ca   :  { %v2076_v32 = vsub.f32 1.0, %v2075_v62  ;;  %v7088_v16 = vadd.f32 1.0, %v5669_v22  ;;  %v2057_v37 = vsel %vm2054_vm8, %v2056_v28, %v2052_v14  ;;  %v7109_v22 = vsel %vm2241_vm11, %v7009_v1, %v6838_v54 }
 0x5cb   :  { %5670 = vrcp.f32 %v7085_v40  ;;  %vm2084_vm14 = vcmp.eq.f32.partialorder %v2083_v43, 8.507059e+37  ;;  %vm2109_vm2 = vweird.f32 %v7085_v40 }
 0x5cc   :  { %v2077_v55 = vmul.f32 %v5665_v19, %v2076_v32  ;;  %5672 = vrcp.f32 %v7088_v16  ;;  %vm2139_vm6 = vweird.f32 %v7088_v16 }
 0x5ce   :  { %v2078_v26 = vadd.f32 %v5665_v19, %v2077_v55 }
 0x5d0   :  { %v2082_v50 = vsel %vm2081_vm12, %v5665_v19, %v2078_v26 }
 0x5d1   :  { %v7095_v33 = vpop.eup %5670  ;;  %v2087_v32 = vsel %vm2084_vm14, %v2086_v36, %v2082_v50  ;;  %5254 = vmatmul.msk.bf16.vlgmr.msrb.gmra.mxu2 %vm857_vm1, %v7077_v57  ;;  %v2145_v36 = vand.u32 2147483648, %v7088_v16 }
 0x5d2   :  { %v2105_v0 = vmul.f32 %v7095_v33, %v7085_v40  ;;  %v5673_v59 = vpop.eup %5672  ;;  %vm2110_vm0 = vweird.f32 %v7095_v33  ;;  %3275 = vmatpush.bf16.msrb.mxu2 %v6170_v20 }
 0x5d3   :  { %v2135_v19 = vmul.f32 %v5673_v59, %v7088_v16  ;;  %vm2111_vm3 = vmor %vm2109_vm2, %vm2110_vm0  ;;  %vm2140_vm5 = vweird.f32 %v5673_v59 }
 0x5d4   :  { %v2106_v51 = vsub.f32 1.0, %v2105_v0  ;;  %vm2141_vm7 = vmor %vm2139_vm6, %vm2140_vm5 }
 0x5d5   :  { %v2136_v14 = vsub.f32 1.0, %v2135_v19 }
 0x5e1   :  { %5255 = vmatmul.msk.bf16.gmra.mxu2 %vm857_vm1, %v7093_v17  ;;  %v8325_v17 = vld [vmem:[#allocation4_spill] sm:$0xff] }
 0x603   :  { %v2208_v62 = vpop.permute.xlu1 %2207 }
 0x604   :  { %v2218_v53 = vmul.f32 %v2208_v62, %v2087_v32  ;;  %v2146_v32 = vor.u32 1.1754944e-38, %v2145_v36  ;;  %v8329_v36 = vld [vmem:[#allocation7_spill] sm:$0xff] }
 0x612   :  { %v2206_v13 = vpop.permute.xlu0 %2205 }
 0x613   :  { %v2217_v61 = vmul.f32 %v2206_v13, %v2057_v37  ;;  %v2115_v13 = vand.u32 2147483648, %v7085_v40 }
 0x615   :  { %v7105_v31 = vsel %vm2241_vm11, %v2217_v61, %v6834_v9  ;;  %v2107_v9 = vmul.f32 %v7095_v33, %v2106_v51  ;;  %v2116_v61 = vor.u32 1.1754944e-38, %v2115_v13 }
 0x616   :  { %v2253_v5 = vsel %vm1296_vm13, %v7105_v31, %v7109_v22 }
 0x617   :  { %v2257_v46 = vpack.c.bf16 %v2253_v5, %v2253_v5  ;;  %v2108_v49 = vadd.f32 %v7095_v33, %v2107_v9  ;;  %v2212_v5 = vpop.permute.xlu2 %2211 }
 0x619   :  { %v2269_v26 = vunpack.c.l.b16 %v2257_v46  ;;  %v2112_v2 = vsel %vm2111_vm3, %v7095_v33, %v2108_v49  ;;  %v2143_v33 = vand.u32 2147483647, %v7088_v16  ;;  %v8327_v49 = vld [vmem:[#allocation6_spill] sm:$0xff] }
 0x61a   :  { %v2234_v42 = vpop.permute.xlu0 %2233 }
 0x61b   :  { %vm2242_vm15 = vcmp.eq.s32.totalorder %v2234_v42, 1  ;;  %vm2144_vm9 = vcmp.eq.f32.partialorder %v2143_v33, 8.507059e+37 }
 0x61c   :  { %v7118_v55 = vsel %vm2242_vm15, %v6996_v52, %v6846_v48  ;;  %v7121_v54 = vsel %vm2242_vm15, %v2218_v53, %v6849_v39  ;;  %v2113_v48 = vand.u32 2147483647, %v7085_v40  ;;  %v2137_v39 = vmul.f32 %v5673_v59, %v2136_v14 }
 0x61d   :  { %v2254_v1 = vsel %vm1296_vm13, %v7121_v54, %v7118_v55 }
 0x61e   :  { %v2258_v28 = vpack.c.bf16 %v2254_v1, %v2254_v1  ;;  %vm2114_vm4 = vcmp.eq.f32.partialorder %v2113_v48, 8.507059e+37  ;;  %v2138_v0 = vadd.f32 %v5673_v59, %v2137_v39 }
 0x61f   :  { %v2117_v43 = vsel %vm2114_vm4, %v2116_v61, %v2112_v2 }
 0x620   :  { %v2270_v37 = vunpack.c.l.b16 %v2258_v28  ;;  %v2142_v62 = vsel %vm2141_vm7, %v5673_v59, %v2138_v0  ;;  %v8326_v28 = vld [vmem:[#allocation5_spill] sm:$0xff] }
 0x621   :  { %v2147_v19 = vsel %vm2144_vm9, %v2146_v32, %v2142_v62 }
 0x622   :  { %v2273_v52 = vpack.c.b16 %v2270_v37, %v2269_v26  ;;  %v2237_v40 = vpop.permute.xlu0 %2236  ;;  %v2220_v59 = vmul.f32 %v2212_v5, %v2147_v19  ;;  %v63_v26 = vld [vmem:[%s8249_s1 + $0x78] sm:$0xff] }
 0x623   :  { %vm2243_vm8 = vcmp.eq.s32.totalorder %v2237_v40, 1  ;;  %v95_v37 = vadd.f32 2.7182817, %v63_v26 }
 0x624   :  { %2301 = vmatmul.bf16.vlgmr.msra.gmra.mxu0 %v2273_v52  ;;  %2339 = vmatmul.bf16.vlgmr.msrb.gmra.mxu1 %v2273_v52  ;;  %v7147_v53 = vsel %vm2243_vm8, %v7045_v34, %v6872_v6 }
 0x625   :  { %2809 = vmatpush.bf16.msra.mxu0 %v6130_v3  ;;  %2847 = vmatpush.bf16.msrb.mxu1 %v6153_v15  ;;  %5674 = vlog2.f32 %v95_v37 }
 0x626   :  { %v2210_v50 = vpop.permute.xlu1 %2209 }
 0x627   :  { %v2219_v57 = vmul.f32 %v2210_v50, %v2117_v43  ;;  %v8328_v43 = vld [vmem:[#allocation9_spill] sm:$0xff] }
 0x629   :  { %2810 = vmatpush.bf16.msra.mxu0 %v6142_v10  ;;  %2848 = vmatpush.bf16.msrb.mxu1 %v6181_v23  ;;  %v7143_v51 = vsel %vm2243_vm8, %v2219_v57, %v6866_v11 }
 0x62a   :  { %v2255_v16 = vsel %vm1296_vm13, %v7143_v51, %v7147_v53 }
 0x62b   :  { %v2259_v6 = vpack.c.bf16 %v2255_v16, %v2255_v16  ;;  %v5675_v13 = vpop.eup %5674 }
 0x62c   :  { %v143_v48 = vmul.f32 0.6931472, %v5675_v13 }
 0x62d   :  { %2811 = vmatpush.bf16.msra.mxu0 %v6175_v21  ;;  %2849 = vmatpush.bf16.msrb.mxu1 %v6206_v30  ;;  %v2271_v1 = vunpack.c.l.b16 %v2259_v6 }
 0x62e   :  { %v2240_v42 = vpop.permute.xlu1 %2239  ;;  %5676 = vrcp.f32 %v143_v48  ;;  %vm406_vm11 = vweird.f32 %v143_v48  ;;  %v412_v6 = vand.u32 2147483648, %v143_v48 }
 0x62f   :  { %vm2244_vm10 = vcmp.eq.s32.totalorder %v2240_v42, 1 }
 0x630   :  { %v7156_v11 = vsel %vm2244_vm10, %v7031_v63, %v6881_v60  ;;  %v7159_v9 = vsel %vm2244_vm10, %v2220_v59, %v6884_v35  ;;  %v8323_v35 = vld [vmem:[#allocation2_spill] sm:$0xff]  ;;  %v8324_v63 = vld [vmem:[#allocation3_spill] sm:$0xff]  ;;  %v413_v37 = vor.u32 1.1754944e-38, %v412_v6 }
 0x631   :  { %v2256_v34 = vsel %vm1296_vm13, %v7159_v9, %v7156_v11  ;;  %2812 = vmatpush.bf16.msra.mxu0 %v6197_v27  ;;  %2850 = vmatpush.bf16.msrb.mxu1 %v6230_v41 }
 0x632   :  { %v2260_v46 = vpack.c.bf16 %v2256_v34, %v2256_v34 }
 0x633   :  { %v2359_v61 = vpop.f32.mrf.mxu3 }
 0x634   :  { %v2272_v14 = vunpack.c.l.b16 %v2260_v46  ;;  %v2321_v39 = vpop.f32.mrf.mxu2  ;;  %v410_v46 = vand.u32 2147483647, %v143_v48 }
 0x635   :  { %2813 = vmatpush.bf16.msra.mxu0 %v6221_v38  ;;  %2851 = vmatpush.bf16.msrb.mxu1 %v6250_v47 }
 0x636   :  { %v2274_v60 = vpack.c.b16 %v2272_v14, %v2271_v1  ;;  %vm411_vm15 = vcmp.eq.f32.partialorder %v410_v46, 8.507059e+37 }
 0x638   :  { %2306 = vmatmul.bf16.gmra.mxu0 %v2274_v60  ;;  %2344 = vmatmul.bf16.gmra.mxu1 %v2274_v60 }
 0x639   :  { %2814 = vmatpush.bf16.msra.mxu0 %v6244_v45  ;;  %2852 = vmatpush.bf16.msrb.mxu1 %v6278_v58 }
 0x63b   :  { %v2361_v59 = vpop.f32.mrf.mxu3 }
 0x63c   :  { %v7193_v5 = vpop.f32.mrf.mxu2 }
 0x63d   :  { %2815 = vmatpush.bf16.msra.mxu0 %v6272_v56  ;;  %2853 = vmatpush.bf16.msrb.mxu1 %v6314_v8 }
 0x641   :  { %2816 = vmatpush.bf16.msra.mxu0 %v6311_v7  ;;  %2854 = vmatpush.bf16.msrb.mxu1 %v6336_v24 }
 0x644   :  { %v2326_v26 = vpop.f32.mrf.mxu2 }
 0x648   :  { %2377 = vmatmul.bf16.vlgmr.msrb.gmra.mxu0 %v2273_v52  ;;  %v5677_v52 = vpop.eup %5676 }
 0x649   :  { %3249 = vmatpush.bf16.msrb.mxu0 %v6301_v4  ;;  %v402_v2 = vmul.f32 %v5677_v52, %v143_v48  ;;  %vm407_vm12 = vweird.f32 %v5677_v52 }
 0x64a   :  { %vm408_vm14 = vmor %vm406_vm11, %vm407_vm12 }
 0x64b   :  { %v403_v33 = vsub.f32 1.0, %v402_v2 }
 0x64d   :  { %3250 = vmatpush.bf16.msrb.mxu0 %v6323_v12  ;;  %v404_v19 = vmul.f32 %v5677_v52, %v403_v33 }
 0x64f   :  { %v405_v34 = vadd.f32 %v5677_v52, %v404_v19 }
 0x651   :  { %3251 = vmatpush.bf16.msrb.mxu0 %v6342_v29  ;;  %v409_v13 = vsel %vm408_vm14, %v5677_v52, %v405_v34 }
 0x655   :  { %3252 = vmatpush.bf16.msrb.mxu0 %v8323_v35 }
 0x658   :  { %2382 = vmatmul.bf16.gmra.mxu0 %v2274_v60 }
 0x659   :  { %3253 = vmatpush.bf16.msrb.mxu0 %v8324_v63 }
 0x65d   :  { %3254 = vmatpush.bf16.msrb.mxu0 %v8325_v17 }
 0x661   :  { %3255 = vmatpush.bf16.msrb.mxu0 %v8326_v28 }
 0x665   :  { %3256 = vmatpush.bf16.msrb.mxu0 %v8327_v49 }
 0x6a1   :  { %v2302_v0 = vpop.f32.mrf.mxu0  ;;  %v2340_v40 = vpop.f32.mrf.mxu1 }
 0x6a2   :  { %v2303_v50 = vadd.f32 %v2302_v0, %v8328_v43  ;;  %v2341_v57 = vadd.f32 %v2340_v40, %v8329_v36 }
 0x6a4   :  { %v7189_v62 = vadd.f32 %v2359_v61, %v2341_v57  ;;  %v7191_v32 = vadd.f32 %v2321_v39, %v2303_v50  ;;  %v414_v39 = vsel %vm411_vm15, %v413_v37, %v409_v13  ;;  %v2364_v61 = vpop.f32.mrf.mxu3  ;;  %v7204_v57 = vpop.f32.mrf.mxu2  ;;  %v8330_v37 = vld [vmem:[#allocation8_spill] sm:$0xff] }
 0x6a6   :  { %5678 = vtanh.f32 %v7189_v62 }
 0x6a9   :  { %v2342_v16 = vpop.f32.mrf.mxu1  ;;  %v2304_v60 = vpop.f32.mrf.mxu0 }
 0x6aa   :  { %v2343_v42 = vadd.f32 %v2342_v16, %v8329_v36 }
 0x6ac   :  { %v5679_v1 = vpop.eup %5678  ;;  %v7197_v14 = vadd.f32 %v2361_v59, %v2343_v42  ;;  %v2366_v42 = vpop.f32.mrf.mxu3 }
 0x6ad   :  { %2639 = vrot.lane.b32.xlu1 %v5679_v1, %s6039_s6  ;;  %v2397_v46 = vpop.f32.mrf.mxu2 }
 0x6ae   :  { %5680 = vtanh.f32 %v7197_v14 }
 0x6b4   :  { %v5681_v2 = vpop.eup %5680 }
 0x6b5   :  { %v2307_v0 = vpop.f32.mrf.mxu0  ;;  %v2345_v40 = vpop.f32.mrf.mxu1  ;;  %2641 = vrot.lane.b32.xlu2 %v5681_v2, %s6039_s6  ;;  %2448 = vperm.xlu1 %5429, %v414_v39  }
 0x6b6   :  { %v2308_v48 = vadd.f32 %v2307_v0, %v8328_v43  ;;  %v2346_v50 = vadd.f32 %v2345_v40, %v8329_v36  ;;  %v2399_v2 = vpop.f32.mrf.mxu2 }
 0x6b8   :  { %v7206_v33 = vadd.f32 %v2364_v61, %v2346_v50  ;;  %v2327_v19 = vadd.f32 %v2326_v26, %v2308_v48  ;;  %v2434_v48 = vpop.permute.xlu2 %2433 }
 0x6ba   :  { %5682 = vtanh.f32 %v7206_v33 }
 0x6bd   :  { %v2309_v52 = vpop.f32.mrf.mxu0  ;;  %v2347_v16 = vpop.f32.mrf.mxu1 }
 0x6be   :  { %v2348_v59 = vadd.f32 %v2347_v16, %v8329_v36 }
 0x6c0   :  { %v5683_v6 = vpop.eup %5682  ;;  %v7210_v34 = vadd.f32 %v2366_v42, %v2348_v59  ;;  %v2402_v42 = vpop.f32.mrf.mxu2 }
 0x6c1   :  { %2643 = vrot.lane.b32.xlu2 %v5683_v6, %s6039_s6 }
 0x6c2   :  { %5684 = vtanh.f32 %v7210_v34 }
 0x6c5   :  { %v2378_v1 = vpop.f32.mrf.mxu0 }
 0x6c6   :  { %v2379_v13 = vadd.f32 %v2378_v1, %v8330_v37  ;;  %v2439_v1 = vpop.permute.xlu0 %2438 }
 0x6c8   :  { %v5685_v39 = vpop.eup %5684  ;;  %v2398_v26 = vadd.f32 %v2397_v46, %v2379_v13 }
 0x6c9   :  { %2645 = vrot.lane.b32.xlu0 %v5685_v39, %s6039_s6 }
 0x6ca   :  { %5686 = vtanh.f32 %v2398_v26  ;;  %v2305_v26 = vadd.f32 %v2304_v60, %v8328_v43 }
 0x6cd   :  { %v2380_v61 = vpop.f32.mrf.mxu0 }
 0x6ce   :  { %v2381_v0 = vadd.f32 %v2380_v61, %v8330_v37 }
 0x6d0   :  { %v5687_v40 = vpop.eup %5686  ;;  %v2400_v50 = vadd.f32 %v2399_v2, %v2381_v0  ;;  %v2324_v2 = vadd.f32 %v7193_v5, %v2305_v26  ;;  %v2310_v5 = vadd.f32 %v2309_v52, %v8328_v43 }
 0x6d1   :  { %2415 = vrot.lane.b32.xlu1 %v5687_v40, %s6039_s6  ;;  %v2451_v16 = vmul.f32 %v5687_v40, %v2434_v48 }
 0x6d2   :  { %5688 = vtanh.f32 %v2400_v50  ;;  %v5258_v0 = vmul.f32 -1.442695, %v2324_v2  ;;  %v5256_v50 = vmul.f32 -1.442695, %v7191_v32  ;;  %v2329_v2 = vadd.f32 %v7204_v57, %v2310_v5  ;;  %v2444_v5 = vpop.permute.xlu0 %2443 }
 0x6d3   :  { %2459 = vrot.lane.b32.xlu0 %v2451_v16, %s6039_s6 }
 0x6d5   :  { %v2383_v59 = vpop.f32.mrf.mxu0 }
 0x6d6   :  { %v2384_v6 = vadd.f32 %v2383_v59, %v8330_v37 }
 0x6d8   :  { %v5689_v46 = vpop.eup %5688  ;;  %v2403_v13 = vadd.f32 %v2402_v42, %v2384_v6 }
 0x6d9   :  { %2417 = vrot.lane.b32.xlu2 %v5689_v46, %s6039_s6  ;;  %v2452_v39 = vmul.f32 %v5689_v46, %v2439_v1  ;;  %v5260_v46 = vmul.f32 -1.442695, %v2327_v19 }
 0x6da   :  { %5690 = vtanh.f32 %v2403_v13 }
 0x6db   :  { %2461 = vrot.lane.b32.xlu1 %v2452_v39, %s6039_s6  ;;  %5692 = vpow2.f32 %v5258_v0 }
 0x6e0   :  { %v5691_v61 = vpop.eup %5690 }
 0x6e1   :  { %v5693_v40 = vpop.eup %5692 }
 0x6e2   :  { %v2501_v48 = vadd.f32 1.0, %v5693_v40 }
 0x6e3   :  { %2419 = vrot.lane.b32.xlu1 %v5691_v61, %s6039_s6 }
 0x6e4   :  { %5694 = vrcp.f32 %v2501_v48  ;;  %v2548_v26 = vand.u32 2147483648, %v2501_v48  ;;  %vm2542_vm2 = vweird.f32 %v2501_v48  ;;  %v2546_v32 = vand.u32 2147483647, %v2501_v48 }
 0x6e5   :  { %5696 = vpow2.f32 %v5256_v50 }
 0x6e6   :  { %vm2547_vm4 = vcmp.eq.f32.partialorder %v2546_v32, 8.507059e+37 }
 0x6ea   :  { %v5695_v16 = vpop.eup %5694 }
 0x6eb   :  { %v5697_v59 = vpop.eup %5696  ;;  %v2538_v42 = vmul.f32 %v5695_v16, %v2501_v48  ;;  %vm2543_vm0 = vweird.f32 %v5695_v16  ;;  %v2385_v48 = vpop.f32.mrf.mxu0 }
 0x6ec   :  { %v2499_v60 = vadd.f32 1.0, %v5697_v59  ;;  %vm2544_vm3 = vmor %vm2542_vm2, %vm2543_vm0  ;;  %v2549_v59 = vor.u32 1.1754944e-38, %v2548_v26 }
 0x6ed   :  { %v2539_v6 = vsub.f32 1.0, %v2538_v42  ;;  %v5262_v42 = vmul.f32 -1.442695, %v2329_v2  ;;  %v2386_v2 = vadd.f32 %v2385_v48, %v8330_v37 }
 0x6ee   :  { %5698 = vrcp.f32 %v2499_v60  ;;  %v2518_v32 = vand.u32 2147483648, %v2499_v60  ;;  %vm2512_vm6 = vweird.f32 %v2499_v60 }
 0x6ef   :  { %v2540_v1 = vmul.f32 %v5695_v16, %v2539_v6  ;;  %5700 = vpow2.f32 %v5260_v46 }
 0x6f0   :  { %5702 = vpow2.f32 %v5262_v42 }
 0x6f1   :  { %v2541_v13 = vadd.f32 %v5695_v16, %v2540_v1 }
 0x6f3   :  { %v2545_v40 = vsel %vm2544_vm3, %v5695_v16, %v2541_v13  ;;  %v2453_v16 = vmul.f32 %v5691_v61, %v2444_v5 }
 0x6f4   :  { %v5699_v39 = vpop.eup %5698  ;;  %v7228_v46 = vsel %vm2547_vm4, %v2549_v59, %v2545_v40  ;;  %v2516_v40 = vand.u32 2147483647, %v2499_v60 }
 0x6f5   :  { %v5701_v0 = vpop.eup %5700  ;;  %v2508_v50 = vmul.f32 %v5699_v39, %v2499_v60  ;;  %vm2513_vm5 = vweird.f32 %v5699_v39 }
 0x6f6   :  { %v2503_v19 = vadd.f32 1.0, %v5701_v0  ;;  %v5703_v43 = vpop.eup %5702  ;;  %v2404_v0 = vpop.f32.mrf.mxu2  ;;  %vm2514_vm7 = vmor %vm2512_vm6, %vm2513_vm5  ;;  %vm2517_vm8 = vcmp.eq.f32.partialorder %v2516_v40, 8.507059e+37 }
 0x6f7   :  { %v2509_v1 = vsub.f32 1.0, %v2508_v50  ;;  %v2505_v50 = vadd.f32 1.0, %v5703_v43 }
 0x6f8   :  { %5704 = vrcp.f32 %v2503_v19  ;;  %vm2572_vm10 = vweird.f32 %v2503_v19 }
 0x6f9   :  { %v2510_v57 = vmul.f32 %v5699_v39, %v2509_v1  ;;  %5706 = vrcp.f32 %v2505_v50  ;;  %vm2602_vm15 = vweird.f32 %v2505_v50 }
 0x6fb   :  { %v2511_v13 = vadd.f32 %v5699_v39, %v2510_v57 }
 0x6fd   :  { %v2515_v42 = vsel %vm2514_vm7, %v5699_v39, %v2511_v13  ;;  %v2578_v39 = vand.u32 2147483648, %v2503_v19  ;;  %v2576_v13 = vand.u32 2147483647, %v2503_v19 }
 0x6fe   :  { %v5705_v26 = vpop.eup %5704 }
 0x6ff   :  { %v2568_v59 = vmul.f32 %v5705_v26, %v2503_v19  ;;  %v5707_v37 = vpop.eup %5706  ;;  %vm2573_vm9 = vweird.f32 %v5705_v26  ;;  %v2579_v40 = vor.u32 1.1754944e-38, %v2578_v39  ;;  %vm2577_vm12 = vcmp.eq.f32.partialorder %v2576_v13, 8.507059e+37 }
 0x700   :  { %v2598_v49 = vmul.f32 %v5707_v37, %v2505_v50  ;;  %vm2574_vm11 = vmor %vm2572_vm10, %vm2573_vm9  ;;  %vm2603_vm14 = vweird.f32 %v5707_v37  ;;  %v2608_v19 = vand.u32 2147483648, %v2505_v50 }
 0x701   :  { %v2569_v57 = vsub.f32 1.0, %v2568_v59  ;;  %vm2604_vm0 = vmor %vm2602_vm15, %vm2603_vm14 }
 0x703   :  { %v2570_v48 = vmul.f32 %v5705_v26, %v2569_v57  ;;  %v2609_v57 = vor.u32 1.1754944e-38, %v2608_v19 }
 0x705   :  { %v2571_v60 = vadd.f32 %v5705_v26, %v2570_v48  ;;  %v8331_v48 = vld [vmem:[#allocation10_spill] sm:$0xff] }
 0x706   :  { %vm2699_vm3 = vcmp.gt.s32.totalorder %v8331_v48, 3 }
 0x70f   :  { %v2642_v6 = vpop.permute.xlu2 %2641 }
 0x710   :  { %v2652_v52 = vmul.f32 %v2642_v6, %v7228_v46  ;;  %v2405_v6 = vadd.f32 %v2404_v0, %v2386_v2  ;;  %v2575_v2 = vsel %vm2574_vm11, %v5705_v26, %v2571_v60 }
 0x711   :  { %v7237_v59 = vsel %vm2577_vm12, %v2579_v40, %v2575_v2 }
 0x712   :  { %2661 = vrot.lane.b32.xlu0 %v2652_v52, %s6039_s6  ;;  %v2519_v52 = vor.u32 1.1754944e-38, %v2518_v32  ;;  %5708 = vtanh.f32 %v2405_v6  ;;  %v2599_v32 = vsub.f32 1.0, %v2598_v49 }
 0x714   :  { %v2520_v61 = vsel %vm2517_vm8, %v2519_v52, %v2515_v42  ;;  %v2600_v6 = vmul.f32 %v5707_v37, %v2599_v32  ;;  %v2606_v52 = vand.u32 2147483647, %v2505_v50  ;;  %v65_v50 = vld [vmem:[%s8249_s1 + $0x88] sm:$0xff] }
 0x715   :  { %v97_v60 = vadd.f32 2.7182817, %v65_v50 }
 0x716   :  { %vm2607_vm2 = vcmp.eq.f32.partialorder %v2606_v52, 8.507059e+37 }
 0x717   :  { %5710 = vlog2.f32 %v97_v60 }
 0x71a   :  { %2463 = vrot.lane.b32.xlu0 %v2453_v16, %s6039_s6  ;;  %v5709_v16 = vpop.eup %5708 }
 0x71b   :  { %v2644_v0 = vpop.permute.xlu2 %2643 }
 0x71c   :  { %v2653_v42 = vmul.f32 %v2644_v0, %v7237_v59 }
 0x71d   :  { %v5711_v0 = vpop.eup %5710 }
 0x71f   :  { %v2640_v1 = vpop.permute.xlu1 %2639 }
 0x720   :  { %v2651_v5 = vmul.f32 %v2640_v1, %v2520_v61 }
 0x722   :  { %2659 = vrot.lane.b32.xlu2 %v2651_v5, %s6039_s6 }
 0x727   :  { %v2449_v36 = vpop.permute.xlu1 %2448 }
 0x728   :  { %v2454_v43 = vmul.f32 %v5709_v16, %v2449_v36  ;;  %v2601_v36 = vadd.f32 %v5707_v37, %v2600_v6 }
 0x72a   :  { %2421 = vrot.lane.b32.xlu2 %v5709_v16, %s6039_s6  ;;  %2465 = vrot.lane.b32.xlu1 %v2454_v43, %s6039_s6  ;;  %v2605_v1 = vsel %vm2604_vm0, %v5707_v37, %v2601_v36  ;;  %v2703_v16 = vsel %vm2699_vm3, 1, %v8310_v25  ;;  %v66_v43 = vld [vmem:[%s8249_s1 + $0x90] sm:$0xff] }
 0x72b   :  { %v7241_v26 = vsel %vm2607_vm2, %v2609_v57, %v2605_v1  ;;  %v98_v32 = vadd.f32 2.7182817, %v66_v43 }
 0x72d   :  { %5712 = vlog2.f32 %v98_v32 }
 0x732   :  { %2663 = vrot.lane.b32.xlu2 %v2653_v42, %s6039_s6  ;;  %v147_v42 = vmul.f32 0.6931472, %v5711_v0 }
 0x733   :  { %v2418_v13 = vpop.permute.xlu2 %2417  ;;  %v5713_v57 = vpop.eup %5712 }
 0x734   :  { %v2428_v52 = vsub.f32 %v7118_v55, %v2418_v13  ;;  %5714 = vrcp.f32 %v147_v42  ;;  %vm436_vm6 = vweird.f32 %v147_v42 }
 0x73b   :  { %v2646_v49 = vpop.permute.xlu0 %2645 }
 0x73c   :  { %v2654_v5 = vmul.f32 %v2646_v49, %v7241_v26 }
 0x73e   :  { %2665 = vrot.lane.b32.xlu0 %v2654_v5, %s6039_s6  ;;  %v7258_v5 = vmul.f32 0.6931472, %v5713_v57 }
 0x740   :  { %vm451_vm10 = vweird.f32 %v7258_v5 }
 0x743   :  { %v2416_v37 = vpop.permute.xlu1 %2415 }
 0x744   :  { %v2427_v39 = vsub.f32 %v7109_v22, %v2416_v37 }
 0x745   :  { %v2460_v2 = vpop.permute.xlu0 %2459 }
 0x746   :  { %2708 = vperm.xlu0 %5427, %v2703_v16   ;;  %v2471_v40 = vadd.f32 %v2460_v2, %v2427_v39  ;;  %v5715_v16 = vpop.eup %5714  ;;  %v8332_v39 = vld [vmem:[#allocation11_spill] sm:$0xff] }
 0x747   :  { %vm2700_vm4 = vcmp.gt.s32.totalorder %v8332_v39, 3  ;;  %v432_v13 = vmul.f32 %v5715_v16, %v147_v42  ;;  %vm437_vm7 = vweird.f32 %v5715_v16 }
 0x748   :  { %v2631_v6 = vmul.f32 %v2520_v61, %v2471_v40  ;;  %vm438_vm8 = vmor %vm436_vm6, %vm437_vm7 }
 0x749   :  { %v433_v40 = vsub.f32 1.0, %v432_v13 }
 0x74d   :  { %v2462_v36 = vpop.permute.xlu1 %2461 }
 0x74e   :  { %v2472_v49 = vadd.f32 %v2462_v36, %v2428_v52  ;;  %v64_v52 = vld [vmem:[%s8249_s1 + $0x80] sm:$0xff] }
 0x750   :  { %v2632_v48 = vmul.f32 %v7228_v46, %v2472_v49  ;;  %v2704_v46 = vsel %vm2700_vm4, 1, %v8310_v25  ;;  %v8333_v49 = vld [vmem:[#allocation12_spill] sm:$0xff] }
 0x751   :  { %vm2701_vm5 = vcmp.gt.s32.totalorder %v8333_v49, 3  ;;  %v455_v49 = vand.u32 2147483647, %v7258_v5 }
 0x752   :  { %v2705_v39 = vsel %vm2701_vm5, 1, %v8310_v25 }
 0x753   :  { %vm456_vm15 = vcmp.eq.f32.partialorder %v455_v49, 8.507059e+37 }
 0x755   :  { %v2420_v43 = vpop.permute.xlu1 %2419 }
 0x756   :  { %v2429_v2 = vsub.f32 %v7147_v53, %v2420_v43  ;;  %v96_v43 = vadd.f32 2.7182817, %v64_v52  ;;  %v457_v52 = vand.u32 2147483648, %v7258_v5 }
 0x77c   :  { %v2660_v19 = vpop.permute.xlu2 %2659 }
 0x77d   :  { %v7255_v1 = vadd.f32 %v2660_v19, %v2631_v6 }
 0x77f   :  { %5716 = vtanh.f32 %v7255_v1 }
 0x780   :  { %5718 = vrcp.f32 %v7258_v5 }
 0x784   :  { %v2662_v50 = vpop.permute.xlu0 %2661  ;;  %v7263_v61 = vpop.permute.xlu2 %2421 }
 0x785   :  { %v5717_v60 = vpop.eup %5716  ;;  %v7261_v37 = vadd.f32 %v2662_v50, %v2632_v48  ;;  %v434_v48 = vmul.f32 %v5715_v16, %v433_v40 }
 0x786   :  { %2683 = vrot.lane.b32.xlu1 %v5717_v60, %s6039_s6  ;;  %v5719_v32 = vpop.eup %5718 }
 0x787   :  { %5720 = vtanh.f32 %v7261_v37  ;;  %v447_v50 = vmul.f32 %v5719_v32, %v7258_v5  ;;  %v435_v13 = vadd.f32 %v5715_v16, %v434_v48  ;;  %vm452_vm11 = vweird.f32 %v5719_v32 }
 0x788   :  { %vm453_vm14 = vmor %vm451_vm10, %vm452_vm11 }
 0x789   :  { %v439_v40 = vsel %vm438_vm8, %v5715_v16, %v435_v13 }
 0x78c   :  { %v2464_v0 = vpop.permute.xlu0 %2463  ;;  %v2664_v57 = vpop.permute.xlu2 %2663 }
 0x78d   :  { %v5721_v6 = vpop.eup %5720  ;;  %v2473_v36 = vadd.f32 %v2464_v0, %v2429_v2  ;;  %v440_v2 = vand.u32 2147483647, %v147_v42 }
 0x78e   :  { %2711 = vperm.xlu1 %5429, %v2704_v46   ;;  %2685 = vrot.lane.b32.xlu2 %v5721_v6, %s6039_s6  ;;  %v448_v46 = vsub.f32 1.0, %v447_v50  ;;  %v458_v50 = vor.u32 1.1754944e-38, %v457_v52 }
 0x78f   :  { %v2633_v19 = vmul.f32 %v7237_v59, %v2473_v36  ;;  %v442_v59 = vand.u32 2147483648, %v147_v42  ;;  %vm441_vm9 = vcmp.eq.f32.partialorder %v440_v2, 8.507059e+37  ;;  %v7288_v42 = vld [vmem:[%s8251_s2 + $0x18] sm:$0xff] }
 0x790   :  { %v449_v6 = vmul.f32 %v5719_v32, %v448_v46  ;;  %vm2702_vm12 = vcmp.gt.s32.totalorder %v7288_v42, 3  ;;  %v2430_v46 = vsub.f32 %v7156_v11, %v7263_v61 }
 0x791   :  { %v7278_v60 = vadd.f32 %v2664_v57, %v2633_v19  ;;  %v443_v0 = vor.u32 1.1754944e-38, %v442_v59  ;;  %v2706_v48 = vsel %vm2702_vm12, 1, %v8310_v25 }
 0x792   :  { %v450_v16 = vadd.f32 %v5719_v32, %v449_v6 }
 0x793   :  { %5722 = vtanh.f32 %v7278_v60  ;;  %v444_v19 = vsel %vm441_vm9, %v443_v0, %v439_v40 }
 0x794   :  { %5724 = vlog2.f32 %v96_v43 }
 0x796   :  { %2714 = vperm.xlu1 %5429, %v2705_v39   ;;  %v454_v39 = vsel %vm453_vm14, %v5719_v32, %v450_v16 }
 0x797   :  { %v459_v59 = vsel %vm456_vm15, %v458_v50, %v454_v39  ;;  %v5257_v50 = vmul.f32 -1.442695, %v7189_v62  ;;  %v5259_v39 = vmul.f32 -1.442695, %v7197_v14 }
 0x799   :  { %v5723_v36 = vpop.eup %5722 }
 0x79a   :  { %2687 = vrot.lane.b32.xlu2 %v5723_v36, %s6039_s6  ;;  %v5725_v57 = vpop.eup %5724 }
 0x79b   :  { %v145_v43 = vmul.f32 0.6931472, %v5725_v57 }
 0x79c   :  { %v2466_v13 = vpop.permute.xlu1 %2465 }
 0x79d   :  { %5726 = vrcp.f32 %v145_v43  ;;  %v2474_v0 = vadd.f32 %v2466_v13, %v2430_v46  ;;  %vm421_vm0 = vweird.f32 %v145_v43  ;;  %v427_v52 = vand.u32 2147483648, %v145_v43 }
 0x79e   :  { %2916 = vperm.xlu1 %5429, %v444_v19   ;;  %v425_v16 = vand.u32 2147483647, %v145_v43 }
 0x79f   :  { %v2634_v5 = vmul.f32 %v7241_v26, %v2474_v0  ;;  %v428_v61 = vor.u32 1.1754944e-38, %v427_v52 }
 0x7a0   :  { %vm426_vm4 = vcmp.eq.f32.partialorder %v425_v16, 8.507059e+37 }
 0x7a2   :  { %2717 = vperm.xlu2 %5428, %v2706_v48  }
 0x7a3   :  { %v5727_v2 = vpop.eup %5726 }
 0x7a4   :  { %v417_v40 = vmul.f32 %v5727_v2, %v145_v43  ;;  %vm422_vm2 = vweird.f32 %v5727_v2 }
 0x7a5   :  { %vm423_vm3 = vmor %vm421_vm0, %vm422_vm2 }
 0x7a6   :  { %2921 = vperm.xlu1 %5429, %v459_v59   ;;  %v418_v36 = vsub.f32 1.0, %v417_v40 }
 0x7a8   :  { %v419_v32 = vmul.f32 %v5727_v2, %v418_v36 }
 0x7aa   :  { %v420_v57 = vadd.f32 %v5727_v2, %v419_v32 }
 0x7ac   :  { %v424_v48 = vsel %vm423_vm3, %v5727_v2, %v420_v57  ;;  %v7305_v2 = vld [vmem:[%s8248_s0 + $0x40] sm:$0xff] }
 0x7ad   :  { %v429_v26 = vsel %vm426_vm4, %v428_v61, %v424_v48  ;;  %5272 = vmatmul.msk.bf16.vlgmr.msra.gmra.mxu3 %vm857_vm1, %v7305_v2  ;;  %5274 = vmatmul.msk.bf16.vlgmr.msra.gmra.mxu2 %vm857_vm1, %v7305_v2 }
 0x7ae   :  { %3313 = vmatpush.bf16.msra.mxu3 %v6162_v18  ;;  %3351 = vmatpush.bf16.msra.mxu2 %v6239_v44 }
 0x7b0   :  { %v2666_v6 = vpop.permute.xlu0 %2665 }
 0x7b1   :  { %v7296_v19 = vadd.f32 %v2666_v6, %v2634_v5 }
 0x7b3   :  { %5728 = vtanh.f32 %v7296_v19 }
 0x7b4   :  { %5730 = vpow2.f32 %v5257_v50 }
 0x7b5   :  { %5732 = vpow2.f32 %v5259_v39 }
 0x7b8   :  { %v2709_v48 = vpop.permute.xlu0 %2708 }
 0x7b9   :  { %v5729_v49 = vpop.eup %5728  ;;  %vm2719_vm11 = vcmp.eq.s32.totalorder %v2709_v48, 1 }
 0x7ba   :  { %2689 = vrot.lane.b32.xlu0 %v5729_v49, %s6039_s6  ;;  %v5731_v59 = vpop.eup %5730 }
 0x7bb   :  { %v2500_v13 = vadd.f32 1.0, %v5731_v59  ;;  %v5733_v46 = vpop.eup %5732  ;;  %v5411_v59 = vld [vmem:[%s8248_s0 + $0x48] sm:$0xff] }
 0x7bc   :  { %v2502_v43 = vadd.f32 1.0, %v5733_v46  ;;  %v5261_v46 = vmul.f32 -1.442695, %v7206_v33  ;;  %v7324_v33 = vsel %vm2719_vm11, %v7255_v1, %v7109_v22 }
 0x7bd   :  { %5734 = vrcp.f32 %v2500_v13  ;;  %v2533_v52 = vand.u32 2147483648, %v2500_v13  ;;  %vm2527_vm6 = vweird.f32 %v2500_v13  ;;  %v2531_v57 = vand.u32 2147483647, %v2500_v13  ;;  %5275 = vmatmul.msk.bf16.gmra.mxu2 %vm857_vm1, %v5411_v59  ;;  %5273 = vmatmul.msk.bf16.gmra.mxu3 %vm857_vm1, %v5411_v59 }
 0x7be   :  { %5736 = vrcp.f32 %v2502_v43  ;;  %vm2557_vm10 = vweird.f32 %v2502_v43 }
 0x7bf   :  { %v2534_v61 = vor.u32 1.1754944e-38, %v2533_v52  ;;  %vm2532_vm8 = vcmp.eq.f32.partialorder %v2531_v57, 8.507059e+37  ;;  %5738 = vpow2.f32 %v5261_v46 }
 0x7c2   :  { %2911 = vperm.xlu0 %5427, %v429_v26  }
 0x7c3   :  { %v5735_v0 = vpop.eup %5734 }
 0x7c4   :  { %v2523_v40 = vmul.f32 %v5735_v0, %v2500_v13  ;;  %v5737_v5 = vpop.eup %5736  ;;  %vm2528_vm5 = vweird.f32 %v5735_v0  ;;  %v2561_v13 = vand.u32 2147483647, %v2502_v43 }
 0x7c5   :  { %v2553_v62 = vmul.f32 %v5737_v5, %v2502_v43  ;;  %vm2529_vm7 = vmor %vm2527_vm6, %vm2528_vm5  ;;  %vm2558_vm9 = vweird.f32 %v5737_v5  ;;  %v5739_v22 = vpop.eup %5738 }
 0x7c6   :  { %v2524_v6 = vsub.f32 1.0, %v2523_v40  ;;  %v2563_v40 = vand.u32 2147483648, %v2502_v43  ;;  %vm2559_vm12 = vmor %vm2557_vm10, %vm2558_vm9  ;;  %vm2562_vm14 = vcmp.eq.f32.partialorder %v2561_v13, 8.507059e+37  ;;  %v5263_v43 = vmul.f32 -1.442695, %v7210_v34 }
 0x7c7   :  { %v2554_v36 = vsub.f32 1.0, %v2553_v62 }
 0x7c8   :  { %v2525_v14 = vmul.f32 %v5735_v0, %v2524_v6  ;;  %5740 = vpow2.f32 %v5263_v43 }
 0x7c9   :  { %v2555_v16 = vmul.f32 %v5737_v5, %v2554_v36 }
 0x7ca   :  { %v2526_v32 = vadd.f32 %v5735_v0, %v2525_v14  ;;  %v2564_v14 = vor.u32 1.1754944e-38, %v2563_v40 }
 0x7cb   :  { %v2556_v26 = vadd.f32 %v5737_v5, %v2555_v16 }
 0x7cc   :  { %v2530_v49 = vsel %vm2529_vm7, %v5735_v0, %v2526_v32 }
 0x7cd   :  { %v2535_v50 = vsel %vm2532_vm8, %v2534_v61, %v2530_v49  ;;  %v2560_v0 = vsel %vm2559_vm12, %v5737_v5, %v2556_v26  ;;  %v2504_v61 = vadd.f32 1.0, %v5739_v22  ;;  %5276 = vmatmul.msk.bf16.vlgmr.msrb.gmra.mxu3 %vm857_vm1, %v7305_v2 }
 0x7ce   :  { %v2565_v32 = vsel %vm2562_vm14, %v2564_v14, %v2560_v0  ;;  %3753 = vmatpush.bf16.msrb.mxu3 %v6170_v20 }
 0x7cf   :  { %5742 = vrcp.f32 %v2504_v61  ;;  %vm2587_vm2 = vweird.f32 %v2504_v61  ;;  %v2591_v43 = vand.u32 2147483647, %v2504_v61 }
 0x7d1   :  { %vm2592_vm4 = vcmp.eq.f32.partialorder %v2591_v43, 8.507059e+37 }
 0x7dd   :  { %5277 = vmatmul.msk.bf16.gmra.mxu3 %vm857_vm1, %v5411_v59 }
 0x7e8   :  { %v2686_v36 = vpop.permute.xlu2 %2685 }
 0x7e9   :  { %v2696_v57 = vmul.f32 %v2686_v36, %v2565_v32  ;;  %v2593_v36 = vand.u32 2147483648, %v2504_v61 }
 0x7eb   :  { %v2594_v59 = vor.u32 1.1754944e-38, %v2593_v36 }
 0x7f4   :  { %v2688_v14 = vpop.permute.xlu2 %2687 }
 0x7f8   :  { %v2684_v39 = vpop.permute.xlu1 %2683 }
 0x7f9   :  { %v2695_v6 = vmul.f32 %v2684_v39, %v2535_v50  ;;  %v5741_v39 = vpop.eup %5740 }
 0x7fb   :  { %v7320_v62 = vsel %vm2719_vm11, %v2695_v6, %v7105_v31 }
 0x7fc   :  { %v2731_v52 = vsel %vm1296_vm13, %v7320_v62, %v7324_v33 }
 0x7fd   :  { %v2735_v31 = vpack.c.bf16 %v2731_v52, %v2731_v52 }
 0x7ff   :  { %v2747_v48 = vunpack.c.l.b16 %v2735_v31 }
 0x800   :  { %v2712_v5 = vpop.permute.xlu1 %2711 }
 0x801   :  { %vm2720_vm15 = vcmp.eq.s32.totalorder %v2712_v5, 1 }
 0x802   :  { %v7332_v16 = vsel %vm2720_vm15, %v7261_v37, %v7118_v55  ;;  %v7335_v49 = vsel %vm2720_vm15, %v2696_v57, %v7121_v54  ;;  %v2506_v55 = vadd.f32 1.0, %v5741_v39  ;;  %v5743_v54 = vpop.eup %5742 }
 0x803   :  { %v2732_v34 = vsel %vm1296_vm13, %v7335_v49, %v7332_v16  ;;  %v2583_v37 = vmul.f32 %v5743_v54, %v2504_v61  ;;  %vm2588_vm0 = vweird.f32 %v5743_v54  ;;  %v2718_v61 = vpop.permute.xlu2 %2717 }
 0x804   :  { %v2736_v1 = vpack.c.bf16 %v2732_v34, %v2732_v34  ;;  %5744 = vrcp.f32 %v2506_v55  ;;  %vm2589_vm3 = vmor %vm2587_vm2, %vm2588_vm0  ;;  %v2623_v22 = vand.u32 2147483648, %v2506_v55  ;;  %vm2617_vm7 = vweird.f32 %v2506_v55 }
 0x805   :  { %v2584_v2 = vsub.f32 1.0, %v2583_v37  ;;  %vm2722_vm10 = vcmp.eq.s32.totalorder %v2718_v61, 1 }
 0x806   :  { %v2748_v26 = vunpack.c.l.b16 %v2736_v1  ;;  %v2621_v1 = vand.u32 2147483647, %v2506_v55 }
 0x807   :  { %v2585_v6 = vmul.f32 %v5743_v54, %v2584_v2 }
 0x808   :  { %v7340_v50 = vpack.c.b16 %v2748_v26, %v2747_v48  ;;  %v2715_v57 = vpop.permute.xlu1 %2714  ;;  %vm2622_vm9 = vcmp.eq.f32.partialorder %v2621_v1, 8.507059e+37 }
 0x809   :  { %v2586_v0 = vadd.f32 %v5743_v54, %v2585_v6  ;;  %vm2721_vm6 = vcmp.eq.s32.totalorder %v2715_v57, 1  ;;  %v7376_v6 = vsel %vm2722_vm10, %v7296_v19, %v7156_v11  ;;  %v8334_v11 = vld [vmem:[#allocation6_spill] sm:$0xff] }
 0x80a   :  { %2779 = vmatmul.bf16.vlgmr.msra.gmra.mxu1 %v7340_v50  ;;  %2817 = vmatmul.bf16.vlgmr.msra.gmra.mxu0 %v7340_v50  ;;  %v5745_v46 = vpop.eup %5744  ;;  %v7366_v48 = vsel %vm2721_vm6, %v7278_v60, %v7147_v53 }
 0x80b   :  { %3287 = vmatpush.bf16.msra.mxu1 %v6130_v3  ;;  %3325 = vmatpush.bf16.msra.mxu0 %v6153_v15  ;;  %v2613_v40 = vmul.f32 %v5745_v46, %v2506_v55  ;;  %v2590_v52 = vsel %vm2589_vm3, %v5743_v54, %v2586_v0  ;;  %vm2618_vm5 = vweird.f32 %v5745_v46  ;;  %v2624_v54 = vor.u32 1.1754944e-38, %v2623_v22 }
 0x80c   :  { %v2595_v31 = vsel %vm2592_vm4, %v2594_v59, %v2590_v52  ;;  %vm2619_vm8 = vmor %vm2617_vm7, %vm2618_vm5  ;;  %v8335_v59 = vld [vmem:[#allocation7_spill] sm:$0xff] }
 0x80d   :  { %v2614_v13 = vsub.f32 1.0, %v2613_v40  ;;  %v2697_v34 = vmul.f32 %v2688_v14, %v2595_v31 }
 0x80f   :  { %3288 = vmatpush.bf16.msra.mxu1 %v6142_v10  ;;  %3326 = vmatpush.bf16.msra.mxu0 %v6181_v23  ;;  %v2615_v32 = vmul.f32 %v5745_v46, %v2614_v13  ;;  %v7369_v26 = vsel %vm2721_vm6, %v2697_v34, %v7143_v51 }
 0x810   :  { %v2733_v55 = vsel %vm1296_vm13, %v7369_v26, %v7366_v48 }
 0x811   :  { %v2616_v5 = vadd.f32 %v5745_v46, %v2615_v32  ;;  %v2737_v53 = vpack.c.bf16 %v2733_v55, %v2733_v55 }
 0x813   :  { %3289 = vmatpush.bf16.msra.mxu1 %v6175_v21  ;;  %3327 = vmatpush.bf16.msra.mxu0 %v6206_v30  ;;  %v2620_v39 = vsel %vm2619_vm8, %v5745_v46, %v2616_v5  ;;  %v2749_v13 = vunpack.c.l.b16 %v2737_v53 }
 0x814   :  { %v2625_v37 = vsel %vm2622_vm9, %v2624_v54, %v2620_v39 }
 0x817   :  { %3290 = vmatpush.bf16.msra.mxu1 %v6197_v27  ;;  %3328 = vmatpush.bf16.msra.mxu0 %v6230_v41 }
 0x81b   :  { %3291 = vmatpush.bf16.msra.mxu1 %v6221_v38  ;;  %3329 = vmatpush.bf16.msra.mxu0 %v6250_v47 }
 0x81f   :  { %3292 = vmatpush.bf16.msra.mxu1 %v6244_v45  ;;  %3330 = vmatpush.bf16.msra.mxu0 %v6278_v58 }
 0x823   :  { %3293 = vmatpush.bf16.msra.mxu1 %v6272_v56  ;;  %3331 = vmatpush.bf16.msra.mxu0 %v6314_v8 }
 0x827   :  { %3294 = vmatpush.bf16.msra.mxu1 %v6311_v7  ;;  %3332 = vmatpush.bf16.msra.mxu0 %v6336_v24 }
 0x82c   :  { %v2690_v2 = vpop.permute.xlu0 %2689 }
 0x82d   :  { %v2698_v40 = vmul.f32 %v2690_v2, %v2625_v37 }
 0x82f   :  { %v7379_v60 = vsel %vm2722_vm10, %v2698_v40, %v7159_v9  ;;  %v67_v9 = vld [vmem:[%s8249_s1 + $0x98] sm:$0xff] }
 0x830   :  { %v2734_v51 = vsel %vm1296_vm13, %v7379_v60, %v7376_v6  ;;  %v99_v19 = vadd.f32 2.7182817, %v67_v9  ;;  %v2837_v32 = vpop.f32.mrf.mxu2 }
 0x831   :  { %v2738_v46 = vpack.c.bf16 %v2734_v51, %v2734_v51 }
 0x832   :  { %5746 = vlog2.f32 %v99_v19 }
 0x833   :  { %v2750_v0 = vunpack.c.l.b16 %v2738_v46 }
 0x835   :  { %v2752_v14 = vpack.c.b16 %v2750_v0, %v2749_v13  ;;  %v2799_v0 = vpop.f32.mrf.mxu3 }
 0x837   :  { %2784 = vmatmul.bf16.gmra.mxu1 %v2752_v14  ;;  %2822 = vmatmul.bf16.gmra.mxu0 %v2752_v14 }
 0x838   :  { %v2839_v61 = vpop.f32.mrf.mxu2 }
 0x83d   :  { %v2801_v9 = vpop.f32.mrf.mxu3 }
 0x847   :  { %2855 = vmatmul.bf16.vlgmr.msrb.gmra.mxu1 %v7340_v50  ;;  %v5747_v50 = vpop.eup %5746 }
 0x848   :  { %3727 = vmatpush.bf16.msrb.mxu1 %v6301_v4  ;;  %v151_v36 = vmul.f32 0.6931472, %v5747_v50  ;;  %v7406_v50 = vpop.f32.mrf.mxu3 }
 0x84a   :  { %5748 = vrcp.f32 %v151_v36  ;;  %vm466_vm11 = vweird.f32 %v151_v36  ;;  %v472_v54 = vand.u32 2147483648, %v151_v36  ;;  %v470_v37 = vand.u32 2147483647, %v151_v36 }
 0x84c   :  { %3728 = vmatpush.bf16.msrb.mxu1 %v6323_v12  ;;  %v473_v53 = vor.u32 1.1754944e-38, %v472_v54  ;;  %vm471_vm15 = vcmp.eq.f32.partialorder %v470_v37, 8.507059e+37 }
 0x850   :  { %3729 = vmatpush.bf16.msrb.mxu1 %v6342_v29  ;;  %v5749_v43 = vpop.eup %5748 }
 0x851   :  { %v462_v52 = vmul.f32 %v5749_v43, %v151_v36  ;;  %vm467_vm12 = vweird.f32 %v5749_v43  ;;  %v2842_v36 = vpop.f32.mrf.mxu2 }
 0x852   :  { %vm468_vm14 = vmor %vm466_vm11, %vm467_vm12 }
 0x853   :  { %v463_v31 = vsub.f32 1.0, %v462_v52 }
 0x854   :  { %3730 = vmatpush.bf16.msrb.mxu1 %v8323_v35 }
 0x855   :  { %v464_v34 = vmul.f32 %v5749_v43, %v463_v31 }
 0x857   :  { %2860 = vmatmul.bf16.gmra.mxu1 %v2752_v14  ;;  %v465_v55 = vadd.f32 %v5749_v43, %v464_v34 }
 0x858   :  { %3731 = vmatpush.bf16.msrb.mxu1 %v8324_v63 }
 0x859   :  { %v469_v51 = vsel %vm468_vm14, %v5749_v43, %v465_v55  ;;  %v8336_v43 = vld [vmem:[#allocation9_spill] sm:$0xff]  ;;  %v2844_v55 = vpop.f32.mrf.mxu2 }
 0x85a   :  { %v474_v46 = vsel %vm471_vm15, %v473_v53, %v469_v51 }
 0x85c   :  { %3732 = vmatpush.bf16.msrb.mxu1 %v8325_v17 }
 0x860   :  { %3733 = vmatpush.bf16.msrb.mxu1 %v8326_v28 }
 0x864   :  { %3734 = vmatpush.bf16.msrb.mxu1 %v8334_v11 }
 0x887   :  { %v2818_v57 = vpop.f32.mrf.mxu0  ;;  %v2780_v14 = vpop.f32.mrf.mxu1 }
 0x888   :  { %v2819_v5 = vadd.f32 %v2818_v57, %v8335_v59  ;;  %v2781_v31 = vadd.f32 %v2780_v14, %v8336_v43 }
 0x88a   :  { %v7397_v22 = vadd.f32 %v2837_v32, %v2819_v5  ;;  %v7411_v5 = vpop.f32.mrf.mxu3 }
 0x88c   :  { %5750 = vtanh.f32 %v7397_v22 }
 0x88f   :  { %v2820_v1 = vpop.f32.mrf.mxu0  ;;  %v2782_v19 = vpop.f32.mrf.mxu1 }
 0x890   :  { %v2821_v39 = vadd.f32 %v2820_v1, %v8335_v59  ;;  %v2800_v1 = vadd.f32 %v2799_v0, %v2781_v31 }
 0x892   :  { %v5751_v2 = vpop.eup %5750  ;;  %v7401_v40 = vadd.f32 %v2839_v61, %v2821_v39  ;;  %v2875_v51 = vpop.f32.mrf.mxu3 }
 0x893   :  { %3117 = vrot.lane.b32.xlu2 %v5751_v2, %s6039_s6  ;;  %v5278_v2 = vmul.f32 -1.442695, %v2800_v1 }
 0x894   :  { %5752 = vtanh.f32 %v7401_v40 }
 0x89a   :  { %v5753_v13 = vpop.eup %5752 }
 0x89b   :  { %3119 = vrot.lane.b32.xlu0 %v5753_v13, %s6039_s6  ;;  %2926 = vperm.xlu2 %5428, %v474_v46   ;;  %v8337_v13 = vld [vmem:[#allocation8_spill] sm:$0xff] }
 0x8b4   :  { %v7408_v32 = vpop.f32.mrf.mxu1  ;;  %v2823_v52 = vpop.f32.mrf.mxu0 }
 0x8b5   :  { %v2824_v57 = vadd.f32 %v2823_v52, %v8335_v59 }
 0x8b7   :  { %v7414_v34 = vadd.f32 %v2842_v36, %v2824_v57  ;;  %v2877_v57 = vpop.f32.mrf.mxu3 }
 0x8b9   :  { %5754 = vtanh.f32 %v7414_v34 }
 0x8bc   :  { %v7417_v61 = vpop.f32.mrf.mxu1  ;;  %v2825_v39 = vpop.f32.mrf.mxu0 }
 0x8bd   :  { %v2826_v54 = vadd.f32 %v2825_v39, %v8335_v59 }
 0x8bf   :  { %v5755_v37 = vpop.eup %5754  ;;  %v7420_v53 = vadd.f32 %v2844_v55, %v2826_v54  ;;  %v2912_v55 = vpop.permute.xlu0 %2911 }
 0x8c0   :  { %3121 = vrot.lane.b32.xlu0 %v5755_v37, %s6039_s6 }
 0x8c1   :  { %5756 = vtanh.f32 %v7420_v53 }
 0x8c2   :  { %5758 = vpow2.f32 %v5278_v2 }
 0x8c4   :  { %v2856_v46 = vpop.f32.mrf.mxu1 }
 0x8c5   :  { %v2857_v14 = vadd.f32 %v2856_v46, %v8337_v13  ;;  %v2880_v46 = vpop.f32.mrf.mxu3 }
 0x8c7   :  { %v5757_v0 = vpop.eup %5756  ;;  %v2876_v36 = vadd.f32 %v2875_v51, %v2857_v14 }
 0x8c8   :  { %3123 = vrot.lane.b32.xlu1 %v5757_v0, %s6039_s6  ;;  %v5759_v52 = vpop.eup %5758 }
 0x8c9   :  { %5760 = vtanh.f32 %v2876_v36  ;;  %v2977_v31 = vadd.f32 1.0, %v5759_v52  ;;  %v2917_v52 = vpop.permute.xlu1 %2916 }
 0x8cb   :  { %5762 = vrcp.f32 %v2977_v31  ;;  %vm2990_vm2 = vweird.f32 %v2977_v31 }
 0x8cc   :  { %v2858_v1 = vpop.f32.mrf.mxu1 }
 0x8cd   :  { %v2859_v39 = vadd.f32 %v2858_v1, %v8337_v13  ;;  %v2783_v1 = vadd.f32 %v2782_v19, %v8336_v43 }
 0x8cf   :  { %v5761_v54 = vpop.eup %5760  ;;  %v2878_v37 = vadd.f32 %v2877_v57, %v2859_v39 }
 0x8d0   :  { %2893 = vrot.lane.b32.xlu2 %v5761_v54, %s6039_s6  ;;  %v2929_v2 = vmul.f32 %v5761_v54, %v2912_v55  ;;  %v2802_v54 = vadd.f32 %v2801_v9, %v2783_v1 }
 0x8d1   :  { %5764 = vtanh.f32 %v2878_v37  ;;  %v5763_v0 = vpop.eup %5762 }
 0x8d2   :  { %2937 = vrot.lane.b32.xlu1 %v2929_v2, %s6039_s6  ;;  %v2986_v39 = vmul.f32 %v5763_v0, %v2977_v31  ;;  %v5280_v37 = vmul.f32 -1.442695, %v2802_v54  ;;  %vm2991_vm0 = vweird.f32 %v5763_v0 }
 0x8d3   :  { %vm2992_vm3 = vmor %vm2990_vm2, %vm2991_vm0 }
 0x8d4   :  { %v2861_v51 = vpop.f32.mrf.mxu1  ;;  %v2987_v55 = vsub.f32 1.0, %v2986_v39 }
 0x8d5   :  { %v2862_v14 = vadd.f32 %v2861_v51, %v8337_v13 }
 0x8d6   :  { %v2988_v51 = vmul.f32 %v5763_v0, %v2987_v55 }
 0x8d7   :  { %v5765_v36 = vpop.eup %5764  ;;  %v2881_v59 = vadd.f32 %v2880_v46, %v2862_v14  ;;  %v2996_v46 = vand.u32 2147483648, %v2977_v31  ;;  %v2882_v14 = vpop.f32.mrf.mxu3 }
 0x8d8   :  { %2895 = vrot.lane.b32.xlu0 %v5765_v36, %s6039_s6  ;;  %v2930_v57 = vmul.f32 %v5765_v36, %v2917_v52  ;;  %v2989_v28 = vadd.f32 %v5763_v0, %v2988_v51  ;;  %v2994_v36 = vand.u32 2147483647, %v2977_v31 }
 0x8d9   :  { %5766 = vtanh.f32 %v2881_v59  ;;  %v2997_v1 = vor.u32 1.1754944e-38, %v2996_v46 }
 0x8da   :  { %2939 = vrot.lane.b32.xlu2 %v2930_v57, %s6039_s6  ;;  %5768 = vpow2.f32 %v5280_v37  ;;  %v2993_v59 = vsel %vm2992_vm3, %v5763_v0, %v2989_v28  ;;  %vm2995_vm4 = vcmp.eq.f32.partialorder %v2994_v36, 8.507059e+37  ;;  %v2786_v0 = vadd.f32 %v7408_v32, %v8336_v43 }
 0x8db   :  { %v7435_v54 = vsel %vm2995_vm4, %v2997_v1, %v2993_v59 }
 0x8dc   :  { %v2863_v11 = vpop.f32.mrf.mxu1  ;;  %v2805_v46 = vadd.f32 %v7406_v50, %v2786_v0  ;;  %v2922_v0 = vpop.permute.xlu1 %2921 }
 0x8dd   :  { %v2864_v19 = vadd.f32 %v2863_v11, %v8337_v13 }
 0x8de   :  { %v5282_v36 = vmul.f32 -1.442695, %v2805_v46 }
 0x8df   :  { %v5767_v2 = vpop.eup %5766  ;;  %v2883_v9 = vadd.f32 %v2882_v14, %v2864_v19 }
 0x8e0   :  { %v5769_v52 = vpop.eup %5768 }
 0x8e1   :  { %v2979_v57 = vadd.f32 1.0, %v5769_v52  ;;  %5770 = vtanh.f32 %v2883_v9  ;;  %v2788_v52 = vadd.f32 %v7417_v61, %v8336_v43 }
 0x8e2   :  { %2897 = vrot.lane.b32.xlu2 %v5767_v2, %s6039_s6 }
 0x8e3   :  { %5772 = vrcp.f32 %v2979_v57  ;;  %v3026_v9 = vand.u32 2147483648, %v2979_v57  ;;  %vm3020_vm6 = vweird.f32 %v2979_v57  ;;  %v3024_v1 = vand.u32 2147483647, %v2979_v57 }
 0x8e4   :  { %5774 = vpow2.f32 %v5282_v36 }
 0x8e5   :  { %vm3025_vm8 = vcmp.eq.f32.partialorder %v3024_v1, 8.507059e+37 }
 0x8e7   :  { %v5771_v11 = vpop.eup %5770 }
 0x8e9   :  { %v5773_v31 = vpop.eup %5772 }
 0x8ea   :  { %v3016_v28 = vmul.f32 %v5773_v31, %v2979_v57  ;;  %vm3021_vm5 = vweird.f32 %v5773_v31  ;;  %v2931_v57 = vmul.f32 %v5767_v2, %v2922_v0 }
 0x8eb   :  { %vm3022_vm7 = vmor %vm3020_vm6, %vm3021_vm5 }
 0x8ec   :  { %v3017_v19 = vsub.f32 1.0, %v3016_v28  ;;  %v5775_v28 = vpop.eup %5774 }
 0x8ed   :  { %v3118_v39 = vpop.permute.xlu2 %3117  ;;  %v2981_v61 = vadd.f32 1.0, %v5775_v28 }
 0x8ee   :  { %v3129_v55 = vmul.f32 %v3118_v39, %v7435_v54  ;;  %v3018_v14 = vmul.f32 %v5773_v31, %v3017_v19  ;;  %v2807_v39 = vadd.f32 %v7411_v5, %v2788_v52 }
 0x8ef   :  { %vm3050_vm10 = vweird.f32 %v2981_v61 }
 0x8f0   :  { %3137 = vrot.lane.b32.xlu0 %v3129_v55, %s6039_s6  ;;  %v3019_v59 = vadd.f32 %v5773_v31, %v3018_v14  ;;  %v5284_v32 = vmul.f32 -1.442695, %v2807_v39  ;;  %v3056_v39 = vand.u32 2147483648, %v2981_v61 }
 0x8f2   :  { %v3023_v55 = vsel %vm3022_vm7, %v5773_v31, %v3019_v59  ;;  %5776 = vpow2.f32 %v5284_v32  ;;  %v3057_v32 = vor.u32 1.1754944e-38, %v3056_v39  ;;  %v70_v39 = vld [vmem:[%s8249_s1 + $0xb0] sm:$0xff] }
 0x8f3   :  { %5778 = vrcp.f32 %v2981_v61 }
 0x8f5   :  { %v2927_v37 = vpop.permute.xlu2 %2926 }
 0x8f6   :  { %v2932_v51 = vmul.f32 %v5771_v11, %v2927_v37 }
 0x8f8   :  { %2899 = vrot.lane.b32.xlu0 %v5771_v11, %s6039_s6  ;;  %2943 = vrot.lane.b32.xlu2 %v2932_v51, %s6039_s6  ;;  %v3027_v11 = vor.u32 1.1754944e-38, %v3026_v9  ;;  %v5777_v19 = vpop.eup %5776 }
 0x8f9   :  { %v2983_v5 = vadd.f32 1.0, %v5777_v19  ;;  %v5779_v31 = vpop.eup %5778 }
 0x8fa   :  { %v7447_v50 = vsel %vm3025_vm8, %v3027_v11, %v3023_v55  ;;  %v3046_v46 = vmul.f32 %v5779_v31, %v2981_v61  ;;  %vm3051_vm9 = vweird.f32 %v5779_v31  ;;  %v3054_v55 = vand.u32 2147483647, %v2981_v61 }
 0x8fb   :  { %5780 = vrcp.f32 %v2983_v5  ;;  %vm3052_vm11 = vmor %vm3050_vm10, %vm3051_vm9  ;;  %vm3080_vm15 = vweird.f32 %v2983_v5  ;;  %v3084_v19 = vand.u32 2147483647, %v2983_v5 }
 0x8fc   :  { %v3047_v14 = vsub.f32 1.0, %v3046_v46  ;;  %vm3055_vm12 = vcmp.eq.f32.partialorder %v3054_v55, 8.507059e+37 }
 0x8fd   :  { %vm3085_vm2 = vcmp.eq.f32.partialorder %v3084_v19, 8.507059e+37 }
 0x8fe   :  { %v3048_v52 = vmul.f32 %v5779_v31, %v3047_v14 }
 0x900   :  { %v3049_v9 = vadd.f32 %v5779_v31, %v3048_v52 }
 0x901   :  { %v5781_v36 = vpop.eup %5780 }
 0x902   :  { %v3076_v59 = vmul.f32 %v5781_v36, %v2983_v5  ;;  %v3053_v11 = vsel %vm3052_vm11, %v5779_v31, %v3049_v9  ;;  %vm3081_vm14 = vweird.f32 %v5781_v36 }
 0x903   :  { %vm3082_vm0 = vmor %vm3080_vm15, %vm3081_vm14  ;;  %vm3180_vm15 = vcmp.gt.s32.totalorder %v7288_v42, 4  ;;  %v5279_v42 = vmul.f32 -1.442695, %v7397_v22 }
 0x904   :  { %v3077_v1 = vsub.f32 1.0, %v3076_v59  ;;  %v7463_v59 = vld [vmem:[%s8251_s2] sm:$0xff] }
 0x905   :  { %8338 = vst [vmem:[#allocation2_spill] sm:$0xff] %v7463_v59  ;;  %vm3177_vm3 = vcmp.gt.s32.totalorder %v7463_v59, 4 }
 0x906   :  { %v3078_v2 = vmul.f32 %v5781_v36, %v3077_v1 }
 0x908   :  { %v3079_v0 = vadd.f32 %v5781_v36, %v3078_v2 }
 0x90a   :  { %v3083_v46 = vsel %vm3082_vm0, %v5781_v36, %v3079_v0  ;;  %v69_v36 = vld [vmem:[%s8249_s1 + $0xa8] sm:$0xff] }
 0x90b   :  { %v101_v9 = vadd.f32 2.7182817, %v69_v36  ;;  %v7482_v36 = vld [vmem:[%s8251_s2 + $0x8] sm:$0xff] }
 0x90c   :  { %8339 = vst [vmem:[#allocation10_spill] sm:$0xff] %v7482_v36  ;;  %vm3178_vm4 = vcmp.gt.s32.totalorder %v7482_v36, 4 }
 0x90d   :  { %v3120_v37 = vpop.permute.xlu0 %3119  ;;  %5782 = vlog2.f32 %v101_v9  ;;  %v3182_v9 = vsel %vm3178_vm4, 1, %v8310_v25 }
 0x90e   :  { %v3130_v51 = vmul.f32 %v3120_v37, %v7447_v50 }
 0x910   :  { %3139 = vrot.lane.b32.xlu1 %v3130_v51, %s6039_s6  ;;  %v7452_v51 = vsel %vm3055_vm12, %v3057_v32, %v3053_v11  ;;  %v102_v32 = vadd.f32 2.7182817, %v70_v39 }
 0x912   :  { %5784 = vlog2.f32 %v102_v32 }
 0x918   :  { %2941 = vrot.lane.b32.xlu1 %v2931_v57, %s6039_s6  ;;  %v3086_v57 = vand.u32 2147483648, %v2983_v5  ;;  %v3181_v5 = vsel %vm3177_vm3, 1, %v8310_v25 }
 0x91a   :  { %v3087_v61 = vor.u32 1.1754944e-38, %v3086_v57 }
 0x91c   :  { %v7456_v31 = vsel %vm3085_vm2, %v3087_v61, %v3083_v46 }
 0x92a   :  { %v2894_v1 = vpop.permute.xlu2 %2893 }
 0x92b   :  { %v2905_v2 = vsub.f32 %v7324_v33, %v2894_v1 }
 0x932   :  { %v3122_v37 = vpop.permute.xlu0 %3121 }
 0x933   :  { %v3131_v28 = vmul.f32 %v3122_v37, %v7452_v51  ;;  %v5783_v37 = vpop.eup %5782 }
 0x934   :  { %v155_v0 = vmul.f32 0.6931472, %v5783_v37  ;;  %v5785_v61 = vpop.eup %5784 }
 0x935   :  { %3141 = vrot.lane.b32.xlu0 %v3131_v28, %s6039_s6 }
 0x936   :  { %5786 = vrcp.f32 %v155_v0  ;;  %vm496_vm6 = vweird.f32 %v155_v0 }
 0x93a   :  { %v3124_v14 = vpop.permute.xlu1 %3123 }
 0x93b   :  { %v3132_v52 = vmul.f32 %v3124_v14, %v7456_v31  ;;  %v157_v14 = vmul.f32 0.6931472, %v5785_v61  ;;  %v500_v61 = vand.u32 2147483647, %v155_v0 }
 0x93d   :  { %3143 = vrot.lane.b32.xlu1 %v3132_v52, %s6039_s6  ;;  %v5787_v52 = vpop.eup %5786  ;;  %vm501_vm9 = vcmp.eq.f32.partialorder %v500_v61, 8.507059e+37  ;;  %vm511_vm10 = vweird.f32 %v157_v14  ;;  %v515_v63 = vand.u32 2147483647, %v157_v14 }
 0x93e   :  { %vm497_vm7 = vweird.f32 %v5787_v52 }
 0x93f   :  { %vm498_vm8 = vmor %vm496_vm6, %vm497_vm7  ;;  %vm516_vm14 = vcmp.eq.f32.partialorder %v515_v63, 8.507059e+37 }
 0x944   :  { %v2938_v55 = vpop.permute.xlu1 %2937 }
 0x945   :  { %3186 = vperm.xlu1 %5429, %v3181_v5   ;;  %v2949_v28 = vadd.f32 %v2938_v55, %v2905_v2  ;;  %v7489_v55 = vld [vmem:[%s8251_s2 + $0x10] sm:$0xff] }
 0x946   :  { %8340 = vst [vmem:[#allocation11_spill] sm:$0xff] %v7489_v55  ;;  %vm3179_vm5 = vcmp.gt.s32.totalorder %v7489_v55, 4 }
 0x947   :  { %v3109_v57 = vmul.f32 %v7435_v54, %v2949_v28  ;;  %v492_v54 = vmul.f32 %v5787_v52, %v155_v0  ;;  %v3183_v28 = vsel %vm3179_vm5, 1, %v8310_v25 }
 0x949   :  { %v493_v1 = vsub.f32 1.0, %v492_v54  ;;  %v2940_v54 = vpop.permute.xlu2 %2939 }
 0x94a   :  { %v2896_v11 = vpop.permute.xlu0 %2895 }
 0x94b   :  { %v494_v2 = vmul.f32 %v5787_v52, %v493_v1  ;;  %v2906_v37 = vsub.f32 %v7332_v16, %v2896_v11  ;;  %v517_v11 = vand.u32 2147483648, %v157_v14 }
 0x962   :  { %v3138_v19 = vpop.permute.xlu0 %3137 }
 0x963   :  { %v7475_v46 = vadd.f32 %v3138_v19, %v3109_v57  ;;  %v502_v57 = vand.u32 2147483648, %v155_v0  ;;  %v495_v19 = vadd.f32 %v5787_v52, %v494_v2  ;;  %v518_v0 = vor.u32 1.1754944e-38, %v517_v11 }
 0x965   :  { %5788 = vtanh.f32 %v7475_v46  ;;  %v503_v36 = vor.u32 1.1754944e-38, %v502_v57  ;;  %v499_v59 = vsel %vm498_vm8, %v5787_v52, %v495_v19 }
 0x966   :  { %5790 = vrcp.f32 %v157_v14 }
 0x967   :  { %v504_v13 = vsel %vm501_vm9, %v503_v36, %v499_v59 }
 0x96b   :  { %v5789_v5 = vpop.eup %5788 }
 0x96c   :  { %3161 = vrot.lane.b32.xlu2 %v5789_v5, %s6039_s6  ;;  %v5791_v39 = vpop.eup %5790 }
 0x96d   :  { %v507_v32 = vmul.f32 %v5791_v39, %v157_v14  ;;  %vm512_vm11 = vweird.f32 %v5791_v39  ;;  %v2898_v14 = vpop.permute.xlu2 %2897 }
 0x96e   :  { %vm513_vm12 = vmor %vm511_vm10, %vm512_vm11 }
 0x96f   :  { %v508_v5 = vsub.f32 1.0, %v507_v32 }
 0x971   :  { %v509_v55 = vmul.f32 %v5791_v39, %v508_v5 }
 0x973   :  { %v510_v17 = vadd.f32 %v5791_v39, %v509_v55 }
 0x974   :  { %3189 = vperm.xlu2 %5428, %v3182_v9   ;;  %v2950_v9 = vadd.f32 %v2940_v54, %v2906_v37 }
 0x975   :  { %v514_v32 = vsel %vm513_vm12, %v5791_v39, %v510_v17  ;;  %v2944_v5 = vpop.permute.xlu2 %2943 }
 0x976   :  { %v3110_v1 = vmul.f32 %v7447_v50, %v2950_v9  ;;  %v519_v52 = vsel %vm516_vm14, %v518_v0, %v514_v32  ;;  %v68_v50 = vld [vmem:[%s8249_s1 + $0xa0] sm:$0xff] }
 0x977   :  { %v100_v59 = vadd.f32 2.7182817, %v68_v50 }
 0x97c   :  { %3192 = vperm.xlu2 %5428, %v3183_v28   ;;  %v2907_v28 = vsub.f32 %v7366_v48, %v2898_v14 }
 0x982   :  { %v3140_v43 = vpop.permute.xlu1 %3139 }
 0x983   :  { %v7495_v2 = vadd.f32 %v3140_v43, %v3110_v1 }
 0x984   :  { %3394 = vperm.xlu2 %5428, %v504_v13   ;;  %v2900_v13 = vpop.permute.xlu0 %2899 }
 0x985   :  { %5792 = vtanh.f32 %v7495_v2  ;;  %v2908_v63 = vsub.f32 %v7376_v6, %v2900_v13 }
 0x986   :  { %5794 = vlog2.f32 %v100_v59 }
 0x987   :  { %v2952_v54 = vadd.f32 %v2944_v5, %v2908_v63 }
 0x989   :  { %v3112_v1 = vmul.f32 %v7456_v31, %v2952_v54 }
 0x98a   :  { %v2942_v55 = vpop.permute.xlu1 %2941 }
 0x98b   :  { %v5793_v37 = vpop.eup %5792  ;;  %v2951_v17 = vadd.f32 %v2942_v55, %v2907_v28  ;;  %v5281_v28 = vmul.f32 -1.442695, %v7401_v40 }
 0x98c   :  { %3399 = vperm.xlu2 %5428, %v519_v52   ;;  %3163 = vrot.lane.b32.xlu0 %v5793_v37, %s6039_s6  ;;  %v5795_v43 = vpop.eup %5794  ;;  %v3184_v37 = vsel %vm3180_vm15, 1, %v8310_v25 }
 0x98d   :  { %v153_v36 = vmul.f32 0.6931472, %v5795_v43  ;;  %v3111_v39 = vmul.f32 %v7452_v51, %v2951_v17 }
 0x98f   :  { %5796 = vrcp.f32 %v153_v36  ;;  %vm481_vm0 = vweird.f32 %v153_v36  ;;  %v487_v50 = vand.u32 2147483648, %v153_v36  ;;  %v485_v43 = vand.u32 2147483647, %v153_v36 }
 0x991   :  { %v488_v14 = vor.u32 1.1754944e-38, %v487_v50  ;;  %vm486_vm4 = vcmp.eq.f32.partialorder %v485_v43, 8.507059e+37  ;;  %v5283_v43 = vmul.f32 -1.442695, %v7414_v34 }
 0x995   :  { %v5797_v19 = vpop.eup %5796 }
 0x996   :  { %v477_v9 = vmul.f32 %v5797_v19, %v153_v36  ;;  %vm482_vm2 = vweird.f32 %v5797_v19 }
 0x997   :  { %vm483_vm3 = vmor %vm481_vm0, %vm482_vm2 }
 0x998   :  { %v478_v0 = vsub.f32 1.0, %v477_v9 }
 0x99a   :  { %v479_v51 = vmul.f32 %v5797_v19, %v478_v0 }
 0x99c   :  { %v480_v59 = vadd.f32 %v5797_v19, %v479_v51 }
 0x99e   :  { %v484_v13 = vsel %vm483_vm3, %v5797_v19, %v480_v59  ;;  %v7521_v19 = vld [vmem:[%s8248_s0 + $0x50] sm:$0xff] }
 0x99f   :  { %v489_v55 = vsel %vm486_vm4, %v488_v14, %v484_v13  ;;  %5294 = vmatmul.msk.bf16.vlgmr.msrb.gmra.mxu2 %vm857_vm1, %v7521_v19  ;;  %5296 = vmatmul.msk.bf16.vlgmr.msra.gmra.mxu3 %vm857_vm1, %v7521_v19 }
 0x9a0   :  { %3791 = vmatpush.bf16.msrb.mxu2 %v6162_v18  ;;  %3829 = vmatpush.bf16.msra.mxu3 %v6239_v44 }
 0x9a7   :  { %v3142_v57 = vpop.permute.xlu0 %3141 }
 0x9a8   :  { %v7505_v61 = vadd.f32 %v3142_v57, %v3111_v39 }
 0x9aa   :  { %5798 = vtanh.f32 %v7505_v61 }
 0x9af   :  { %v3144_v11 = vpop.permute.xlu1 %3143 }
 0x9b0   :  { %v5799_v32 = vpop.eup %5798  ;;  %v7509_v52 = vadd.f32 %v3144_v11, %v3112_v1 }
 0x9b1   :  { %3165 = vrot.lane.b32.xlu0 %v5799_v32, %s6039_s6 }
 0x9b2   :  { %5800 = vtanh.f32 %v7509_v52 }
 0x9b3   :  { %5802 = vpow2.f32 %v5279_v42 }
 0x9b4   :  { %5804 = vpow2.f32 %v5281_v28 }
 0x9b7   :  { %v3187_v14 = vpop.permute.xlu1 %3186 }
 0x9b8   :  { %v5801_v31 = vpop.eup %5800  ;;  %vm3197_vm11 = vcmp.eq.s32.totalorder %v3187_v14, 1 }
 0x9b9   :  { %3195 = vperm.xlu0 %5427, %v3184_v37   ;;  %3167 = vrot.lane.b32.xlu1 %v5801_v31, %s6039_s6  ;;  %v5803_v17 = vpop.eup %5802  ;;  %v7535_v34 = vsel %vm3197_vm11, %v7475_v46, %v7324_v33 }
 0x9ba   :  { %v2978_v63 = vadd.f32 1.0, %v5803_v17  ;;  %v5805_v36 = vpop.eup %5804 }
 0x9bb   :  { %v2980_v39 = vadd.f32 1.0, %v5805_v36 }
 0x9bc   :  { %5806 = vrcp.f32 %v2978_v63  ;;  %v3011_v0 = vand.u32 2147483648, %v2978_v63  ;;  %vm3005_vm6 = vweird.f32 %v2978_v63  ;;  %v3009_v32 = vand.u32 2147483647, %v2978_v63 }
 0x9bd   :  { %5808 = vrcp.f32 %v2980_v39  ;;  %v3041_v42 = vand.u32 2147483648, %v2980_v39  ;;  %vm3035_vm10 = vweird.f32 %v2980_v39  ;;  %v3039_v28 = vand.u32 2147483647, %v2980_v39 }
 0x9be   :  { %v3012_v59 = vor.u32 1.1754944e-38, %v3011_v0  ;;  %vm3010_vm8 = vcmp.eq.f32.partialorder %v3009_v32, 8.507059e+37  ;;  %5810 = vpow2.f32 %v5283_v43 }
 0x9bf   :  { %vm3040_vm14 = vcmp.eq.f32.partialorder %v3039_v28, 8.507059e+37 }
 0x9c1   :  { %3389 = vperm.xlu1 %5429, %v489_v55  }
 0x9c2   :  { %v5807_v57 = vpop.eup %5806 }
 0x9c3   :  { %v3001_v5 = vmul.f32 %v5807_v57, %v2978_v63  ;;  %v5809_v9 = vpop.eup %5808  ;;  %vm3006_vm5 = vweird.f32 %v5807_v57 }
 0x9c4   :  { %v3031_v40 = vmul.f32 %v5809_v9, %v2980_v39  ;;  %vm3007_vm7 = vmor %vm3005_vm6, %vm3006_vm5  ;;  %vm3036_vm9 = vweird.f32 %v5809_v9 }
 0x9c5   :  { %v3002_v54 = vsub.f32 1.0, %v3001_v5  ;;  %vm3037_vm12 = vmor %vm3035_vm10, %vm3036_vm9  ;;  %v5285_v5 = vmul.f32 -1.442695, %v7420_v53 }
 0x9c6   :  { %v3032_v11 = vsub.f32 1.0, %v3031_v40  ;;  %v3162_v51 = vpop.permute.xlu2 %3161 }
 0x9c7   :  { %v3003_v22 = vmul.f32 %v5807_v57, %v3002_v54  ;;  %5812 = vpow2.f32 %v5285_v5 }
 0x9c8   :  { %v3033_v50 = vmul.f32 %v5809_v9, %v3032_v11 }
 0x9c9   :  { %v3004_v1 = vadd.f32 %v5807_v57, %v3003_v22 }
 0x9ca   :  { %v3034_v55 = vadd.f32 %v5809_v9, %v3033_v50 }
 0x9cb   :  { %v3008_v37 = vsel %vm3007_vm7, %v5807_v57, %v3004_v1  ;;  %v3042_v57 = vor.u32 1.1754944e-38, %v3041_v42 }
 0x9cc   :  { %v3013_v31 = vsel %vm3010_vm8, %v3012_v59, %v3008_v37  ;;  %v3038_v36 = vsel %vm3037_vm12, %v5809_v9, %v3034_v55 }
 0x9cd   :  { %v3173_v13 = vmul.f32 %v3162_v51, %v3013_v31  ;;  %v3043_v54 = vsel %vm3040_vm14, %v3042_v57, %v3038_v36  ;;  %v5413_v51 = vld [vmem:[%s8248_s0 + $0x58] sm:$0xff] }
 0x9ce   :  { %v3190_v63 = vpop.permute.xlu2 %3189  ;;  %5297 = vmatmul.msk.bf16.gmra.mxu3 %vm857_vm1, %v5413_v51  ;;  %5295 = vmatmul.msk.bf16.gmra.mxu2 %vm857_vm1, %v5413_v51 }
 0x9cf   :  { %v7531_v17 = vsel %vm3197_vm11, %v3173_v13, %v7320_v62  ;;  %vm3198_vm15 = vcmp.eq.s32.totalorder %v3190_v63, 1  ;;  %v5811_v62 = vpop.eup %5810 }
 0x9d0   :  { %v3209_v39 = vsel %vm1296_vm13, %v7531_v17, %v7535_v34  ;;  %v7543_v9 = vsel %vm3198_vm15, %v7495_v2, %v7332_v16  ;;  %v2982_v46 = vadd.f32 1.0, %v5811_v62  ;;  %v5813_v16 = vpop.eup %5812 }
 0x9d1   :  { %v3213_v1 = vpack.c.bf16 %v3209_v39, %v3209_v39 }
 0x9d2   :  { %5814 = vrcp.f32 %v2982_v46  ;;  %v3071_v42 = vand.u32 2147483648, %v2982_v46  ;;  %vm3065_vm2 = vweird.f32 %v2982_v46  ;;  %v3069_v28 = vand.u32 2147483647, %v2982_v46 }
 0x9d3   :  { %v3225_v0 = vunpack.c.l.b16 %v3213_v1 }
 0x9d4   :  { %vm3070_vm4 = vcmp.eq.f32.partialorder %v3069_v28, 8.507059e+37 }
 0x9d6   :  { %v3193_v5 = vpop.permute.xlu2 %3192 }
 0x9d7   :  { %vm3199_vm7 = vcmp.eq.s32.totalorder %v3193_v5, 1 }
 0x9d8   :  { %v5815_v2 = vpop.eup %5814 }
 0x9d9   :  { %v3061_v50 = vmul.f32 %v5815_v2, %v2982_v46  ;;  %vm3066_vm0 = vweird.f32 %v5815_v2  ;;  %v7585_v46 = vsel %vm3199_vm7, %v7505_v61, %v7366_v48 }
 0x9da   :  { %vm3067_vm3 = vmor %vm3065_vm2, %vm3066_vm0 }
 0x9db   :  { %v3062_v59 = vsub.f32 1.0, %v3061_v50 }
 0x9dd   :  { %v3063_v31 = vmul.f32 %v5815_v2, %v3062_v59 }
 0x9de   :  { %5298 = vmatmul.msk.bf16.vlgmr.msra.gmra.mxu2 %vm857_vm1, %v7521_v19  ;;  %v3072_v19 = vor.u32 1.1754944e-38, %v3071_v42 }
 0x9df   :  { %4231 = vmatpush.bf16.msra.mxu2 %v6170_v20  ;;  %v3064_v13 = vadd.f32 %v5815_v2, %v3063_v31  ;;  %v8344_v31 = vld [vmem:[#allocation6_spill] sm:$0xff] }
 0x9e1   :  { %v3068_v63 = vsel %vm3067_vm3, %v5815_v2, %v3064_v13 }
 0x9e2   :  { %v3073_v20 = vsel %vm3070_vm4, %v3072_v19, %v3068_v63  ;;  %v8345_v63 = vld [vmem:[#allocation9_spill] sm:$0xff]  ;;  %v8346_v19 = vld [vmem:[#allocation7_spill] sm:$0xff] }
 0x9ee   :  { %5299 = vmatmul.msk.bf16.gmra.mxu2 %vm857_vm1, %v5413_v51 }
 0x9fe   :  { %v3164_v22 = vpop.permute.xlu0 %3163 }
 0x9ff   :  { %v3174_v40 = vmul.f32 %v3164_v22, %v3043_v54 }
 0xa01   :  { %v7546_v33 = vsel %vm3198_vm15, %v3174_v40, %v7335_v49  ;;  %v2984_v49 = vadd.f32 1.0, %v5813_v16 }
 0xa02   :  { %v3210_v53 = vsel %vm1296_vm13, %v7546_v33, %v7543_v9 }
 0xa03   :  { %v3214_v11 = vpack.c.bf16 %v3210_v53, %v3210_v53  ;;  %5816 = vrcp.f32 %v2984_v49  ;;  %v3101_v22 = vand.u32 2147483648, %v2984_v49  ;;  %vm3095_vm6 = vweird.f32 %v2984_v49 }
 0xa04   :  { %v3099_v40 = vand.u32 2147483647, %v2984_v49 }
 0xa05   :  { %v3226_v32 = vunpack.c.l.b16 %v3214_v11  ;;  %v3102_v53 = vor.u32 1.1754944e-38, %v3101_v22 }
 0xa06   :  { %vm3100_vm9 = vcmp.eq.f32.partialorder %v3099_v40, 8.507059e+37 }
 0xa07   :  { %v7554_v37 = vpack.c.b16 %v3226_v32, %v3225_v0 }
 0xa09   :  { %3257 = vmatmul.bf16.vlgmr.msrb.gmra.mxu0 %v7554_v37  ;;  %3295 = vmatmul.bf16.vlgmr.msra.gmra.mxu1 %v7554_v37  ;;  %v5817_v43 = vpop.eup %5816 }
 0xa0a   :  { %3765 = vmatpush.bf16.msrb.mxu0 %v6130_v3  ;;  %3803 = vmatpush.bf16.msra.mxu1 %v6153_v15  ;;  %v3091_v14 = vmul.f32 %v5817_v43, %v2984_v49  ;;  %vm3096_vm5 = vweird.f32 %v5817_v43 }
 0xa0b   :  { %vm3097_vm8 = vmor %vm3095_vm6, %vm3096_vm5 }
 0xa0c   :  { %v3092_v55 = vsub.f32 1.0, %v3091_v14 }
 0xa0e   :  { %3766 = vmatpush.bf16.msrb.mxu0 %v6142_v10  ;;  %3804 = vmatpush.bf16.msra.mxu1 %v6181_v23  ;;  %v3093_v36 = vmul.f32 %v5817_v43, %v3092_v55 }
 0xa10   :  { %v3094_v54 = vadd.f32 %v5817_v43, %v3093_v36 }
 0xa12   :  { %3767 = vmatpush.bf16.msrb.mxu0 %v6175_v21  ;;  %3805 = vmatpush.bf16.msra.mxu1 %v6206_v30  ;;  %v3098_v1 = vsel %vm3097_vm8, %v5817_v43, %v3094_v54 }
 0xa13   :  { %v3103_v0 = vsel %vm3100_vm9, %v3102_v53, %v3098_v1 }
 0xa16   :  { %3768 = vmatpush.bf16.msrb.mxu0 %v6197_v27  ;;  %3806 = vmatpush.bf16.msra.mxu1 %v6230_v41 }
 0xa1a   :  { %3769 = vmatpush.bf16.msrb.mxu0 %v6221_v38  ;;  %3807 = vmatpush.bf16.msra.mxu1 %v6250_v47 }
 0xa1e   :  { %3770 = vmatpush.bf16.msrb.mxu0 %v6244_v45  ;;  %3808 = vmatpush.bf16.msra.mxu1 %v6278_v58 }
 0xa22   :  { %3771 = vmatpush.bf16.msrb.mxu0 %v6272_v56  ;;  %3809 = vmatpush.bf16.msra.mxu1 %v6314_v8  ;;  %v3315_v13 = vpop.f32.mrf.mxu3 }
 0xa23   :  { %v3166_v57 = vpop.permute.xlu0 %3165 }
 0xa24   :  { %v3175_v39 = vmul.f32 %v3166_v57, %v3073_v20 }
 0xa26   :  { %3772 = vmatpush.bf16.msrb.mxu0 %v6311_v7  ;;  %3810 = vmatpush.bf16.msra.mxu1 %v6336_v24  ;;  %v7580_v62 = vsel %vm3199_vm7, %v3175_v39, %v7369_v26 }
 0xa27   :  { %v3211_v16 = vsel %vm1296_vm13, %v7580_v62, %v7585_v46 }
 0xa28   :  { %v3215_v2 = vpack.c.bf16 %v3211_v16, %v3211_v16 }
 0xa2a   :  { %v3227_v50 = vunpack.c.l.b16 %v3215_v2  ;;  %v3317_v40 = vpop.f32.mrf.mxu3 }
 0xa2b   :  { %v3196_v11 = vpop.permute.xlu0 %3195  ;;  %v3168_v32 = vpop.permute.xlu1 %3167 }
 0xa2c   :  { %vm3200_vm10 = vcmp.eq.s32.totalorder %v3196_v11, 1  ;;  %v3176_v49 = vmul.f32 %v3168_v32, %v3103_v0 }
 0xa2d   :  { %v7592_v26 = vsel %vm3200_vm10, %v7509_v52, %v7376_v6  ;;  %v8341_v6 = vld [vmem:[#allocation3_spill] sm:$0xff]  ;;  %v8343_v52 = vld [vmem:[#allocation5_spill] sm:$0xff] }
 0xa2e   :  { %v7595_v51 = vsel %vm3200_vm10, %v3176_v49, %v7379_v60  ;;  %v8342_v60 = vld [vmem:[#allocation4_spill] sm:$0xff] }
 0xa2f   :  { %v3212_v48 = vsel %vm1296_vm13, %v7595_v51, %v7592_v26 }
 0xa30   :  { %v3216_v61 = vpack.c.bf16 %v3212_v48, %v3212_v48 }
 0xa32   :  { %v3228_v59 = vunpack.c.l.b16 %v3216_v61 }
 0xa34   :  { %v3230_v43 = vpack.c.b16 %v3228_v59, %v3227_v50 }
 0xa36   :  { %3262 = vmatmul.bf16.gmra.mxu0 %v3230_v43  ;;  %3300 = vmatmul.bf16.gmra.mxu1 %v3230_v43 }
 0xa46   :  { %3333 = vmatmul.bf16.vlgmr.msra.gmra.mxu0 %v7554_v37  ;;  %v71_v37 = vld [vmem:[%s8249_s1 + $0xb8] sm:$0xff] }
 0xa47   :  { %4205 = vmatpush.bf16.msra.mxu0 %v6301_v4  ;;  %v103_v4 = vadd.f32 2.7182817, %v71_v37 }
 0xa49   :  { %5818 = vlog2.f32 %v103_v4 }
 0xa4b   :  { %4206 = vmatpush.bf16.msra.mxu0 %v6323_v12 }
 0xa4f   :  { %4207 = vmatpush.bf16.msra.mxu0 %v6342_v29  ;;  %v5819_v12 = vpop.eup %5818 }
 0xa50   :  { %v159_v14 = vmul.f32 0.6931472, %v5819_v12 }
 0xa52   :  { %5820 = vrcp.f32 %v159_v14  ;;  %vm526_vm11 = vweird.f32 %v159_v14  ;;  %v532_v32 = vand.u32 2147483648, %v159_v14  ;;  %v530_v49 = vand.u32 2147483647, %v159_v14 }
 0xa53   :  { %4208 = vmatpush.bf16.msra.mxu0 %v8323_v35  ;;  %v3277_v35 = vpop.f32.mrf.mxu2 }
 0xa54   :  { %v533_v50 = vor.u32 1.1754944e-38, %v532_v32  ;;  %vm531_vm15 = vcmp.eq.f32.partialorder %v530_v49, 8.507059e+37 }
 0xa56   :  { %3338 = vmatmul.bf16.gmra.mxu0 %v3230_v43 }
 0xa57   :  { %4209 = vmatpush.bf16.msra.mxu0 %v8341_v6 }
 0xa58   :  { %v5821_v29 = vpop.eup %5820 }
 0xa59   :  { %v522_v55 = vmul.f32 %v5821_v29, %v159_v14  ;;  %vm527_vm12 = vweird.f32 %v5821_v29 }
 0xa5a   :  { %vm528_vm14 = vmor %vm526_vm11, %vm527_vm12 }
 0xa5b   :  { %4210 = vmatpush.bf16.msra.mxu0 %v8342_v60  ;;  %v523_v57 = vsub.f32 1.0, %v522_v55  ;;  %v3279_v22 = vpop.f32.mrf.mxu2 }
 0xa5d   :  { %v524_v54 = vmul.f32 %v5821_v29, %v523_v57 }
 0xa5f   :  { %4211 = vmatpush.bf16.msra.mxu0 %v8343_v52  ;;  %v525_v16 = vadd.f32 %v5821_v29, %v524_v54  ;;  %v3320_v52 = vpop.f32.mrf.mxu3 }
 0xa61   :  { %v529_v59 = vsel %vm528_vm14, %v5821_v29, %v525_v16 }
 0xa62   :  { %v534_v43 = vsel %vm531_vm15, %v533_v50, %v529_v59  ;;  %v3390_v50 = vpop.permute.xlu1 %3389 }
 0xa63   :  { %4212 = vmatpush.bf16.msra.mxu0 %v8344_v31  ;;  %v3282_v60 = vpop.f32.mrf.mxu2 }
 0xa6b   :  { %v3284_v14 = vpop.f32.mrf.mxu2 }
 0xa86   :  { %v3258_v42 = vpop.f32.mrf.mxu0  ;;  %v3296_v28 = vpop.f32.mrf.mxu1 }
 0xa87   :  { %v3259_v36 = vadd.f32 %v3258_v42, %v8345_v63  ;;  %v3297_v20 = vadd.f32 %v3296_v28, %v8346_v19 }
 0xa89   :  { %v7614_v5 = vadd.f32 %v3277_v35, %v3259_v36  ;;  %v7616_v39 = vadd.f32 %v3315_v13, %v3297_v20  ;;  %v3322_v36 = vpop.f32.mrf.mxu3 }
 0xa8b   :  { %5822 = vtanh.f32 %v7616_v39 }
 0xa8e   :  { %v3260_v1 = vpop.f32.mrf.mxu0  ;;  %v3298_v53 = vpop.f32.mrf.mxu1 }
 0xa8f   :  { %v3261_v11 = vadd.f32 %v3260_v1, %v8345_v63  ;;  %v3299_v0 = vadd.f32 %v3298_v53, %v8346_v19  ;;  %v8347_v1 = vld [vmem:[#allocation8_spill] sm:$0xff] }
 0xa91   :  { %v5823_v2 = vpop.eup %5822  ;;  %v3280_v48 = vadd.f32 %v3279_v22, %v3261_v11  ;;  %v7621_v61 = vadd.f32 %v3317_v40, %v3299_v0  ;;  %v3353_v22 = vpop.f32.mrf.mxu2 }
 0xa92   :  { %3595 = vrot.lane.b32.xlu0 %v5823_v2, %s6039_s6 }
 0xa93   :  { %5824 = vtanh.f32 %v7621_v61 }
 0xa99   :  { %v5825_v6 = vpop.eup %5824  ;;  %v3355_v32 = vpop.f32.mrf.mxu2 }
 0xa9a   :  { %3597 = vrot.lane.b32.xlu1 %v5825_v6, %s6039_s6  ;;  %3404 = vperm.xlu0 %5427, %v534_v43  }
 0xab3   :  { %v3263_v31 = vpop.f32.mrf.mxu0  ;;  %v3301_v37 = vpop.f32.mrf.mxu1 }
 0xab4   :  { %v3264_v4 = vadd.f32 %v3263_v31, %v8345_v63  ;;  %v3302_v12 = vadd.f32 %v3301_v37, %v8346_v19  ;;  %v3395_v37 = vpop.permute.xlu2 %3394 }
 0xab6   :  { %v7628_v35 = vadd.f32 %v3320_v52, %v3302_v12  ;;  %v7630_v13 = vadd.f32 %v3282_v60, %v3264_v4  ;;  %v3358_v60 = vpop.f32.mrf.mxu2  ;;  %v5300_v12 = vmul.f32 -1.442695, %v7614_v5 }
 0xab8   :  { %5826 = vtanh.f32 %v7628_v35 }
 0xabb   :  { %v3265_v29 = vpop.f32.mrf.mxu0  ;;  %v3303_v55 = vpop.f32.mrf.mxu1 }
 0xabc   :  { %v3266_v42 = vadd.f32 %v3265_v29, %v8345_v63  ;;  %v3304_v28 = vadd.f32 %v3303_v55, %v8346_v19  ;;  %v5302_v29 = vmul.f32 -1.442695, %v3280_v48 }
 0xabe   :  { %v5827_v20 = vpop.eup %5826  ;;  %v7635_v57 = vadd.f32 %v3322_v36, %v3304_v28  ;;  %v3285_v54 = vadd.f32 %v3284_v14, %v3266_v42 }
 0xabf   :  { %3599 = vrot.lane.b32.xlu1 %v5827_v20, %s6039_s6 }
 0xac0   :  { %5828 = vtanh.f32 %v7635_v57 }
 0xac3   :  { %v3334_v40 = vpop.f32.mrf.mxu0 }
 0xac4   :  { %v3335_v53 = vadd.f32 %v3334_v40, %v8347_v1  ;;  %v5306_v40 = vmul.f32 -1.442695, %v3285_v54 }
 0xac6   :  { %v5829_v11 = vpop.eup %5828  ;;  %v3354_v0 = vadd.f32 %v3353_v22, %v3335_v53 }
 0xac7   :  { %3601 = vrot.lane.b32.xlu2 %v5829_v11, %s6039_s6 }
 0xac8   :  { %5830 = vtanh.f32 %v3354_v0 }
 0xacb   :  { %v3336_v16 = vpop.f32.mrf.mxu0 }
 0xacc   :  { %v3337_v49 = vadd.f32 %v3336_v16, %v8347_v1 }
 0xace   :  { %v5831_v2 = vpop.eup %5830  ;;  %v3356_v59 = vadd.f32 %v3355_v32, %v3337_v49 }
 0xacf   :  { %3371 = vrot.lane.b32.xlu0 %v5831_v2, %s6039_s6  ;;  %v3407_v43 = vmul.f32 %v5831_v2, %v3390_v50 }
 0xad0   :  { %5832 = vtanh.f32 %v3356_v59 }
 0xad1   :  { %3415 = vrot.lane.b32.xlu2 %v3407_v43, %s6039_s6  ;;  %v3360_v43 = vpop.f32.mrf.mxu2 }
 0xad3   :  { %v3339_v6 = vpop.f32.mrf.mxu0 }
 0xad4   :  { %v3340_v52 = vadd.f32 %v3339_v6, %v8347_v1 }
 0xad6   :  { %v5833_v31 = vpop.eup %5832  ;;  %v3359_v4 = vadd.f32 %v3358_v60, %v3340_v52 }
 0xad7   :  { %3373 = vrot.lane.b32.xlu1 %v5833_v31, %s6039_s6  ;;  %v3408_v14 = vmul.f32 %v5833_v31, %v3395_v37 }
 0xad8   :  { %5834 = vtanh.f32 %v3359_v4  ;;  %v5304_v4 = vmul.f32 -1.442695, %v7630_v13 }
 0xad9   :  { %3417 = vrot.lane.b32.xlu0 %v3408_v14, %s6039_s6  ;;  %5836 = vpow2.f32 %v5300_v12 }
 0xada   :  { %5838 = vpow2.f32 %v5302_v29 }
 0xadb   :  { %v3341_v32 = vpop.f32.mrf.mxu0 }
 0xadc   :  { %v3342_v50 = vadd.f32 %v3341_v32, %v8347_v1 }
 0xade   :  { %v7648_v55 = vpop.eup %5834  ;;  %v3361_v31 = vadd.f32 %v3360_v43, %v3342_v50 }
 0xadf   :  { %v5837_v42 = vpop.eup %5836 }
 0xae0   :  { %v3455_v28 = vadd.f32 1.0, %v5837_v42  ;;  %v5839_v36 = vpop.eup %5838 }
 0xae1   :  { %3375 = vrot.lane.b32.xlu0 %v7648_v55, %s6039_s6  ;;  %v3457_v20 = vadd.f32 1.0, %v5839_v36 }
 0xae2   :  { %5840 = vrcp.f32 %v3455_v28  ;;  %v3474_v59 = vand.u32 2147483648, %v3455_v28  ;;  %vm3468_vm2 = vweird.f32 %v3455_v28  ;;  %v3472_v6 = vand.u32 2147483647, %v3455_v28 }
 0xae3   :  { %5842 = vrcp.f32 %v3457_v20  ;;  %v3504_v36 = vand.u32 2147483648, %v3457_v20  ;;  %vm3498_vm6 = vweird.f32 %v3457_v20 }
 0xae4   :  { %5844 = vpow2.f32 %v5306_v40  ;;  %v3475_v37 = vor.u32 1.1754944e-38, %v3474_v59  ;;  %vm3473_vm4 = vcmp.eq.f32.partialorder %v3472_v6, 8.507059e+37 }
 0xae8   :  { %v5841_v5 = vpop.eup %5840 }
 0xae9   :  { %v3464_v22 = vmul.f32 %v5841_v5, %v3455_v28  ;;  %v5843_v11 = vpop.eup %5842  ;;  %vm3469_vm0 = vweird.f32 %v5841_v5  ;;  %v3502_v28 = vand.u32 2147483647, %v3457_v20 }
 0xaea   :  { %v3494_v48 = vmul.f32 %v5843_v11, %v3457_v20  ;;  %v5845_v2 = vpop.eup %5844  ;;  %vm3470_vm3 = vmor %vm3468_vm2, %vm3469_vm0  ;;  %vm3499_vm5 = vweird.f32 %v5843_v11 }
 0xaeb   :  { %v3465_v53 = vsub.f32 1.0, %v3464_v22  ;;  %v3461_v60 = vadd.f32 1.0, %v5845_v2  ;;  %vm3500_vm7 = vmor %vm3498_vm6, %vm3499_vm5  ;;  %v3505_v22 = vor.u32 1.1754944e-38, %v3504_v36  ;;  %vm3503_vm8 = vcmp.eq.f32.partialorder %v3502_v28, 8.507059e+37  ;;  %v8348_v28 = vld [vmem:[#allocation2_spill] sm:$0xff] }
 0xaec   :  { %v3495_v49 = vsub.f32 1.0, %v3494_v48  ;;  %vm3655_vm14 = vcmp.gt.s32.totalorder %v8348_v28, 5 }
 0xaed   :  { %v3466_v0 = vmul.f32 %v5841_v5, %v3465_v53  ;;  %5846 = vrcp.f32 %v3461_v60  ;;  %vm3558_vm10 = vweird.f32 %v3461_v60 }
 0xaee   :  { %v3496_v54 = vmul.f32 %v5843_v11, %v3495_v49  ;;  %5848 = vtanh.f32 %v3361_v31  ;;  %v3562_v31 = vand.u32 2147483647, %v3461_v60 }
 0xaef   :  { %v3467_v16 = vadd.f32 %v5841_v5, %v3466_v0  ;;  %5850 = vpow2.f32 %v5304_v4 }
 0xaf0   :  { %v3497_v42 = vadd.f32 %v5843_v11, %v3496_v54  ;;  %v3564_v54 = vand.u32 2147483648, %v3461_v60  ;;  %vm3563_vm12 = vcmp.eq.f32.partialorder %v3562_v31, 8.507059e+37 }
 0xaf1   :  { %v3471_v52 = vsel %vm3470_vm3, %v5841_v5, %v3467_v16 }
 0xaf2   :  { %v7654_v14 = vsel %vm3473_vm4, %v3475_v37, %v3471_v52  ;;  %v3501_v5 = vsel %vm3500_vm7, %v5843_v11, %v3497_v42  ;;  %v3400_v11 = vpop.permute.xlu2 %3399 }
 0xaf3   :  { %v5847_v40 = vpop.eup %5846  ;;  %v3506_v0 = vsel %vm3503_vm8, %v3505_v22, %v3501_v5  ;;  %v3409_v59 = vmul.f32 %v7648_v55, %v3400_v11  ;;  %v3659_v22 = vsel %vm3655_vm14, 1, %v8310_v25 }
 0xaf4   :  { %v5849_v13 = vpop.eup %5848  ;;  %v3554_v2 = vmul.f32 %v5847_v40, %v3461_v60  ;;  %vm3559_vm9 = vweird.f32 %v5847_v40 }
 0xaf5   :  { %v5851_v49 = vpop.eup %5850  ;;  %vm3560_vm11 = vmor %vm3558_vm10, %vm3559_vm9 }
 0xaf6   :  { %v3459_v20 = vadd.f32 1.0, %v5851_v49  ;;  %v3555_v50 = vsub.f32 1.0, %v3554_v2 }
 0xaf8   :  { %5852 = vrcp.f32 %v3459_v20  ;;  %v3556_v43 = vmul.f32 %v5847_v40, %v3555_v50  ;;  %v3534_v60 = vand.u32 2147483648, %v3459_v20  ;;  %vm3528_vm0 = vweird.f32 %v3459_v20 }
 0xafa   :  { %v3557_v6 = vadd.f32 %v5847_v40, %v3556_v43 }
 0xafc   :  { %v3561_v37 = vsel %vm3560_vm11, %v5847_v40, %v3557_v6  ;;  %v3532_v40 = vand.u32 2147483647, %v3459_v20 }
 0xafe   :  { %v5853_v52 = vpop.eup %5852  ;;  %vm3533_vm3 = vcmp.eq.f32.partialorder %v3532_v40, 8.507059e+37 }
 0xaff   :  { %v3524_v4 = vmul.f32 %v5853_v52, %v3459_v20  ;;  %vm3529_vm15 = vweird.f32 %v5853_v52  ;;  %v72_v20 = vld [vmem:[%s8249_s1 + $0xc0] sm:$0xff] }
 0xb00   :  { %vm3530_vm2 = vmor %vm3528_vm0, %vm3529_vm15 }
 0xb01   :  { %v3525_v55 = vsub.f32 1.0, %v3524_v4 }
 0xb03   :  { %v3526_v5 = vmul.f32 %v5853_v52, %v3525_v55 }
 0xb04   :  { %v3596_v12 = vpop.permute.xlu0 %3595 }
 0xb05   :  { %v3607_v29 = vmul.f32 %v3596_v12, %v7654_v14  ;;  %v3565_v12 = vor.u32 1.1754944e-38, %v3564_v54  ;;  %v104_v54 = vadd.f32 2.7182817, %v72_v20 }
 0xb07   :  { %3615 = vrot.lane.b32.xlu1 %v3607_v29, %s6039_s6  ;;  %v7663_v42 = vsel %vm3563_vm12, %v3565_v12, %v3561_v37  ;;  %5854 = vlog2.f32 %v104_v54 }
 0xb0c   :  { %v3405_v53 = vpop.permute.xlu0 %3404  ;;  %v3598_v48 = vpop.permute.xlu1 %3597 }
 0xb0d   :  { %v3410_v32 = vmul.f32 %v5849_v13, %v3405_v53  ;;  %v3608_v16 = vmul.f32 %v3598_v48, %v3506_v0  ;;  %v3535_v48 = vor.u32 1.1754944e-38, %v3534_v60  ;;  %v5855_v55 = vpop.eup %5854 }
 0xb0f   :  { %3377 = vrot.lane.b32.xlu1 %v5849_v13, %s6039_s6  ;;  %3421 = vrot.lane.b32.xlu0 %v3410_v32, %s6039_s6  ;;  %v3527_v13 = vadd.f32 %v5853_v52, %v3526_v5 }
 0xb10   :  { %3617 = vrot.lane.b32.xlu2 %v3608_v16, %s6039_s6 }
 0xb11   :  { %v3531_v53 = vsel %vm3530_vm2, %v5853_v52, %v3527_v13  ;;  %v73_v52 = vld [vmem:[%s8249_s1 + $0xc8] sm:$0xff] }
 0xb12   :  { %v7669_v32 = vsel %vm3533_vm3, %v3535_v48, %v3531_v53  ;;  %v105_v4 = vadd.f32 2.7182817, %v73_v52 }
 0xb18   :  { %3419 = vrot.lane.b32.xlu2 %v3409_v59, %s6039_s6 }
 0xb21   :  { %v3602_v29 = vpop.permute.xlu2 %3601 }
 0xb22   :  { %v3610_v36 = vmul.f32 %v3602_v29, %v7663_v42 }
 0xb24   :  { %3621 = vrot.lane.b32.xlu2 %v3610_v36, %s6039_s6  ;;  %v74_v36 = vld [vmem:[%s8249_s1 + $0xd0] sm:$0xff] }
 0xb25   :  { %v106_v5 = vadd.f32 2.7182817, %v74_v36 }
 0xb2b   :  { %v3416_v59 = vpop.permute.xlu2 %3415 }
 0xb2c   :  { %3664 = vperm.xlu2 %5428, %v3659_v22  }
 0xb31   :  { %v3600_v16 = vpop.permute.xlu1 %3599 }
 0xb32   :  { %v3609_v49 = vmul.f32 %v3600_v16, %v7669_v32 }
 0xb34   :  { %3619 = vrot.lane.b32.xlu1 %v3609_v49, %s6039_s6 }
 0xb41   :  { %v3372_v2 = vpop.permute.xlu0 %3371 }
 0xb42   :  { %v3383_v29 = vsub.f32 %v7535_v34, %v3372_v2 }
 0xb44   :  { %v3427_v13 = vadd.f32 %v3416_v59, %v3383_v29 }
 0xb46   :  { %v3587_v40 = vmul.f32 %v7654_v14, %v3427_v13 }
 0xb49   :  { %v3374_v50 = vpop.permute.xlu1 %3373 }
 0xb4a   :  { %v3384_v11 = vsub.f32 %v7543_v9, %v3374_v50 }
 0xb4b   :  { %v3418_v43 = vpop.permute.xlu0 %3417 }
 0xb4c   :  { %v3428_v6 = vadd.f32 %v3418_v43, %v3384_v11 }
 0xb4e   :  { %v3588_v31 = vmul.f32 %v3506_v0, %v3428_v6  ;;  %v161_v0 = vmul.f32 0.6931472, %v5855_v55 }
 0xb50   :  { %vm541_vm6 = vweird.f32 %v161_v0 }
 0xb53   :  { %v7691_v16 = vpop.permute.xlu0 %3375 }
 0xb6a   :  { %v3618_v37 = vpop.permute.xlu2 %3617 }
 0xb6b   :  { %v7680_v12 = vadd.f32 %v3618_v37, %v3588_v31  ;;  %v8349_v31 = vld [vmem:[#allocation10_spill] sm:$0xff] }
 0xb6c   :  { %vm3656_vm4 = vcmp.gt.s32.totalorder %v8349_v31, 5 }
 0xb6d   :  { %5856 = vtanh.f32 %v7680_v12 }
 0xb6e   :  { %5858 = vlog2.f32 %v105_v4 }
 0xb6f   :  { %5860 = vlog2.f32 %v106_v5 }
 0xb70   :  { %5862 = vrcp.f32 %v161_v0 }
 0xb72   :  { %v7694_v2 = vpop.permute.xlu2 %3419 }
 0xb73   :  { %v5857_v28 = vpop.eup %5856 }
 0xb74   :  { %v5859_v22 = vpop.eup %5858  ;;  %3641 = vrot.lane.b32.xlu1 %v5857_v28, %s6039_s6  ;;  %v3660_v28 = vsel %vm3656_vm4, 1, %v8310_v25 }
 0xb75   :  { %v163_v60 = vmul.f32 0.6931472, %v5859_v22  ;;  %v5861_v49 = vpop.eup %5860 }
 0xb76   :  { %v5863_v50 = vpop.eup %5862  ;;  %v165_v11 = vmul.f32 0.6931472, %v5861_v49 }
 0xb77   :  { %5864 = vrcp.f32 %v163_v60  ;;  %v537_v52 = vmul.f32 %v5863_v50, %v161_v0  ;;  %vm542_vm7 = vweird.f32 %v5863_v50  ;;  %vm556_vm8 = vweird.f32 %v163_v60 }
 0xb78   :  { %vm7706_vm10 = vmor %vm541_vm6, %vm542_vm7  ;;  %vm571_vm15 = vweird.f32 %v165_v11  ;;  %v577_v1 = vand.u32 2147483648, %v165_v11 }
 0xb79   :  { %v3616_v53 = vpop.permute.xlu1 %3615  ;;  %v538_v36 = vsub.f32 1.0, %v537_v52 }
 0xb7a   :  { %v7689_v48 = vadd.f32 %v3616_v53, %v3587_v40  ;;  %v8350_v40 = vld [vmem:[#allocation11_spill] sm:$0xff] }
 0xb7b   :  { %v539_v13 = vmul.f32 %v5863_v50, %v538_v36  ;;  %vm3657_vm5 = vcmp.gt.s32.totalorder %v8350_v40, 5 }
 0xb7c   :  { %5866 = vtanh.f32 %v7689_v48 }
 0xb7d   :  { %v5865_v59 = vpop.eup %5864  ;;  %5868 = vrcp.f32 %v165_v11 }
 0xb7e   :  { %v552_v37 = vmul.f32 %v5865_v59, %v163_v60  ;;  %v3622_v29 = vpop.permute.xlu2 %3621  ;;  %vm557_vm9 = vweird.f32 %v5865_v59 }
 0xb7f   :  { %vm558_vm11 = vmor %vm556_vm8, %vm557_vm9 }
 0xb80   :  { %v553_v5 = vsub.f32 1.0, %v552_v37  ;;  %v560_v37 = vand.u32 2147483647, %v163_v60 }
 0xb81   :  { %v3378_v43 = vpop.permute.xlu1 %3377  ;;  %v3422_v14 = vpop.permute.xlu0 %3421 }
 0xb82   :  { %v5867_v6 = vpop.eup %5866  ;;  %v3386_v20 = vsub.f32 %v7592_v26, %v3378_v43  ;;  %v554_v53 = vmul.f32 %v5865_v59, %v553_v5  ;;  %v547_v43 = vand.u32 2147483648, %v161_v0  ;;  %vm561_vm14 = vcmp.eq.f32.partialorder %v560_v37, 8.507059e+37 }
 0xb83   :  { %3639 = vrot.lane.b32.xlu0 %v5867_v6, %s6039_s6  ;;  %v5869_v22 = vpop.eup %5868  ;;  %v545_v6 = vand.u32 2147483647, %v161_v0 }
 0xb84   :  { %v3430_v54 = vadd.f32 %v3422_v14, %v3386_v20  ;;  %v567_v49 = vmul.f32 %v5869_v22, %v165_v11  ;;  %v3661_v14 = vsel %vm3657_vm5, 1, %v8310_v25  ;;  %v555_v31 = vadd.f32 %v5865_v59, %v554_v53 }
 0xb85   :  { %vm546_vm12 = vcmp.eq.f32.partialorder %v545_v6, 8.507059e+37  ;;  %vm572_vm0 = vweird.f32 %v5869_v22 }
 0xb86   :  { %v3590_v4 = vmul.f32 %v7663_v42, %v3430_v54  ;;  %v540_v42 = vadd.f32 %v5863_v50, %v539_v13  ;;  %v562_v54 = vand.u32 2147483648, %v163_v60  ;;  %v575_v60 = vand.u32 2147483647, %v165_v11  ;;  %vm573_vm2 = vmor %vm571_vm15, %vm572_vm0 }
 0xb88   :  { %v7700_v55 = vadd.f32 %v3622_v29, %v3590_v4  ;;  %v568_v4 = vsub.f32 1.0, %v567_v49  ;;  %v548_v29 = vor.u32 1.1754944e-38, %v547_v43  ;;  %v544_v0 = vsel %vm7706_vm10, %v5863_v50, %v540_v42 }
 0xb89   :  { %v563_v36 = vor.u32 1.1754944e-38, %v562_v54  ;;  %v578_v49 = vor.u32 1.1754944e-38, %v577_v1  ;;  %vm576_vm3 = vcmp.eq.f32.partialorder %v575_v60, 8.507059e+37  ;;  %v3385_v50 = vsub.f32 %v7585_v46, %v7691_v16  ;;  %v7724_v1 = vld [vmem:[%s8251_s2 + $0x18] sm:$0xff] }
 0xb8a   :  { %5870 = vtanh.f32 %v7700_v55  ;;  %v569_v5 = vmul.f32 %v5869_v22, %v568_v4  ;;  %v549_v13 = vsel %vm546_vm12, %v548_v29, %v544_v0  ;;  %vm3658_vm4 = vcmp.gt.s32.totalorder %v7724_v1, 5  ;;  %v7733_v29 = vld [vmem:[%s8248_s0 + $0x60] sm:$0xff] }
 0xb8b   :  { %3667 = vperm.xlu0 %5427, %v3660_v28   ;;  %v559_v28 = vsel %vm558_vm11, %v5865_v59, %v555_v31  ;;  %v3429_v59 = vadd.f32 %v7694_v2, %v3385_v50  ;;  %v3662_v16 = vsel %vm3658_vm4, 1, %v8310_v25  ;;  %v5303_v2 = vmul.f32 -1.442695, %v7621_v61  ;;  %5316 = vmatmul.msk.bf16.vlgmr.msrb.gmra.mxu3 %vm857_vm1, %v7733_v29  ;;  %v3665_v50 = vpop.permute.xlu2 %3664 }
 0xb8c   :  { %v564_v40 = vsel %vm561_vm14, %v563_v36, %v559_v28  ;;  %v570_v53 = vadd.f32 %v5869_v22, %v569_v5  ;;  %5318 = vmatmul.msk.bf16.vlgmr.msrb.gmra.mxu2 %vm857_vm1, %v7733_v29  ;;  %4269 = vmatpush.bf16.msrb.mxu3 %v6162_v18  ;;  %vm3675_vm11 = vcmp.eq.s32.totalorder %v3665_v50, 1 }
 0xb8d   :  { %v3589_v6 = vmul.f32 %v7669_v32, %v3429_v59  ;;  %v5301_v32 = vmul.f32 -1.442695, %v7616_v39  ;;  %4307 = vmatpush.bf16.msrb.mxu2 %v6239_v44 }
 0xb8e   :  { %v574_v43 = vsel %vm573_vm2, %v5869_v22, %v570_v53 }
 0xb8f   :  { %v579_v42 = vsel %vm576_vm3, %v578_v49, %v574_v43  ;;  %v5305_v43 = vmul.f32 -1.442695, %v7628_v35  ;;  %v7747_v35 = vsel %vm3675_vm11, %v7689_v48, %v7535_v34 }
 0xb90   :  { %v5871_v20 = vpop.eup %5870 }
 0xb91   :  { %3645 = vrot.lane.b32.xlu2 %v5871_v20, %s6039_s6 }
 0xb93   :  { %3670 = vperm.xlu0 %5427, %v3661_v14  }
 0xb99   :  { %3867 = vperm.xlu2 %5428, %v549_v13  }
 0xb9b   :  { %3872 = vperm.xlu0 %5427, %v564_v40  }
 0xba3   :  { %3877 = vperm.xlu0 %5427, %v579_v42  }
 0xba6   :  { %v3620_v20 = vpop.permute.xlu1 %3619 }
 0xba7   :  { %v7717_v14 = vadd.f32 %v3620_v20, %v3589_v6 }
 0xba9   :  { %5872 = vtanh.f32 %v7717_v14 }
 0xbaa   :  { %5874 = vpow2.f32 %v5301_v32 }
 0xbab   :  { %5876 = vpow2.f32 %v5303_v2 }
 0xbaf   :  { %v5873_v11 = vpop.eup %5872 }
 0xbb0   :  { %3643 = vrot.lane.b32.xlu1 %v5873_v11, %s6039_s6  ;;  %v5875_v22 = vpop.eup %5874 }
 0xbb1   :  { %v3456_v52 = vadd.f32 1.0, %v5875_v22  ;;  %v5877_v54 = vpop.eup %5876  ;;  %v5307_v22 = vmul.f32 -1.442695, %v7635_v57 }
 0xbb2   :  { %v3458_v31 = vadd.f32 1.0, %v5877_v54 }
 0xbb3   :  { %5878 = vrcp.f32 %v3456_v52  ;;  %v3489_v13 = vand.u32 2147483648, %v3456_v52  ;;  %vm3483_vm6 = vweird.f32 %v3456_v52  ;;  %v3487_v40 = vand.u32 2147483647, %v3456_v52 }
 0xbb4   :  { %5880 = vrcp.f32 %v3458_v31  ;;  %v3519_v59 = vand.u32 2147483648, %v3458_v31  ;;  %vm3513_vm10 = vweird.f32 %v3458_v31  ;;  %v3517_v20 = vand.u32 2147483647, %v3458_v31 }
 0xbb5   :  { %v3490_v49 = vor.u32 1.1754944e-38, %v3489_v13  ;;  %vm3488_vm8 = vcmp.eq.f32.partialorder %v3487_v40, 8.507059e+37  ;;  %5882 = vpow2.f32 %v5305_v43 }
 0xbb6   :  { %v3520_v32 = vor.u32 1.1754944e-38, %v3519_v59  ;;  %vm3518_vm14 = vcmp.eq.f32.partialorder %v3517_v20, 8.507059e+37  ;;  %5884 = vpow2.f32 %v5307_v22 }
 0xbb8   :  { %3673 = vperm.xlu1 %5429, %v3662_v16  }
 0xbb9   :  { %v5879_v37 = vpop.eup %5878 }
 0xbba   :  { %v3479_v4 = vmul.f32 %v5879_v37, %v3456_v52  ;;  %v5881_v0 = vpop.eup %5880  ;;  %vm3484_vm5 = vweird.f32 %v5879_v37 }
 0xbbb   :  { %v3509_v39 = vmul.f32 %v5881_v0, %v3458_v31  ;;  %vm3485_vm7 = vmor %vm3483_vm6, %vm3484_vm5  ;;  %vm3514_vm9 = vweird.f32 %v5881_v0 }
 0xbbc   :  { %v3480_v36 = vsub.f32 1.0, %v3479_v4  ;;  %vm3515_vm12 = vmor %vm3513_vm10, %vm3514_vm9  ;;  %v5883_v4 = vpop.eup %5882 }
 0xbbd   :  { %v3510_v28 = vsub.f32 1.0, %v3509_v39 }
 0xbbe   :  { %v3481_v61 = vmul.f32 %v5879_v37, %v3480_v36  ;;  %v3460_v36 = vadd.f32 1.0, %v5883_v4 }
 0xbbf   :  { %v3511_v53 = vmul.f32 %v5881_v0, %v3510_v28 }
 0xbc0   :  { %v3482_v5 = vadd.f32 %v5879_v37, %v3481_v61  ;;  %5886 = vrcp.f32 %v3460_v36  ;;  %vm3543_vm2 = vweird.f32 %v3460_v36 }
 0xbc1   :  { %v3512_v42 = vadd.f32 %v5881_v0, %v3511_v53 }
 0xbc2   :  { %v3486_v60 = vsel %vm3485_vm7, %v5879_v37, %v3482_v5  ;;  %v5415_v5 = vld [vmem:[%s8248_s0 + $0x68] sm:$0xff] }
 0xbc3   :  { %v3491_v18 = vsel %vm3488_vm8, %v3490_v49, %v3486_v60  ;;  %v3516_v11 = vsel %vm3515_vm12, %v5881_v0, %v3512_v42  ;;  %5319 = vmatmul.msk.bf16.gmra.mxu2 %vm857_vm1, %v5415_v5  ;;  %5317 = vmatmul.msk.bf16.gmra.mxu3 %vm857_vm1, %v5415_v5 }
 0xbc4   :  { %v3521_v52 = vsel %vm3518_vm14, %v3520_v32, %v3516_v11 }
 0xbd3   :  { %5320 = vmatmul.msk.bf16.vlgmr.msra.gmra.mxu3 %vm857_vm1, %v7733_v29 }
 0xbe3   :  { %5321 = vmatmul.msk.bf16.gmra.mxu3 %vm857_vm1, %v5415_v5 }
 0xbe6   :  { %v3642_v2 = vpop.permute.xlu1 %3641 }
 0xbe7   :  { %v3652_v31 = vmul.f32 %v3642_v2, %v3521_v52 }
 0xbeb   :  { %v3646_v42 = vpop.permute.xlu2 %3645 }
 0xbf5   :  { %v3640_v44 = vpop.permute.xlu0 %3639 }
 0xbf6   :  { %v3651_v6 = vmul.f32 %v3640_v44, %v3491_v18 }
 0xbf8   :  { %v7743_v16 = vsel %vm3675_vm11, %v3651_v6, %v7531_v17 }
 0xbf9   :  { %v3687_v54 = vsel %vm1296_vm13, %v7743_v16, %v7747_v35 }
 0xbfa   :  { %v3691_v17 = vpack.c.bf16 %v3687_v54, %v3687_v54 }
 0xbfc   :  { %v3703_v39 = vunpack.c.l.b16 %v3691_v17 }
 0xbfd   :  { %v3668_v37 = vpop.permute.xlu0 %3667 }
 0xbfe   :  { %vm3676_vm15 = vcmp.eq.s32.totalorder %v3668_v37, 1 }
 0xbff   :  { %v7755_v0 = vsel %vm3676_vm15, %v7680_v12, %v7543_v9  ;;  %v7758_v34 = vsel %vm3676_vm15, %v3652_v31, %v7546_v33  ;;  %v5885_v9 = vpop.eup %5884 }
 0xc00   :  { %v3688_v57 = vsel %vm1296_vm13, %v7758_v34, %v7755_v0  ;;  %v3462_v33 = vadd.f32 1.0, %v5885_v9  ;;  %v5887_v12 = vpop.eup %5886 }
 0xc01   :  { %v3692_v48 = vpack.c.bf16 %v3688_v57, %v3688_v57  ;;  %v3539_v13 = vmul.f32 %v5887_v12, %v3460_v36  ;;  %vm3544_vm0 = vweird.f32 %v5887_v12 }
 0xc02   :  { %5888 = vrcp.f32 %v3462_v33  ;;  %vm3545_vm3 = vmor %vm3543_vm2, %vm3544_vm0  ;;  %v3579_v43 = vand.u32 2147483648, %v3462_v33  ;;  %vm3573_vm6 = vweird.f32 %v3462_v33 }
 0xc03   :  { %v3704_v61 = vunpack.c.l.b16 %v3692_v48  ;;  %v3540_v53 = vsub.f32 1.0, %v3539_v13 }
 0xc05   :  { %v7763_v28 = vpack.c.b16 %v3704_v61, %v3703_v39  ;;  %v3541_v60 = vmul.f32 %v5887_v12, %v3540_v53 }
 0xc07   :  { %3735 = vmatmul.bf16.vlgmr.msrb.gmra.mxu1 %v7763_v28  ;;  %3773 = vmatmul.bf16.vlgmr.msrb.gmra.mxu0 %v7763_v28 }
 0xc08   :  { %4243 = vmatpush.bf16.msrb.mxu1 %v6130_v3  ;;  %4281 = vmatpush.bf16.msrb.mxu0 %v6153_v15  ;;  %v5889_v40 = vpop.eup %5888  ;;  %v3542_v15 = vadd.f32 %v5887_v12, %v3541_v60 }
 0xc09   :  { %v3569_v3 = vmul.f32 %v5889_v40, %v3462_v33  ;;  %vm3574_vm5 = vweird.f32 %v5889_v40 }
 0xc0a   :  { %vm3575_vm7 = vmor %vm3573_vm6, %vm3574_vm5 }
 0xc0c   :  { %4244 = vmatpush.bf16.msrb.mxu1 %v6142_v10  ;;  %4282 = vmatpush.bf16.msrb.mxu0 %v6181_v23  ;;  %v3570_v10 = vsub.f32 1.0, %v3569_v3  ;;  %v3547_v23 = vand.u32 2147483647, %v3460_v36 }
 0xc0e   :  { %vm3548_vm4 = vcmp.eq.f32.partialorder %v3547_v23, 8.507059e+37  ;;  %v3755_v37 = vpop.f32.mrf.mxu3 }
 0xc0f   :  { %v3793_v54 = vpop.f32.mrf.mxu2 }
 0xc10   :  { %4245 = vmatpush.bf16.msrb.mxu1 %v6175_v21  ;;  %4283 = vmatpush.bf16.msrb.mxu0 %v6206_v30  ;;  %v3549_v21 = vand.u32 2147483648, %v3460_v36  ;;  %v3546_v30 = vsel %vm3545_vm3, %v5887_v12, %v3542_v15 }
 0xc14   :  { %4246 = vmatpush.bf16.msrb.mxu1 %v6197_v27  ;;  %4284 = vmatpush.bf16.msrb.mxu0 %v6230_v41  ;;  %v3571_v27 = vmul.f32 %v5889_v40, %v3570_v10  ;;  %v3550_v41 = vor.u32 1.1754944e-38, %v3549_v21 }
 0xc16   :  { %v3551_v29 = vsel %vm3548_vm4, %v3550_v41, %v3546_v30  ;;  %v3757_v23 = vpop.f32.mrf.mxu3 }
 0xc17   :  { %v3795_v9 = vpop.f32.mrf.mxu2 }
 0xc18   :  { %4247 = vmatpush.bf16.msrb.mxu1 %v6221_v38  ;;  %4285 = vmatpush.bf16.msrb.mxu0 %v6250_v47  ;;  %v3572_v38 = vadd.f32 %v5889_v40, %v3571_v27  ;;  %v3671_v47 = vpop.permute.xlu0 %3670 }
 0xc19   :  { %vm3677_vm8 = vcmp.eq.s32.totalorder %v3671_v47, 1 }
 0xc1a   :  { %v7795_v18 = vsel %vm3677_vm8, %v7717_v14, %v7585_v46 }
 0xc1c   :  { %4248 = vmatpush.bf16.msrb.mxu1 %v6244_v45  ;;  %4286 = vmatpush.bf16.msrb.mxu0 %v6278_v58  ;;  %v3577_v45 = vand.u32 2147483647, %v3462_v33  ;;  %v3576_v58 = vsel %vm3575_vm7, %v5889_v40, %v3572_v38 }
 0xc1e   :  { %vm3578_vm9 = vcmp.eq.f32.partialorder %v3577_v45, 8.507059e+37 }
 0xc20   :  { %4249 = vmatpush.bf16.msrb.mxu1 %v6272_v56  ;;  %4287 = vmatpush.bf16.msrb.mxu0 %v6314_v8  ;;  %v3580_v8 = vor.u32 1.1754944e-38, %v3579_v43 }
 0xc22   :  { %v3644_v49 = vpop.permute.xlu1 %3643  ;;  %v3581_v44 = vsel %vm3578_vm9, %v3580_v8, %v3576_v58 }
 0xc23   :  { %v3653_v50 = vmul.f32 %v3644_v49, %v3551_v29  ;;  %v3654_v59 = vmul.f32 %v3646_v42, %v3581_v44 }
 0xc24   :  { %4250 = vmatpush.bf16.msrb.mxu1 %v6311_v7  ;;  %4288 = vmatpush.bf16.msrb.mxu0 %v6336_v24 }
 0xc25   :  { %v7791_v56 = vsel %vm3677_vm8, %v3653_v50, %v7580_v62 }
 0xc26   :  { %v3689_v7 = vsel %vm1296_vm13, %v7791_v56, %v7795_v18 }
 0xc27   :  { %v3693_v20 = vpack.c.bf16 %v3689_v7, %v3689_v7 }
 0xc29   :  { %v3705_v32 = vunpack.c.l.b16 %v3693_v20 }
 0xc2a   :  { %v3674_v24 = vpop.permute.xlu1 %3673 }
 0xc2b   :  { %vm3678_vm10 = vcmp.eq.s32.totalorder %v3674_v24, 1 }
 0xc2c   :  { %v7803_v62 = vsel %vm3678_vm10, %v7700_v55, %v7592_v26  ;;  %v7806_v6 = vsel %vm3678_vm10, %v3654_v59, %v7595_v51  ;;  %v75_v26 = vld [vmem:[%s8249_s1 + $0xd8] sm:$0xff] }
 0xc2d   :  { %v3690_v46 = vsel %vm1296_vm13, %v7806_v6, %v7803_v62  ;;  %v107_v51 = vadd.f32 2.7182817, %v75_v26 }
 0xc2e   :  { %v3694_v14 = vpack.c.bf16 %v3690_v46, %v3690_v46 }
 0xc2f   :  { %5890 = vlog2.f32 %v107_v51 }
 0xc30   :  { %v3706_v11 = vunpack.c.l.b16 %v3694_v14 }
 0xc32   :  { %v3708_v2 = vpack.c.b16 %v3706_v11, %v3705_v32 }
 0xc34   :  { %3740 = vmatmul.bf16.gmra.mxu1 %v3708_v2  ;;  %3778 = vmatmul.bf16.gmra.mxu0 %v3708_v2 }
 0xc35   :  { %v5891_v55 = vpop.eup %5890 }
 0xc36   :  { %v167_v22 = vmul.f32 0.6931472, %v5891_v55 }
 0xc38   :  { %5892 = vrcp.f32 %v167_v22  ;;  %vm586_vm11 = vweird.f32 %v167_v22  ;;  %v592_v12 = vand.u32 2147483648, %v167_v22  ;;  %v590_v40 = vand.u32 2147483647, %v167_v22 }
 0xc3a   :  { %v593_v60 = vor.u32 1.1754944e-38, %v592_v12  ;;  %vm591_vm15 = vcmp.eq.f32.partialorder %v590_v40, 8.507059e+37  ;;  %v3873_v12 = vpop.permute.xlu0 %3872 }
 0xc3e   :  { %v5893_v52 = vpop.eup %5892 }
 0xc3f   :  { %v582_v31 = vmul.f32 %v5893_v52, %v167_v22  ;;  %vm587_vm12 = vweird.f32 %v5893_v52 }
 0xc40   :  { %vm588_vm14 = vmor %vm586_vm11, %vm587_vm12 }
 0xc41   :  { %v583_v36 = vsub.f32 1.0, %v582_v31 }
 0xc44   :  { %3811 = vmatmul.bf16.vlgmr.msra.gmra.mxu1 %v7763_v28  ;;  %v584_v28 = vmul.f32 %v5893_v52, %v583_v36 }
 0xc46   :  { %v585_v13 = vadd.f32 %v5893_v52, %v584_v28  ;;  %v3760_v30 = vpop.f32.mrf.mxu3  ;;  %v3798_v41 = vpop.f32.mrf.mxu2 }
 0xc48   :  { %v589_v10 = vsel %vm588_vm14, %v5893_v52, %v585_v13 }
 0xc49   :  { %v594_v15 = vsel %vm591_vm15, %v593_v60, %v589_v10 }
 0xc4e   :  { %v3762_v43 = vpop.f32.mrf.mxu3  ;;  %v3800_v7 = vpop.f32.mrf.mxu2 }
 0xc54   :  { %3816 = vmatmul.bf16.gmra.mxu1 %v3708_v2  ;;  %v8353_v2 = vld [vmem:[#allocation8_spill] sm:$0xff] }
 0xc56   :  { %v3831_v14 = vpop.f32.mrf.mxu3 }
 0xc5e   :  { %v3833_v52 = vpop.f32.mrf.mxu3 }
 0xc66   :  { %v3836_v28 = vpop.f32.mrf.mxu3 }
 0xc84   :  { %v3736_v4 = vpop.f32.mrf.mxu1  ;;  %v3774_v17 = vpop.f32.mrf.mxu0 }
 0xc85   :  { %v3737_v57 = vadd.f32 %v3736_v4, %v8345_v63  ;;  %v3775_v48 = vadd.f32 %v3774_v17, %v8346_v19  ;;  %v3868_v4 = vpop.permute.xlu2 %3867 }
 0xc87   :  { %v7817_v39 = vadd.f32 %v3755_v37, %v3737_v57  ;;  %v7819_v61 = vadd.f32 %v3793_v54, %v3775_v48 }
 0xc89   :  { %5894 = vtanh.f32 %v7819_v61  ;;  %v5322_v40 = vmul.f32 -1.442695, %v7817_v39 }
 0xc8c   :  { %v3776_v5 = vpop.f32.mrf.mxu0  ;;  %v3738_v27 = vpop.f32.mrf.mxu1 }
 0xc8d   :  { %v3777_v33 = vadd.f32 %v3776_v5, %v8346_v19  ;;  %v3739_v46 = vadd.f32 %v3738_v27, %v8345_v63 }
 0xc8f   :  { %v5895_v53 = vpop.eup %5894  ;;  %v7823_v3 = vadd.f32 %v3795_v9, %v3777_v33  ;;  %v3758_v11 = vadd.f32 %v3757_v23, %v3739_v46 }
 0xc90   :  { %4073 = vrot.lane.b32.xlu1 %v5895_v53, %s6039_s6 }
 0xc91   :  { %5896 = vtanh.f32 %v7823_v3  ;;  %v5324_v22 = vmul.f32 -1.442695, %v3758_v11  ;;  %v3878_v11 = vpop.permute.xlu0 %3877 }
 0xc97   :  { %v5897_v21 = vpop.eup %5896 }
 0xc98   :  { %4075 = vrot.lane.b32.xlu2 %v5897_v21, %s6039_s6  ;;  %3882 = vperm.xlu1 %5429, %v594_v15  }
 0xcb1   :  { %v3741_v38 = vpop.f32.mrf.mxu1  ;;  %v3779_v47 = vpop.f32.mrf.mxu0 }
 0xcb2   :  { %v3742_v29 = vadd.f32 %v3741_v38, %v8345_v63  ;;  %v3780_v49 = vadd.f32 %v3779_v47, %v8346_v19 }
 0xcb4   :  { %v7830_v50 = vadd.f32 %v3798_v41, %v3780_v49  ;;  %v3761_v45 = vadd.f32 %v3760_v30, %v3742_v29 }
 0xcb6   :  { %5898 = vtanh.f32 %v7830_v50  ;;  %v5326_v41 = vmul.f32 -1.442695, %v3761_v45 }
 0xcb9   :  { %v3743_v58 = vpop.f32.mrf.mxu1  ;;  %v3781_v8 = vpop.f32.mrf.mxu0 }
 0xcba   :  { %v3744_v42 = vadd.f32 %v3743_v58, %v8345_v63  ;;  %v3782_v44 = vadd.f32 %v3781_v8, %v8346_v19 }
 0xcbc   :  { %v5899_v59 = vpop.eup %5898  ;;  %v7835_v24 = vadd.f32 %v3800_v7, %v3782_v44  ;;  %v7837_v20 = vadd.f32 %v3762_v43, %v3744_v42 }
 0xcbd   :  { %4077 = vrot.lane.b32.xlu2 %v5899_v59, %s6039_s6 }
 0xcbe   :  { %5900 = vtanh.f32 %v7835_v24 }
 0xcc1   :  { %v3812_v32 = vpop.f32.mrf.mxu1 }
 0xcc2   :  { %v3813_v26 = vadd.f32 %v3812_v32, %v8353_v2 }
 0xcc4   :  { %v5901_v51 = vpop.eup %5900  ;;  %v3832_v55 = vadd.f32 %v3831_v14, %v3813_v26 }
 0xcc5   :  { %4079 = vrot.lane.b32.xlu0 %v5901_v51, %s6039_s6 }
 0xcc6   :  { %5902 = vtanh.f32 %v3832_v55 }
 0xcc7   :  { %5904 = vpow2.f32 %v5324_v22  ;;  %v3838_v22 = vpop.f32.mrf.mxu3 }
 0xcc9   :  { %v3814_v54 = vpop.f32.mrf.mxu1 }
 0xcca   :  { %v3815_v31 = vadd.f32 %v3814_v54, %v8353_v2 }
 0xccc   :  { %v5903_v37 = vpop.eup %5902  ;;  %v3834_v17 = vadd.f32 %v3833_v52, %v3815_v31 }
 0xccd   :  { %3849 = vrot.lane.b32.xlu1 %v5903_v37, %s6039_s6  ;;  %v3885_v57 = vmul.f32 %v5903_v37, %v3868_v4  ;;  %v5905_v48 = vpop.eup %5904 }
 0xcce   :  { %5906 = vtanh.f32 %v3834_v17  ;;  %v3935_v5 = vadd.f32 1.0, %v5905_v48 }
 0xccf   :  { %3893 = vrot.lane.b32.xlu0 %v3885_v57, %s6039_s6 }
 0xcd0   :  { %5908 = vrcp.f32 %v3935_v5  ;;  %v3982_v47 = vand.u32 2147483648, %v3935_v5  ;;  %vm3976_vm2 = vweird.f32 %v3935_v5  ;;  %v3980_v29 = vand.u32 2147483647, %v3935_v5 }
 0xcd1   :  { %v3817_v36 = vpop.f32.mrf.mxu1 }
 0xcd2   :  { %v3818_v9 = vadd.f32 %v3817_v36, %v8353_v2  ;;  %v3983_v58 = vor.u32 1.1754944e-38, %v3982_v47  ;;  %vm3981_vm4 = vcmp.eq.f32.partialorder %v3980_v29, 8.507059e+37 }
 0xcd4   :  { %v5907_v33 = vpop.eup %5906  ;;  %v3837_v13 = vadd.f32 %v3836_v28, %v3818_v9  ;;  %v5328_v9 = vmul.f32 -1.442695, %v7837_v20 }
 0xcd5   :  { %3851 = vrot.lane.b32.xlu2 %v5907_v33, %s6039_s6  ;;  %v3886_v53 = vmul.f32 %v5907_v33, %v3873_v12 }
 0xcd6   :  { %5910 = vtanh.f32 %v3837_v13  ;;  %v5909_v60 = vpop.eup %5908 }
 0xcd7   :  { %3895 = vrot.lane.b32.xlu1 %v3886_v53, %s6039_s6  ;;  %5912 = vpow2.f32 %v5322_v40  ;;  %v3972_v21 = vmul.f32 %v5909_v60, %v3935_v5  ;;  %vm3977_vm0 = vweird.f32 %v5909_v60 }
 0xcd8   :  { %vm3978_vm3 = vmor %vm3976_vm2, %vm3977_vm0 }
 0xcd9   :  { %v3973_v27 = vsub.f32 1.0, %v3972_v21  ;;  %v3819_v14 = vpop.f32.mrf.mxu1 }
 0xcda   :  { %v3820_v51 = vadd.f32 %v3819_v14, %v8353_v2  ;;  %v77_v14 = vld [vmem:[%s8249_s1 + $0xe8] sm:$0xff] }
 0xcdb   :  { %v3974_v30 = vmul.f32 %v5909_v60, %v3973_v27 }
 0xcdc   :  { %v5911_v10 = vpop.eup %5910  ;;  %v3839_v31 = vadd.f32 %v3838_v22, %v3820_v51 }
 0xcdd   :  { %v5913_v15 = vpop.eup %5912  ;;  %v3975_v39 = vadd.f32 %v5909_v60, %v3974_v30  ;;  %v3887_v32 = vmul.f32 %v5911_v10, %v3878_v11  ;;  %v109_v11 = vadd.f32 2.7182817, %v77_v14 }
 0xcde   :  { %v3933_v23 = vadd.f32 1.0, %v5913_v15 }
 0xcdf   :  { %3853 = vrot.lane.b32.xlu1 %v5911_v10, %s6039_s6  ;;  %v3979_v49 = vsel %vm3978_vm3, %v5909_v60, %v3975_v39 }
 0xce0   :  { %5914 = vrcp.f32 %v3933_v23  ;;  %v7852_v42 = vsel %vm3981_vm4, %v3983_v58, %v3979_v49  ;;  %v3952_v55 = vand.u32 2147483648, %v3933_v23  ;;  %vm3946_vm6 = vweird.f32 %v3933_v23 }
 0xce1   :  { %5916 = vpow2.f32 %v5326_v41  ;;  %v3950_v52 = vand.u32 2147483647, %v3933_v23 }
 0xce2   :  { %v3953_v37 = vor.u32 1.1754944e-38, %v3952_v55 }
 0xce3   :  { %vm3951_vm8 = vcmp.eq.f32.partialorder %v3950_v52, 8.507059e+37 }
 0xce6   :  { %v5915_v38 = vpop.eup %5914 }
 0xce7   :  { %v3942_v43 = vmul.f32 %v5915_v38, %v3933_v23  ;;  %v5917_v59 = vpop.eup %5916  ;;  %vm3947_vm5 = vweird.f32 %v5915_v38 }
 0xce8   :  { %v3937_v45 = vadd.f32 1.0, %v5917_v59  ;;  %vm3948_vm7 = vmor %vm3946_vm6, %vm3947_vm5 }
 0xce9   :  { %v3943_v7 = vsub.f32 1.0, %v3942_v43 }
 0xcea   :  { %5918 = vrcp.f32 %v3937_v45  ;;  %v4012_v53 = vand.u32 2147483648, %v3937_v45  ;;  %vm4006_vm10 = vweird.f32 %v3937_v45  ;;  %v4010_v60 = vand.u32 2147483647, %v3937_v45 }
 0xceb   :  { %v3944_v46 = vmul.f32 %v5915_v38, %v3943_v7  ;;  %5920 = vtanh.f32 %v3839_v31 }
 0xcec   :  { %5922 = vpow2.f32 %v5328_v9  ;;  %v4013_v21 = vor.u32 1.1754944e-38, %v4012_v53  ;;  %vm4011_vm12 = vcmp.eq.f32.partialorder %v4010_v60, 8.507059e+37  ;;  %v7900_v60 = vld [vmem:[%s8251_s2 + $0x8] sm:$0xff] }
 0xced   :  { %v3945_v26 = vadd.f32 %v5915_v38, %v3944_v46  ;;  %vm4134_vm4 = vcmp.gt.s32.totalorder %v7900_v60, 6 }
 0xcef   :  { %v3949_v54 = vsel %vm3948_vm7, %v5915_v38, %v3945_v26 }
 0xcf0   :  { %v5919_v4 = vpop.eup %5918  ;;  %v7858_v17 = vsel %vm3951_vm8, %v3953_v37, %v3949_v54  ;;  %v78_v54 = vld [vmem:[%s8249_s1 + $0xf0] sm:$0xff] }
 0xcf1   :  { %v4002_v36 = vmul.f32 %v5919_v4, %v3937_v45  ;;  %v5921_v5 = vpop.eup %5920  ;;  %vm4007_vm9 = vweird.f32 %v5919_v4  ;;  %v7876_v45 = vld [vmem:[%s8251_s2] sm:$0xff]  ;;  %v110_v37 = vadd.f32 2.7182817, %v78_v54 }
 0xcf2   :  { %v4076_v8 = vpop.permute.xlu2 %4075  ;;  %vm4008_vm11 = vmor %vm4006_vm10, %vm4007_vm9  ;;  %v5923_v10 = vpop.eup %5922  ;;  %vm4133_vm3 = vcmp.gt.s32.totalorder %v7876_v45, 6  ;;  %vm4136_vm10 = vcmp.gt.s32.totalorder %v7724_v1, 6 }
 0xcf3   :  { %v4086_v44 = vmul.f32 %v4076_v8, %v7852_v42  ;;  %v4003_v28 = vsub.f32 1.0, %v4002_v36  ;;  %v3939_v23 = vadd.f32 1.0, %v5923_v10  ;;  %v4137_v46 = vsel %vm4133_vm3, 1, %v8310_v25 }
 0xcf5   :  { %4095 = vrot.lane.b32.xlu0 %v4086_v44, %s6039_s6  ;;  %v4004_v13 = vmul.f32 %v5919_v4, %v4003_v28  ;;  %5924 = vrcp.f32 %v3939_v23  ;;  %v4042_v49 = vand.u32 2147483648, %v3939_v23  ;;  %vm4036_vm15 = vweird.f32 %v3939_v23 }
 0xcf6   :  { %v4040_v43 = vand.u32 2147483647, %v3939_v23  ;;  %5926 = vlog2.f32 %v109_v11 }
 0xcf7   :  { %v4005_v40 = vadd.f32 %v5919_v4, %v4004_v13  ;;  %v4043_v8 = vor.u32 1.1754944e-38, %v4042_v49 }
 0xcf8   :  { %vm4041_vm2 = vcmp.eq.f32.partialorder %v4040_v43, 8.507059e+37 }
 0xcf9   :  { %v4009_v15 = vsel %vm4008_vm11, %v5919_v4, %v4005_v40 }
 0xcfa   :  { %v7865_v27 = vsel %vm4011_vm12, %v4013_v21, %v4009_v15 }
 0xcfb   :  { %v5925_v41 = vpop.eup %5924 }
 0xcfc   :  { %v4032_v39 = vmul.f32 %v5925_v41, %v3939_v23  ;;  %vm4037_vm14 = vweird.f32 %v5925_v41  ;;  %v5927_v22 = vpop.eup %5926  ;;  %v4138_v23 = vsel %vm4134_vm4, 1, %v8310_v25 }
 0xcfd   :  { %3897 = vrot.lane.b32.xlu0 %v3887_v32, %s6039_s6  ;;  %vm4038_vm0 = vmor %vm4036_vm15, %vm4037_vm14  ;;  %v171_v31 = vmul.f32 0.6931472, %v5927_v22  ;;  %v4140_v22 = vsel %vm4136_vm10, 1, %v8310_v25 }
 0xcfe   :  { %v4033_v38 = vsub.f32 1.0, %v4032_v39 }
 0xcff   :  { %5928 = vrcp.f32 %v171_v31  ;;  %vm616_vm6 = vweird.f32 %v171_v31 }
 0xd00   :  { %v4034_v47 = vmul.f32 %v5925_v41, %v4033_v38  ;;  %5930 = vlog2.f32 %v110_v37 }
 0xd02   :  { %v4074_v57 = vpop.permute.xlu1 %4073  ;;  %v4035_v29 = vadd.f32 %v5925_v41, %v4034_v47  ;;  %v7912_v47 = vld [vmem:[%s8251_s2 + $0x10] sm:$0xff] }
 0xd03   :  { %v4085_v48 = vmul.f32 %v4074_v57, %v7858_v17  ;;  %vm4135_vm5 = vcmp.gt.s32.totalorder %v7912_v47, 6 }
 0xd04   :  { %v4039_v58 = vsel %vm4038_vm0, %v5925_v41, %v4035_v29 }
 0xd05   :  { %4093 = vrot.lane.b32.xlu2 %v4085_v48, %s6039_s6  ;;  %v7869_v7 = vsel %vm4041_vm2, %v4043_v8, %v4039_v58  ;;  %v5929_v9 = vpop.eup %5928  ;;  %v4139_v8 = vsel %vm4135_vm5, 1, %v8310_v25 }
 0xd06   :  { %v612_v10 = vmul.f32 %v5929_v9, %v171_v31  ;;  %vm617_vm7 = vweird.f32 %v5929_v9 }
 0xd07   :  { %vm618_vm8 = vmor %vm616_vm6, %vm617_vm7 }
 0xd0a   :  { %v3883_v33 = vpop.permute.xlu1 %3882 }
 0xd0b   :  { %v3888_v12 = vmul.f32 %v5921_v5, %v3883_v33 }
 0xd0d   :  { %3855 = vrot.lane.b32.xlu2 %v5921_v5, %s6039_s6  ;;  %3899 = vrot.lane.b32.xlu1 %v3888_v12, %s6039_s6  ;;  %v5931_v12 = vpop.eup %5930 }
 0xd0e   :  { %v173_v15 = vmul.f32 0.6931472, %v5931_v12 }
 0xd10   :  { %vm631_vm11 = vweird.f32 %v173_v15 }
 0xd17   :  { %v4078_v20 = vpop.permute.xlu2 %4077 }
 0xd18   :  { %v4087_v30 = vmul.f32 %v4078_v20, %v7865_v27 }
 0xd1a   :  { %4097 = vrot.lane.b32.xlu2 %v4087_v30, %s6039_s6  ;;  %v613_v30 = vsub.f32 1.0, %v612_v10 }
 0xd1c   :  { %v614_v29 = vmul.f32 %v5929_v9, %v613_v30 }
 0xd2f   :  { %v3852_v51 = vpop.permute.xlu2 %3851 }
 0xd30   :  { %v3862_v36 = vsub.f32 %v7755_v0, %v3852_v51 }
 0xd37   :  { %v4080_v44 = vpop.permute.xlu0 %4079 }
 0xd38   :  { %v4088_v59 = vmul.f32 %v4080_v44, %v7869_v7  ;;  %v622_v44 = vand.u32 2147483648, %v171_v31 }
 0xd3a   :  { %4099 = vrot.lane.b32.xlu0 %v4088_v59, %s6039_s6  ;;  %v620_v59 = vand.u32 2147483647, %v171_v31  ;;  %v623_v14 = vor.u32 1.1754944e-38, %v622_v44  ;;  %v635_v31 = vand.u32 2147483647, %v173_v15 }
 0xd3c   :  { %vm621_vm9 = vcmp.eq.f32.partialorder %v620_v59, 8.507059e+37  ;;  %vm636_vm15 = vcmp.eq.f32.partialorder %v635_v31, 8.507059e+37 }
 0xd3f   :  { %v3850_v32 = vpop.permute.xlu1 %3849 }
 0xd40   :  { %v3861_v26 = vsub.f32 %v7747_v35, %v3850_v32 }
 0xd41   :  { %v3894_v55 = vpop.permute.xlu0 %3893 }
 0xd42   :  { %4142 = vperm.xlu0 %5427, %v4137_v46   ;;  %v3905_v52 = vadd.f32 %v3894_v55, %v3861_v26 }
 0xd44   :  { %v4065_v4 = vmul.f32 %v7858_v17, %v3905_v52  ;;  %v637_v52 = vand.u32 2147483648, %v173_v15 }
 0xd46   :  { %v638_v37 = vor.u32 1.1754944e-38, %v637_v52 }
 0xd49   :  { %v3896_v57 = vpop.permute.xlu1 %3895 }
 0xd4a   :  { %v3906_v5 = vadd.f32 %v3896_v57, %v3862_v36  ;;  %v79_v36 = vld [vmem:[%s8249_s1 + $0xf8] sm:$0xff] }
 0xd4c   :  { %v4066_v33 = vmul.f32 %v7852_v42, %v3906_v5  ;;  %v111_v5 = vadd.f32 2.7182817, %v79_v36 }
 0xd51   :  { %v3854_v17 = vpop.permute.xlu1 %3853 }
 0xd52   :  { %v3863_v21 = vsub.f32 %v7795_v18, %v3854_v17 }
 0xd5f   :  { %v4094_v48 = vpop.permute.xlu2 %4093 }
 0xd60   :  { %v7889_v28 = vadd.f32 %v4094_v48, %v4065_v4  ;;  %v76_v48 = vld [vmem:[%s8249_s1 + $0xe0] sm:$0xff] }
 0xd61   :  { %v108_v1 = vadd.f32 2.7182817, %v76_v48 }
 0xd62   :  { %5932 = vtanh.f32 %v7889_v28 }
 0xd67   :  { %v4096_v13 = vpop.permute.xlu0 %4095  ;;  %v7903_v42 = vpop.permute.xlu2 %3855 }
 0xd68   :  { %v5933_v40 = vpop.eup %5932  ;;  %v7893_v53 = vadd.f32 %v4096_v13, %v4066_v33  ;;  %v3864_v10 = vsub.f32 %v7803_v62, %v7903_v42 }
 0xd69   :  { %4117 = vrot.lane.b32.xlu1 %v5933_v40, %s6039_s6 }
 0xd6a   :  { %5934 = vtanh.f32 %v7893_v53 }
 0xd6b   :  { %5936 = vrcp.f32 %v173_v15 }
 0xd6f   :  { %v3898_v20 = vpop.permute.xlu0 %3897 }
 0xd70   :  { %v5935_v41 = vpop.eup %5934  ;;  %v3907_v39 = vadd.f32 %v3898_v20, %v3863_v21 }
 0xd71   :  { %4145 = vperm.xlu1 %5429, %v4138_v23   ;;  %4119 = vrot.lane.b32.xlu2 %v5935_v41, %s6039_s6  ;;  %v5937_v43 = vpop.eup %5936 }
 0xd72   :  { %v4067_v38 = vmul.f32 %v7865_v27, %v3907_v39  ;;  %v615_v27 = vadd.f32 %v5929_v9, %v614_v29  ;;  %v627_v46 = vmul.f32 %v5937_v43, %v173_v15  ;;  %vm632_vm12 = vweird.f32 %v5937_v43 }
 0xd73   :  { %vm633_vm14 = vmor %vm631_vm11, %vm632_vm12 }
 0xd74   :  { %v4098_v49 = vpop.permute.xlu2 %4097  ;;  %v619_v11 = vsel %vm618_vm8, %v5929_v9, %v615_v27  ;;  %v628_v32 = vsub.f32 1.0, %v627_v46 }
 0xd75   :  { %v7915_v58 = vadd.f32 %v4098_v49, %v4067_v38  ;;  %v624_v51 = vsel %vm621_vm9, %v623_v14, %v619_v11  ;;  %v5323_v38 = vmul.f32 -1.442695, %v7819_v61 }
 0xd76   :  { %v629_v55 = vmul.f32 %v5937_v43, %v628_v32 }
 0xd77   :  { %5938 = vtanh.f32 %v7915_v58 }
 0xd78   :  { %v630_v54 = vadd.f32 %v5937_v43, %v629_v55  ;;  %5940 = vlog2.f32 %v108_v1 }
 0xd79   :  { %4148 = vperm.xlu1 %5429, %v4139_v8   ;;  %5942 = vlog2.f32 %v111_v5 }
 0xd7a   :  { %v634_v4 = vsel %vm633_vm14, %v5937_v43, %v630_v54 }
 0xd7b   :  { %v639_v57 = vsel %vm636_vm15, %v638_v37, %v634_v4 }
 0xd7d   :  { %v5939_v26 = vpop.eup %5938 }
 0xd7e   :  { %4121 = vrot.lane.b32.xlu2 %v5939_v26, %s6039_s6  ;;  %v5941_v9 = vpop.eup %5940 }
 0xd7f   :  { %v169_v33 = vmul.f32 0.6931472, %v5941_v9  ;;  %v5943_v12 = vpop.eup %5942  ;;  %v3900_v40 = vpop.permute.xlu1 %3899 }
 0xd80   :  { %v175_v13 = vmul.f32 0.6931472, %v5943_v12  ;;  %v3908_v15 = vadd.f32 %v3900_v40, %v3864_v10 }
 0xd81   :  { %4350 = vperm.xlu1 %5429, %v624_v51   ;;  %5944 = vrcp.f32 %v169_v33  ;;  %vm601_vm0 = vweird.f32 %v169_v33  ;;  %v607_v42 = vand.u32 2147483648, %v169_v33  ;;  %v605_v8 = vand.u32 2147483647, %v169_v33 }
 0xd82   :  { %5946 = vrcp.f32 %v175_v13  ;;  %v4068_v23 = vmul.f32 %v7869_v7, %v3908_v15  ;;  %v5325_v7 = vmul.f32 -1.442695, %v7823_v3  ;;  %vm646_vm5 = vweird.f32 %v175_v13  ;;  %v5417_v15 = vld [vmem:[%s8248_s0 + $0x78] sm:$0xff] }
 0xd83   :  { %v608_v59 = vor.u32 1.1754944e-38, %v607_v42  ;;  %vm606_vm4 = vcmp.eq.f32.partialorder %v605_v8, 8.507059e+37  ;;  %v652_v26 = vand.u32 2147483648, %v175_v13  ;;  %v650_v55 = vand.u32 2147483647, %v175_v13 }
 0xd85   :  { %v653_v3 = vor.u32 1.1754944e-38, %v652_v26  ;;  %vm651_vm8 = vcmp.eq.f32.partialorder %v650_v55, 8.507059e+37 }
 0xd86   :  { %4151 = vperm.xlu2 %5428, %v4140_v22  }
 0xd87   :  { %v5945_v17 = vpop.eup %5944 }
 0xd88   :  { %v597_v21 = vmul.f32 %v5945_v17, %v169_v33  ;;  %v5947_v41 = vpop.eup %5946  ;;  %vm602_vm2 = vweird.f32 %v5945_v17 }
 0xd89   :  { %v642_v49 = vmul.f32 %v5947_v41, %v175_v13  ;;  %vm603_vm3 = vmor %vm601_vm0, %vm602_vm2  ;;  %vm647_vm6 = vweird.f32 %v5947_v41 }
 0xd8a   :  { %v598_v30 = vsub.f32 1.0, %v597_v21  ;;  %vm648_vm7 = vmor %vm646_vm5, %vm647_vm6 }
 0xd8b   :  { %v643_v44 = vsub.f32 1.0, %v642_v49 }
 0xd8c   :  { %v599_v29 = vmul.f32 %v5945_v17, %v598_v30 }
 0xd8d   :  { %v644_v14 = vmul.f32 %v5947_v41, %v643_v44 }
 0xd8e   :  { %4355 = vperm.xlu2 %5428, %v639_v57   ;;  %v600_v43 = vadd.f32 %v5945_v17, %v599_v29  ;;  %v5416_v57 = vld [vmem:[%s8248_s0 + $0x70] sm:$0xff] }
 0xd8f   :  { %v645_v51 = vadd.f32 %v5947_v41, %v644_v14  ;;  %5338 = vmatmul.msk.bf16.vlgmr.msra.gmra.mxu2 %vm857_vm1, %v5416_v57  ;;  %5340 = vmatmul.msk.bf16.vlgmr.msrb.gmra.mxu3 %vm857_vm1, %v5416_v57 }
 0xd90   :  { %v604_v61 = vsel %vm603_vm3, %v5945_v17, %v600_v43 }
 0xd91   :  { %v609_v32 = vsel %vm606_vm4, %v608_v59, %v604_v61  ;;  %v649_v52 = vsel %vm648_vm7, %v5947_v41, %v645_v51 }
 0xd92   :  { %v654_v31 = vsel %vm651_vm8, %v653_v3, %v649_v52 }
 0xd9f   :  { %5341 = vmatmul.msk.bf16.gmra.mxu3 %vm857_vm1, %v5417_v15  ;;  %5339 = vmatmul.msk.bf16.gmra.mxu2 %vm857_vm1, %v5417_v15 }
 0xdac   :  { %v4100_v20 = vpop.permute.xlu0 %4099 }
 0xdad   :  { %v7931_v39 = vadd.f32 %v4100_v20, %v4068_v23 }
 0xdaf   :  { %5948 = vtanh.f32 %v7931_v39  ;;  %5342 = vmatmul.msk.bf16.vlgmr.msrb.gmra.mxu2 %vm857_vm1, %v5416_v57 }
 0xdb0   :  { %5950 = vpow2.f32 %v5323_v38 }
 0xdb1   :  { %5952 = vpow2.f32 %v5325_v7 }
 0xdb4   :  { %v4143_v21 = vpop.permute.xlu0 %4142 }
 0xdb5   :  { %v5949_v27 = vpop.eup %5948  ;;  %vm4153_vm0 = vcmp.eq.s32.totalorder %v4143_v21, 1 }
 0xdb6   :  { %4123 = vrot.lane.b32.xlu0 %v5949_v27, %s6039_s6  ;;  %v5951_v46 = vpop.eup %5950  ;;  %v7952_v44 = vsel %vm4153_vm0, %v7889_v28, %v7747_v35 }
 0xdb7   :  { %v3934_v11 = vadd.f32 1.0, %v5951_v46  ;;  %v5953_v22 = vpop.eup %5952 }
 0xdb8   :  { %v3936_v54 = vadd.f32 1.0, %v5953_v22 }
 0xdb9   :  { %5954 = vrcp.f32 %v3934_v11  ;;  %v3967_v12 = vand.u32 2147483648, %v3934_v11  ;;  %vm3961_vm10 = vweird.f32 %v3934_v11  ;;  %v3965_v13 = vand.u32 2147483647, %v3934_v11 }
 0xdba   :  { %5956 = vrcp.f32 %v3936_v54  ;;  %v3997_v41 = vand.u32 2147483648, %v3936_v54  ;;  %vm3991_vm15 = vweird.f32 %v3936_v54  ;;  %v3995_v29 = vand.u32 2147483647, %v3936_v54 }
 0xdbb   :  { %v3968_v10 = vor.u32 1.1754944e-38, %v3967_v12  ;;  %vm3966_vm12 = vcmp.eq.f32.partialorder %v3965_v13, 8.507059e+37 }
 0xdbc   :  { %v3998_v43 = vor.u32 1.1754944e-38, %v3997_v41  ;;  %vm3996_vm3 = vcmp.eq.f32.partialorder %v3995_v29, 8.507059e+37 }
 0xdbe   :  { %4345 = vperm.xlu0 %5427, %v609_v32  }
 0xdbf   :  { %v5955_v37 = vpop.eup %5954  ;;  %5343 = vmatmul.msk.bf16.gmra.mxu2 %vm857_vm1, %v5417_v15 }
 0xdc0   :  { %v3957_v4 = vmul.f32 %v5955_v37, %v3934_v11  ;;  %v5957_v48 = vpop.eup %5956  ;;  %vm3962_vm9 = vweird.f32 %v5955_v37 }
 0xdc1   :  { %v3987_v36 = vmul.f32 %v5957_v48, %v3936_v54  ;;  %vm3963_vm11 = vmor %vm3961_vm10, %vm3962_vm9  ;;  %vm3992_vm14 = vweird.f32 %v5957_v48 }
 0xdc2   :  { %v3958_v1 = vsub.f32 1.0, %v3957_v4  ;;  %vm3993_vm2 = vmor %vm3991_vm15, %vm3992_vm14 }
 0xdc3   :  { %v3988_v9 = vsub.f32 1.0, %v3987_v36 }
 0xdc4   :  { %v3959_v5 = vmul.f32 %v5955_v37, %v3958_v1 }
 0xdc5   :  { %v3989_v40 = vmul.f32 %v5957_v48, %v3988_v9 }
 0xdc6   :  { %4360 = vperm.xlu0 %5427, %v654_v31   ;;  %v3960_v33 = vadd.f32 %v5955_v37, %v3959_v5 }
 0xdc7   :  { %v3990_v23 = vadd.f32 %v5957_v48, %v3989_v40 }
 0xdc8   :  { %v3964_v17 = vsel %vm3963_vm11, %v5955_v37, %v3960_v33 }
 0xdc9   :  { %v3969_v20 = vsel %vm3966_vm12, %v3968_v10, %v3964_v17  ;;  %v3994_v49 = vsel %vm3993_vm2, %v5957_v48, %v3990_v23 }
 0xdca   :  { %v3999_v27 = vsel %vm3996_vm3, %v3998_v43, %v3994_v49 }
 0xdcb   :  { %v4120_v8 = vpop.permute.xlu2 %4119 }
 0xdcc   :  { %v4130_v59 = vmul.f32 %v4120_v8, %v3999_v27 }
 0xdd8   :  { %v4122_v48 = vpop.permute.xlu2 %4121 }
 0xddb   :  { %v4118_v30 = vpop.permute.xlu1 %4117 }
 0xddc   :  { %v4129_v38 = vmul.f32 %v4118_v30, %v3969_v20 }
 0xdde   :  { %v7948_v42 = vsel %vm4153_vm0, %v4129_v38, %v7743_v16 }
 0xddf   :  { %v4165_v7 = vsel %vm1296_vm13, %v7948_v42, %v7952_v44 }
 0xde0   :  { %v4169_v61 = vpack.c.bf16 %v4165_v7, %v4165_v7  ;;  %v4152_v15 = vpop.permute.xlu2 %4151 }
 0xde1   :  { %vm4156_vm14 = vcmp.eq.s32.totalorder %v4152_v15, 1 }
 0xde2   :  { %v4181_v11 = vunpack.c.l.b16 %v4169_v61  ;;  %v7987_v43 = vsel %vm4156_vm14, %v7931_v39, %v7803_v62 }
 0xde3   :  { %v4146_v46 = vpop.permute.xlu1 %4145 }
 0xde4   :  { %vm4154_vm4 = vcmp.eq.s32.totalorder %v4146_v46, 1 }
 0xde5   :  { %v7959_v16 = vsel %vm4154_vm4, %v7893_v53, %v7755_v0  ;;  %v7962_v14 = vsel %vm4154_vm4, %v4130_v59, %v7758_v34  ;;  %v5327_v0 = vmul.f32 -1.442695, %v7830_v50  ;;  %v5329_v34 = vmul.f32 -1.442695, %v7835_v24 }
 0xde6   :  { %v4166_v35 = vsel %vm1296_vm13, %v7962_v14, %v7959_v16 }
 0xde7   :  { %v4170_v28 = vpack.c.bf16 %v4166_v35, %v4166_v35  ;;  %5958 = vpow2.f32 %v5327_v0 }
 0xde8   :  { %5960 = vpow2.f32 %v5329_v34 }
 0xde9   :  { %v4182_v32 = vunpack.c.l.b16 %v4170_v28 }
 0xdeb   :  { %v7967_v26 = vpack.c.b16 %v4182_v32, %v4181_v11  ;;  %v4149_v9 = vpop.permute.xlu1 %4148 }
 0xdec   :  { %vm4155_vm9 = vcmp.eq.s32.totalorder %v4149_v9, 1 }
 0xded   :  { %4213 = vmatmul.bf16.vlgmr.msra.gmra.mxu0 %v7967_v26  ;;  %4251 = vmatmul.bf16.vlgmr.msrb.gmra.mxu1 %v7967_v26  ;;  %v5959_v53 = vpop.eup %5958  ;;  %v7977_v21 = vsel %vm4155_vm9, %v7915_v58, %v7795_v18 }
 0xdee   :  { %v3938_v51 = vadd.f32 1.0, %v5959_v53  ;;  %v5961_v55 = vpop.eup %5960 }
 0xdef   :  { %v3940_v22 = vadd.f32 1.0, %v5961_v55 }
 0xdf0   :  { %5962 = vrcp.f32 %v3938_v51  ;;  %v4027_v24 = vand.u32 2147483648, %v3938_v51  ;;  %vm4021_vm6 = vweird.f32 %v3938_v51  ;;  %v4025_v1 = vand.u32 2147483647, %v3938_v51 }
 0xdf1   :  { %5964 = vrcp.f32 %v3940_v22  ;;  %v4057_v40 = vand.u32 2147483648, %v3940_v22  ;;  %vm4051_vm10 = vweird.f32 %v3940_v22  ;;  %v4055_v10 = vand.u32 2147483647, %v3940_v22 }
 0xdf2   :  { %v4028_v33 = vor.u32 1.1754944e-38, %v4027_v24  ;;  %vm4026_vm7 = vcmp.eq.f32.partialorder %v4025_v1, 8.507059e+37 }
 0xdf3   :  { %v4058_v30 = vor.u32 1.1754944e-38, %v4057_v40  ;;  %vm4056_vm12 = vcmp.eq.f32.partialorder %v4055_v10, 8.507059e+37 }
 0xdf6   :  { %v5963_v3 = vpop.eup %5962 }
 0xdf7   :  { %v4017_v52 = vmul.f32 %v5963_v3, %v3938_v51  ;;  %v5965_v54 = vpop.eup %5964  ;;  %vm4022_vm5 = vweird.f32 %v5963_v3 }
 0xdf8   :  { %v4047_v37 = vmul.f32 %v5965_v54, %v3940_v22  ;;  %vm4023_vm1 = vmor %vm4021_vm6, %vm4022_vm5  ;;  %vm4052_vm8 = vweird.f32 %v5965_v54 }
 0xdf9   :  { %v4018_v31 = vsub.f32 1.0, %v4017_v52  ;;  %vm4053_vm11 = vmor %vm4051_vm10, %vm4052_vm8 }
 0xdfa   :  { %v4048_v57 = vsub.f32 1.0, %v4047_v37 }
 0xdfb   :  { %v4019_v4 = vmul.f32 %v5963_v3, %v4018_v31 }
 0xdfc   :  { %v4049_v36 = vmul.f32 %v5965_v54, %v4048_v57 }
 0xdfd   :  { %v4020_v50 = vadd.f32 %v5963_v3, %v4019_v4 }
 0xdfe   :  { %v4050_v12 = vadd.f32 %v5965_v54, %v4049_v36 }
 0xdff   :  { %v4024_v5 = vsel %vm4023_vm1, %v5963_v3, %v4020_v50  ;;  %vm4612_vm1 = vcmp.gt.s32.totalorder %v7900_v60, 7 }
 0xe00   :  { %v4029_v13 = vsel %vm4026_vm7, %v4028_v33, %v4024_v5  ;;  %v4054_v20 = vsel %vm4053_vm11, %v5965_v54, %v4050_v12 }
 0xe01   :  { %v4131_v17 = vmul.f32 %v4122_v48, %v4029_v13  ;;  %v4059_v38 = vsel %vm4056_vm12, %v4058_v30, %v4054_v20 }
 0xe03   :  { %v7980_v23 = vsel %vm4155_vm9, %v4131_v17, %v7791_v56 }
 0xe04   :  { %v4167_v41 = vsel %vm1296_vm13, %v7980_v23, %v7977_v21 }
 0xe05   :  { %v4171_v18 = vpack.c.bf16 %v4167_v41, %v4167_v41 }
 0xe07   :  { %v4183_v27 = vunpack.c.l.b16 %v4171_v18 }
 0xe12   :  { %v4271_v46 = vpop.f32.mrf.mxu3  ;;  %v4233_v0 = vpop.f32.mrf.mxu2 }
 0xe1a   :  { %v4273_v35 = vpop.f32.mrf.mxu3  ;;  %v4235_v34 = vpop.f32.mrf.mxu2 }
 0xe22   :  { %v4238_v51 = vpop.f32.mrf.mxu2  ;;  %v4276_v3 = vpop.f32.mrf.mxu3 }
 0xe28   :  { %v4124_v29 = vpop.permute.xlu0 %4123 }
 0xe29   :  { %v4132_v49 = vmul.f32 %v4124_v29, %v4059_v38 }
 0xe2a   :  { %v4240_v52 = vpop.f32.mrf.mxu2  ;;  %v4278_v13 = vpop.f32.mrf.mxu3 }
 0xe2b   :  { %v7990_v58 = vsel %vm4156_vm14, %v4132_v49, %v7806_v6 }
 0xe2c   :  { %v4168_v56 = vsel %vm1296_vm13, %v7990_v58, %v7987_v43 }
 0xe2d   :  { %v4172_v8 = vpack.c.bf16 %v4168_v56, %v4168_v56 }
 0xe2f   :  { %v4184_v7 = vunpack.c.l.b16 %v4172_v8 }
 0xe31   :  { %v4186_v59 = vpack.c.b16 %v4184_v7, %v4183_v27 }
 0xe32   :  { %v4309_v40 = vpop.f32.mrf.mxu2 }
 0xe33   :  { %4218 = vmatmul.bf16.gmra.mxu0 %v4186_v59  ;;  %4256 = vmatmul.bf16.gmra.mxu1 %v4186_v59 }
 0xe3a   :  { %v4311_v49 = vpop.f32.mrf.mxu2 }
 0xe43   :  { %4289 = vmatmul.bf16.vlgmr.msrb.gmra.mxu0 %v7967_v26 }
 0xe53   :  { %4294 = vmatmul.bf16.gmra.mxu0 %v4186_v59 }
 0xe6a   :  { %v4252_v62 = vpop.f32.mrf.mxu1  ;;  %v4214_v53 = vpop.f32.mrf.mxu0 }
 0xe6b   :  { %v4253_v39 = vadd.f32 %v4252_v62, %v8346_v19  ;;  %v4215_v50 = vadd.f32 %v4214_v53, %v8345_v63  ;;  %v4314_v62 = vpop.f32.mrf.mxu2 }
 0xe6d   :  { %v7997_v61 = vadd.f32 %v4271_v46, %v4253_v39  ;;  %v4234_v36 = vadd.f32 %v4233_v0, %v4215_v50 }
 0xe6f   :  { %5966 = vtanh.f32 %v7997_v61  ;;  %v5344_v10 = vmul.f32 -1.442695, %v4234_v36 }
 0xe72   :  { %v4254_v6 = vpop.f32.mrf.mxu1  ;;  %v4216_v55 = vpop.f32.mrf.mxu0 }
 0xe73   :  { %v4255_v28 = vadd.f32 %v4254_v6, %v8346_v19  ;;  %v4217_v22 = vadd.f32 %v4216_v55, %v8345_v63 }
 0xe75   :  { %v5967_v11 = vpop.eup %5966  ;;  %v8001_v32 = vadd.f32 %v4273_v35, %v4255_v28  ;;  %v4236_v57 = vadd.f32 %v4235_v34, %v4217_v22  ;;  %v4346_v35 = vpop.permute.xlu0 %4345 }
 0xe76   :  { %4551 = vrot.lane.b32.xlu1 %v5967_v11, %s6039_s6 }
 0xe77   :  { %5968 = vtanh.f32 %v8001_v32  ;;  %v5346_v1 = vmul.f32 -1.442695, %v4236_v57 }
 0xe7d   :  { %v5969_v26 = vpop.eup %5968 }
 0xe7e   :  { %4553 = vrot.lane.b32.xlu2 %v5969_v26, %s6039_s6 }
 0xeb0   :  { %v4219_v54 = vpop.f32.mrf.mxu0  ;;  %v4257_v31 = vpop.f32.mrf.mxu1 }
 0xeb1   :  { %v4220_v37 = vadd.f32 %v4219_v54, %v8345_v63  ;;  %v4258_v4 = vadd.f32 %v4257_v31, %v8346_v19  ;;  %v4351_v54 = vpop.permute.xlu1 %4350 }
 0xeb3   :  { %v8010_v48 = vadd.f32 %v4276_v3, %v4258_v4  ;;  %v8012_v24 = vadd.f32 %v4238_v51, %v4220_v37  ;;  %v4316_v3 = vpop.f32.mrf.mxu2 }
 0xeb5   :  { %5970 = vtanh.f32 %v8010_v48 }
 0xeb6   :  { %5972 = vpow2.f32 %v5346_v1 }
 0xeb8   :  { %v4221_v5 = vpop.f32.mrf.mxu0  ;;  %v4259_v9 = vpop.f32.mrf.mxu1 }
 0xeb9   :  { %v4222_v33 = vadd.f32 %v4221_v5, %v8345_v63  ;;  %v4260_v12 = vadd.f32 %v4259_v9, %v8346_v19 }
 0xebb   :  { %v5971_v17 = vpop.eup %5970  ;;  %v8017_v15 = vadd.f32 %v4278_v13, %v4260_v12  ;;  %v8019_v20 = vadd.f32 %v4240_v52, %v4222_v33  ;;  %v4356_v52 = vpop.permute.xlu2 %4355 }
 0xebc   :  { %4555 = vrot.lane.b32.xlu0 %v5971_v17, %s6039_s6  ;;  %v5973_v30 = vpop.eup %5972 }
 0xebd   :  { %5974 = vtanh.f32 %v8017_v15  ;;  %v4413_v19 = vadd.f32 1.0, %v5973_v30  ;;  %v4361_v30 = vpop.permute.xlu0 %4360 }
 0xebe   :  { %5976 = vpow2.f32 %v5344_v10 }
 0xebf   :  { %v4460_v5 = vand.u32 2147483648, %v4413_v19  ;;  %vm4454_vm15 = vweird.f32 %v4413_v19  ;;  %v4458_v33 = vand.u32 2147483647, %v4413_v19 }
 0xec0   :  { %v4290_v41 = vpop.f32.mrf.mxu0 }
 0xec1   :  { %v4291_v63 = vadd.f32 %v4290_v41, %v8353_v2  ;;  %v4461_v13 = vor.u32 1.1754944e-38, %v4460_v5  ;;  %vm4459_vm3 = vcmp.eq.f32.partialorder %v4458_v33, 8.507059e+37 }
 0xec3   :  { %v5975_v38 = vpop.eup %5974  ;;  %v4310_v29 = vadd.f32 %v4309_v40, %v4291_v63 }
 0xec4   :  { %4557 = vrot.lane.b32.xlu1 %v5975_v38, %s6039_s6  ;;  %v5977_v18 = vpop.eup %5976 }
 0xec5   :  { %5978 = vtanh.f32 %v4310_v29  ;;  %v8025_v56 = vadd.f32 1.0, %v5977_v18 }
 0xec6   :  { %5980 = vrcp.f32 %v4413_v19 }
 0xec7   :  { %5982 = vrcp.f32 %v8025_v56  ;;  %v4430_v17 = vand.u32 2147483648, %v8025_v56  ;;  %vm4424_vm4 = vweird.f32 %v8025_v56  ;;  %v4428_v63 = vand.u32 2147483647, %v8025_v56 }
 0xec8   :  { %v4292_v8 = vpop.f32.mrf.mxu0 }
 0xec9   :  { %v4293_v27 = vadd.f32 %v4292_v8, %v8353_v2  ;;  %vm4429_vm6 = vcmp.eq.f32.partialorder %v4428_v63, 8.507059e+37 }
 0xecb   :  { %v5979_v7 = vpop.eup %5978  ;;  %v4312_v59 = vadd.f32 %v4311_v49, %v4293_v27  ;;  %v4431_v49 = vor.u32 1.1754944e-38, %v4430_v17  ;;  %v4616_v27 = vsel %vm4612_vm1, 1, %v8310_v25  ;;  %v6036_v17 = vld [vmem:[%s8251_s2 + $0x18] sm:$0xff] }
 0xecc   :  { %4327 = vrot.lane.b32.xlu2 %v5979_v7, %s6039_s6  ;;  %v5981_v46 = vpop.eup %5980  ;;  %v4363_v26 = vmul.f32 %v5979_v7, %v4346_v35  ;;  %v5348_v7 = vmul.f32 -1.442695, %v8012_v24 }
 0xecd   :  { %5984 = vtanh.f32 %v4312_v59  ;;  %v4450_v6 = vmul.f32 %v5981_v46, %v4413_v19  ;;  %v5983_v11 = vpop.eup %5982  ;;  %vm4455_vm13 = vweird.f32 %v5981_v46  ;;  %v5350_v59 = vmul.f32 -1.442695, %v8019_v20 }
 0xece   :  { %v4420_v51 = vmul.f32 %v5983_v11, %v8025_v56  ;;  %vm4456_vm0 = vmor %vm4454_vm15, %vm4455_vm13  ;;  %vm4425_vm2 = vweird.f32 %v5983_v11  ;;  %vm4611_vm15 = vcmp.gt.s32.totalorder %v7876_v45, 7 }
 0xecf   :  { %v4451_v53 = vsub.f32 1.0, %v4450_v6  ;;  %vm4426_vm5 = vmor %vm4424_vm4, %vm4425_vm2  ;;  %v4615_v33 = vsel %vm4611_vm15, 1, %v8310_v25  ;;  %vm4614_vm2 = vcmp.gt.s32.totalorder %v6036_v17, 7 }
 0xed0   :  { %v4295_v39 = vpop.f32.mrf.mxu0  ;;  %v4421_v37 = vsub.f32 1.0, %v4420_v51  ;;  %v4618_v63 = vsel %vm4614_vm2, 1, %v8310_v25 }
 0xed1   :  { %v4296_v28 = vadd.f32 %v4295_v39, %v8353_v2  ;;  %v4452_v22 = vmul.f32 %v5981_v46, %v4451_v53 }
 0xed2   :  { %v4422_v9 = vmul.f32 %v5983_v11, %v4421_v37 }
 0xed3   :  { %v5985_v0 = vpop.eup %5984  ;;  %v4315_v34 = vadd.f32 %v4314_v62, %v4296_v28  ;;  %v4453_v1 = vadd.f32 %v5981_v46, %v4452_v22 }
 0xed4   :  { %4329 = vrot.lane.b32.xlu0 %v5985_v0, %s6039_s6  ;;  %4371 = vrot.lane.b32.xlu2 %v4363_v26, %s6039_s6  ;;  %v4364_v4 = vmul.f32 %v5985_v0, %v4351_v54  ;;  %v4423_v40 = vadd.f32 %v5983_v11, %v4422_v9 }
 0xed5   :  { %5986 = vtanh.f32 %v4315_v34 }
 0xed6   :  { %v4427_v29 = vsel %vm4426_vm5, %v5983_v11, %v4423_v40 }
 0xed7   :  { %v8047_v18 = vsel %vm4429_vm6, %v4431_v49, %v4427_v29 }
 0xed8   :  { %v4297_v55 = vpop.f32.mrf.mxu0  ;;  %v4554_v12 = vpop.permute.xlu2 %4553 }
 0xed9   :  { %v4298_v31 = vadd.f32 %v4297_v55, %v8353_v2  ;;  %v4457_v2 = vsel %vm4456_vm0, %v5981_v46, %v4453_v1  ;;  %vm4613_vm0 = vcmp.gt.s32.totalorder %v7912_v47, 7 }
 0xeda   :  { %v8039_v41 = vsel %vm4459_vm3, %v4461_v13, %v4457_v2  ;;  %v4617_v13 = vsel %vm4613_vm0, 1, %v8310_v25  ;;  %vm4661_vm3 = vcmask 130048  }
 0xedb   :  { %v5987_v57 = vpop.eup %5986  ;;  %v4317_v50 = vadd.f32 %v4316_v3, %v4298_v31  ;;  %v4564_v38 = vmul.f32 %v4554_v12, %v8039_v41 }
 0xedc   :  { %4331 = vrot.lane.b32.xlu1 %v5987_v57, %s6039_s6  ;;  %4373 = vrot.lane.b32.xlu0 %v4364_v4, %s6039_s6  ;;  %v4365_v36 = vmul.f32 %v5987_v57, %v4356_v52 }
 0xedd   :  { %5988 = vtanh.f32 %v4317_v50 }
 0xede   :  { %4375 = vrot.lane.b32.xlu2 %v4365_v36, %s6039_s6  ;;  %5990 = vpow2.f32 %v5348_v7 }
 0xedf   :  { %5992 = vpow2.f32 %v5350_v59 }
 0xee3   :  { %v5989_v10 = vpop.eup %5988 }
 0xee4   :  { %4333 = vrot.lane.b32.xlu1 %v5989_v10, %s6039_s6  ;;  %v4366_v19 = vmul.f32 %v5989_v10, %v4361_v30  ;;  %v5991_v46 = vpop.eup %5990 }
 0xee5   :  { %v4415_v62 = vadd.f32 1.0, %v5991_v46  ;;  %v5993_v39 = vpop.eup %5992 }
 0xee6   :  { %4573 = vrot.lane.b32.xlu2 %v4564_v38, %s6039_s6  ;;  %4377 = vrot.lane.b32.xlu0 %v4366_v19, %s6039_s6  ;;  %v4417_v6 = vadd.f32 1.0, %v5993_v39 }
 0xee7   :  { %5994 = vrcp.f32 %v4415_v62  ;;  %v4490_v24 = vand.u32 2147483648, %v4415_v62  ;;  %vm4484_vm8 = vweird.f32 %v4415_v62  ;;  %v4488_v51 = vand.u32 2147483647, %v4415_v62 }
 0xee8   :  { %v4552_v8 = vpop.permute.xlu1 %4551  ;;  %5996 = vrcp.f32 %v4417_v6  ;;  %v4520_v37 = vand.u32 2147483648, %v4417_v6  ;;  %vm4514_vm12 = vweird.f32 %v4417_v6  ;;  %v4518_v4 = vand.u32 2147483647, %v4417_v6 }
 0xee9   :  { %v4563_v56 = vmul.f32 %v4552_v8, %v8047_v18  ;;  %v4491_v22 = vor.u32 1.1754944e-38, %v4490_v24  ;;  %vm4489_vm10 = vcmp.eq.f32.partialorder %v4488_v51, 8.507059e+37  ;;  %v4644_v24 = vld [vmem:[%s8253_s8] sm:$0xff]  ;;  %v4647_v51 = vld [vmem:[%s8253_s8 + $0x18] sm:$0xff] }
 0xeea   :  { %v4521_v50 = vor.u32 1.1754944e-38, %v4520_v37  ;;  %vm4519_vm13 = vcmp.eq.f32.partialorder %v4518_v4, 8.507059e+37 }
 0xeec   :  { %4571 = vrot.lane.b32.xlu1 %v4563_v56, %s6039_s6 }
 0xeed   :  { %v5995_v35 = vpop.eup %5994 }
 0xeee   :  { %4623 = vperm.xlu2 %5428, %v4616_v27   ;;  %v4480_v60 = vmul.f32 %v5995_v35, %v4415_v62  ;;  %v5997_v11 = vpop.eup %5996  ;;  %vm4485_vm7 = vweird.f32 %v5995_v35 }
 0xeef   :  { %v4510_v0 = vmul.f32 %v5997_v11, %v4417_v6  ;;  %vm4486_vm9 = vmor %vm4484_vm8, %vm4485_vm7  ;;  %vm4515_vm11 = vweird.f32 %v5997_v11  ;;  %vm8300_vm7 = vcmask 261120  }
 0xef0   :  { %v4481_v28 = vsub.f32 1.0, %v4480_v60  ;;  %vm4516_vm14 = vmor %vm4514_vm12, %vm4515_vm11 }
 0xef1   :  { %v4511_v53 = vsub.f32 1.0, %v4510_v0 }
 0xef2   :  { %v4482_v26 = vmul.f32 %v5995_v35, %v4481_v28  ;;  %v4649_v28 = vld [vmem:[%s8253_s8 + $0x28] sm:$0xff] }
 0xef3   :  { %v4512_v55 = vmul.f32 %v5997_v11, %v4511_v53  ;;  %4710 = vmatpush.msra.mxu3 %v4649_v28 }
 0xef4   :  { %v4483_v34 = vadd.f32 %v5995_v35, %v4482_v26 }
 0xef5   :  { %v4513_v31 = vadd.f32 %v5997_v11, %v4512_v55 }
 0xef6   :  { %v4487_v20 = vsel %vm4486_vm9, %v5995_v35, %v4483_v34 }
 0xef7   :  { %v4492_v52 = vsel %vm4489_vm10, %v4491_v22, %v4487_v20  ;;  %v4517_v57 = vsel %vm4516_vm14, %v5997_v11, %v4513_v31  ;;  %v4648_v11 = vld [vmem:[%s8253_s8 + $0x20] sm:$0xff] }
 0xef8   :  { %v4522_v36 = vsel %vm4519_vm13, %v4521_v50, %v4517_v57  ;;  %4711 = vmatpush.msra.mxu3 %v4648_v11  ;;  %v8096_v20 = vld [vmem:[%s8254_s4] sm:$0xff] }
 0xef9   :  { %v4640_v31 = vld [vmem:[%s8255_s3] sm:$0xff] }
 0xefa   :  { %4712 = vmatpush.msra.mxu3 %v4647_v51 }
 0xf26   :  { %v4328_v1 = vpop.permute.xlu2 %4327 }
 0xf27   :  { %v4339_v7 = vsub.f32 %v7952_v44, %v4328_v1  ;;  %v5442_v44 = vld [vmem:[%s8252_s7] ss:$0 sm:$0xff]  ;;  %v4641_v1 = vld [vmem:[%s8255_s3 + $0x8] sm:$0xff] }
 0xf2e   :  { %v4556_v3 = vpop.permute.xlu0 %4555  ;;  %v4372_v2 = vpop.permute.xlu2 %4371 }
 0xf2f   :  { %v4565_v54 = vmul.f32 %v4556_v3, %v4492_v52  ;;  %v4383_v46 = vadd.f32 %v4372_v2, %v4339_v7 }
 0xf31   :  { %4575 = vrot.lane.b32.xlu0 %v4565_v54, %s6039_s6 }
 0xf36   :  { %v4558_v5 = vpop.permute.xlu1 %4557 }
 0xf37   :  { %v4566_v9 = vmul.f32 %v4558_v5, %v4522_v36 }
 0xf38   :  { %v4376_v40 = vpop.permute.xlu2 %4375 }
 0xf39   :  { %4577 = vrot.lane.b32.xlu1 %v4566_v9, %s6039_s6 }
 0xf40   :  { %v4574_v49 = vpop.permute.xlu2 %4573 }
 0xf41   :  { %4620 = vperm.xlu1 %5429, %v4615_v33  }
 0xf46   :  { %v4330_v12 = vpop.permute.xlu0 %4329 }
 0xf47   :  { %v4340_v10 = vsub.f32 %v7959_v16, %v4330_v12 }
 0xf48   :  { %v4624_v9 = vpop.permute.xlu2 %4623 }
 0xf49   :  { %4626 = vperm.xlu1 %5429, %v4617_v13   ;;  %vm4632_vm14 = vcmp.eq.s32.totalorder %v4624_v9, 1 }
 0xf4e   :  { %v4374_v30 = vpop.permute.xlu0 %4373  ;;  %v4332_v45 = vpop.permute.xlu1 %4331 }
 0xf4f   :  { %v4384_v38 = vadd.f32 %v4374_v30, %v4340_v10  ;;  %v4341_v19 = vsub.f32 %v7977_v21, %v4332_v45  ;;  %v4543_v21 = vmul.f32 %v8047_v18, %v4383_v46  ;;  %v4645_v18 = vld [vmem:[%s8253_s8 + $0x8] sm:$0xff] }
 0xf50   :  { %4679 = vmatpush.msra.mxu1 %v4645_v18 }
 0xf51   :  { %v4544_v47 = vmul.f32 %v8039_v41, %v4384_v38  ;;  %v4385_v29 = vadd.f32 %v4376_v40, %v4341_v19  ;;  %4629 = vperm.xlu1 %5429, %v4618_v63  }
 0xf52   :  { %4680 = vmatpush.msra.mxu1 %v4644_v24 }
 0xf53   :  { %v4584_v8 = vadd.f32 %v4574_v49, %v4544_v47  ;;  %v4545_v56 = vmul.f32 %v4492_v52, %v4385_v29  ;;  %5352 = vmatmul.msk.f32.vlgmr.msra.gmra.mxu1 %vm4661_vm3, %v8096_v20 }
 0xf54   :  { %4753 = vmatpush.msrb.mxu1 %v4645_v18 }
 0xf55   :  { %5998 = vtanh.f32 %v4584_v8 }
 0xf56   :  { %v4334_v27 = vpop.permute.xlu1 %4333  ;;  %4754 = vmatpush.msrb.mxu1 %v4644_v24 }
 0xf57   :  { %v4342_v16 = vsub.f32 %v7987_v43, %v4334_v27  ;;  %v5345_v43 = vmul.f32 -1.442695, %v7997_v61  ;;  %v5347_v61 = vmul.f32 -1.442695, %v8001_v32  ;;  %v4646_v32 = vld [vmem:[%s8253_s8 + $0x10] sm:$0xff] }
 0xf58   :  { %v4378_v59 = vpop.permute.xlu0 %4377  ;;  %4713 = vmatpush.msra.mxu3 %v4646_v32 }
 0xf59   :  { %v4386_v62 = vadd.f32 %v4378_v59, %v4342_v16 }
 0xf5b   :  { %v5999_v39 = vpop.eup %5998  ;;  %v4546_v6 = vmul.f32 %v4522_v36, %v4386_v62  ;;  %5357 = vmatmul.msk.f32.vlgmr.msrb.gmra.mxu1 %vm4661_vm3, %v4640_v31 }
 0xf5c   :  { %4597 = vrot.lane.b32.xlu0 %v5999_v39, %s6039_s6 }
 0xf5e   :  { %v4572_v41 = vpop.permute.xlu1 %4571 }
 0xf5f   :  { %v4583_v35 = vadd.f32 %v4572_v41, %v4543_v21  ;;  %v5351_v21 = vmul.f32 -1.442695, %v8017_v15 }
 0xf61   :  { %6000 = vtanh.f32 %v4583_v35 }
 0xf62   :  { %6002 = vpow2.f32 %v5345_v43 }
 0xf63   :  { %5358 = vmatmul.msk.f32.gmra.mxu1 %vm4661_vm3, %v4641_v1 }
 0xf67   :  { %v6001_v60 = vpop.eup %6000 }
 0xf68   :  { %4595 = vrot.lane.b32.xlu2 %v6001_v60, %s6039_s6  ;;  %v6003_v26 = vpop.eup %6002 }
 0xf69   :  { %v4412_v0 = vadd.f32 1.0, %v6003_v26 }
 0xf6b   :  { %6004 = vrcp.f32 %v4412_v0  ;;  %v4445_v12 = vand.u32 2147483648, %v4412_v0  ;;  %vm4439_vm5 = vweird.f32 %v4412_v0  ;;  %v4443_v13 = vand.u32 2147483647, %v4412_v0 }
 0xf6c   :  { %6006 = vpow2.f32 %v5347_v61 }
 0xf6d   :  { %v4446_v10 = vor.u32 1.1754944e-38, %v4445_v12  ;;  %vm4444_vm1 = vcmp.eq.f32.partialorder %v4443_v13, 8.507059e+37 }
 0xf70   :  { %4779 = vrot.lane.b32.xlu2 %v5442_v44, %s6040_s28 }
 0xf71   :  { %v6005_v55 = vpop.eup %6004 }
 0xf72   :  { %v6007_v22 = vpop.eup %6006  ;;  %v4435_v4 = vmul.f32 %v6005_v55, %v4412_v0  ;;  %vm4440_vm4 = vweird.f32 %v6005_v55 }
 0xf73   :  { %v4414_v37 = vadd.f32 1.0, %v6007_v22  ;;  %vm4441_vm6 = vmor %vm4439_vm5, %vm4440_vm4 }
 0xf74   :  { %v4436_v57 = vsub.f32 1.0, %v4435_v4 }
 0xf75   :  { %v4475_v49 = vand.u32 2147483648, %v4414_v37  ;;  %vm4469_vm10 = vweird.f32 %v4414_v37  ;;  %v4473_v8 = vand.u32 2147483647, %v4414_v37 }
 0xf76   :  { %v4437_v36 = vmul.f32 %v6005_v55, %v4436_v57 }
 0xf77   :  { %v4476_v16 = vor.u32 1.1754944e-38, %v4475_v49  ;;  %vm4474_vm12 = vcmp.eq.f32.partialorder %v4473_v8, 8.507059e+37 }
 0xf78   :  { %v4438_v33 = vadd.f32 %v6005_v55, %v4437_v36 }
 0xf7a   :  { %v4442_v40 = vsel %vm4441_vm6, %v6005_v55, %v4438_v33 }
 0xf7b   :  { %v4447_v45 = vsel %vm4444_vm1, %v4446_v10, %v4442_v40 }
 0xfa3   :  { %v4576_v34 = vpop.permute.xlu0 %4575 }
 0xfa4   :  { %v4585_v53 = vadd.f32 %v4576_v34, %v4545_v56 }
 0xfa6   :  { %6008 = vtanh.f32 %v4585_v53 }
 0xfab   :  { %v4578_v3 = vpop.permute.xlu1 %4577 }
 0xfac   :  { %v6009_v52 = vpop.eup %6008  ;;  %v4586_v54 = vadd.f32 %v4578_v3, %v4546_v6  ;;  %v5349_v6 = vmul.f32 -1.442695, %v8010_v48  ;;  %v4643_v48 = vld [vmem:[%s8255_s3 + $0x18] sm:$0xff] }
 0xfad   :  { %4599 = vrot.lane.b32.xlu0 %v6009_v52, %s6039_s6 }
 0xfae   :  { %6010 = vtanh.f32 %v4586_v54 }
 0xfaf   :  { %6012 = vrcp.f32 %v4414_v37 }
 0xfb0   :  { %6014 = vpow2.f32 %v5349_v6 }
 0xfb1   :  { %6016 = vpow2.f32 %v5351_v21 }
 0xfb3   :  { %v4621_v30 = vpop.permute.xlu1 %4620 }
 0xfb4   :  { %v6011_v50 = vpop.eup %6010  ;;  %vm4631_vm8 = vcmp.eq.s32.totalorder %v4621_v30, 1 }
 0xfb5   :  { %4601 = vrot.lane.b32.xlu0 %v6011_v50, %s6039_s6  ;;  %v6013_v5 = vpop.eup %6012  ;;  %s6041_s6 = smov 96  }
 0xfb6   :  { %v4465_v2 = vmul.f32 %v6013_v5, %v4414_v37  ;;  %vm4470_vm9 = vweird.f32 %v6013_v5  ;;  %v6015_v41 = vpop.eup %6014 }
 0xfb7   :  { %vm4471_vm11 = vmor %vm4469_vm10, %vm4470_vm9  ;;  %v4416_v35 = vadd.f32 1.0, %v6015_v41  ;;  %v6017_v60 = vpop.eup %6016 }
 0xfb8   :  { %v4466_v17 = vsub.f32 1.0, %v4465_v2  ;;  %v4418_v44 = vadd.f32 1.0, %v6017_v60 }
 0xfb9   :  { %6018 = vrcp.f32 %v4416_v35  ;;  %v4505_v34 = vand.u32 2147483648, %v4416_v35  ;;  %vm4499_vm15 = vweird.f32 %v4416_v35  ;;  %v4503_v53 = vand.u32 2147483647, %v4416_v35 }
 0xfba   :  { %v4467_v19 = vmul.f32 %v6013_v5, %v4466_v17  ;;  %6020 = vrcp.f32 %v4418_v44  ;;  %v4535_v31 = vand.u32 2147483648, %v4418_v44  ;;  %vm4529_vm6 = vweird.f32 %v4418_v44 }
 0xfbb   :  { %v4627_v24 = vpop.permute.xlu1 %4626  ;;  %v4506_v55 = vor.u32 1.1754944e-38, %v4505_v34  ;;  %vm4504_vm2 = vcmp.eq.f32.partialorder %v4503_v53, 8.507059e+37  ;;  %v4533_v4 = vand.u32 2147483647, %v4418_v44 }
 0xfbc   :  { %v4468_v29 = vadd.f32 %v6013_v5, %v4467_v19  ;;  %vm4633_vm5 = vcmp.eq.s32.totalorder %v4627_v24, 1  ;;  %v4536_v1 = vor.u32 1.1754944e-38, %v4535_v31 }
 0xfbe   :  { %v4472_v7 = vsel %vm4471_vm11, %v6013_v5, %v4468_v29 }
 0xfbf   :  { %v4477_v59 = vsel %vm4474_vm12, %v4476_v16, %v4472_v7  ;;  %v6019_v43 = vpop.eup %6018 }
 0xfc0   :  { %v4495_v28 = vmul.f32 %v6019_v43, %v4416_v35  ;;  %v6021_v18 = vpop.eup %6020  ;;  %vm4500_vm13 = vweird.f32 %v6019_v43 }
 0xfc1   :  { %v4525_v26 = vmul.f32 %v6021_v18, %v4418_v44  ;;  %vm4501_vm0 = vmor %vm4499_vm15, %vm4500_vm13  ;;  %vm4530_vm4 = vweird.f32 %v6021_v18 }
 0xfc2   :  { %v4596_v63 = vpop.permute.xlu2 %4595  ;;  %v4496_v15 = vsub.f32 1.0, %v4495_v28  ;;  %vm4531_vm1 = vmor %vm4529_vm6, %vm4530_vm4  ;;  %vm4848_vm4 = vcmask 31744  }
 0xfc3   :  { %v4607_v38 = vmul.f32 %v4596_v63, %v4447_v45  ;;  %v4526_v61 = vsub.f32 1.0, %v4525_v26  ;;  %v4630_v36 = vpop.permute.xlu1 %4629 }
 0xfc4   :  { %v4497_v11 = vmul.f32 %v6019_v43, %v4496_v15  ;;  %vm4634_vm9 = vcmp.eq.s32.totalorder %v4630_v36, 1 }
 0xfc5   :  { %v4635_v47 = vsel %vm4631_vm8, %v4607_v38, %v7948_v42  ;;  %v4527_v32 = vmul.f32 %v6021_v18, %v4526_v61  ;;  %vm4534_vm8 = vcmp.eq.f32.partialorder %v4533_v4, 8.507059e+37  ;;  %v4826_v38 = vlaneseq }
 0xfc6   :  { %5353 = vmatmul.msk.f32.vlgmr.msra.gmra.mxu3 %vm8300_vm7, %v4635_v47  ;;  %v4498_v0 = vadd.f32 %v6019_v43, %v4497_v11  ;;  %v6044_v11 = vmov 1   ;;  %v6045_v61 = vmov 3  }
 0xfc7   :  { %v4528_v54 = vadd.f32 %v6021_v18, %v4527_v32  ;;  %v8145_v19 = vand.u32 127, %v4826_v38  ;;  %5430 = vset.pattern.permute.xlu2 %v6044_v11 }
 0xfc8   :  { %v4502_v51 = vsel %vm4501_vm0, %v6019_v43, %v4498_v0 }
 0xfc9   :  { %v4507_v22 = vsel %vm4504_vm2, %v4506_v55, %v4502_v51  ;;  %v4532_v50 = vsel %vm4531_vm1, %v6021_v18, %v4528_v54  ;;  %vm4833_vm10 = vcmp.eq.s32.totalorder %v8145_v19, 1  ;;  %vm4828_vm12 = vcmp.eq.s32.totalorder %v8145_v19, 0 }
 0xfca   :  { %v8115_v56 = vpop.permute.xlu2 %4779  ;;  %v4537_v5 = vsel %vm4534_vm8, %v4536_v1, %v4532_v50  ;;  %vm4838_vm13 = vcmp.eq.s32.totalorder %v8145_v19, 2  ;;  %vm4843_vm0 = vcmp.eq.s32.totalorder %v8145_v19, 3  ;;  %v6043_v18 = vmov 2  }
 0xfcb   :  { %v4782_v27 = vmul.f32 %v8115_v56, %v4635_v47  ;;  %5431 = vset.pattern.permute.xlu0 %v6043_v18 }
 0xfcd   :  { %4790 = vrot.lane.b32.xlu2 %v4782_v27, %s6041_s6  ;;  %v6042_v27 = vmov 0.0  }
 0xfce   :  { %v4598_v42 = vpop.permute.xlu0 %4597  ;;  %v5362_v7 = vsel %vm4833_vm10, 1.0, %v6042_v27  ;;  %v5364_v35 = vsel %vm4843_vm0, 1.0, %v6042_v27 }
 0xfcf   :  { %v4608_v46 = vmul.f32 %v4598_v42, %v4477_v59  ;;  %v5361_v59 = vsel %vm4828_vm12, 1.0, %v6042_v27 }
 0xfd1   :  { %v4636_v62 = vsel %vm4632_vm14, %v4608_v46, %v7962_v14  ;;  %v4642_v14 = vld [vmem:[%s8255_s3 + $0x10] sm:$0xff]  ;;  %v5363_v46 = vsel %vm4838_vm13, 1.0, %v6042_v27 }
 0xfd2   :  { %5354 = vmatmul.msk.f32.gmra.mxu3 %vm8300_vm7, %v4636_v62  ;;  %v4783_v39 = vmul.f32 %v8115_v56, %v4636_v62  ;;  %5359 = vmatmul.msk.f32.gmra.mxu1 %vm4661_vm3, %v4642_v14 }
 0xfd4   :  { %4792 = vrot.lane.b32.xlu0 %v4783_v39, %s6041_s6 }
 0xfda   :  { %5360 = vmatmul.msk.f32.gmra.mxu1 %vm4661_vm3, %v4643_v48 }
0x101f   :  { %v4600_v3 = vpop.permute.xlu0 %4599 }
0x1020   :  { %v4609_v52 = vmul.f32 %v4600_v3, %v4507_v22 }
0x1022   :  { %v4637_v37 = vsel %vm4633_vm5, %v4609_v52, %v7980_v23  ;;  %vm4872_vm5 = vcmp.gt.s32.totalorder %v8145_v19, 1 }
0x1023   :  { %5355 = vmatmul.msk.f32.gmra.mxu3 %vm8300_vm7, %v4637_v37  ;;  %v4784_v57 = vmul.f32 %v8115_v56, %v4637_v37 }
0x1025   :  { %4794 = vrot.lane.b32.xlu1 %v4784_v57, %s6041_s6 }
0x1027   :  { %v4602_v9 = vpop.permute.xlu0 %4601  ;;  %v4791_v33 = vpop.permute.xlu2 %4790 }
0x1028   :  { %v4610_v2 = vmul.f32 %v4602_v9, %v4537_v5  ;;  %v4802_v12 = vsel %vm8300_vm7, %v4791_v33, 0.0 }
0x1029   :  { %4803 = vadd.xlane.f32.xlu0 %v4802_v12 }
0x102a   :  { %v4638_v23 = vsel %vm4634_vm9, %v4610_v2, %v7990_v58  ;;  %vm4860_vm9 = vcmp.gt.s32.totalorder %v8145_v19, 0 }
0x102b   :  { %5356 = vmatmul.msk.f32.gmra.mxu3 %vm8300_vm7, %v4638_v23  ;;  %v4785_v13 = vmul.f32 %v8115_v56, %v4638_v23 }
0x102d   :  { %4796 = vrot.lane.b32.xlu2 %v4785_v13, %s6041_s6 }
0x1046   :  { %v4793_v40 = vpop.permute.xlu0 %4792 }
0x1047   :  { %v4805_v17 = vsel %vm8300_vm7, %v4793_v40, 0.0 }
0x104f   :  { %4806 = vadd.xlane.f32.xlu1 %v4805_v17 }
0x1087   :  { %v4797_v45 = vpop.permute.xlu2 %4796 }
0x1088   :  { %v4811_v63 = vsel %vm8300_vm7, %v4797_v45, 0.0 }
0x1097   :  { %v4795_v10 = vpop.permute.xlu1 %4794 }
0x1098   :  { %v4808_v30 = vsel %vm8300_vm7, %v4795_v10, 0.0 }
0x1099   :  { %4809 = vadd.xlane.f32.xlu2 %v4808_v30 }
0x109c   :  { %v4804_v47 = vpop.xlane.xlu0 %4803 }
0x109d   :  { %v4818_v8 = vmul.f32 0.01, %v4804_v47  ;;  %vm4814_vm14 = vcmp.ge.f32.partialorder %v4804_v47, 0.0 }
0x109f   :  { %v4822_v42 = vsel %vm4814_vm14, %v4804_v47, %v4818_v8  ;;  %vm4884_vm14 = vcmp.gt.s32.totalorder %v8145_v19, 2 }
0x10a0   :  { %v4831_v6 = vmul.f32 %v5361_v59, %v4822_v42 }
0x10a1   :  { %4812 = vadd.xlane.f32.xlu2 %v4811_v63 }
0x10c2   :  { %v4807_v58 = vpop.xlane.xlu1 %4806 }
0x10c3   :  { %v4819_v29 = vmul.f32 0.01, %v4807_v58  ;;  %vm4815_vm11 = vcmp.ge.f32.partialorder %v4807_v58, 0.0 }
0x10c5   :  { %v4823_v16 = vsel %vm4815_vm11, %v4807_v58, %v4819_v29 }
0x10c6   :  { %v4836_v39 = vmul.f32 %v5362_v7, %v4823_v16 }
0x10c8   :  { %v4837_v44 = vadd.f32 %v4836_v39, %v4831_v6 }
0x110c   :  { %v4810_v49 = vpop.xlane.xlu2 %4809 }
0x110d   :  { %v4820_v56 = vmul.f32 0.01, %v4810_v49  ;;  %vm4816_vm15 = vcmp.ge.f32.partialorder %v4810_v49, 0.0 }
0x110f   :  { %v4824_v62 = vsel %vm4816_vm15, %v4810_v49, %v4820_v56 }
0x1110   :  { %v4841_v21 = vmul.f32 %v5363_v46, %v4824_v62 }
0x1112   :  { %v4842_v28 = vadd.f32 %v4841_v21, %v4837_v44  ;;  %v4652_v21 = vld [vmem:[%s8257_s10 + $0x8] sm:$0xff]  ;;  %v4682_v44 = vpop.f32.mrf.mxu1 }
0x1113   :  { %5033 = vmatpush.msra.mxu2 %v4652_v21 }
0x1114   :  { %v4813_v41 = vpop.xlane.xlu2 %4812 }
0x1115   :  { %vm4817_vm2 = vcmp.ge.f32.partialorder %v4813_v41, 0.0  ;;  %v4821_v60 = vmul.f32 0.01, %v4813_v41 }
0x1117   :  { %v4825_v14 = vsel %vm4817_vm2, %v4813_v41, %v4821_v60  ;;  %v4656_v60 = vld [vmem:[%s8257_s10 + $0x28] sm:$0xff] }
0x1118   :  { %v4846_v43 = vmul.f32 %v5364_v35, %v4825_v14  ;;  %5011 = vmatpush.msra.mxu0 %v4656_v60  ;;  %v4655_v14 = vld [vmem:[%s8257_s10 + $0x20] sm:$0xff] }
0x111a   :  { %v4847_v48 = vadd.f32 %v4846_v43, %v4842_v28  ;;  %v4651_v43 = vld [vmem:[%s8257_s10] sm:$0xff]  ;;  %v4654_v28 = vld [vmem:[%s8257_s10 + $0x18] sm:$0xff]  ;;  %5012 = vmatpush.msra.mxu0 %v4655_v14 }
0x111b   :  { %5034 = vmatpush.msra.mxu2 %v4651_v43 }
0x111c   :  { %v4849_v15 = vsel %vm4848_vm4, %v4847_v48, -inf  ;;  %5376 = vmatmul.msk.f32.vlgmr.msra.gmra.mxu2 %vm4661_vm3, %v8096_v20  ;;  %5013 = vmatpush.msra.mxu0 %v4654_v28  ;;  %v5045_v20 = vld [vmem:[%s8258_s12 + $0x8] sm:$0xff]  ;;  %vm8354_vm3 = vcmask 261120  }
0x111d   :  { %4850 = vmax.xlane.f32.xlu0 %v4849_v15  ;;  %v4756_v15 = vpop.f32.mrf.mxu1 }
0x1190   :  { %v4851_v26 = vpop.xlane.xlu0 %4850 }
0x1191   :  { %v8158_v0 = vsub.f32 %v4847_v48, %v4851_v26  ;;  %v4715_v48 = vpop.f32.mrf.mxu3  ;;  %v4759_v26 = vpop.f32.mrf.mxu1 }
0x1193   :  { %4879 = vperm.xlu0 %5431, %v8158_v0   ;;  %4867 = vperm.xlu2 %5430, %v8158_v0  }
0x1194   :  { %4855 = vperm.xlu1 %5429, %v8158_v0  }
0x119b   :  { %5433 = vset.pattern.permute.xlu2 %v8310_v25  ;;  %5441 = vset.pattern.permute.xlu0 %v6045_v61 }
0x119c   :  { %5432 = vset.pattern.permute.xlu1 %v6045_v61 }
0x119d   :  { %4891 = vperm.xlu1 %5432, %v8158_v0  }
0x11a5   :  { %5434 = vset.pattern.permute.xlu1 %v6044_v11 }
0x11ed   :  { %v4868_v34 = vpop.permute.xlu2 %4867 }
0x11ee   :  { %vm4871_vm6 = vcmp.eq.f32.partialorder %v4868_v34, %v8158_v0  ;;  %vm4870_vm1 = vcmp.gt.f32.partialorder %v4868_v34, %v8158_v0 }
0x11ef   :  { %vm4873_vm8 = vmand %vm4871_vm6, %vm4872_vm5  ;;  %vm4896_vm6 = vcmp.gt.s32.totalorder %v8145_v19, 3 }
0x11f0   :  { %vm4874_vm12 = vmor %vm4870_vm1, %vm4873_vm8 }
0x11f1   :  { %v5366_v55 = vsel %vm4874_vm12, 1.0, %v6042_v27 }
0x1205   :  { %v4880_v53 = vpop.permute.xlu0 %4879 }
0x1206   :  { %v4856_v24 = vpop.permute.xlu1 %4855  ;;  %vm4883_vm13 = vcmp.eq.f32.partialorder %v4880_v53, %v8158_v0  ;;  %vm4882_vm2 = vcmp.gt.f32.partialorder %v4880_v53, %v8158_v0 }
0x1207   :  { %vm4858_vm10 = vcmp.gt.f32.partialorder %v4856_v24, %v8158_v0  ;;  %vm4859_vm11 = vcmp.eq.f32.partialorder %v4856_v24, %v8158_v0  ;;  %vm4885_vm7 = vmand %vm4883_vm13, %vm4884_vm14 }
0x1208   :  { %vm4861_vm15 = vmand %vm4859_vm11, %vm4860_vm9 }
0x1209   :  { %vm4862_vm0 = vmor %vm4858_vm10, %vm4861_vm15 }
0x120a   :  { %v5365_v51 = vsel %vm4862_vm0, 1.0, %v6042_v27  ;;  %vm4886_vm5 = vmor %vm4882_vm2, %vm4885_vm7 }
0x120b   :  { %v4865_v32 = vadd.f32 1.0, %v5365_v51  ;;  %v5367_v52 = vsel %vm4886_vm5, 1.0, %v6042_v27  ;;  %v5044_v51 = vld [vmem:[%s8258_s12] sm:$0xff] }
0x120d   :  { %v4877_v22 = vadd.f32 %v5366_v55, %v4865_v32 }
0x120f   :  { %v4892_v3 = vpop.permute.xlu1 %4891  ;;  %v4889_v54 = vadd.f32 %v5367_v52, %v4877_v22  ;;  %v5443_v22 = vld [vmem:[%s8256_s9] ss:$0 sm:$0xff] }
0x1210   :  { %vm4894_vm1 = vcmp.gt.f32.partialorder %v4892_v3, %v8158_v0  ;;  %vm4895_vm8 = vcmp.eq.f32.partialorder %v4892_v3, %v8158_v0 }
0x1211   :  { %vm4897_vm9 = vmand %vm4895_vm8, %vm4896_vm6 }
0x1212   :  { %vm4898_vm10 = vmor %vm4894_vm1, %vm4897_vm9 }
0x1213   :  { %v5368_v31 = vsel %vm4898_vm10, 1.0, %v6042_v27  ;;  %vm8355_vm6 = vmmov %vm8354_vm3 }
0x1214   :  { %v4901_v37 = vadd.f32 %v5368_v31, %v4889_v54 }
0x1216   :  { %4913 = vperm.xlu1 %5434, %v4901_v37   ;;  %4904 = vperm.xlu2 %5433, %v4901_v37  }
0x121e   :  { %5436 = vset.pattern.permute.xlu1 %v6045_v61  ;;  %5435 = vset.pattern.permute.xlu2 %v6043_v18 }
0x121f   :  { %4931 = vperm.xlu1 %5436, %v4901_v37   ;;  %4922 = vperm.xlu2 %5435, %v4901_v37  }
0x1227   :  { %5437 = vset.pattern.permute.xlu1 %v8310_v25  ;;  %v4939_v25 = vmul.f32 %v4901_v37, %v8158_v0 }
0x1229   :  { %v4940_v30 = vadd.f32 1.0, %v4939_v25 }
0x1270   :  { %v4905_v4 = vpop.permute.xlu2 %4904 }
0x1271   :  { %vm4907_vm7 = vcmp.le.f32.partialorder %v4905_v4, %v4901_v37 }
0x1272   :  { %v5369_v36 = vsel %vm4907_vm7, 1.0, %v6042_v27 }
0x1273   :  { %v4910_v9 = vmul.f32 %v5369_v36, %v4856_v24  ;;  %v4762_v24 = vpop.f32.mrf.mxu1 }
0x1279   :  { %v4923_v50 = vpop.permute.xlu2 %4922 }
0x127a   :  { %vm4925_vm12 = vcmp.le.f32.partialorder %v4923_v50, %v4901_v37 }
0x127b   :  { %v5371_v33 = vsel %vm4925_vm12, 1.0, %v6042_v27  ;;  %v4765_v31 = vpop.f32.mrf.mxu1 }
0x127c   :  { %v4928_v23 = vmul.f32 %v5371_v33, %v4880_v53 }
0x1288   :  { %v4914_v57 = vpop.permute.xlu1 %4913 }
0x1289   :  { %vm4916_vm11 = vcmp.le.f32.partialorder %v4914_v57, %v4901_v37 }
0x128a   :  { %v5370_v1 = vsel %vm4916_vm11, 1.0, %v6042_v27 }
0x128b   :  { %v4919_v5 = vmul.f32 %v5370_v1, %v4868_v34  ;;  %v5046_v34 = vld [vmem:[%s8258_s12 + $0x10] sm:$0xff] }
0x128d   :  { %v4920_v2 = vadd.f32 %v4919_v5, %v4910_v9 }
0x128f   :  { %v4929_v40 = vadd.f32 %v4928_v23, %v4920_v2 }
0x1291   :  { %v4932_v12 = vpop.permute.xlu1 %4931 }
0x1292   :  { %vm4934_vm14 = vcmp.le.f32.partialorder %v4932_v12, %v4901_v37 }
0x1293   :  { %v5372_v13 = vsel %vm4934_vm14, 1.0, %v6042_v27 }
0x1294   :  { %v4937_v17 = vmul.f32 %v5372_v13, %v4892_v3  ;;  %v4757_v3 = vadd.f32 %v4756_v15, %v4715_v48 }
0x1296   :  { %v4938_v10 = vadd.f32 %v4937_v17, %v4929_v40  ;;  %v4768_v4 = vadd.f32 %v5443_v22, %v4757_v3 }
0x1298   :  { %vm4941_vm13 = vcmp.gt.f32.partialorder %v4940_v30, %v4938_v10  ;;  %v4772_v9 = vmax.f32 %v4768_v4, 0.0  ;;  %v4683_v30 = vadd.f32 %v5443_v22, %v4682_v44 }
0x1299   :  { %v5373_v45 = vsel %vm4941_vm13, 1.0, %v6042_v27 }
0x129a   :  { %v4948_v63 = vmul.f32 %v5373_v45, %v8158_v0  ;;  %v4944_v38 = vmul.f32 %v5373_v45, %v4901_v37 }
0x129c   :  { %v4949_v58 = vsel %vm4848_vm4, %v4948_v63, 0.0  ;;  %v4945_v19 = vsel %vm4848_vm4, %v4944_v38, -inf  ;;  %v5036_v38 = vpop.f32.mrf.mxu2 }
0x129d   :  { %4950 = vadd.xlane.f32.xlu0 %v4949_v58  ;;  %4946 = vmax.xlane.f32.xlu2 %v4945_v19  ;;  %v5444_v58 = vld [vmem:[%s8259_s11] ss:$0 sm:$0xff] }
0x1310   :  { %v4947_v47 = vpop.xlane.xlu2 %4946  ;;  %v4951_v59 = vpop.xlane.xlu0 %4950 }
0x1311   :  { %6022 = vrcp.f32 %v4947_v47  ;;  %v4964_v56 = vand.u32 2147483648, %v4947_v47  ;;  %v4962_v16 = vand.u32 2147483647, %v4947_v47  ;;  %vm4958_vm0 = vweird.f32 %v4947_v47 }
0x1312   :  { %v5374_v46 = vadd.f32 -1.0, %v4951_v59 }
0x1313   :  { %v4965_v42 = vor.u32 1.1754944e-38, %v4964_v56  ;;  %vm4963_vm5 = vcmp.eq.f32.partialorder %v4962_v16, 8.507059e+37 }
0x1317   :  { %v6023_v29 = vpop.eup %6022 }
0x1318   :  { %v4954_v49 = vmul.f32 %v6023_v29, %v4947_v47  ;;  %vm4959_vm15 = vweird.f32 %v6023_v29 }
0x1319   :  { %vm4960_vm2 = vmor %vm4958_vm0, %vm4959_vm15 }
0x131a   :  { %v4955_v8 = vsub.f32 1.0, %v4954_v49 }
0x131c   :  { %v4956_v7 = vmul.f32 %v6023_v29, %v4955_v8  ;;  %v5445_v8 = vld [vmem:[%s8260_s13] ss:$0 sm:$0xff] }
0x131e   :  { %v4957_v27 = vadd.f32 %v6023_v29, %v4956_v7 }
0x1320   :  { %v4961_v62 = vsel %vm4960_vm2, %v6023_v29, %v4957_v27 }
0x1321   :  { %v4966_v39 = vsel %vm4963_vm5, %v4965_v42, %v4961_v62 }
0x1322   :  { %v4967_v6 = vmul.f32 %v5374_v46, %v4966_v39 }
0x1324   :  { %v4968_v41 = vsub.f32 %v8158_v0, %v4967_v6 }
0x1326   :  { %v4969_v35 = vmax.f32 %v4968_v41, 0.0 }
0x1328   :  { %4972 = vperm.xlu1 %5437, %v4969_v35  }
0x1330   :  { %5438 = vset.pattern.permute.xlu1 %v6044_v11  ;;  %v4718_v11 = vpop.f32.mrf.mxu3 }
0x1331   :  { %4978 = vperm.xlu1 %5438, %v4969_v35   ;;  %v4760_v55 = vadd.f32 %v4759_v26, %v4718_v11 }
0x1333   :  { %v4769_v37 = vadd.f32 %v5443_v22, %v4760_v55 }
0x1335   :  { %v4773_v36 = vmax.f32 %v4769_v37, 0.0 }
0x1338   :  { %v4721_v53 = vpop.f32.mrf.mxu3 }
0x1339   :  { %5439 = vset.pattern.permute.xlu1 %v6043_v18  ;;  %v4653_v18 = vld [vmem:[%s8257_s10 + $0x10] sm:$0xff]  ;;  %v4763_v52 = vadd.f32 %v4762_v24, %v4721_v53 }
0x133a   :  { %4984 = vperm.xlu1 %5439, %v4969_v35   ;;  %5014 = vmatpush.msra.mxu0 %v4653_v18 }
0x133b   :  { %v4770_v57 = vadd.f32 %v5443_v22, %v4763_v52 }
0x133d   :  { %v4774_v2 = vmax.f32 %v4770_v57, 0.0 }
0x1340   :  { %v4724_v54 = vpop.f32.mrf.mxu3 }
0x1341   :  { %v4766_v50 = vadd.f32 %v4765_v31, %v4724_v54 }
0x1342   :  { %5440 = vset.pattern.permute.xlu1 %v6045_v61  ;;  %v5047_v61 = vld [vmem:[%s8258_s12 + $0x18] sm:$0xff] }
0x1343   :  { %4990 = vperm.xlu1 %5440, %v4969_v35   ;;  %5067 = vmatpush.msrb.mxu3 %v5047_v61  ;;  %v4771_v5 = vadd.f32 %v5443_v22, %v4766_v50 }
0x1345   :  { %5068 = vmatpush.msrb.mxu3 %v5046_v34  ;;  %v4775_v13 = vmax.f32 %v4771_v5, 0.0 }
0x1347   :  { %5069 = vmatpush.msrb.mxu3 %v5045_v20 }
0x1349   :  { %5070 = vmatpush.msrb.mxu3 %v5044_v51 }
0x139a   :  { %v4973_v0 = vpop.permute.xlu1 %4972 }
0x139b   :  { %v4975_v12 = vmul.f32 %v4973_v0, %v4772_v9 }
0x13a3   :  { %v4979_v32 = vpop.permute.xlu1 %4978 }
0x13a4   :  { %v4981_v33 = vmul.f32 %v4979_v32, %v4773_v36 }
0x13a6   :  { %v4982_v25 = vadd.f32 %v4981_v33, %v4975_v12 }
0x13ac   :  { %v4985_v1 = vpop.permute.xlu1 %4984 }
0x13ad   :  { %v4987_v23 = vmul.f32 %v4985_v1, %v4774_v2 }
0x13af   :  { %v4988_v17 = vadd.f32 %v4987_v23, %v4982_v25 }
0x13b5   :  { %v4991_v40 = vpop.permute.xlu1 %4990 }
0x13b6   :  { %v4993_v10 = vmul.f32 %v4991_v40, %v4775_v13 }
0x13b8   :  { %v4994_v45 = vadd.f32 %v4993_v10, %v4988_v17 }
0x13ba   :  { %v4995_v63 = vsub.f32 %v4994_v45, %v4683_v30 }
0x13bc   :  { %5375 = vmatmul.msk.f32.vlgmr.msra.gmra.mxu0 %vm8354_vm3, %v4995_v63 }
0x1439   :  { %v5016_v19 = vpop.f32.mrf.mxu0 }
0x143a   :  { %v5037_v47 = vadd.f32 %v5036_v38, %v5016_v19 }
0x143c   :  { %v5042_v29 = vadd.f32 %v5444_v58, %v5037_v47 }
0x143e   :  { %v5043_v49 = vmax.f32 %v5042_v29, 0.0 }
0x1440   :  { %5377 = vmatmul.msk.f32.vlgmr.msrb.gmra.mxu3 %vm8355_vm6, %v5043_v49 }
0x14c3   :  { %v5072_v56 = vpop.f32.mrf.mxu3 }
0x14c4   :  { %v5073_v7 = vadd.f32 %v5445_v8, %v5072_v56 }
0x14c6   :  { %5075 = vst.msk [vmem:[%s8261_s14] sm:$0xff] %vm4848_vm4, %v5073_v7 }

</bundles_post_ra>
